<compile_context>
chip_gen: v6e
topology: v6e:2x2x1
jax: 0.10.0
libtpu: 0.0.40
codegen_flags: <defaults>
</compile_context>

<pallas_src>
import jax
import jax.numpy as jnp
from jax.experimental import pallas as pl
from jax.experimental.pallas import tpu as pltpu

IN_DIM = 32 * 32 * 3   # 3072
H1 = 512
H2 = 128
OUT = 10
OUT_PAD = 128          # lane-dense padded logits width


def mlp_kernel(x_ref, w1_ref, b1_ref, w2_ref, b2_ref, w3_ref, b3_ref, o_ref):
    # x tile arrives as f32 straight from HBM; cast to bf16 on-chip (cheap,
    # hidden under the MXU-bound layer-1 dot). Weights are bf16, biases f32,
    # every dot accumulates in f32, elementwise (bias+ReLU) stays f32.
    x = x_ref[...].astype(jnp.bfloat16)
    h1 = jnp.dot(x, w1_ref[...], preferred_element_type=jnp.float32) + b1_ref[...]
    h1 = jnp.maximum(h1, 0.0)
    h2 = jnp.dot(h1.astype(jnp.bfloat16), w2_ref[...],
                 preferred_element_type=jnp.float32) + b2_ref[...]
    h2 = jnp.maximum(h2, 0.0)
    o = jnp.dot(h2.astype(jnp.bfloat16), w3_ref[...],
                preferred_element_type=jnp.float32) + b3_ref[...]
    o_ref[...] = o.astype(o_ref.dtype)


def _cdiv(a, b):
    return -(-a // b)


def _round_up(x, m):
    return (x + m - 1) // m * m


def _vmem_limit_bytes(tb_eff, single_buffer_weights):
    """Working-set estimate with 2x headroom, clamped to [16 MiB, 64 MiB]."""
    wbuf = 1 if single_buffer_weights else 2
    weights = (IN_DIM * H1 + H1 * H2 + H2 * OUT_PAD) * 2            # bf16
    biases = (H1 + H2 + OUT_PAD) * 4                                # f32
    x_tiles = 2 * tb_eff * IN_DIM * 4                               # f32, 2-buffered
    out_tiles = 2 * tb_eff * OUT_PAD * 4                            # f32, 2-buffered
    # in-kernel temporaries: bf16 cast of x, h1/h2 (f32+bf16), o (f32)
    scratch = tb_eff * (IN_DIM * 2 + H1 * 6 + H2 * 6 + OUT_PAD * 4)
    total = wbuf * (weights + biases) + x_tiles + out_tiles + scratch
    return int(min(max(2 * total, 16 * 1024 * 1024), 64 * 1024 * 1024))


def _pallas_forward(x_pad, w1b, b1, w2b, b2, w3b, b3p, *, tb_eff,
                    single_buffer_weights):
    Bp = x_pad.shape[0]
    grid = (Bp // tb_eff,)

    def const_spec(shape):
        # Grid-constant block (weights / biases): single-buffer if supported.
        if single_buffer_weights:
            return pl.BlockSpec(shape, lambda i: (0, 0),
                                pipeline_mode=pl.Buffered(1))
        return pl.BlockSpec(shape, lambda i: (0, 0))

    return pl.pallas_call(
        mlp_kernel,
        out_shape=jax.ShapeDtypeStruct((Bp, OUT_PAD), jnp.float32),
        grid_spec=pltpu.PrefetchScalarGridSpec(
            num_scalar_prefetch=0,
            grid=grid,
            in_specs=[
                pl.BlockSpec((tb_eff, IN_DIM), lambda i: (i, 0)),  # x tile (f32)
                const_spec((IN_DIM, H1)),     # w1 (resident, bf16)
                const_spec((1, H1)),          # b1
                const_spec((H1, H2)),         # w2
                const_spec((1, H2)),          # b2
                const_spec((H2, OUT_PAD)),    # w3 (lane-padded)
                const_spec((1, OUT_PAD)),     # b3 (lane-padded)
            ],
            out_specs=pl.BlockSpec((tb_eff, OUT_PAD), lambda i: (i, 0)),
        ),
        compiler_params=pltpu.CompilerParams(
            dimension_semantics=("parallel",),
            vmem_limit_bytes=_vmem_limit_bytes(tb_eff, single_buffer_weights),
        ),
    )(x_pad, w1b, b1, w2b, b2, w3b, b3p)


def net_forward(x_nchw, params, *, tb=256):
    """x_nchw: (B, 3, 32, 32) float32.  Returns (B, 10) float32 logits.

    tb: requested max batch tile, multiple of 16. Sweep {256, 512} on v6e/v7x,
    {128, 256} on v5e. Small batches always run as a single grid step with the
    smallest 16-aligned tile that covers them (no forced splitting).
    """
    assert tb % 16 == 0, "batch tile must be a multiple of 16 (bf16 sublane pack)"
    w1, b1, w2, b2, w3, b3 = params
    B = x_nchw.shape[0]

    # Row-major flatten identical to torch's x.view(-1, 3072). No dtype cast or
    # pad pre-pass here -- the kernel casts each tile to bf16 on-chip.
    x = x_nchw.reshape(B, IN_DIM)

    # Tile selection: ceil(B / tb) grid steps, tile shrunk to minimize padding.
    num_steps = max(1, _cdiv(B, tb))
    tb_eff = _round_up(_cdiv(B, num_steps), 16)
    Bp = num_steps * tb_eff
    if Bp != B:
        x = jnp.pad(x, ((0, Bp - B), (0, 0)))

    # bf16 weights for the MXU (halves VMEM + HBM traffic); biases stay f32.
    w1b = w1.astype(jnp.bfloat16)
    w2b = w2.astype(jnp.bfloat16)
    # Zero-pad the last layer to 128 lanes (lane-dense output store).
    w3b = jnp.zeros((H2, OUT_PAD), jnp.bfloat16).at[:, :OUT].set(
        w3.astype(jnp.bfloat16))
    b3p = jnp.zeros((1, OUT_PAD), jnp.float32).at[:, :OUT].set(b3)

    args = (x, w1b, b1, w2b, b2, w3b, b3p)
    try:
        out = _pallas_forward(*args, tb_eff=tb_eff, single_buffer_weights=True)
    except Exception:
        # Fallback for jax versions without BlockSpec(pipeline_mode=...):
        # identical semantics, default double-buffered weight blocks.
        out = _pallas_forward(*args, tb_eff=tb_eff, single_buffer_weights=False)

    return out[:B, :OUT]


def init_params(key):
    """Deterministic nn.Linear-style init: U(-1/sqrt(fan_in), 1/sqrt(fan_in))."""
    ks = jax.random.split(key, 6)

    def linear(kw, kb, fan_in, fan_out):
        bound = 1.0 / jnp.sqrt(fan_in)
        # stored as (in, out) so the kernel does x @ W
        w = jax.random.uniform(kw, (fan_in, fan_out), jnp.float32, -bound, bound)
        b = jax.random.uniform(kb, (1, fan_out), jnp.float32, -bound, bound)
        return w, b

    w1, b1 = linear(ks[0], ks[1], IN_DIM, H1)
    w2, b2 = linear(ks[2], ks[3], H1, H2)
    w3, b3 = linear(ks[4], ks[5], H2, OUT)
    return (w1, b1, w2, b2, w3, b3)


def net_forward_ref(x_nchw, params, *, bf16=True):
    """Pure-JAX reference. With bf16=True it mirrors the kernel's operand
    rounding (bf16 operands, f32 accumulation) for a tight comparison."""
    w1, b1, w2, b2, w3, b3 = params
    rd = (lambda a: a.astype(jnp.bfloat16).astype(jnp.float32)) if bf16 \
        else (lambda a: a)
    x = rd(x_nchw.reshape(x_nchw.shape[0], IN_DIM).astype(jnp.float32))
    h1 = jnp.maximum(x @ rd(w1) + b1, 0.0)
    h2 = jnp.maximum(rd(h1) @ rd(w2) + b2, 0.0)
    return rd(h2) @ rd(w3) + b3


if __name__ == "__main__":
    key = jax.random.PRNGKey(0)
    k_x, k_p = jax.random.split(key)

    B = 16  # small batch -> single grid step with a 16-row tile, no padding
    x = jax.random.normal(k_x, (B, 3, 32, 32), jnp.float32)  # NCHW like PyTorch
    params = init_params(k_p)

    out = net_forward(x, params)
    out = jax.block_until_ready(out)
    assert out.shape == (B, OUT)

    # Tight check against a reference that uses the same bf16 operand rounding.
    ref_bf16 = net_forward_ref(x, params, bf16=True)
    assert jnp.allclose(out, ref_bf16, atol=2e-3, rtol=2e-3), \
        "mismatch vs bf16-rounded JAX reference"

    # Loose sanity check against the full-f32 reference (bf16 quantization noise).
    ref_f32 = net_forward_ref(x, params, bf16=False)
    assert jnp.allclose(out, ref_f32, atol=5e-2, rtol=5e-2), \
        "mismatch vs f32 JAX reference"

    print("KERNEL_OK")
</pallas_src>

<mosaic_0001>
module attributes {stable_mosaic.version = 11 : i64} {
  func.func @mlp_kernel(%arg0: i32, %arg1: memref<16x3072xf32, #tpu.memory_space<vmem>>, %arg2: memref<3072x512xbf16, #tpu.memory_space<vmem>>, %arg3: memref<1x512xf32, #tpu.memory_space<vmem>>, %arg4: memref<512x128xbf16, #tpu.memory_space<vmem>>, %arg5: memref<1x128xf32, #tpu.memory_space<vmem>>, %arg6: memref<128x128xbf16, #tpu.memory_space<vmem>>, %arg7: memref<1x128xf32, #tpu.memory_space<vmem>>, %arg8: memref<16x128xf32, #tpu.memory_space<vmem>>) attributes {dimension_semantics = [#tpu.dimension_semantics<parallel>], iteration_bounds = array<i64: 1>, scalar_prefetch = 0 : i64, scratch_operands = 0 : i64, tpu.core_type = #tpu.core_type<tc>, window_params = [{transform_indices = @transform_0, window_bounds = array<i64: 16, 3072>}, {pipeline_mode = #tpu.pipeline_mode<synchronous>, transform_indices = @transform_1, window_bounds = array<i64: 3072, 512>}, {pipeline_mode = #tpu.pipeline_mode<synchronous>, transform_indices = @transform_2, window_bounds = array<i64: 1, 512>}, {pipeline_mode = #tpu.pipeline_mode<synchronous>, transform_indices = @transform_3, window_bounds = array<i64: 512, 128>}, {pipeline_mode = #tpu.pipeline_mode<synchronous>, transform_indices = @transform_4, window_bounds = array<i64: 1, 128>}, {pipeline_mode = #tpu.pipeline_mode<synchronous>, transform_indices = @transform_5, window_bounds = array<i64: 128, 128>}, {pipeline_mode = #tpu.pipeline_mode<synchronous>, transform_indices = @transform_6, window_bounds = array<i64: 1, 128>}, {transform_indices = @transform_7, window_bounds = array<i64: 16, 128>}]} {
    %c0 = arith.constant 0 : index
    %c0_0 = arith.constant 0 : index
    %0 = vector.load %arg1[%c0, %c0_0] : memref<16x3072xf32, #tpu.memory_space<vmem>>, vector<16x3072xf32>
    %1 = arith.truncf %0 : vector<16x3072xf32> to vector<16x3072xbf16>
    %c0_1 = arith.constant 0 : index
    %c0_2 = arith.constant 0 : index
    %2 = vector.load %arg2[%c0_1, %c0_2] : memref<3072x512xbf16, #tpu.memory_space<vmem>>, vector<3072x512xbf16>
    %cst = arith.constant dense<0.000000e+00> : vector<16x512xf32>
    %3 = tpu.matmul %1, %2, %cst {dimension_numbers = #tpu.dot_dimension_numbers<[1], [0], [0], [1], [0, 0, 1, 1], [], []>} : vector<16x3072xbf16>, vector<3072x512xbf16>, vector<16x512xf32> -> vector<16x512xf32>
    %c0_3 = arith.constant 0 : index
    %c0_4 = arith.constant 0 : index
    %4 = vector.load %arg3[%c0_3, %c0_4] : memref<1x512xf32, #tpu.memory_space<vmem>>, vector<1x512xf32>
    %5 = vector.broadcast %4 : vector<1x512xf32> to vector<16x512xf32>
    %6 = arith.addf %3, %5 : vector<16x512xf32>
    %cst_5 = arith.constant 0.000000e+00 : f32
    %7 = vector.broadcast %cst_5 : f32 to vector<16x512xf32>
    %8 = arith.maximumf %6, %7 : vector<16x512xf32>
    %9 = arith.truncf %8 : vector<16x512xf32> to vector<16x512xbf16>
    %c0_6 = arith.constant 0 : index
    %c0_7 = arith.constant 0 : index
    %10 = vector.load %arg4[%c0_6, %c0_7] : memref<512x128xbf16, #tpu.memory_space<vmem>>, vector<512x128xbf16>
    %cst_8 = arith.constant dense<0.000000e+00> : vector<16x128xf32>
    %11 = tpu.matmul %9, %10, %cst_8 {dimension_numbers = #tpu.dot_dimension_numbers<[1], [0], [0], [1], [0, 0, 1, 1], [], []>} : vector<16x512xbf16>, vector<512x128xbf16>, vector<16x128xf32> -> vector<16x128xf32>
    %c0_9 = arith.constant 0 : index
    %c0_10 = arith.constant 0 : index
    %12 = vector.load %arg5[%c0_9, %c0_10] : memref<1x128xf32, #tpu.memory_space<vmem>>, vector<1x128xf32>
    %13 = vector.broadcast %12 : vector<1x128xf32> to vector<16x128xf32>
    %14 = arith.addf %11, %13 : vector<16x128xf32>
    %cst_11 = arith.constant 0.000000e+00 : f32
    %15 = vector.broadcast %cst_11 : f32 to vector<16x128xf32>
    %16 = arith.maximumf %14, %15 : vector<16x128xf32>
    %17 = arith.truncf %16 : vector<16x128xf32> to vector<16x128xbf16>
    %c0_12 = arith.constant 0 : index
    %c0_13 = arith.constant 0 : index
    %18 = vector.load %arg6[%c0_12, %c0_13] : memref<128x128xbf16, #tpu.memory_space<vmem>>, vector<128x128xbf16>
    %cst_14 = arith.constant dense<0.000000e+00> : vector<16x128xf32>
    %19 = tpu.matmul %17, %18, %cst_14 {dimension_numbers = #tpu.dot_dimension_numbers<[1], [0], [0], [1], [0, 0, 1, 1], [], []>} : vector<16x128xbf16>, vector<128x128xbf16>, vector<16x128xf32> -> vector<16x128xf32>
    %c0_15 = arith.constant 0 : index
    %c0_16 = arith.constant 0 : index
    %20 = vector.load %arg7[%c0_15, %c0_16] : memref<1x128xf32, #tpu.memory_space<vmem>>, vector<1x128xf32>
    %21 = vector.broadcast %20 : vector<1x128xf32> to vector<16x128xf32>
    %22 = arith.addf %19, %21 : vector<16x128xf32>
    %c0_17 = arith.constant 0 : index
    %c0_18 = arith.constant 0 : index
    %23 = vector.load %arg8[%c0_17, %c0_18] : memref<16x128xf32, #tpu.memory_space<vmem>>, vector<16x128xf32>
    tpu.vector_store %arg8[%c0_17, %c0_18], %22 {strides = array<i32>} : memref<16x128xf32, #tpu.memory_space<vmem>>, vector<16x128xf32>,
    return
  }
  func.func @transform_0(%arg0: i32) -> (i32, i32) {
    %c0_i32 = arith.constant 0 : i32
    %c0_i32_0 = arith.constant 0 : i32
    return %arg0, %c0_i32 : i32, i32
  }
  func.func @transform_1(%arg0: i32) -> (i32, i32) {
    %c0_i32 = arith.constant 0 : i32
    %c0_i32_0 = arith.constant 0 : i32
    %c0_i32_1 = arith.constant 0 : i32
    return %c0_i32, %c0_i32_0 : i32, i32
  }
  func.func @transform_2(%arg0: i32) -> (i32, i32) {
    %c0_i32 = arith.constant 0 : i32
    %c0_i32_0 = arith.constant 0 : i32
    %c0_i32_1 = arith.constant 0 : i32
    return %c0_i32, %c0_i32_0 : i32, i32
  }
  func.func @transform_3(%arg0: i32) -> (i32, i32) {
    %c0_i32 = arith.constant 0 : i32
    %c0_i32_0 = arith.constant 0 : i32
    %c0_i32_1 = arith.constant 0 : i32
    return %c0_i32, %c0_i32_0 : i32, i32
  }
  func.func @transform_4(%arg0: i32) -> (i32, i32) {
    %c0_i32 = arith.constant 0 : i32
    %c0_i32_0 = arith.constant 0 : i32
    %c0_i32_1 = arith.constant 0 : i32
    return %c0_i32, %c0_i32_0 : i32, i32
  }
  func.func @transform_5(%arg0: i32) -> (i32, i32) {
    %c0_i32 = arith.constant 0 : i32
    %c0_i32_0 = arith.constant 0 : i32
    %c0_i32_1 = arith.constant 0 : i32
    return %c0_i32, %c0_i32_0 : i32, i32
  }
  func.func @transform_6(%arg0: i32) -> (i32, i32) {
    %c0_i32 = arith.constant 0 : i32
    %c0_i32_0 = arith.constant 0 : i32
    %c0_i32_1 = arith.constant 0 : i32
    return %c0_i32, %c0_i32_0 : i32, i32
  }
  func.func @transform_7(%arg0: i32) -> (i32, i32) {
    %c0_i32 = arith.constant 0 : i32
    %c0_i32_0 = arith.constant 0 : i32
    return %arg0, %c0_i32 : i32, i32
  }
}

module attributes {stable_mosaic.version = 11 : i64} {
  func.func @mlp_kernel(%arg0: i32, %arg1: memref<16x3072xf32, #tpu.memory_space<vmem>>, %arg2: memref<3072x512xbf16, #tpu.memory_space<vmem>>, %arg3: memref<1x512xf32, #tpu.memory_space<vmem>>, %arg4: memref<512x128xbf16, #tpu.memory_space<vmem>>, %arg5: memref<1x128xf32, #tpu.memory_space<vmem>>, %arg6: memref<128x128xbf16, #tpu.memory_space<vmem>>, %arg7: memref<1x128xf32, #tpu.memory_space<vmem>>, %arg8: memref<16x128xf32, #tpu.memory_space<vmem>>) attributes {dimension_semantics = [#tpu.dimension_semantics<parallel>], iteration_bounds = array<i64: 1>, scalar_prefetch = 0 : i64, scratch_operands = 0 : i64, tpu.core_type = #tpu.core_type<tc>, window_params = [{transform_indices = @transform_0, window_bounds = array<i64: 16, 3072>}, {pipeline_mode = #tpu.pipeline_mode<synchronous>, transform_indices = @transform_1, window_bounds = array<i64: 3072, 512>}, {pipeline_mode = #tpu.pipeline_mode<synchronous>, transform_indices = @transform_2, window_bounds = array<i64: 1, 512>}, {pipeline_mode = #tpu.pipeline_mode<synchronous>, transform_indices = @transform_3, window_bounds = array<i64: 512, 128>}, {pipeline_mode = #tpu.pipeline_mode<synchronous>, transform_indices = @transform_4, window_bounds = array<i64: 1, 128>}, {pipeline_mode = #tpu.pipeline_mode<synchronous>, transform_indices = @transform_5, window_bounds = array<i64: 128, 128>}, {pipeline_mode = #tpu.pipeline_mode<synchronous>, transform_indices = @transform_6, window_bounds = array<i64: 1, 128>}, {transform_indices = @transform_7, window_bounds = array<i64: 16, 128>}]} {
    %c0 = arith.constant 0 : index
    %c0_0 = arith.constant 0 : index
    %0 = vector.load %arg1[%c0, %c0_0] : memref<16x3072xf32, #tpu.memory_space<vmem>>, vector<16x3072xf32>
    %1 = arith.truncf %0 : vector<16x3072xf32> to vector<16x3072xbf16>
    %c0_1 = arith.constant 0 : index
    %c0_2 = arith.constant 0 : index
    %2 = vector.load %arg2[%c0_1, %c0_2] : memref<3072x512xbf16, #tpu.memory_space<vmem>>, vector<3072x512xbf16>
    %cst = arith.constant dense<0.000000e+00> : vector<16x512xf32>
    %3 = tpu.matmul %1, %2, %cst {dimension_numbers = #tpu.dot_dimension_numbers<[1], [0], [0], [1], [0, 0, 1, 1], [], []>} : vector<16x3072xbf16>, vector<3072x512xbf16>, vector<16x512xf32> -> vector<16x512xf32>
    %c0_3 = arith.constant 0 : index
    %c0_4 = arith.constant 0 : index
    %4 = vector.load %arg3[%c0_3, %c0_4] : memref<1x512xf32, #tpu.memory_space<vmem>>, vector<1x512xf32>
    %5 = vector.broadcast %4 : vector<1x512xf32> to vector<16x512xf32>
    %6 = arith.addf %3, %5 : vector<16x512xf32>
    %cst_5 = arith.constant 0.000000e+00 : f32
    %7 = vector.broadcast %cst_5 : f32 to vector<16x512xf32>
    %8 = arith.maximumf %6, %7 : vector<16x512xf32>
    %9 = arith.truncf %8 : vector<16x512xf32> to vector<16x512xbf16>
    %c0_6 = arith.constant 0 : index
    %c0_7 = arith.constant 0 : index
    %10 = vector.load %arg4[%c0_6, %c0_7] : memref<512x128xbf16, #tpu.memory_space<vmem>>, vector<512x128xbf16>
    %cst_8 = arith.constant dense<0.000000e+00> : vector<16x128xf32>
    %11 = tpu.matmul %9, %10, %cst_8 {dimension_numbers = #tpu.dot_dimension_numbers<[1], [0], [0], [1], [0, 0, 1, 1], [], []>} : vector<16x512xbf16>, vector<512x128xbf16>, vector<16x128xf32> -> vector<16x128xf32>
    %c0_9 = arith.constant 0 : index
    %c0_10 = arith.constant 0 : index
    %12 = vector.load %arg5[%c0_9, %c0_10] : memref<1x128xf32, #tpu.memory_space<vmem>>, vector<1x128xf32>
    %13 = vector.broadcast %12 : vector<1x128xf32> to vector<16x128xf32>
    %14 = arith.addf %11, %13 : vector<16x128xf32>
    %cst_11 = arith.constant 0.000000e+00 : f32
    %15 = vector.broadcast %cst_11 : f32 to vector<16x128xf32>
    %16 = arith.maximumf %14, %15 : vector<16x128xf32>
    %17 = arith.truncf %16 : vector<16x128xf32> to vector<16x128xbf16>
    %c0_12 = arith.constant 0 : index
    %c0_13 = arith.constant 0 : index
    %18 = vector.load %arg6[%c0_12, %c0_13] : memref<128x128xbf16, #tpu.memory_space<vmem>>, vector<128x128xbf16>
    %cst_14 = arith.constant dense<0.000000e+00> : vector<16x128xf32>
    %19 = tpu.matmul %17, %18, %cst_14 {dimension_numbers = #tpu.dot_dimension_numbers<[1], [0], [0], [1], [0, 0, 1, 1], [], []>} : vector<16x128xbf16>, vector<128x128xbf16>, vector<16x128xf32> -> vector<16x128xf32>
    %c0_15 = arith.constant 0 : index
    %c0_16 = arith.constant 0 : index
    %20 = vector.load %arg7[%c0_15, %c0_16] : memref<1x128xf32, #tpu.memory_space<vmem>>, vector<1x128xf32>
    %21 = vector.broadcast %20 : vector<1x128xf32> to vector<16x128xf32>
    %22 = arith.addf %19, %21 : vector<16x128xf32>
    %c0_17 = arith.constant 0 : index
    %c0_18 = arith.constant 0 : index
    %23 = vector.load %arg8[%c0_17, %c0_18] : memref<16x128xf32, #tpu.memory_space<vmem>>, vector<16x128xf32>
    tpu.vector_store %arg8[%c0_17, %c0_18], %22 {strides = array<i32>} : memref<16x128xf32, #tpu.memory_space<vmem>>, vector<16x128xf32>,
    return
  }
  func.func @transform_0(%arg0: i32) -> (i32, i32) {
    %c0_i32 = arith.constant 0 : i32
    %c0_i32_0 = arith.constant 0 : i32
    return %arg0, %c0_i32 : i32, i32
  }
  func.func @transform_1(%arg0: i32) -> (i32, i32) {
    %c0_i32 = arith.constant 0 : i32
    %c0_i32_0 = arith.constant 0 : i32
    %c0_i32_1 = arith.constant 0 : i32
    return %c0_i32, %c0_i32_0 : i32, i32
  }
  func.func @transform_2(%arg0: i32) -> (i32, i32) {
    %c0_i32 = arith.constant 0 : i32
    %c0_i32_0 = arith.constant 0 : i32
    %c0_i32_1 = arith.constant 0 : i32
    return %c0_i32, %c0_i32_0 : i32, i32
  }
  func.func @transform_3(%arg0: i32) -> (i32, i32) {
    %c0_i32 = arith.constant 0 : i32
    %c0_i32_0 = arith.constant 0 : i32
    %c0_i32_1 = arith.constant 0 : i32
    return %c0_i32, %c0_i32_0 : i32, i32
  }
  func.func @transform_4(%arg0: i32) -> (i32, i32) {
    %c0_i32 = arith.constant 0 : i32
    %c0_i32_0 = arith.constant 0 : i32
    %c0_i32_1 = arith.constant 0 : i32
    return %c0_i32, %c0_i32_0 : i32, i32
  }
  func.func @transform_5(%arg0: i32) -> (i32, i32) {
    %c0_i32 = arith.constant 0 : i32
    %c0_i32_0 = arith.constant 0 : i32
    %c0_i32_1 = arith.constant 0 : i32
    return %c0_i32, %c0_i32_0 : i32, i32
  }
  func.func @transform_6(%arg0: i32) -> (i32, i32) {
    %c0_i32 = arith.constant 0 : i32
    %c0_i32_0 = arith.constant 0 : i32
    %c0_i32_1 = arith.constant 0 : i32
    return %c0_i32, %c0_i32_0 : i32, i32
  }
  func.func @transform_7(%arg0: i32) -> (i32, i32) {
    %c0_i32 = arith.constant 0 : i32
    %c0_i32_0 = arith.constant 0 : i32
    return %arg0, %c0_i32 : i32, i32
  }
}

</mosaic_0001>

<bundles_post_ra>
// kernel: tpu_custom_call.1
= control target key start
LH: loop header
LB: loop body
LE: loop exit
PB: predicated region body
PF: predicated region fallthrough
CT: control target
= control target key end

     0   :  { %12 = vsyncpa [#allocation3], 0  ;;  %s8930_s0 = inlined_call_operand.hbm [shape: f32[16,3072], index: 0, kind: input, shape index: {}]   ;;  %s8931_s1 = inlined_call_operand.hbm [shape: bf16[3072,512], index: 1, kind: input, shape index: {}]   ;;  %s8932_s2 = inlined_call_operand.hbm [shape: f32[1,512], index: 2, kind: input, shape index: {}]   ;;  %s8933_s3 = inlined_call_operand.hbm [shape: bf16[512,128], index: 3, kind: input, shape index: {}]   ;;  %s8934_s4 = inlined_call_operand.hbm [shape: f32[1,128], index: 4, kind: input, shape index: {}]   ;;  %s8935_s5 = inlined_call_operand.hbm [shape: bf16[128,128], index: 5, kind: input, shape index: {}]   ;;  %s8936_s6 = inlined_call_operand.hbm [shape: f32[1,128], index: 6, kind: input, shape index: {}]   ;;  %s8937_s7 = inlined_call_operand.hbm [shape: f32[16,128], index: 7, kind: output, shape index: {}]  }
   0x1   :  { %13 = vsyncpa [#allocation6], 0 }
   0x2   :  { %14 = vsyncpa [#allocation9], 0 }
   0x3   :  { %15 = vsyncpa [#allocation12], 0 }
   0x4   :  { %16 = vsyncpa [#allocation4], 0  ;;  %s8608_s24 = smov [#allocation5]  }
   0x5   :  { %s34_s25 = sshll.u32 %s8608_s24, 4  ;;  %s35_s25 = int_to_ptr.vmem [resolvable:$true] %s34_s25 }
   0x6   :  { %s8446_s26 = scalar_lea.vmem %s35_s25, 98304  ;;  %p8451_p1 = scmp.lt.s32.totalorder %s35_s25, %s35_s25 }
   0x7   :  { %p8447_p0 = scmp.ne.s32.totalorder %s35_s25, %s8446_s26  ;;  %p8452_p2 = scmp.lt.s32.totalorder %s8446_s26, %s8446_s26 }
   0x9   :  { %p8453_p3 = por %p8452_p2, %p8451_p1 }
   0xb   :  { %p8454_p4 = pnand %p8453_p3, %p8447_p0 }
   0xd   :  { %8457 = shalt.err (!%p8454_p4)
}
   0xe   :  { %s8609_s27 = smov 256   ;;  %s8610_s28 = smov 16  }
   0xf   :  { %40 = dma.hbm_to_vmem [thread:$0]  %s8931_s1, 98304, %s35_s25, [#allocation6], %s8609_s27, %s8609_s27, %s8610_s28  }
  0x10   :  { %s8611_s8 = smov [#allocation8]  }
  0x11   :  { %s56_s9 = sshll.u32 %s8611_s8, 4  ;;  %s57_s9 = int_to_ptr.vmem [resolvable:$true] %s56_s9 }
  0x12   :  { %s8466_s10 = scalar_lea.vmem %s57_s9, 4096  ;;  %p8471_p6 = scmp.lt.s32.totalorder %s57_s9, %s57_s9 }
  0x13   :  { %p8467_p5 = scmp.ne.s32.totalorder %s57_s9, %s8466_s10  ;;  %p8472_p7 = scmp.lt.s32.totalorder %s8466_s10, %s8466_s10 }
  0x15   :  { %p8473_p8 = por %p8472_p7, %p8471_p6 }
  0x17   :  { %p8474_p9 = pnand %p8473_p8, %p8467_p5 }
  0x19   :  { %8477 = shalt.err (!%p8474_p9)
}
  0x1a   :  { %s8612_s11 = smov 64   ;;  %s8613_s12 = smov 4  }
  0x1b   :  { %62 = dma.hbm_to_vmem [thread:$0]  %s8933_s3, 4096, %s57_s9, [#allocation9], %s8612_s11, %s8612_s11, %s8613_s12  }
  0x1c   :  { %s8614_s15 = smov [#allocation11]   ;;  %s8615_s17 = smov [#allocation2]  }
  0x1d   :  { %s78_s16 = sshll.u32 %s8614_s15, 4  ;;  %s22_s1 = sshll.u32 %s8615_s17, 4  ;;  %s79_s16 = int_to_ptr.vmem [resolvable:$true] %s78_s16  ;;  %s23_s1 = int_to_ptr.vmem [resolvable:$true] %s22_s1 }
  0x1e   :  { %s8486_s18 = scalar_lea.vmem %s79_s16, 1024  ;;  %p8491_p11 = scmp.lt.s32.totalorder %s79_s16, %s79_s16 }
  0x1f   :  { %p8487_p10 = scmp.ne.s32.totalorder %s79_s16, %s8486_s18  ;;  %p8492_p12 = scmp.lt.s32.totalorder %s8486_s18, %s8486_s18 }
  0x21   :  { %p8493_p13 = por %p8492_p12, %p8491_p11 }
  0x23   :  { %p8494_p0 = pnand %p8493_p13, %p8487_p10 }
  0x25   :  { %8497 = shalt.err (!%p8494_p0)
}
  0x26   :  { %84 = dma.hbm_to_vmem [thread:$0]  %s8935_s5, 1024, %s79_s16, [#allocation12], %s8612_s11, %s8612_s11, %s8613_s12  }
  0x27   :  { %s8506_s21 = scalar_lea.vmem %s23_s1, 6144  ;;  %p8511_p2 = scmp.lt.s32.totalorder %s23_s1, %s23_s1 }
  0x28   :  { %p8507_p1 = scmp.ne.s32.totalorder %s23_s1, %s8506_s21  ;;  %p8512_p3 = scmp.lt.s32.totalorder %s8506_s21, %s8506_s21 }
  0x2a   :  { %p8513_p4 = por %p8512_p3, %p8511_p2 }
  0x2c   :  { %p8514_p5 = pnand %p8513_p4, %p8507_p1 }
  0x2e   :  { %8517 = shalt.err (!%p8514_p5)
}
  0x2f   :  { %s8616_s3 = smov 3072   ;;  %s8617_s22 = smov 192  }
  0x30   :  { %28 = dma.hbm_to_vmem [thread:$0]  %s8930_s0, 6144, %s23_s1, [#allocation3], %s8616_s3, %s8616_s3, %s8617_s22  }
  0x31   :  { %s8618_s25 = smov [#allocation7]   ;;  %s8619_s27 = smov [#allocation10]  }
  0x32   :  { %s47_s26 = sshll.u32 %s8618_s25, 4  ;;  %s69_s28 = sshll.u32 %s8619_s27, 4  ;;  %s48_s26 = int_to_ptr.vmem [resolvable:$true] %s47_s26  ;;  %s70_s28 = int_to_ptr.vmem [resolvable:$true] %s69_s28 }
  0x33   :  { %s8526_s5 = scalar_lea.vmem %s48_s26, 64  ;;  %p8531_p7 = scmp.lt.s32.totalorder %s48_s26, %s48_s26 }
  0x34   :  { %p8527_p6 = scmp.ne.s32.totalorder %s48_s26, %s8526_s5  ;;  %p8532_p8 = scmp.lt.s32.totalorder %s8526_s5, %s8526_s5 }
  0x36   :  { %p8533_p9 = por %p8532_p8, %p8531_p7 }
  0x38   :  { %p8534_p10 = pnand %p8533_p9, %p8527_p6 }
  0x3a   :  { %8537 = shalt.err (!%p8534_p10)
}
  0x3b   :  { %50 = dma.hbm_to_vmem [thread:$0]  %s8932_s2, 64, %s48_s26, [#allocation6]  }
  0x3c   :  { %s8546_s8 = scalar_lea.vmem %s70_s28, 16  ;;  %s8550_s0 = scalar_lea.vmem %s70_s28, 32 }
  0x3d   :  { %p8547_p11 = scmp.ne.s32.totalorder %s70_s28, %s8546_s8  ;;  %p8551_p12 = scmp.lt.s32.totalorder %s70_s28, %s70_s28 }
  0x3e   :  { %p8552_p13 = scmp.lt.s32.totalorder %s8550_s0, %s8546_s8 }
  0x40   :  { %p8553_p0 = por %p8552_p13, %p8551_p12 }
  0x42   :  { %p8554_p1 = pnand %p8553_p0, %p8547_p11 }
  0x44   :  { %8557 = shalt.err (!%p8554_p1)
}
  0x45   :  { %72 = dma.hbm_to_vmem [thread:$0]  %s8934_s4, 16, %s70_s28, [#allocation9]  }
  0x46   :  { %s8620_s11 = smov [#allocation13]  }
  0x47   :  { %s91_s12 = sshll.u32 %s8620_s11, 4  ;;  %s92_s12 = int_to_ptr.vmem [resolvable:$true] %s91_s12 }
  0x48   :  { %s8566_s13 = scalar_lea.vmem %s92_s12, 16  ;;  %s8570_s14 = scalar_lea.vmem %s92_s12, 32 }
  0x49   :  { %p8567_p2 = scmp.ne.s32.totalorder %s92_s12, %s8566_s13  ;;  %p8571_p3 = scmp.lt.s32.totalorder %s92_s12, %s92_s12 }
  0x4a   :  { %p8572_p4 = scmp.lt.s32.totalorder %s8570_s14, %s8566_s13 }
  0x4c   :  { %p8573_p5 = por %p8572_p4, %p8571_p3 }
  0x4e   :  { %p8574_p6 = pnand %p8573_p5, %p8567_p2 }
  0x50   :  { %8577 = shalt.err (!%p8574_p6)
}
  0x51   :  { %94 = dma.hbm_to_vmem [thread:$0]  %s8936_s6, 16, %s92_s12, [#allocation12]  }
  0x52   :  { %8598 = dma.done.wait [#allocation3], 6144  }
  0x53   :  { %8599 = vsyncadd [#allocation3], 4294961152 }
  0x54   :  { %8600 = dma.done.wait [#allocation6], 98368  }
  0x55   :  { %8601 = vsyncadd [#allocation6], 4294868928 }
  0x56   :  { %8602 = dma.done.wait [#allocation9], 4112  }
  0x57   :  { %8603 = vsyncadd [#allocation9], 4294963184 }
  0x58   :  { %8604 = dma.done.wait [#allocation12], 1040  }
  0x59   :  { %8605 = vsyncadd [#allocation12], 4294966256  ;;  %v7246_v0 = vld [vmem:[#allocation5 + $0xe4] ss:$16 sps:$4 sm:$0xff]   ;;  %v7250_v2 = vld [vmem:[#allocation5 + $0xe0] ss:$16 sps:$4 sm:$0xff]  }
  0x5a   :  { %v7248_v1 = vld [vmem:[#allocation5 + $0x2e4] ss:$16 sps:$4 sm:$0xff]   ;;  %4819 = vmatprep.subr.bf16.mxu0 %v7246_v0  ;;  %v7251_v3 = vld [vmem:[#allocation5 + $0x2e0] ss:$16 sps:$4 sm:$0xff]   ;;  %v118_v46 = vld [vmem:[#allocation2 + $0x8] sm:$0xff]  ;;  %vm8622_vm0 = vmmov 0  }
  0x5b   :  { %4862 = vmatprep.subr.bf16.mxu1 %v7248_v1  ;;  %v7252_v4 = vld [vmem:[#allocation5 + $0xc4] ss:$16 sps:$4 sm:$0xff]   ;;  %4820 = vmatpush1.bf16.msra.mxu0 %v7250_v2  ;;  %v7256_v6 = vld [vmem:[#allocation5 + $0xc0] ss:$16 sps:$4 sm:$0xff]   ;;  %v142_v47 = vld [vmem:[#allocation2 + $0xc8] sm:$0xff]  ;;  %s8623_s4 = smov [#allocation14]  }
  0x5c   :  { %4863 = vmatpush1.bf16.msra.mxu1 %v7251_v3  ;;  %v7254_v5 = vld [vmem:[#allocation5 + $0x2c4] ss:$16 sps:$4 sm:$0xff]   ;;  %4821 = vmatprep.subr.bf16.mxu0 %v7252_v4  ;;  %v7257_v7 = vld [vmem:[#allocation5 + $0x2c0] ss:$16 sps:$4 sm:$0xff]   ;;  %v120_v48 = vld [vmem:[#allocation2 + $0x18] sm:$0xff]  ;;  %v8687_v53 = vpack.c.bf16 %v142_v47, %v118_v46  ;;  %s6330_s6 = sshll.u32 %s8623_s4, 4  ;;  %s6331_s6 = int_to_ptr.vmem [resolvable:$true] %s6330_s6 }
  0x5d   :  { %4864 = vmatprep.subr.bf16.mxu1 %v7254_v5  ;;  %v7258_v8 = vld [vmem:[#allocation5 + $0xa4] ss:$16 sps:$4 sm:$0xff]   ;;  %v7262_v10 = vld [vmem:[#allocation5 + $0xa0] ss:$16 sps:$4 sm:$0xff]   ;;  %v144_v49 = vld [vmem:[#allocation2 + $0xd8] sm:$0xff]  ;;  %s8578_s16 = scalar_lea.vmem %s6331_s6, 256  ;;  %p8583_p8 = scmp.lt.s32.totalorder %s6331_s6, %s6331_s6 }
  0x5e   :  { %v7260_v9 = vld [vmem:[#allocation5 + $0x2a4] ss:$16 sps:$4 sm:$0xff]   ;;  %v7263_v11 = vld [vmem:[#allocation5 + $0x2a0] ss:$16 sps:$4 sm:$0xff]   ;;  %v8689_v54 = vpack.c.bf16 %v144_v49, %v120_v48  ;;  %4851 = vmatprep.mubr.bf16.mxu0 %v8687_v53  ;;  %v148_v46 = vld [vmem:[#allocation2 + $0xf8] sm:$0xff]  ;;  %p8579_p7 = scmp.ne.s32.totalorder %s6331_s6, %s8578_s16  ;;  %p8584_p9 = scmp.lt.s32.totalorder %s8578_s16, %s8578_s16 }
  0x5f   :  { %4822 = vmatpush1.bf16.msra.mxu0 %v7256_v6  ;;  %v7264_v12 = vld [vmem:[#allocation5 + $0x84] ss:$16 sps:$4 sm:$0xff]   ;;  %v7268_v14 = vld [vmem:[#allocation5 + $0x80] ss:$16 sps:$4 sm:$0xff]  }
  0x60   :  { %4865 = vmatpush1.bf16.msra.mxu1 %v7257_v7  ;;  %4823 = vmatprep.subr.bf16.mxu0 %v7258_v8  ;;  %v7266_v13 = vld [vmem:[#allocation5 + $0x284] ss:$16 sps:$4 sm:$0xff]   ;;  %v7269_v15 = vld [vmem:[#allocation5 + $0x280] ss:$16 sps:$4 sm:$0xff]   ;;  %p8585_p10 = por %p8584_p9, %p8583_p8 }
  0x61   :  { %4866 = vmatprep.subr.bf16.mxu1 %v7260_v9  ;;  %v7270_v16 = vld [vmem:[#allocation5 + $0x64] ss:$16 sps:$4 sm:$0xff]   ;;  %v7274_v18 = vld [vmem:[#allocation5 + $0x60] ss:$16 sps:$4 sm:$0xff]   ;;  %4894 = vmatprep.mubr.bf16.mxu1 %v8689_v54 }
  0x62   :  { %v7272_v17 = vld [vmem:[#allocation5 + $0x264] ss:$16 sps:$4 sm:$0xff]   ;;  %v7275_v19 = vld [vmem:[#allocation5 + $0x260] ss:$16 sps:$4 sm:$0xff]   ;;  %p8586_p11 = pnand %p8585_p10, %p8579_p7 }
  0x63   :  { %4824 = vmatpush1.bf16.msra.mxu0 %v7262_v10  ;;  %v7276_v20 = vld [vmem:[#allocation5 + $0x44] ss:$16 sps:$4 sm:$0xff]   ;;  %v7280_v22 = vld [vmem:[#allocation5 + $0x40] ss:$16 sps:$4 sm:$0xff]  }
  0x64   :  { %4867 = vmatpush1.bf16.msra.mxu1 %v7263_v11  ;;  %4825 = vmatprep.subr.bf16.mxu0 %v7264_v12  ;;  %v7278_v21 = vld [vmem:[#allocation5 + $0x244] ss:$16 sps:$4 sm:$0xff]   ;;  %v7281_v23 = vld [vmem:[#allocation5 + $0x240] ss:$16 sps:$4 sm:$0xff]  }
  0x65   :  { %4868 = vmatprep.subr.bf16.mxu1 %v7266_v13  ;;  %v7282_v24 = vld [vmem:[#allocation5 + $0x24] ss:$16 sps:$4 sm:$0xff]   ;;  %v7286_v26 = vld [vmem:[#allocation5 + $0x20] ss:$16 sps:$4 sm:$0xff]  }
  0x66   :  { %v7284_v25 = vld [vmem:[#allocation5 + $0x224] ss:$16 sps:$4 sm:$0xff]   ;;  %v7287_v27 = vld [vmem:[#allocation5 + $0x220] ss:$16 sps:$4 sm:$0xff]  }
  0x67   :  { %4826 = vmatpush1.bf16.msra.mxu0 %v7268_v14  ;;  %v7288_v28 = vld [vmem:[#allocation5 + $0x4] ss:$16 sps:$4 sm:$0xff]   ;;  %v7292_v30 = vld [vmem:[#allocation5] ss:$16 sps:$4 sm:$0xff]  }
  0x68   :  { %4869 = vmatpush1.bf16.msra.mxu1 %v7269_v15  ;;  %4827 = vmatprep.subr.bf16.mxu0 %v7270_v16  ;;  %v7290_v29 = vld [vmem:[#allocation5 + $0x204] ss:$16 sps:$4 sm:$0xff]   ;;  %v7293_v31 = vld [vmem:[#allocation5 + $0x200] ss:$16 sps:$4 sm:$0xff]  }
  0x69   :  { %4870 = vmatprep.subr.bf16.mxu1 %v7272_v17  ;;  %v7294_v32 = vld [vmem:[#allocation5 + $0x1e4] ss:$16 sps:$4 sm:$0xff]   ;;  %v7298_v34 = vld [vmem:[#allocation5 + $0x1e0] ss:$16 sps:$4 sm:$0xff]  }
  0x6a   :  { %v7296_v33 = vld [vmem:[#allocation5 + $0x3e4] ss:$16 sps:$4 sm:$0xff]   ;;  %v7299_v35 = vld [vmem:[#allocation5 + $0x3e0] ss:$16 sps:$4 sm:$0xff]  }
  0x6b   :  { %4828 = vmatpush1.bf16.msra.mxu0 %v7274_v18  ;;  %v7300_v36 = vld [vmem:[#allocation5 + $0x1c4] ss:$16 sps:$4 sm:$0xff]   ;;  %v7304_v38 = vld [vmem:[#allocation5 + $0x1c0] ss:$16 sps:$4 sm:$0xff]  }
  0x6c   :  { %4871 = vmatpush1.bf16.msra.mxu1 %v7275_v19  ;;  %4829 = vmatprep.subr.bf16.mxu0 %v7276_v20  ;;  %v7302_v37 = vld [vmem:[#allocation5 + $0x3c4] ss:$16 sps:$4 sm:$0xff]   ;;  %v7305_v39 = vld [vmem:[#allocation5 + $0x3c0] ss:$16 sps:$4 sm:$0xff]  }
  0x6d   :  { %4872 = vmatprep.subr.bf16.mxu1 %v7278_v21  ;;  %v7306_v40 = vld [vmem:[#allocation5 + $0x1a4] ss:$16 sps:$4 sm:$0xff]   ;;  %v7310_v42 = vld [vmem:[#allocation5 + $0x1a0] ss:$16 sps:$4 sm:$0xff]  }
  0x6e   :  { %v7308_v41 = vld [vmem:[#allocation5 + $0x3a4] ss:$16 sps:$4 sm:$0xff]   ;;  %v7311_v43 = vld [vmem:[#allocation5 + $0x3a0] ss:$16 sps:$4 sm:$0xff]  }
  0x6f   :  { %4830 = vmatpush1.bf16.msra.mxu0 %v7280_v22  ;;  %v7312_v44 = vld [vmem:[#allocation5 + $0x184] ss:$16 sps:$4 sm:$0xff]   ;;  %v7316_v50 = vld [vmem:[#allocation5 + $0x180] ss:$16 sps:$4 sm:$0xff]  }
  0x70   :  { %4873 = vmatpush1.bf16.msra.mxu1 %v7281_v23  ;;  %4831 = vmatprep.subr.bf16.mxu0 %v7282_v24  ;;  %v7314_v45 = vld [vmem:[#allocation5 + $0x384] ss:$16 sps:$4 sm:$0xff]   ;;  %v7317_v51 = vld [vmem:[#allocation5 + $0x380] ss:$16 sps:$4 sm:$0xff]  }
  0x71   :  { %4874 = vmatprep.subr.bf16.mxu1 %v7284_v25  ;;  %v7318_v52 = vld [vmem:[#allocation5 + $0x164] ss:$16 sps:$4 sm:$0xff]   ;;  %v7322_v56 = vld [vmem:[#allocation5 + $0x160] ss:$16 sps:$4 sm:$0xff]  }
  0x72   :  { %v7320_v55 = vld [vmem:[#allocation5 + $0x364] ss:$16 sps:$4 sm:$0xff]   ;;  %v7323_v57 = vld [vmem:[#allocation5 + $0x360] ss:$16 sps:$4 sm:$0xff]  }
  0x73   :  { %4832 = vmatpush1.bf16.msra.mxu0 %v7286_v26  ;;  %v7324_v58 = vld [vmem:[#allocation5 + $0x144] ss:$16 sps:$4 sm:$0xff]   ;;  %v7328_v60 = vld [vmem:[#allocation5 + $0x140] ss:$16 sps:$4 sm:$0xff]  }
  0x74   :  { %4875 = vmatpush1.bf16.msra.mxu1 %v7287_v27  ;;  %4833 = vmatprep.subr.bf16.mxu0 %v7288_v28  ;;  %v7326_v59 = vld [vmem:[#allocation5 + $0x344] ss:$16 sps:$4 sm:$0xff]   ;;  %v7329_v61 = vld [vmem:[#allocation5 + $0x340] ss:$16 sps:$4 sm:$0xff]  }
  0x75   :  { %4876 = vmatprep.subr.bf16.mxu1 %v7290_v29  ;;  %v7330_v62 = vld [vmem:[#allocation5 + $0x124] ss:$16 sps:$4 sm:$0xff]   ;;  %v7334_v0 = vld [vmem:[#allocation5 + $0x120] ss:$16 sps:$4 sm:$0xff]  }
  0x76   :  { %v7332_v63 = vld [vmem:[#allocation5 + $0x324] ss:$16 sps:$4 sm:$0xff]   ;;  %v7335_v1 = vld [vmem:[#allocation5 + $0x320] ss:$16 sps:$4 sm:$0xff]  }
  0x77   :  { %4834 = vmatpush1.bf16.msra.mxu0 %v7292_v30  ;;  %v7336_v2 = vld [vmem:[#allocation5 + $0x104] ss:$16 sps:$4 sm:$0xff]   ;;  %v7340_v4 = vld [vmem:[#allocation5 + $0x100] ss:$16 sps:$4 sm:$0xff]  }
  0x78   :  { %4877 = vmatpush1.bf16.msra.mxu1 %v7293_v31  ;;  %4835 = vmatprep.subr.bf16.mxu0 %v7294_v32  ;;  %v7338_v3 = vld [vmem:[#allocation5 + $0x304] ss:$16 sps:$4 sm:$0xff]   ;;  %v7341_v5 = vld [vmem:[#allocation5 + $0x300] ss:$16 sps:$4 sm:$0xff]  }
  0x79   :  { %4878 = vmatprep.subr.bf16.mxu1 %v7296_v33  ;;  %v117_v6 = vld [vmem:[#allocation2] sm:$0xff]  ;;  %v119_v8 = vld [vmem:[#allocation2 + $0x10] sm:$0xff] }
  0x7a   :  { %v141_v7 = vld [vmem:[#allocation2 + $0xc0] sm:$0xff]  ;;  %v143_v9 = vld [vmem:[#allocation2 + $0xd0] sm:$0xff] }
  0x7b   :  { %4836 = vmatpush2.bf16.msra.mxu0 %v7298_v34  ;;  %v7344_v10 = vld [vmem:[#allocation5 + $0x4e4] ss:$16 sps:$4 sm:$0xff]   ;;  %v8693_v12 = vpack.c.bf16 %v141_v7, %v117_v6  ;;  %v8695_v13 = vpack.c.bf16 %v143_v9, %v119_v8  ;;  %v7342_v14 = vld [vmem:[#allocation5 + $0x4e0] ss:$16 sps:$4 sm:$0xff]  }
  0x7c   :  { %4879 = vmatpush2.bf16.msra.mxu1 %v7299_v35  ;;  %4837 = vmatprep.subr.bf16.mxu0 %v7300_v36  ;;  %v7347_v11 = vld [vmem:[#allocation5 + $0x6e4] ss:$16 sps:$4 sm:$0xff]   ;;  %v7345_v15 = vld [vmem:[#allocation5 + $0x6e0] ss:$16 sps:$4 sm:$0xff]  }
  0x7d   :  { %4880 = vmatprep.subr.bf16.mxu1 %v7302_v37  ;;  %v7350_v16 = vld [vmem:[#allocation5 + $0x4c4] ss:$16 sps:$4 sm:$0xff]   ;;  %v7348_v18 = vld [vmem:[#allocation5 + $0x4c0] ss:$16 sps:$4 sm:$0xff]  }
  0x7e   :  { %v7353_v17 = vld [vmem:[#allocation5 + $0x6c4] ss:$16 sps:$4 sm:$0xff]   ;;  %v7351_v19 = vld [vmem:[#allocation5 + $0x6c0] ss:$16 sps:$4 sm:$0xff]  }
  0x7f   :  { %4838 = vmatpush2.bf16.msra.mxu0 %v7304_v38  ;;  %v7356_v20 = vld [vmem:[#allocation5 + $0x4a4] ss:$16 sps:$4 sm:$0xff]   ;;  %v7354_v22 = vld [vmem:[#allocation5 + $0x4a0] ss:$16 sps:$4 sm:$0xff]  }
  0x80   :  { %4881 = vmatpush2.bf16.msra.mxu1 %v7305_v39  ;;  %4839 = vmatprep.subr.bf16.mxu0 %v7306_v40  ;;  %v7359_v21 = vld [vmem:[#allocation5 + $0x6a4] ss:$16 sps:$4 sm:$0xff]   ;;  %v7357_v23 = vld [vmem:[#allocation5 + $0x6a0] ss:$16 sps:$4 sm:$0xff]   ;;  %v122_v40 = vld [vmem:[#allocation2 + $0x28] sm:$0xff] }
  0x81   :  { %4882 = vmatprep.subr.bf16.mxu1 %v7308_v41  ;;  %v7362_v24 = vld [vmem:[#allocation5 + $0x484] ss:$16 sps:$4 sm:$0xff]   ;;  %v7360_v26 = vld [vmem:[#allocation5 + $0x480] ss:$16 sps:$4 sm:$0xff]   ;;  %v146_v41 = vld [vmem:[#allocation2 + $0xe8] sm:$0xff] }
  0x82   :  { %v7365_v25 = vld [vmem:[#allocation5 + $0x684] ss:$16 sps:$4 sm:$0xff]   ;;  %v7363_v27 = vld [vmem:[#allocation5 + $0x680] ss:$16 sps:$4 sm:$0xff]  }
  0x83   :  { %4840 = vmatpush2.bf16.msra.mxu0 %v7310_v42  ;;  %v7368_v28 = vld [vmem:[#allocation5 + $0x464] ss:$16 sps:$4 sm:$0xff]   ;;  %v7366_v30 = vld [vmem:[#allocation5 + $0x460] ss:$16 sps:$4 sm:$0xff]   ;;  %v124_v42 = vld [vmem:[#allocation2 + $0x38] sm:$0xff] }
  0x84   :  { %4883 = vmatpush2.bf16.msra.mxu1 %v7311_v43  ;;  %4841 = vmatprep.subr.bf16.mxu0 %v7312_v44  ;;  %v7371_v29 = vld [vmem:[#allocation5 + $0x664] ss:$16 sps:$4 sm:$0xff]   ;;  %v7369_v31 = vld [vmem:[#allocation5 + $0x660] ss:$16 sps:$4 sm:$0xff]   ;;  %v8701_v47 = vpack.c.bf16 %v148_v46, %v124_v42  ;;  %v152_v42 = vld [vmem:[#allocation2 + $0x118] sm:$0xff] }
  0x85   :  { %4884 = vmatprep.subr.bf16.mxu1 %v7314_v45  ;;  %v7374_v32 = vld [vmem:[#allocation5 + $0x444] ss:$16 sps:$4 sm:$0xff]   ;;  %v7372_v34 = vld [vmem:[#allocation5 + $0x440] ss:$16 sps:$4 sm:$0xff]   ;;  %v8699_v45 = vpack.c.bf16 %v146_v41, %v122_v40  ;;  %v128_v41 = vld [vmem:[#allocation2 + $0x58] sm:$0xff] }
  0x86   :  { %v7377_v33 = vld [vmem:[#allocation5 + $0x644] ss:$16 sps:$4 sm:$0xff]   ;;  %v7375_v35 = vld [vmem:[#allocation5 + $0x640] ss:$16 sps:$4 sm:$0xff]   ;;  %v8713_v46 = vpack.c.bf16 %v152_v42, %v128_v41 }
  0x87   :  { %4842 = vmatpush2.bf16.msra.mxu0 %v7316_v50  ;;  %v7380_v36 = vld [vmem:[#allocation5 + $0x424] ss:$16 sps:$4 sm:$0xff]   ;;  %v7378_v38 = vld [vmem:[#allocation5 + $0x420] ss:$16 sps:$4 sm:$0xff]  }
  0x88   :  { %4885 = vmatpush2.bf16.msra.mxu1 %v7317_v51  ;;  %4843 = vmatprep.subr.bf16.mxu0 %v7318_v52  ;;  %v7383_v37 = vld [vmem:[#allocation5 + $0x624] ss:$16 sps:$4 sm:$0xff]   ;;  %v7381_v39 = vld [vmem:[#allocation5 + $0x620] ss:$16 sps:$4 sm:$0xff]  }
  0x89   :  { %4886 = vmatprep.subr.bf16.mxu1 %v7320_v55  ;;  %v7386_v43 = vld [vmem:[#allocation5 + $0x404] ss:$16 sps:$4 sm:$0xff]   ;;  %v7384_v48 = vld [vmem:[#allocation5 + $0x400] ss:$16 sps:$4 sm:$0xff]  }
  0x8a   :  { %v7389_v44 = vld [vmem:[#allocation5 + $0x604] ss:$16 sps:$4 sm:$0xff]   ;;  %v7387_v49 = vld [vmem:[#allocation5 + $0x600] ss:$16 sps:$4 sm:$0xff]  }
  0x8b   :  { %4844 = vmatpush2.bf16.msra.mxu0 %v7322_v56  ;;  %v7392_v50 = vld [vmem:[#allocation5 + $0x5e4] ss:$16 sps:$4 sm:$0xff]   ;;  %v7390_v52 = vld [vmem:[#allocation5 + $0x5e0] ss:$16 sps:$4 sm:$0xff]  }
  0x8c   :  { %4887 = vmatpush2.bf16.msra.mxu1 %v7323_v57  ;;  %4845 = vmatprep.subr.bf16.mxu0 %v7324_v58  ;;  %v7395_v51 = vld [vmem:[#allocation5 + $0x7e4] ss:$16 sps:$4 sm:$0xff]   ;;  %v7393_v55 = vld [vmem:[#allocation5 + $0x7e0] ss:$16 sps:$4 sm:$0xff]  }
  0x8d   :  { %4888 = vmatprep.subr.bf16.mxu1 %v7326_v59  ;;  %v7398_v56 = vld [vmem:[#allocation5 + $0x5c4] ss:$16 sps:$4 sm:$0xff]   ;;  %v7396_v58 = vld [vmem:[#allocation5 + $0x5c0] ss:$16 sps:$4 sm:$0xff]  }
  0x8e   :  { %v7401_v57 = vld [vmem:[#allocation5 + $0x7c4] ss:$16 sps:$4 sm:$0xff]   ;;  %v7399_v59 = vld [vmem:[#allocation5 + $0x7c0] ss:$16 sps:$4 sm:$0xff]  }
  0x8f   :  { %4846 = vmatpush2.bf16.msra.mxu0 %v7328_v60  ;;  %v7404_v60 = vld [vmem:[#allocation5 + $0x5a4] ss:$16 sps:$4 sm:$0xff]   ;;  %v7414_v6 = vld [vmem:[#allocation5 + $0x560] ss:$16 sps:$4 sm:$0xff]  }
  0x90   :  { %4889 = vmatpush2.bf16.msra.mxu1 %v7329_v61  ;;  %4847 = vmatprep.subr.bf16.mxu0 %v7330_v62  ;;  %v7407_v61 = vld [vmem:[#allocation5 + $0x7a4] ss:$16 sps:$4 sm:$0xff]   ;;  %v7402_v62 = vld [vmem:[#allocation5 + $0x5a0] ss:$16 sps:$4 sm:$0xff]  }
  0x91   :  { %4890 = vmatprep.subr.bf16.mxu1 %v7332_v63  ;;  %v7405_v63 = vld [vmem:[#allocation5 + $0x7a0] ss:$16 sps:$4 sm:$0xff]   ;;  %v7422_v8 = vld [vmem:[#allocation5 + $0x544] ss:$16 sps:$4 sm:$0xff]  }
  0x92   :  { %v7417_v7 = vld [vmem:[#allocation5 + $0x760] ss:$16 sps:$4 sm:$0xff]   ;;  %v7425_v9 = vld [vmem:[#allocation5 + $0x744] ss:$16 sps:$4 sm:$0xff]  }
  0x93   :  { %4848 = vmatpush2.bf16.msra.mxu0 %v7334_v0  ;;  %v7410_v0 = vld [vmem:[#allocation5 + $0x584] ss:$16 sps:$4 sm:$0xff]   ;;  %v7528_v41 = vld [vmem:[#allocation5 + $0x900] ss:$16 sps:$4 sm:$0xff]  }
  0x94   :  { %4891 = vmatpush2.bf16.msra.mxu1 %v7335_v1  ;;  %4849 = vmatprep.subr.bf16.mxu0 %v7336_v2  ;;  %v7413_v1 = vld [vmem:[#allocation5 + $0x784] ss:$16 sps:$4 sm:$0xff]   ;;  %v7408_v2 = vld [vmem:[#allocation5 + $0x580] ss:$16 sps:$4 sm:$0xff]  }
  0x95   :  { %4892 = vmatprep.subr.bf16.mxu1 %v7338_v3  ;;  %v7411_v3 = vld [vmem:[#allocation5 + $0x780] ss:$16 sps:$4 sm:$0xff]  }
  0x96   :  { %v7531_v42 = vld [vmem:[#allocation5 + $0xb00] ss:$16 sps:$4 sm:$0xff]  }
  0x97   :  { %4850 = vmatpush2.bf16.msra.mxu0 %v7340_v4  ;;  %v7416_v4 = vld [vmem:[#allocation5 + $0x564] ss:$16 sps:$4 sm:$0xff]  }
  0x98   :  { %4893 = vmatpush2.bf16.msra.mxu1 %v7341_v5  ;;  %4905 = vmatprep.subr.bf16.mxu0 %v7344_v10  ;;  %v7419_v5 = vld [vmem:[#allocation5 + $0x764] ss:$16 sps:$4 sm:$0xff]   ;;  %v7420_v10 = vld [vmem:[#allocation5 + $0x540] ss:$16 sps:$4 sm:$0xff]  }
  0x99   :  { %4948 = vmatprep.subr.bf16.mxu1 %v7347_v11  ;;  %v7423_v11 = vld [vmem:[#allocation5 + $0x740] ss:$16 sps:$4 sm:$0xff]  }
  0x9a   :  { %4852 = vmatmul.mubr.bf16.vlgmr.msra.gmra.mxu0 %v8693_v12 }
  0x9b   :  { %4895 = vmatmul.mubr.bf16.vlgmr.msra.gmra.mxu1 %v8695_v13  ;;  %4906 = vmatpush1.bf16.msra.mxu0 %v7342_v14  ;;  %v7428_v14 = vld [vmem:[#allocation5 + $0x524] ss:$16 sps:$4 sm:$0xff]  }
  0x9c   :  { %4949 = vmatpush1.bf16.msra.mxu1 %v7345_v15  ;;  %4907 = vmatprep.subr.bf16.mxu0 %v7350_v16  ;;  %v7431_v15 = vld [vmem:[#allocation5 + $0x724] ss:$16 sps:$4 sm:$0xff]   ;;  %v7426_v16 = vld [vmem:[#allocation5 + $0x520] ss:$16 sps:$4 sm:$0xff]  }
  0x9d   :  { %4950 = vmatprep.subr.bf16.mxu1 %v7353_v17  ;;  %4937 = vmatprep.mubr.bf16.mxu0 %v8699_v45  ;;  %v7429_v17 = vld [vmem:[#allocation5 + $0x720] ss:$16 sps:$4 sm:$0xff]  }
  0x9e   :  { %4980 = vmatprep.mubr.bf16.mxu1 %v8701_v47 }
  0x9f   :  { %4908 = vmatpush1.bf16.msra.mxu0 %v7348_v18  ;;  %v7434_v18 = vld [vmem:[#allocation5 + $0x504] ss:$16 sps:$4 sm:$0xff]  }
  0xa0   :  { %4951 = vmatpush1.bf16.msra.mxu1 %v7351_v19  ;;  %4909 = vmatprep.subr.bf16.mxu0 %v7356_v20  ;;  %v7437_v19 = vld [vmem:[#allocation5 + $0x704] ss:$16 sps:$4 sm:$0xff]   ;;  %v7432_v20 = vld [vmem:[#allocation5 + $0x500] ss:$16 sps:$4 sm:$0xff]  }
  0xa1   :  { %4952 = vmatprep.subr.bf16.mxu1 %v7359_v21  ;;  %v7435_v21 = vld [vmem:[#allocation5 + $0x700] ss:$16 sps:$4 sm:$0xff]  }
  0xa3   :  { %4910 = vmatpush1.bf16.msra.mxu0 %v7354_v22  ;;  %v121_v22 = vld [vmem:[#allocation2 + $0x20] sm:$0xff] }
  0xa4   :  { %4953 = vmatpush1.bf16.msra.mxu1 %v7357_v23  ;;  %4911 = vmatprep.subr.bf16.mxu0 %v7362_v24  ;;  %v145_v23 = vld [vmem:[#allocation2 + $0xe0] sm:$0xff]  ;;  %v123_v24 = vld [vmem:[#allocation2 + $0x30] sm:$0xff] }
  0xa5   :  { %4954 = vmatprep.subr.bf16.mxu1 %v7365_v25  ;;  %v147_v25 = vld [vmem:[#allocation2 + $0xf0] sm:$0xff] }
  0xa7   :  { %4912 = vmatpush1.bf16.msra.mxu0 %v7360_v26  ;;  %v7440_v26 = vld [vmem:[#allocation5 + $0x8e4] ss:$16 sps:$4 sm:$0xff]  }
  0xa8   :  { %4955 = vmatpush1.bf16.msra.mxu1 %v7363_v27  ;;  %4913 = vmatprep.subr.bf16.mxu0 %v7368_v28  ;;  %v7443_v27 = vld [vmem:[#allocation5 + $0xae4] ss:$16 sps:$4 sm:$0xff]   ;;  %v8705_v28 = vpack.c.bf16 %v145_v23, %v121_v22  ;;  %v7504_v22 = vld [vmem:[#allocation5 + $0x980] ss:$16 sps:$4 sm:$0xff]  }
  0xa9   :  { %4956 = vmatprep.subr.bf16.mxu1 %v7371_v29  ;;  %v8707_v29 = vpack.c.bf16 %v147_v25, %v123_v24  ;;  %v7507_v23 = vld [vmem:[#allocation5 + $0xb80] ss:$16 sps:$4 sm:$0xff]   ;;  %v7512_v24 = vld [vmem:[#allocation5 + $0x964] ss:$16 sps:$4 sm:$0xff]  }
  0xaa   :  { %v7515_v25 = vld [vmem:[#allocation5 + $0xb64] ss:$16 sps:$4 sm:$0xff]  }
  0xab   :  { %4914 = vmatpush1.bf16.msra.mxu0 %v7366_v30  ;;  %v7438_v30 = vld [vmem:[#allocation5 + $0x8e0] ss:$16 sps:$4 sm:$0xff]  }
  0xac   :  { %4957 = vmatpush1.bf16.msra.mxu1 %v7369_v31  ;;  %4915 = vmatprep.subr.bf16.mxu0 %v7374_v32  ;;  %v7441_v31 = vld [vmem:[#allocation5 + $0xae0] ss:$16 sps:$4 sm:$0xff]   ;;  %v7446_v32 = vld [vmem:[#allocation5 + $0x8c4] ss:$16 sps:$4 sm:$0xff]  }
  0xad   :  { %4958 = vmatprep.subr.bf16.mxu1 %v7377_v33  ;;  %v7449_v33 = vld [vmem:[#allocation5 + $0xac4] ss:$16 sps:$4 sm:$0xff]  }
  0xaf   :  { %4916 = vmatpush1.bf16.msra.mxu0 %v7372_v34  ;;  %v7444_v34 = vld [vmem:[#allocation5 + $0x8c0] ss:$16 sps:$4 sm:$0xff]  }
  0xb0   :  { %4959 = vmatpush1.bf16.msra.mxu1 %v7375_v35  ;;  %4917 = vmatprep.subr.bf16.mxu0 %v7380_v36  ;;  %v7447_v35 = vld [vmem:[#allocation5 + $0xac0] ss:$16 sps:$4 sm:$0xff]   ;;  %v7452_v36 = vld [vmem:[#allocation5 + $0x8a4] ss:$16 sps:$4 sm:$0xff]  }
  0xb1   :  { %4960 = vmatprep.subr.bf16.mxu1 %v7383_v37  ;;  %v7455_v37 = vld [vmem:[#allocation5 + $0xaa4] ss:$16 sps:$4 sm:$0xff]  }
  0xb3   :  { %4918 = vmatpush1.bf16.msra.mxu0 %v7378_v38  ;;  %v126_v38 = vld [vmem:[#allocation2 + $0x48] sm:$0xff] }
  0xb4   :  { %4961 = vmatpush1.bf16.msra.mxu1 %v7381_v39  ;;  %4919 = vmatprep.subr.bf16.mxu0 %v7386_v43  ;;  %v150_v39 = vld [vmem:[#allocation2 + $0x108] sm:$0xff]  ;;  %v7450_v43 = vld [vmem:[#allocation5 + $0x8a0] ss:$16 sps:$4 sm:$0xff]  }
  0xb5   :  { %4962 = vmatprep.subr.bf16.mxu1 %v7389_v44  ;;  %v8711_v40 = vpack.c.bf16 %v150_v39, %v126_v38  ;;  %v7453_v44 = vld [vmem:[#allocation5 + $0xaa0] ss:$16 sps:$4 sm:$0xff]   ;;  %v7530_v38 = vld [vmem:[#allocation5 + $0x904] ss:$16 sps:$4 sm:$0xff]  }
  0xb6   :  { %v7533_v39 = vld [vmem:[#allocation5 + $0xb04] ss:$16 sps:$4 sm:$0xff]  }
  0xb7   :  { %4920 = vmatpush1.bf16.msra.mxu0 %v7384_v48  ;;  %v7458_v48 = vld [vmem:[#allocation5 + $0x884] ss:$16 sps:$4 sm:$0xff]  }
  0xb8   :  { %4963 = vmatpush1.bf16.msra.mxu1 %v7387_v49  ;;  %4921 = vmatprep.subr.bf16.mxu0 %v7392_v50  ;;  %v7461_v49 = vld [vmem:[#allocation5 + $0xa84] ss:$16 sps:$4 sm:$0xff]   ;;  %v7456_v50 = vld [vmem:[#allocation5 + $0x880] ss:$16 sps:$4 sm:$0xff]  }
  0xb9   :  { %4964 = vmatprep.subr.bf16.mxu1 %v7395_v51  ;;  %v7459_v51 = vld [vmem:[#allocation5 + $0xa80] ss:$16 sps:$4 sm:$0xff]  }
  0xbb   :  { %4922 = vmatpush2.bf16.msra.mxu0 %v7390_v52  ;;  %v7464_v52 = vld [vmem:[#allocation5 + $0x864] ss:$16 sps:$4 sm:$0xff]  }
  0xbc   :  { %4965 = vmatpush2.bf16.msra.mxu1 %v7393_v55  ;;  %4923 = vmatprep.subr.bf16.mxu0 %v7398_v56  ;;  %v7467_v55 = vld [vmem:[#allocation5 + $0xa64] ss:$16 sps:$4 sm:$0xff]   ;;  %v7462_v56 = vld [vmem:[#allocation5 + $0x860] ss:$16 sps:$4 sm:$0xff]  }
  0xbd   :  { %4966 = vmatprep.subr.bf16.mxu1 %v7401_v57  ;;  %v7465_v57 = vld [vmem:[#allocation5 + $0xa60] ss:$16 sps:$4 sm:$0xff]  }
  0xbf   :  { %4924 = vmatpush2.bf16.msra.mxu0 %v7396_v58  ;;  %v7470_v58 = vld [vmem:[#allocation5 + $0x844] ss:$16 sps:$4 sm:$0xff]  }
  0xc0   :  { %4967 = vmatpush2.bf16.msra.mxu1 %v7399_v59  ;;  %4925 = vmatprep.subr.bf16.mxu0 %v7404_v60  ;;  %v7473_v59 = vld [vmem:[#allocation5 + $0xa44] ss:$16 sps:$4 sm:$0xff]   ;;  %v7468_v60 = vld [vmem:[#allocation5 + $0x840] ss:$16 sps:$4 sm:$0xff]  }
  0xc1   :  { %4968 = vmatprep.subr.bf16.mxu1 %v7407_v61  ;;  %v7471_v61 = vld [vmem:[#allocation5 + $0xa40] ss:$16 sps:$4 sm:$0xff]  }
  0xc3   :  { %4926 = vmatpush2.bf16.msra.mxu0 %v7402_v62  ;;  %v7476_v62 = vld [vmem:[#allocation5 + $0x824] ss:$16 sps:$4 sm:$0xff]  }
  0xc4   :  { %4969 = vmatpush2.bf16.msra.mxu1 %v7405_v63  ;;  %4927 = vmatprep.subr.bf16.mxu0 %v7410_v0  ;;  %v7479_v63 = vld [vmem:[#allocation5 + $0xa24] ss:$16 sps:$4 sm:$0xff]   ;;  %v7474_v0 = vld [vmem:[#allocation5 + $0x820] ss:$16 sps:$4 sm:$0xff]  }
  0xc5   :  { %4970 = vmatprep.subr.bf16.mxu1 %v7413_v1  ;;  %v7477_v1 = vld [vmem:[#allocation5 + $0xa20] ss:$16 sps:$4 sm:$0xff]  }
  0xc7   :  { %4928 = vmatpush2.bf16.msra.mxu0 %v7408_v2  ;;  %v7482_v2 = vld [vmem:[#allocation5 + $0x804] ss:$16 sps:$4 sm:$0xff]  }
  0xc8   :  { %4971 = vmatpush2.bf16.msra.mxu1 %v7411_v3  ;;  %4929 = vmatprep.subr.bf16.mxu0 %v7416_v4  ;;  %v7485_v3 = vld [vmem:[#allocation5 + $0xa04] ss:$16 sps:$4 sm:$0xff]   ;;  %v7480_v4 = vld [vmem:[#allocation5 + $0x800] ss:$16 sps:$4 sm:$0xff]  }
  0xc9   :  { %4972 = vmatprep.subr.bf16.mxu1 %v7419_v5  ;;  %v7483_v5 = vld [vmem:[#allocation5 + $0xa00] ss:$16 sps:$4 sm:$0xff]  }
  0xcb   :  { %4930 = vmatpush2.bf16.msra.mxu0 %v7414_v6  ;;  %v7488_v6 = vld [vmem:[#allocation5 + $0x9e4] ss:$16 sps:$4 sm:$0xff]  }
  0xcc   :  { %4973 = vmatpush2.bf16.msra.mxu1 %v7417_v7  ;;  %4931 = vmatprep.subr.bf16.mxu0 %v7422_v8  ;;  %v7491_v7 = vld [vmem:[#allocation5 + $0xbe4] ss:$16 sps:$4 sm:$0xff]   ;;  %v7486_v8 = vld [vmem:[#allocation5 + $0x9e0] ss:$16 sps:$4 sm:$0xff]  }
  0xcd   :  { %4974 = vmatprep.subr.bf16.mxu1 %v7425_v9  ;;  %v7489_v9 = vld [vmem:[#allocation5 + $0xbe0] ss:$16 sps:$4 sm:$0xff]  }
  0xcf   :  { %4932 = vmatpush2.bf16.msra.mxu0 %v7420_v10  ;;  %v7494_v10 = vld [vmem:[#allocation5 + $0x9c4] ss:$16 sps:$4 sm:$0xff]  }
  0xd0   :  { %4975 = vmatpush2.bf16.msra.mxu1 %v7423_v11  ;;  %4933 = vmatprep.subr.bf16.mxu0 %v7428_v14  ;;  %v7497_v11 = vld [vmem:[#allocation5 + $0xbc4] ss:$16 sps:$4 sm:$0xff]   ;;  %v7492_v14 = vld [vmem:[#allocation5 + $0x9c0] ss:$16 sps:$4 sm:$0xff]  }
  0xd1   :  { %4976 = vmatprep.subr.bf16.mxu1 %v7431_v15  ;;  %v7495_v15 = vld [vmem:[#allocation5 + $0xbc0] ss:$16 sps:$4 sm:$0xff]  }
  0xd3   :  { %4934 = vmatpush2.bf16.msra.mxu0 %v7426_v16  ;;  %v7500_v16 = vld [vmem:[#allocation5 + $0x9a4] ss:$16 sps:$4 sm:$0xff]  }
  0xd4   :  { %4977 = vmatpush2.bf16.msra.mxu1 %v7429_v17  ;;  %4935 = vmatprep.subr.bf16.mxu0 %v7434_v18  ;;  %v7503_v17 = vld [vmem:[#allocation5 + $0xba4] ss:$16 sps:$4 sm:$0xff]   ;;  %v7498_v18 = vld [vmem:[#allocation5 + $0x9a0] ss:$16 sps:$4 sm:$0xff]  }
  0xd5   :  { %4978 = vmatprep.subr.bf16.mxu1 %v7437_v19  ;;  %v7501_v19 = vld [vmem:[#allocation5 + $0xba0] ss:$16 sps:$4 sm:$0xff]  }
  0xd7   :  { %4936 = vmatpush2.bf16.msra.mxu0 %v7432_v20  ;;  %v7506_v20 = vld [vmem:[#allocation5 + $0x984] ss:$16 sps:$4 sm:$0xff]  }
  0xd8   :  { %4979 = vmatpush2.bf16.msra.mxu1 %v7435_v21  ;;  %4991 = vmatprep.subr.bf16.mxu0 %v7440_v26  ;;  %v7509_v21 = vld [vmem:[#allocation5 + $0xb84] ss:$16 sps:$4 sm:$0xff]   ;;  %v7510_v26 = vld [vmem:[#allocation5 + $0x960] ss:$16 sps:$4 sm:$0xff]  }
  0xd9   :  { %5034 = vmatprep.subr.bf16.mxu1 %v7443_v27  ;;  %v7513_v27 = vld [vmem:[#allocation5 + $0xb60] ss:$16 sps:$4 sm:$0xff]  }
  0xda   :  { %4938 = vmatmul.mubr.bf16.vlgmr.msra.gmra.mxu0 %v8705_v28 }
  0xdb   :  { %4981 = vmatmul.mubr.bf16.vlgmr.msra.gmra.mxu1 %v8707_v29  ;;  %4992 = vmatpush1.bf16.msra.mxu0 %v7438_v30  ;;  %v7518_v30 = vld [vmem:[#allocation5 + $0x944] ss:$16 sps:$4 sm:$0xff]  }
  0xdc   :  { %5035 = vmatpush1.bf16.msra.mxu1 %v7441_v31  ;;  %4993 = vmatprep.subr.bf16.mxu0 %v7446_v32  ;;  %v7521_v31 = vld [vmem:[#allocation5 + $0xb44] ss:$16 sps:$4 sm:$0xff]   ;;  %v7516_v32 = vld [vmem:[#allocation5 + $0x940] ss:$16 sps:$4 sm:$0xff]  }
  0xdd   :  { %5036 = vmatprep.subr.bf16.mxu1 %v7449_v33  ;;  %5023 = vmatprep.mubr.bf16.mxu0 %v8711_v40  ;;  %v7519_v33 = vld [vmem:[#allocation5 + $0xb40] ss:$16 sps:$4 sm:$0xff]  }
  0xde   :  { %5066 = vmatprep.mubr.bf16.mxu1 %v8713_v46 }
  0xdf   :  { %4994 = vmatpush1.bf16.msra.mxu0 %v7444_v34  ;;  %v7524_v34 = vld [vmem:[#allocation5 + $0x924] ss:$16 sps:$4 sm:$0xff]  }
  0xe0   :  { %5037 = vmatpush1.bf16.msra.mxu1 %v7447_v35  ;;  %4995 = vmatprep.subr.bf16.mxu0 %v7452_v36  ;;  %v7527_v35 = vld [vmem:[#allocation5 + $0xb24] ss:$16 sps:$4 sm:$0xff]   ;;  %v7522_v36 = vld [vmem:[#allocation5 + $0x920] ss:$16 sps:$4 sm:$0xff]  }
  0xe1   :  { %5038 = vmatprep.subr.bf16.mxu1 %v7455_v37  ;;  %v7525_v37 = vld [vmem:[#allocation5 + $0xb20] ss:$16 sps:$4 sm:$0xff]  }
  0xe3   :  { %4996 = vmatpush1.bf16.msra.mxu0 %v7450_v43  ;;  %v125_v43 = vld [vmem:[#allocation2 + $0x40] sm:$0xff] }
  0xe4   :  { %5039 = vmatpush1.bf16.msra.mxu1 %v7453_v44  ;;  %4997 = vmatprep.subr.bf16.mxu0 %v7458_v48  ;;  %v149_v44 = vld [vmem:[#allocation2 + $0x100] sm:$0xff]  ;;  %v127_v48 = vld [vmem:[#allocation2 + $0x50] sm:$0xff] }
  0xe5   :  { %5040 = vmatprep.subr.bf16.mxu1 %v7461_v49  ;;  %v151_v49 = vld [vmem:[#allocation2 + $0x110] sm:$0xff] }
  0xe7   :  { %4998 = vmatpush1.bf16.msra.mxu0 %v7456_v50  ;;  %v7536_v50 = vld [vmem:[#allocation5 + $0xce4] ss:$16 sps:$4 sm:$0xff]  }
  0xe8   :  { %5041 = vmatpush1.bf16.msra.mxu1 %v7459_v51  ;;  %4999 = vmatprep.subr.bf16.mxu0 %v7464_v52  ;;  %v7539_v51 = vld [vmem:[#allocation5 + $0xee4] ss:$16 sps:$4 sm:$0xff]   ;;  %v130_v52 = vld [vmem:[#allocation2 + $0x68] sm:$0xff] }
  0xe9   :  { %5042 = vmatprep.subr.bf16.mxu1 %v7467_v55  ;;  %v7534_v55 = vld [vmem:[#allocation5 + $0xce0] ss:$16 sps:$4 sm:$0xff]  }
  0xeb   :  { %5000 = vmatpush1.bf16.msra.mxu0 %v7462_v56  ;;  %v154_v56 = vld [vmem:[#allocation2 + $0x128] sm:$0xff] }
  0xec   :  { %5043 = vmatpush1.bf16.msra.mxu1 %v7465_v57  ;;  %5001 = vmatprep.subr.bf16.mxu0 %v7470_v58  ;;  %v132_v57 = vld [vmem:[#allocation2 + $0x78] sm:$0xff]  ;;  %v8717_v58 = vpack.c.bf16 %v149_v44, %v125_v43  ;;  %v7594_v43 = vld [vmem:[#allocation5 + $0xda0] ss:$16 sps:$4 sm:$0xff]  }
  0xed   :  { %5044 = vmatprep.subr.bf16.mxu1 %v7473_v59  ;;  %v8719_v59 = vpack.c.bf16 %v151_v49, %v127_v48  ;;  %v7597_v44 = vld [vmem:[#allocation5 + $0xfa0] ss:$16 sps:$4 sm:$0xff]   ;;  %v7602_v48 = vld [vmem:[#allocation5 + $0xd84] ss:$16 sps:$4 sm:$0xff]  }
  0xee   :  { %v7605_v49 = vld [vmem:[#allocation5 + $0xf84] ss:$16 sps:$4 sm:$0xff]  }
  0xef   :  { %5002 = vmatpush1.bf16.msra.mxu0 %v7468_v60  ;;  %v156_v60 = vld [vmem:[#allocation2 + $0x138] sm:$0xff] }
  0xf0   :  { %5045 = vmatpush1.bf16.msra.mxu1 %v7471_v61  ;;  %5003 = vmatprep.subr.bf16.mxu0 %v7476_v62  ;;  %v7537_v61 = vld [vmem:[#allocation5 + $0xee0] ss:$16 sps:$4 sm:$0xff]   ;;  %v7542_v62 = vld [vmem:[#allocation5 + $0xcc4] ss:$16 sps:$4 sm:$0xff]  }
  0xf1   :  { %5046 = vmatprep.subr.bf16.mxu1 %v7479_v63  ;;  %v7545_v63 = vld [vmem:[#allocation5 + $0xec4] ss:$16 sps:$4 sm:$0xff]  }
  0xf3   :  { %5004 = vmatpush1.bf16.msra.mxu0 %v7474_v0  ;;  %v8721_v0 = vpack.c.bf16 %v154_v56, %v130_v52  ;;  %v7608_v52 = vld [vmem:[#allocation5 + $0xd64] ss:$16 sps:$4 sm:$0xff]   ;;  %v7606_v56 = vld [vmem:[#allocation5 + $0xd60] ss:$16 sps:$4 sm:$0xff]  }
  0xf4   :  { %5047 = vmatpush1.bf16.msra.mxu1 %v7477_v1  ;;  %5005 = vmatprep.subr.bf16.mxu0 %v7482_v2  ;;  %v8723_v1 = vpack.c.bf16 %v156_v60, %v132_v57  ;;  %v7540_v2 = vld [vmem:[#allocation5 + $0xcc0] ss:$16 sps:$4 sm:$0xff]   ;;  %v7614_v60 = vld [vmem:[#allocation5 + $0xd44] ss:$16 sps:$4 sm:$0xff]  }
  0xf5   :  { %5048 = vmatprep.subr.bf16.mxu1 %v7485_v3  ;;  %v7543_v3 = vld [vmem:[#allocation5 + $0xec0] ss:$16 sps:$4 sm:$0xff]  }
  0xf6   :  { %v7609_v57 = vld [vmem:[#allocation5 + $0xf60] ss:$16 sps:$4 sm:$0xff]  }
  0xf7   :  { %5006 = vmatpush1.bf16.msra.mxu0 %v7480_v4  ;;  %v7548_v4 = vld [vmem:[#allocation5 + $0xca4] ss:$16 sps:$4 sm:$0xff]  }
  0xf8   :  { %5049 = vmatpush1.bf16.msra.mxu1 %v7483_v5  ;;  %5007 = vmatprep.subr.bf16.mxu0 %v7488_v6  ;;  %v7551_v5 = vld [vmem:[#allocation5 + $0xea4] ss:$16 sps:$4 sm:$0xff]   ;;  %v7546_v6 = vld [vmem:[#allocation5 + $0xca0] ss:$16 sps:$4 sm:$0xff]  }
  0xf9   :  { %5050 = vmatprep.subr.bf16.mxu1 %v7491_v7  ;;  %v7549_v7 = vld [vmem:[#allocation5 + $0xea0] ss:$16 sps:$4 sm:$0xff]  }
  0xfb   :  { %5008 = vmatpush2.bf16.msra.mxu0 %v7486_v8  ;;  %v7554_v8 = vld [vmem:[#allocation5 + $0xc84] ss:$16 sps:$4 sm:$0xff]  }
  0xfc   :  { %5051 = vmatpush2.bf16.msra.mxu1 %v7489_v9  ;;  %5009 = vmatprep.subr.bf16.mxu0 %v7494_v10  ;;  %v7557_v9 = vld [vmem:[#allocation5 + $0xe84] ss:$16 sps:$4 sm:$0xff]   ;;  %v7552_v10 = vld [vmem:[#allocation5 + $0xc80] ss:$16 sps:$4 sm:$0xff]  }
  0xfd   :  { %5052 = vmatprep.subr.bf16.mxu1 %v7497_v11  ;;  %v7555_v11 = vld [vmem:[#allocation5 + $0xe80] ss:$16 sps:$4 sm:$0xff]  }
  0xff   :  { %5010 = vmatpush2.bf16.msra.mxu0 %v7492_v14  ;;  %v7560_v14 = vld [vmem:[#allocation5 + $0xc64] ss:$16 sps:$4 sm:$0xff]  }
 0x100   :  { %5053 = vmatpush2.bf16.msra.mxu1 %v7495_v15  ;;  %5011 = vmatprep.subr.bf16.mxu0 %v7500_v16  ;;  %v7563_v15 = vld [vmem:[#allocation5 + $0xe64] ss:$16 sps:$4 sm:$0xff]   ;;  %v7558_v16 = vld [vmem:[#allocation5 + $0xc60] ss:$16 sps:$4 sm:$0xff]  }
 0x101   :  { %5054 = vmatprep.subr.bf16.mxu1 %v7503_v17  ;;  %v7561_v17 = vld [vmem:[#allocation5 + $0xe60] ss:$16 sps:$4 sm:$0xff]  }
 0x103   :  { %5012 = vmatpush2.bf16.msra.mxu0 %v7498_v18  ;;  %v7566_v18 = vld [vmem:[#allocation5 + $0xc44] ss:$16 sps:$4 sm:$0xff]  }
 0x104   :  { %5055 = vmatpush2.bf16.msra.mxu1 %v7501_v19  ;;  %5013 = vmatprep.subr.bf16.mxu0 %v7506_v20  ;;  %v7569_v19 = vld [vmem:[#allocation5 + $0xe44] ss:$16 sps:$4 sm:$0xff]   ;;  %v7564_v20 = vld [vmem:[#allocation5 + $0xc40] ss:$16 sps:$4 sm:$0xff]  }
 0x105   :  { %5056 = vmatprep.subr.bf16.mxu1 %v7509_v21  ;;  %v7567_v21 = vld [vmem:[#allocation5 + $0xe40] ss:$16 sps:$4 sm:$0xff]  }
 0x107   :  { %5014 = vmatpush2.bf16.msra.mxu0 %v7504_v22  ;;  %v7572_v22 = vld [vmem:[#allocation5 + $0xc24] ss:$16 sps:$4 sm:$0xff]  }
 0x108   :  { %5057 = vmatpush2.bf16.msra.mxu1 %v7507_v23  ;;  %5015 = vmatprep.subr.bf16.mxu0 %v7512_v24  ;;  %v7575_v23 = vld [vmem:[#allocation5 + $0xe24] ss:$16 sps:$4 sm:$0xff]   ;;  %v7570_v24 = vld [vmem:[#allocation5 + $0xc20] ss:$16 sps:$4 sm:$0xff]  }
 0x109   :  { %5058 = vmatprep.subr.bf16.mxu1 %v7515_v25  ;;  %v7573_v25 = vld [vmem:[#allocation5 + $0xe20] ss:$16 sps:$4 sm:$0xff]  }
 0x10b   :  { %5016 = vmatpush2.bf16.msra.mxu0 %v7510_v26  ;;  %v7578_v26 = vld [vmem:[#allocation5 + $0xc04] ss:$16 sps:$4 sm:$0xff]  }
 0x10c   :  { %5059 = vmatpush2.bf16.msra.mxu1 %v7513_v27  ;;  %5017 = vmatprep.subr.bf16.mxu0 %v7518_v30  ;;  %v7581_v27 = vld [vmem:[#allocation5 + $0xe04] ss:$16 sps:$4 sm:$0xff]   ;;  %v7576_v30 = vld [vmem:[#allocation5 + $0xc00] ss:$16 sps:$4 sm:$0xff]  }
 0x10d   :  { %5060 = vmatprep.subr.bf16.mxu1 %v7521_v31  ;;  %v7579_v31 = vld [vmem:[#allocation5 + $0xe00] ss:$16 sps:$4 sm:$0xff]  }
 0x10f   :  { %5018 = vmatpush2.bf16.msra.mxu0 %v7516_v32  ;;  %v7584_v32 = vld [vmem:[#allocation5 + $0xde4] ss:$16 sps:$4 sm:$0xff]  }
 0x110   :  { %5061 = vmatpush2.bf16.msra.mxu1 %v7519_v33  ;;  %5019 = vmatprep.subr.bf16.mxu0 %v7524_v34  ;;  %v7587_v33 = vld [vmem:[#allocation5 + $0xfe4] ss:$16 sps:$4 sm:$0xff]   ;;  %v7582_v34 = vld [vmem:[#allocation5 + $0xde0] ss:$16 sps:$4 sm:$0xff]  }
 0x111   :  { %5062 = vmatprep.subr.bf16.mxu1 %v7527_v35  ;;  %v7585_v35 = vld [vmem:[#allocation5 + $0xfe0] ss:$16 sps:$4 sm:$0xff]  }
 0x113   :  { %5020 = vmatpush2.bf16.msra.mxu0 %v7522_v36  ;;  %v7590_v36 = vld [vmem:[#allocation5 + $0xdc4] ss:$16 sps:$4 sm:$0xff]  }
 0x114   :  { %5063 = vmatpush2.bf16.msra.mxu1 %v7525_v37  ;;  %5021 = vmatprep.subr.bf16.mxu0 %v7530_v38  ;;  %v7593_v37 = vld [vmem:[#allocation5 + $0xfc4] ss:$16 sps:$4 sm:$0xff]   ;;  %v7588_v38 = vld [vmem:[#allocation5 + $0xdc0] ss:$16 sps:$4 sm:$0xff]  }
 0x115   :  { %5064 = vmatprep.subr.bf16.mxu1 %v7533_v39  ;;  %v7591_v39 = vld [vmem:[#allocation5 + $0xfc0] ss:$16 sps:$4 sm:$0xff]  }
 0x117   :  { %5022 = vmatpush2.bf16.msra.mxu0 %v7528_v41  ;;  %v7596_v41 = vld [vmem:[#allocation5 + $0xda4] ss:$16 sps:$4 sm:$0xff]  }
 0x118   :  { %5065 = vmatpush2.bf16.msra.mxu1 %v7531_v42  ;;  %5077 = vmatprep.subr.bf16.mxu0 %v7536_v50  ;;  %v7599_v42 = vld [vmem:[#allocation5 + $0xfa4] ss:$16 sps:$4 sm:$0xff]   ;;  %v7600_v50 = vld [vmem:[#allocation5 + $0xd80] ss:$16 sps:$4 sm:$0xff]  }
 0x119   :  { %5120 = vmatprep.subr.bf16.mxu1 %v7539_v51  ;;  %v7603_v51 = vld [vmem:[#allocation5 + $0xf80] ss:$16 sps:$4 sm:$0xff]  }
 0x11a   :  { %5024 = vmatmul.mubr.bf16.vlgmr.msra.gmra.mxu0 %v8717_v58 }
 0x11b   :  { %5067 = vmatmul.mubr.bf16.vlgmr.msra.gmra.mxu1 %v8719_v59  ;;  %5078 = vmatpush1.bf16.msra.mxu0 %v7534_v55  ;;  %v7611_v55 = vld [vmem:[#allocation5 + $0xf64] ss:$16 sps:$4 sm:$0xff]  }
 0x11c   :  { %5121 = vmatpush1.bf16.msra.mxu1 %v7537_v61  ;;  %5079 = vmatprep.subr.bf16.mxu0 %v7542_v62  ;;  %v7617_v61 = vld [vmem:[#allocation5 + $0xf44] ss:$16 sps:$4 sm:$0xff]   ;;  %v7612_v62 = vld [vmem:[#allocation5 + $0xd40] ss:$16 sps:$4 sm:$0xff]  }
 0x11d   :  { %5122 = vmatprep.subr.bf16.mxu1 %v7545_v63  ;;  %5109 = vmatprep.mubr.bf16.mxu0 %v8721_v0  ;;  %v7615_v63 = vld [vmem:[#allocation5 + $0xf40] ss:$16 sps:$4 sm:$0xff]  }
 0x11e   :  { %5152 = vmatprep.mubr.bf16.mxu1 %v8723_v1 }
 0x11f   :  { %5080 = vmatpush1.bf16.msra.mxu0 %v7540_v2  ;;  %v7620_v2 = vld [vmem:[#allocation5 + $0xd24] ss:$16 sps:$4 sm:$0xff]  }
 0x120   :  { %5123 = vmatpush1.bf16.msra.mxu1 %v7543_v3  ;;  %5081 = vmatprep.subr.bf16.mxu0 %v7548_v4  ;;  %v7623_v3 = vld [vmem:[#allocation5 + $0xf24] ss:$16 sps:$4 sm:$0xff]   ;;  %v7618_v4 = vld [vmem:[#allocation5 + $0xd20] ss:$16 sps:$4 sm:$0xff]  }
 0x121   :  { %5124 = vmatprep.subr.bf16.mxu1 %v7551_v5  ;;  %v7621_v5 = vld [vmem:[#allocation5 + $0xf20] ss:$16 sps:$4 sm:$0xff]  }
 0x123   :  { %5082 = vmatpush1.bf16.msra.mxu0 %v7546_v6  ;;  %v7626_v6 = vld [vmem:[#allocation5 + $0xd04] ss:$16 sps:$4 sm:$0xff]  }
 0x124   :  { %5125 = vmatpush1.bf16.msra.mxu1 %v7549_v7  ;;  %5083 = vmatprep.subr.bf16.mxu0 %v7554_v8  ;;  %v7629_v7 = vld [vmem:[#allocation5 + $0xf04] ss:$16 sps:$4 sm:$0xff]   ;;  %v7624_v8 = vld [vmem:[#allocation5 + $0xd00] ss:$16 sps:$4 sm:$0xff]  }
 0x125   :  { %5126 = vmatprep.subr.bf16.mxu1 %v7557_v9  ;;  %v7627_v9 = vld [vmem:[#allocation5 + $0xf00] ss:$16 sps:$4 sm:$0xff]  }
 0x127   :  { %5084 = vmatpush1.bf16.msra.mxu0 %v7552_v10  ;;  %v129_v10 = vld [vmem:[#allocation2 + $0x60] sm:$0xff] }
 0x128   :  { %5127 = vmatpush1.bf16.msra.mxu1 %v7555_v11  ;;  %5085 = vmatprep.subr.bf16.mxu0 %v7560_v14  ;;  %v153_v11 = vld [vmem:[#allocation2 + $0x120] sm:$0xff]  ;;  %v131_v14 = vld [vmem:[#allocation2 + $0x70] sm:$0xff] }
 0x129   :  { %5128 = vmatprep.subr.bf16.mxu1 %v7563_v15  ;;  %v155_v15 = vld [vmem:[#allocation2 + $0x130] sm:$0xff] }
 0x12b   :  { %5086 = vmatpush1.bf16.msra.mxu0 %v7558_v16  ;;  %v7632_v16 = vld [vmem:[#allocation5 + $0x10e4] ss:$16 sps:$4 sm:$0xff]  }
 0x12c   :  { %5129 = vmatpush1.bf16.msra.mxu1 %v7561_v17  ;;  %5087 = vmatprep.subr.bf16.mxu0 %v7566_v18  ;;  %v7635_v17 = vld [vmem:[#allocation5 + $0x12e4] ss:$16 sps:$4 sm:$0xff]   ;;  %v134_v18 = vld [vmem:[#allocation2 + $0x88] sm:$0xff] }
 0x12d   :  { %5130 = vmatprep.subr.bf16.mxu1 %v7569_v19  ;;  %v7630_v19 = vld [vmem:[#allocation5 + $0x10e0] ss:$16 sps:$4 sm:$0xff]  }
 0x12f   :  { %5088 = vmatpush1.bf16.msra.mxu0 %v7564_v20  ;;  %v158_v20 = vld [vmem:[#allocation2 + $0x148] sm:$0xff] }
 0x130   :  { %5131 = vmatpush1.bf16.msra.mxu1 %v7567_v21  ;;  %5089 = vmatprep.subr.bf16.mxu0 %v7572_v22  ;;  %v136_v21 = vld [vmem:[#allocation2 + $0x98] sm:$0xff]  ;;  %v8729_v22 = vpack.c.bf16 %v153_v11, %v129_v10  ;;  %v7684_v10 = vld [vmem:[#allocation5 + $0x11c0] ss:$16 sps:$4 sm:$0xff]  }
 0x131   :  { %5132 = vmatprep.subr.bf16.mxu1 %v7575_v23  ;;  %v8731_v23 = vpack.c.bf16 %v155_v15, %v131_v14  ;;  %v7687_v11 = vld [vmem:[#allocation5 + $0x13c0] ss:$16 sps:$4 sm:$0xff]   ;;  %v7692_v14 = vld [vmem:[#allocation5 + $0x11a4] ss:$16 sps:$4 sm:$0xff]  }
 0x132   :  { %v7695_v15 = vld [vmem:[#allocation5 + $0x13a4] ss:$16 sps:$4 sm:$0xff]  }
 0x133   :  { %5090 = vmatpush1.bf16.msra.mxu0 %v7570_v24  ;;  %v160_v24 = vld [vmem:[#allocation2 + $0x158] sm:$0xff] }
 0x134   :  { %5133 = vmatpush1.bf16.msra.mxu1 %v7573_v25  ;;  %5091 = vmatprep.subr.bf16.mxu0 %v7578_v26  ;;  %v7633_v25 = vld [vmem:[#allocation5 + $0x12e0] ss:$16 sps:$4 sm:$0xff]   ;;  %v7638_v26 = vld [vmem:[#allocation5 + $0x10c4] ss:$16 sps:$4 sm:$0xff]  }
 0x135   :  { %5134 = vmatprep.subr.bf16.mxu1 %v7581_v27  ;;  %v7641_v27 = vld [vmem:[#allocation5 + $0x12c4] ss:$16 sps:$4 sm:$0xff]  }
 0x137   :  { %5092 = vmatpush1.bf16.msra.mxu0 %v7576_v30  ;;  %v8733_v30 = vpack.c.bf16 %v158_v20, %v134_v18  ;;  %v7698_v18 = vld [vmem:[#allocation5 + $0x1184] ss:$16 sps:$4 sm:$0xff]   ;;  %v7696_v20 = vld [vmem:[#allocation5 + $0x1180] ss:$16 sps:$4 sm:$0xff]  }
 0x138   :  { %5135 = vmatpush1.bf16.msra.mxu1 %v7579_v31  ;;  %5093 = vmatprep.subr.bf16.mxu0 %v7584_v32  ;;  %v8735_v31 = vpack.c.bf16 %v160_v24, %v136_v21  ;;  %v7636_v32 = vld [vmem:[#allocation5 + $0x10c0] ss:$16 sps:$4 sm:$0xff]   ;;  %v7704_v24 = vld [vmem:[#allocation5 + $0x1164] ss:$16 sps:$4 sm:$0xff]  }
 0x139   :  { %5136 = vmatprep.subr.bf16.mxu1 %v7587_v33  ;;  %v7639_v33 = vld [vmem:[#allocation5 + $0x12c0] ss:$16 sps:$4 sm:$0xff]  }
 0x13a   :  { %v7699_v21 = vld [vmem:[#allocation5 + $0x1380] ss:$16 sps:$4 sm:$0xff]  }
 0x13b   :  { %5094 = vmatpush2.bf16.msra.mxu0 %v7582_v34  ;;  %v7644_v34 = vld [vmem:[#allocation5 + $0x10a4] ss:$16 sps:$4 sm:$0xff]  }
 0x13c   :  { %5137 = vmatpush2.bf16.msra.mxu1 %v7585_v35  ;;  %5095 = vmatprep.subr.bf16.mxu0 %v7590_v36  ;;  %v7647_v35 = vld [vmem:[#allocation5 + $0x12a4] ss:$16 sps:$4 sm:$0xff]   ;;  %v7642_v36 = vld [vmem:[#allocation5 + $0x10a0] ss:$16 sps:$4 sm:$0xff]  }
 0x13d   :  { %5138 = vmatprep.subr.bf16.mxu1 %v7593_v37  ;;  %v7645_v37 = vld [vmem:[#allocation5 + $0x12a0] ss:$16 sps:$4 sm:$0xff]  }
 0x13f   :  { %5096 = vmatpush2.bf16.msra.mxu0 %v7588_v38  ;;  %v7650_v38 = vld [vmem:[#allocation5 + $0x1084] ss:$16 sps:$4 sm:$0xff]  }
 0x140   :  { %5139 = vmatpush2.bf16.msra.mxu1 %v7591_v39  ;;  %5097 = vmatprep.subr.bf16.mxu0 %v7596_v41  ;;  %v7653_v39 = vld [vmem:[#allocation5 + $0x1284] ss:$16 sps:$4 sm:$0xff]   ;;  %v7648_v41 = vld [vmem:[#allocation5 + $0x1080] ss:$16 sps:$4 sm:$0xff]  }
 0x141   :  { %5140 = vmatprep.subr.bf16.mxu1 %v7599_v42  ;;  %v7651_v42 = vld [vmem:[#allocation5 + $0x1280] ss:$16 sps:$4 sm:$0xff]  }
 0x143   :  { %5098 = vmatpush2.bf16.msra.mxu0 %v7594_v43  ;;  %v7656_v43 = vld [vmem:[#allocation5 + $0x1064] ss:$16 sps:$4 sm:$0xff]  }
 0x144   :  { %5141 = vmatpush2.bf16.msra.mxu1 %v7597_v44  ;;  %5099 = vmatprep.subr.bf16.mxu0 %v7602_v48  ;;  %v7659_v44 = vld [vmem:[#allocation5 + $0x1264] ss:$16 sps:$4 sm:$0xff]   ;;  %v7654_v48 = vld [vmem:[#allocation5 + $0x1060] ss:$16 sps:$4 sm:$0xff]  }
 0x145   :  { %5142 = vmatprep.subr.bf16.mxu1 %v7605_v49  ;;  %v7657_v49 = vld [vmem:[#allocation5 + $0x1260] ss:$16 sps:$4 sm:$0xff]  }
 0x147   :  { %5100 = vmatpush2.bf16.msra.mxu0 %v7600_v50  ;;  %v7662_v50 = vld [vmem:[#allocation5 + $0x1044] ss:$16 sps:$4 sm:$0xff]  }
 0x148   :  { %5143 = vmatpush2.bf16.msra.mxu1 %v7603_v51  ;;  %5101 = vmatprep.subr.bf16.mxu0 %v7608_v52  ;;  %v7665_v51 = vld [vmem:[#allocation5 + $0x1244] ss:$16 sps:$4 sm:$0xff]   ;;  %v7660_v52 = vld [vmem:[#allocation5 + $0x1040] ss:$16 sps:$4 sm:$0xff]  }
 0x149   :  { %5144 = vmatprep.subr.bf16.mxu1 %v7611_v55  ;;  %v7663_v55 = vld [vmem:[#allocation5 + $0x1240] ss:$16 sps:$4 sm:$0xff]  }
 0x14b   :  { %5102 = vmatpush2.bf16.msra.mxu0 %v7606_v56  ;;  %v7668_v56 = vld [vmem:[#allocation5 + $0x1024] ss:$16 sps:$4 sm:$0xff]  }
 0x14c   :  { %5145 = vmatpush2.bf16.msra.mxu1 %v7609_v57  ;;  %5103 = vmatprep.subr.bf16.mxu0 %v7614_v60  ;;  %v7671_v57 = vld [vmem:[#allocation5 + $0x1224] ss:$16 sps:$4 sm:$0xff]   ;;  %v7666_v60 = vld [vmem:[#allocation5 + $0x1020] ss:$16 sps:$4 sm:$0xff]  }
 0x14d   :  { %5146 = vmatprep.subr.bf16.mxu1 %v7617_v61  ;;  %v7669_v61 = vld [vmem:[#allocation5 + $0x1220] ss:$16 sps:$4 sm:$0xff]  }
 0x14f   :  { %5104 = vmatpush2.bf16.msra.mxu0 %v7612_v62  ;;  %v7674_v62 = vld [vmem:[#allocation5 + $0x1004] ss:$16 sps:$4 sm:$0xff]  }
 0x150   :  { %5147 = vmatpush2.bf16.msra.mxu1 %v7615_v63  ;;  %5105 = vmatprep.subr.bf16.mxu0 %v7620_v2  ;;  %v7677_v63 = vld [vmem:[#allocation5 + $0x1204] ss:$16 sps:$4 sm:$0xff]   ;;  %v7672_v2 = vld [vmem:[#allocation5 + $0x1000] ss:$16 sps:$4 sm:$0xff]  }
 0x151   :  { %5148 = vmatprep.subr.bf16.mxu1 %v7623_v3  ;;  %v7675_v3 = vld [vmem:[#allocation5 + $0x1200] ss:$16 sps:$4 sm:$0xff]  }
 0x153   :  { %5106 = vmatpush2.bf16.msra.mxu0 %v7618_v4  ;;  %v7680_v4 = vld [vmem:[#allocation5 + $0x11e4] ss:$16 sps:$4 sm:$0xff]  }
 0x154   :  { %5149 = vmatpush2.bf16.msra.mxu1 %v7621_v5  ;;  %5107 = vmatprep.subr.bf16.mxu0 %v7626_v6  ;;  %v7683_v5 = vld [vmem:[#allocation5 + $0x13e4] ss:$16 sps:$4 sm:$0xff]   ;;  %v7678_v6 = vld [vmem:[#allocation5 + $0x11e0] ss:$16 sps:$4 sm:$0xff]  }
 0x155   :  { %5150 = vmatprep.subr.bf16.mxu1 %v7629_v7  ;;  %v7681_v7 = vld [vmem:[#allocation5 + $0x13e0] ss:$16 sps:$4 sm:$0xff]  }
 0x157   :  { %5108 = vmatpush2.bf16.msra.mxu0 %v7624_v8  ;;  %v7686_v8 = vld [vmem:[#allocation5 + $0x11c4] ss:$16 sps:$4 sm:$0xff]  }
 0x158   :  { %5151 = vmatpush2.bf16.msra.mxu1 %v7627_v9  ;;  %5163 = vmatprep.subr.bf16.mxu0 %v7632_v16  ;;  %v7689_v9 = vld [vmem:[#allocation5 + $0x13c4] ss:$16 sps:$4 sm:$0xff]   ;;  %v7690_v16 = vld [vmem:[#allocation5 + $0x11a0] ss:$16 sps:$4 sm:$0xff]  }
 0x159   :  { %5206 = vmatprep.subr.bf16.mxu1 %v7635_v17  ;;  %v7693_v17 = vld [vmem:[#allocation5 + $0x13a0] ss:$16 sps:$4 sm:$0xff]  }
 0x15a   :  { %5110 = vmatmul.mubr.bf16.vlgmr.msra.gmra.mxu0 %v8729_v22 }
 0x15b   :  { %5153 = vmatmul.mubr.bf16.vlgmr.msra.gmra.mxu1 %v8731_v23  ;;  %5164 = vmatpush1.bf16.msra.mxu0 %v7630_v19  ;;  %v7701_v19 = vld [vmem:[#allocation5 + $0x1384] ss:$16 sps:$4 sm:$0xff]  }
 0x15c   :  { %5207 = vmatpush1.bf16.msra.mxu1 %v7633_v25  ;;  %5165 = vmatprep.subr.bf16.mxu0 %v7638_v26  ;;  %v7707_v25 = vld [vmem:[#allocation5 + $0x1364] ss:$16 sps:$4 sm:$0xff]   ;;  %v7702_v26 = vld [vmem:[#allocation5 + $0x1160] ss:$16 sps:$4 sm:$0xff]  }
 0x15d   :  { %5208 = vmatprep.subr.bf16.mxu1 %v7641_v27  ;;  %5195 = vmatprep.mubr.bf16.mxu0 %v8733_v30  ;;  %v7705_v27 = vld [vmem:[#allocation5 + $0x1360] ss:$16 sps:$4 sm:$0xff]  }
 0x15e   :  { %5238 = vmatprep.mubr.bf16.mxu1 %v8735_v31 }
 0x15f   :  { %5166 = vmatpush1.bf16.msra.mxu0 %v7636_v32  ;;  %v7710_v32 = vld [vmem:[#allocation5 + $0x1144] ss:$16 sps:$4 sm:$0xff]  }
 0x160   :  { %5209 = vmatpush1.bf16.msra.mxu1 %v7639_v33  ;;  %5167 = vmatprep.subr.bf16.mxu0 %v7644_v34  ;;  %v7713_v33 = vld [vmem:[#allocation5 + $0x1344] ss:$16 sps:$4 sm:$0xff]   ;;  %v7708_v34 = vld [vmem:[#allocation5 + $0x1140] ss:$16 sps:$4 sm:$0xff]  }
 0x161   :  { %5210 = vmatprep.subr.bf16.mxu1 %v7647_v35  ;;  %v7711_v35 = vld [vmem:[#allocation5 + $0x1340] ss:$16 sps:$4 sm:$0xff]  }
 0x163   :  { %5168 = vmatpush1.bf16.msra.mxu0 %v7642_v36  ;;  %v7716_v36 = vld [vmem:[#allocation5 + $0x1124] ss:$16 sps:$4 sm:$0xff]  }
 0x164   :  { %5211 = vmatpush1.bf16.msra.mxu1 %v7645_v37  ;;  %5169 = vmatprep.subr.bf16.mxu0 %v7650_v38  ;;  %v7719_v37 = vld [vmem:[#allocation5 + $0x1324] ss:$16 sps:$4 sm:$0xff]   ;;  %v7714_v38 = vld [vmem:[#allocation5 + $0x1120] ss:$16 sps:$4 sm:$0xff]  }
 0x165   :  { %5212 = vmatprep.subr.bf16.mxu1 %v7653_v39  ;;  %v7717_v39 = vld [vmem:[#allocation5 + $0x1320] ss:$16 sps:$4 sm:$0xff]  }
 0x167   :  { %5170 = vmatpush1.bf16.msra.mxu0 %v7648_v41  ;;  %v7722_v41 = vld [vmem:[#allocation5 + $0x1104] ss:$16 sps:$4 sm:$0xff]  }
 0x168   :  { %5213 = vmatpush1.bf16.msra.mxu1 %v7651_v42  ;;  %5171 = vmatprep.subr.bf16.mxu0 %v7656_v43  ;;  %v7725_v42 = vld [vmem:[#allocation5 + $0x1304] ss:$16 sps:$4 sm:$0xff]   ;;  %v7720_v43 = vld [vmem:[#allocation5 + $0x1100] ss:$16 sps:$4 sm:$0xff]  }
 0x169   :  { %5214 = vmatprep.subr.bf16.mxu1 %v7659_v44  ;;  %v7723_v44 = vld [vmem:[#allocation5 + $0x1300] ss:$16 sps:$4 sm:$0xff]  }
 0x16b   :  { %5172 = vmatpush1.bf16.msra.mxu0 %v7654_v48  ;;  %v133_v48 = vld [vmem:[#allocation2 + $0x80] sm:$0xff] }
 0x16c   :  { %5215 = vmatpush1.bf16.msra.mxu1 %v7657_v49  ;;  %5173 = vmatprep.subr.bf16.mxu0 %v7662_v50  ;;  %v157_v49 = vld [vmem:[#allocation2 + $0x140] sm:$0xff]  ;;  %v135_v50 = vld [vmem:[#allocation2 + $0x90] sm:$0xff] }
 0x16d   :  { %5216 = vmatprep.subr.bf16.mxu1 %v7665_v51  ;;  %v159_v51 = vld [vmem:[#allocation2 + $0x150] sm:$0xff] }
 0x16f   :  { %5174 = vmatpush1.bf16.msra.mxu0 %v7660_v52  ;;  %v7728_v52 = vld [vmem:[#allocation5 + $0x14e4] ss:$16 sps:$4 sm:$0xff]  }
 0x170   :  { %5217 = vmatpush1.bf16.msra.mxu1 %v7663_v55  ;;  %5175 = vmatprep.subr.bf16.mxu0 %v7668_v56  ;;  %v7731_v55 = vld [vmem:[#allocation5 + $0x16e4] ss:$16 sps:$4 sm:$0xff]   ;;  %v138_v56 = vld [vmem:[#allocation2 + $0xa8] sm:$0xff] }
 0x171   :  { %5218 = vmatprep.subr.bf16.mxu1 %v7671_v57  ;;  %v162_v57 = vld [vmem:[#allocation2 + $0x168] sm:$0xff] }
 0x173   :  { %5176 = vmatpush1.bf16.msra.mxu0 %v7666_v60  ;;  %v140_v60 = vld [vmem:[#allocation2 + $0xb8] sm:$0xff] }
 0x174   :  { %5219 = vmatpush1.bf16.msra.mxu1 %v7669_v61  ;;  %5177 = vmatprep.subr.bf16.mxu0 %v7674_v62  ;;  %v164_v61 = vld [vmem:[#allocation2 + $0x178] sm:$0xff]  ;;  %v7726_v62 = vld [vmem:[#allocation5 + $0x14e0] ss:$16 sps:$4 sm:$0xff]  }
 0x175   :  { %5220 = vmatprep.subr.bf16.mxu1 %v7677_v63  ;;  %v7729_v63 = vld [vmem:[#allocation5 + $0x16e0] ss:$16 sps:$4 sm:$0xff]  }
 0x177   :  { %5178 = vmatpush1.bf16.msra.mxu0 %v7672_v2  ;;  %v8741_v2 = vpack.c.bf16 %v157_v49, %v133_v48  ;;  %v7774_v48 = vld [vmem:[#allocation5 + $0x15e0] ss:$16 sps:$4 sm:$0xff]  }
 0x178   :  { %5221 = vmatpush1.bf16.msra.mxu1 %v7675_v3  ;;  %5179 = vmatprep.subr.bf16.mxu0 %v7680_v4  ;;  %v8743_v3 = vpack.c.bf16 %v159_v51, %v135_v50  ;;  %v7734_v4 = vld [vmem:[#allocation5 + $0x14c4] ss:$16 sps:$4 sm:$0xff]   ;;  %v7777_v49 = vld [vmem:[#allocation5 + $0x17e0] ss:$16 sps:$4 sm:$0xff]  }
 0x179   :  { %5222 = vmatprep.subr.bf16.mxu1 %v7683_v5  ;;  %v7737_v5 = vld [vmem:[#allocation5 + $0x16c4] ss:$16 sps:$4 sm:$0xff]  }
 0x17a   :  { %v7782_v50 = vld [vmem:[#allocation5 + $0x15c4] ss:$16 sps:$4 sm:$0xff]  }
 0x17b   :  { %5180 = vmatpush2.bf16.msra.mxu0 %v7678_v6  ;;  %v7732_v6 = vld [vmem:[#allocation5 + $0x14c0] ss:$16 sps:$4 sm:$0xff]   ;;  %v7785_v51 = vld [vmem:[#allocation5 + $0x17c4] ss:$16 sps:$4 sm:$0xff]  }
 0x17c   :  { %5223 = vmatpush2.bf16.msra.mxu1 %v7681_v7  ;;  %5181 = vmatprep.subr.bf16.mxu0 %v7686_v8  ;;  %v7735_v7 = vld [vmem:[#allocation5 + $0x16c0] ss:$16 sps:$4 sm:$0xff]   ;;  %v8745_v8 = vpack.c.bf16 %v162_v57, %v138_v56  ;;  %v7788_v56 = vld [vmem:[#allocation5 + $0x15a4] ss:$16 sps:$4 sm:$0xff]  }
 0x17d   :  { %5224 = vmatprep.subr.bf16.mxu1 %v7689_v9  ;;  %v8747_v9 = vpack.c.bf16 %v164_v61, %v140_v60  ;;  %v7791_v57 = vld [vmem:[#allocation5 + $0x17a4] ss:$16 sps:$4 sm:$0xff]   ;;  %v7786_v60 = vld [vmem:[#allocation5 + $0x15a0] ss:$16 sps:$4 sm:$0xff]  }
 0x17e   :  { %v7789_v61 = vld [vmem:[#allocation5 + $0x17a0] ss:$16 sps:$4 sm:$0xff]  }
 0x17f   :  { %5182 = vmatpush2.bf16.msra.mxu0 %v7684_v10  ;;  %v7740_v10 = vld [vmem:[#allocation5 + $0x14a4] ss:$16 sps:$4 sm:$0xff]  }
 0x180   :  { %5225 = vmatpush2.bf16.msra.mxu1 %v7687_v11  ;;  %5183 = vmatprep.subr.bf16.mxu0 %v7692_v14  ;;  %v7743_v11 = vld [vmem:[#allocation5 + $0x16a4] ss:$16 sps:$4 sm:$0xff]   ;;  %v7738_v14 = vld [vmem:[#allocation5 + $0x14a0] ss:$16 sps:$4 sm:$0xff]  }
 0x181   :  { %5226 = vmatprep.subr.bf16.mxu1 %v7695_v15  ;;  %v7741_v15 = vld [vmem:[#allocation5 + $0x16a0] ss:$16 sps:$4 sm:$0xff]  }
 0x183   :  { %5184 = vmatpush2.bf16.msra.mxu0 %v7690_v16  ;;  %v7746_v16 = vld [vmem:[#allocation5 + $0x1484] ss:$16 sps:$4 sm:$0xff]  }
 0x184   :  { %5227 = vmatpush2.bf16.msra.mxu1 %v7693_v17  ;;  %5185 = vmatprep.subr.bf16.mxu0 %v7698_v18  ;;  %v7749_v17 = vld [vmem:[#allocation5 + $0x1684] ss:$16 sps:$4 sm:$0xff]   ;;  %v7744_v18 = vld [vmem:[#allocation5 + $0x1480] ss:$16 sps:$4 sm:$0xff]  }
 0x185   :  { %5228 = vmatprep.subr.bf16.mxu1 %v7701_v19  ;;  %v7747_v19 = vld [vmem:[#allocation5 + $0x1680] ss:$16 sps:$4 sm:$0xff]  }
 0x187   :  { %5186 = vmatpush2.bf16.msra.mxu0 %v7696_v20  ;;  %v7752_v20 = vld [vmem:[#allocation5 + $0x1464] ss:$16 sps:$4 sm:$0xff]  }
 0x188   :  { %5229 = vmatpush2.bf16.msra.mxu1 %v7699_v21  ;;  %5187 = vmatprep.subr.bf16.mxu0 %v7704_v24  ;;  %v7755_v21 = vld [vmem:[#allocation5 + $0x1664] ss:$16 sps:$4 sm:$0xff]   ;;  %v7750_v24 = vld [vmem:[#allocation5 + $0x1460] ss:$16 sps:$4 sm:$0xff]  }
 0x189   :  { %5230 = vmatprep.subr.bf16.mxu1 %v7707_v25  ;;  %v7753_v25 = vld [vmem:[#allocation5 + $0x1660] ss:$16 sps:$4 sm:$0xff]  }
 0x18b   :  { %5188 = vmatpush2.bf16.msra.mxu0 %v7702_v26  ;;  %v7758_v26 = vld [vmem:[#allocation5 + $0x1444] ss:$16 sps:$4 sm:$0xff]  }
 0x18c   :  { %5231 = vmatpush2.bf16.msra.mxu1 %v7705_v27  ;;  %5189 = vmatprep.subr.bf16.mxu0 %v7710_v32  ;;  %v7761_v27 = vld [vmem:[#allocation5 + $0x1644] ss:$16 sps:$4 sm:$0xff]   ;;  %v7756_v32 = vld [vmem:[#allocation5 + $0x1440] ss:$16 sps:$4 sm:$0xff]  }
 0x18d   :  { %5232 = vmatprep.subr.bf16.mxu1 %v7713_v33  ;;  %v7759_v33 = vld [vmem:[#allocation5 + $0x1640] ss:$16 sps:$4 sm:$0xff]  }
 0x18f   :  { %5190 = vmatpush2.bf16.msra.mxu0 %v7708_v34  ;;  %v7764_v34 = vld [vmem:[#allocation5 + $0x1424] ss:$16 sps:$4 sm:$0xff]  }
 0x190   :  { %5233 = vmatpush2.bf16.msra.mxu1 %v7711_v35  ;;  %5191 = vmatprep.subr.bf16.mxu0 %v7716_v36  ;;  %v7767_v35 = vld [vmem:[#allocation5 + $0x1624] ss:$16 sps:$4 sm:$0xff]   ;;  %v7762_v36 = vld [vmem:[#allocation5 + $0x1420] ss:$16 sps:$4 sm:$0xff]  }
 0x191   :  { %5234 = vmatprep.subr.bf16.mxu1 %v7719_v37  ;;  %v7765_v37 = vld [vmem:[#allocation5 + $0x1620] ss:$16 sps:$4 sm:$0xff]  }
 0x193   :  { %5192 = vmatpush2.bf16.msra.mxu0 %v7714_v38  ;;  %v7770_v38 = vld [vmem:[#allocation5 + $0x1404] ss:$16 sps:$4 sm:$0xff]  }
 0x194   :  { %5235 = vmatpush2.bf16.msra.mxu1 %v7717_v39  ;;  %5193 = vmatprep.subr.bf16.mxu0 %v7722_v41  ;;  %v7773_v39 = vld [vmem:[#allocation5 + $0x1604] ss:$16 sps:$4 sm:$0xff]   ;;  %v7768_v41 = vld [vmem:[#allocation5 + $0x1400] ss:$16 sps:$4 sm:$0xff]  }
 0x195   :  { %5236 = vmatprep.subr.bf16.mxu1 %v7725_v42  ;;  %v7771_v42 = vld [vmem:[#allocation5 + $0x1600] ss:$16 sps:$4 sm:$0xff]  }
 0x197   :  { %5194 = vmatpush2.bf16.msra.mxu0 %v7720_v43  ;;  %v7776_v43 = vld [vmem:[#allocation5 + $0x15e4] ss:$16 sps:$4 sm:$0xff]  }
 0x198   :  { %5237 = vmatpush2.bf16.msra.mxu1 %v7723_v44  ;;  %5249 = vmatprep.subr.bf16.mxu0 %v7728_v52  ;;  %v7779_v44 = vld [vmem:[#allocation5 + $0x17e4] ss:$16 sps:$4 sm:$0xff]   ;;  %v7780_v52 = vld [vmem:[#allocation5 + $0x15c0] ss:$16 sps:$4 sm:$0xff]  }
 0x199   :  { %5292 = vmatprep.subr.bf16.mxu1 %v7731_v55  ;;  %v7783_v55 = vld [vmem:[#allocation5 + $0x17c0] ss:$16 sps:$4 sm:$0xff]  }
 0x19a   :  { %5196 = vmatmul.mubr.bf16.vlgmr.msra.gmra.mxu0 %v8741_v2 }
 0x19b   :  { %5239 = vmatmul.mubr.bf16.vlgmr.msra.gmra.mxu1 %v8743_v3  ;;  %5250 = vmatpush1.bf16.msra.mxu0 %v7726_v62  ;;  %v7794_v62 = vld [vmem:[#allocation5 + $0x1584] ss:$16 sps:$4 sm:$0xff]  }
 0x19c   :  { %5293 = vmatpush1.bf16.msra.mxu1 %v7729_v63  ;;  %5251 = vmatprep.subr.bf16.mxu0 %v7734_v4  ;;  %v7797_v63 = vld [vmem:[#allocation5 + $0x1784] ss:$16 sps:$4 sm:$0xff]   ;;  %v7792_v4 = vld [vmem:[#allocation5 + $0x1580] ss:$16 sps:$4 sm:$0xff]  }
 0x19d   :  { %5294 = vmatprep.subr.bf16.mxu1 %v7737_v5  ;;  %5281 = vmatprep.mubr.bf16.mxu0 %v8745_v8  ;;  %v7795_v5 = vld [vmem:[#allocation5 + $0x1780] ss:$16 sps:$4 sm:$0xff]  }
 0x19e   :  { %5324 = vmatprep.mubr.bf16.mxu1 %v8747_v9 }
 0x19f   :  { %5252 = vmatpush1.bf16.msra.mxu0 %v7732_v6  ;;  %v7800_v6 = vld [vmem:[#allocation5 + $0x1564] ss:$16 sps:$4 sm:$0xff]  }
 0x1a0   :  { %5295 = vmatpush1.bf16.msra.mxu1 %v7735_v7  ;;  %5253 = vmatprep.subr.bf16.mxu0 %v7740_v10  ;;  %v7803_v7 = vld [vmem:[#allocation5 + $0x1764] ss:$16 sps:$4 sm:$0xff]   ;;  %v7798_v10 = vld [vmem:[#allocation5 + $0x1560] ss:$16 sps:$4 sm:$0xff]  }
 0x1a1   :  { %5296 = vmatprep.subr.bf16.mxu1 %v7743_v11  ;;  %v7801_v11 = vld [vmem:[#allocation5 + $0x1760] ss:$16 sps:$4 sm:$0xff]  }
 0x1a3   :  { %5254 = vmatpush1.bf16.msra.mxu0 %v7738_v14  ;;  %v7806_v14 = vld [vmem:[#allocation5 + $0x1544] ss:$16 sps:$4 sm:$0xff]  }
 0x1a4   :  { %5297 = vmatpush1.bf16.msra.mxu1 %v7741_v15  ;;  %5255 = vmatprep.subr.bf16.mxu0 %v7746_v16  ;;  %v7809_v15 = vld [vmem:[#allocation5 + $0x1744] ss:$16 sps:$4 sm:$0xff]   ;;  %v7804_v16 = vld [vmem:[#allocation5 + $0x1540] ss:$16 sps:$4 sm:$0xff]  }
 0x1a5   :  { %5298 = vmatprep.subr.bf16.mxu1 %v7749_v17  ;;  %v7807_v17 = vld [vmem:[#allocation5 + $0x1740] ss:$16 sps:$4 sm:$0xff]  }
 0x1a7   :  { %5256 = vmatpush1.bf16.msra.mxu0 %v7744_v18  ;;  %v7812_v18 = vld [vmem:[#allocation5 + $0x1524] ss:$16 sps:$4 sm:$0xff]  }
 0x1a8   :  { %5299 = vmatpush1.bf16.msra.mxu1 %v7747_v19  ;;  %5257 = vmatprep.subr.bf16.mxu0 %v7752_v20  ;;  %v7815_v19 = vld [vmem:[#allocation5 + $0x1724] ss:$16 sps:$4 sm:$0xff]   ;;  %v7810_v20 = vld [vmem:[#allocation5 + $0x1520] ss:$16 sps:$4 sm:$0xff]  }
 0x1a9   :  { %5300 = vmatprep.subr.bf16.mxu1 %v7755_v21  ;;  %v7813_v21 = vld [vmem:[#allocation5 + $0x1720] ss:$16 sps:$4 sm:$0xff]  }
 0x1ab   :  { %5258 = vmatpush1.bf16.msra.mxu0 %v7750_v24  ;;  %v7818_v24 = vld [vmem:[#allocation5 + $0x1504] ss:$16 sps:$4 sm:$0xff]  }
 0x1ac   :  { %5301 = vmatpush1.bf16.msra.mxu1 %v7753_v25  ;;  %5259 = vmatprep.subr.bf16.mxu0 %v7758_v26  ;;  %v7821_v25 = vld [vmem:[#allocation5 + $0x1704] ss:$16 sps:$4 sm:$0xff]   ;;  %v7816_v26 = vld [vmem:[#allocation5 + $0x1500] ss:$16 sps:$4 sm:$0xff]  }
 0x1ad   :  { %5302 = vmatprep.subr.bf16.mxu1 %v7761_v27  ;;  %v7819_v27 = vld [vmem:[#allocation5 + $0x1700] ss:$16 sps:$4 sm:$0xff]  }
 0x1af   :  { %5260 = vmatpush1.bf16.msra.mxu0 %v7756_v32  ;;  %v137_v32 = vld [vmem:[#allocation2 + $0xa0] sm:$0xff] }
 0x1b0   :  { %5303 = vmatpush1.bf16.msra.mxu1 %v7759_v33  ;;  %5261 = vmatprep.subr.bf16.mxu0 %v7764_v34  ;;  %v161_v33 = vld [vmem:[#allocation2 + $0x160] sm:$0xff]  ;;  %v139_v34 = vld [vmem:[#allocation2 + $0xb0] sm:$0xff] }
 0x1b1   :  { %5304 = vmatprep.subr.bf16.mxu1 %v7767_v35  ;;  %v163_v35 = vld [vmem:[#allocation2 + $0x170] sm:$0xff] }
 0x1b3   :  { %5262 = vmatpush1.bf16.msra.mxu0 %v7762_v36  ;;  %v7824_v36 = vld [vmem:[#allocation5 + $0xec] ss:$16 sps:$4 sm:$0xff]  }
 0x1b4   :  { %5305 = vmatpush1.bf16.msra.mxu1 %v7765_v37  ;;  %5263 = vmatprep.subr.bf16.mxu0 %v7770_v38  ;;  %v7827_v37 = vld [vmem:[#allocation5 + $0x2ec] ss:$16 sps:$4 sm:$0xff]   ;;  %v7822_v38 = vld [vmem:[#allocation5 + $0xe8] ss:$16 sps:$4 sm:$0xff]  }
 0x1b5   :  { %5306 = vmatprep.subr.bf16.mxu1 %v7773_v39  ;;  %v7825_v39 = vld [vmem:[#allocation5 + $0x2e8] ss:$16 sps:$4 sm:$0xff]  }
 0x1b7   :  { %5264 = vmatpush1.bf16.msra.mxu0 %v7768_v41  ;;  %v8753_v41 = vpack.c.bf16 %v161_v33, %v137_v32  ;;  %v7876_v32 = vld [vmem:[#allocation5 + $0x1c8] ss:$16 sps:$4 sm:$0xff]  }
 0x1b8   :  { %5307 = vmatpush1.bf16.msra.mxu1 %v7771_v42  ;;  %5265 = vmatprep.subr.bf16.mxu0 %v7776_v43  ;;  %v8755_v42 = vpack.c.bf16 %v163_v35, %v139_v34  ;;  %v7830_v43 = vld [vmem:[#allocation5 + $0xcc] ss:$16 sps:$4 sm:$0xff]   ;;  %v7879_v33 = vld [vmem:[#allocation5 + $0x3c8] ss:$16 sps:$4 sm:$0xff]  }
 0x1b9   :  { %5308 = vmatprep.subr.bf16.mxu1 %v7779_v44  ;;  %v7833_v44 = vld [vmem:[#allocation5 + $0x2cc] ss:$16 sps:$4 sm:$0xff]  }
 0x1ba   :  { %v7884_v34 = vld [vmem:[#allocation5 + $0x1ac] ss:$16 sps:$4 sm:$0xff]  }
 0x1bb   :  { %5266 = vmatpush2.bf16.msra.mxu0 %v7774_v48  ;;  %v7828_v48 = vld [vmem:[#allocation5 + $0xc8] ss:$16 sps:$4 sm:$0xff]   ;;  %v7887_v35 = vld [vmem:[#allocation5 + $0x3ac] ss:$16 sps:$4 sm:$0xff]  }
 0x1bc   :  { %5309 = vmatpush2.bf16.msra.mxu1 %v7777_v49  ;;  %5267 = vmatprep.subr.bf16.mxu0 %v7782_v50  ;;  %v7831_v49 = vld [vmem:[#allocation5 + $0x2c8] ss:$16 sps:$4 sm:$0xff]   ;;  %v7836_v50 = vld [vmem:[#allocation5 + $0xac] ss:$16 sps:$4 sm:$0xff]  }
 0x1bd   :  { %5310 = vmatprep.subr.bf16.mxu1 %v7785_v51  ;;  %v7839_v51 = vld [vmem:[#allocation5 + $0x2ac] ss:$16 sps:$4 sm:$0xff]  }
 0x1bf   :  { %5268 = vmatpush2.bf16.msra.mxu0 %v7780_v52  ;;  %v7834_v52 = vld [vmem:[#allocation5 + $0xa8] ss:$16 sps:$4 sm:$0xff]  }
 0x1c0   :  { %5311 = vmatpush2.bf16.msra.mxu1 %v7783_v55  ;;  %5269 = vmatprep.subr.bf16.mxu0 %v7788_v56  ;;  %v7837_v55 = vld [vmem:[#allocation5 + $0x2a8] ss:$16 sps:$4 sm:$0xff]   ;;  %v7842_v56 = vld [vmem:[#allocation5 + $0x8c] ss:$16 sps:$4 sm:$0xff]  }
 0x1c1   :  { %5312 = vmatprep.subr.bf16.mxu1 %v7791_v57  ;;  %v7845_v57 = vld [vmem:[#allocation5 + $0x28c] ss:$16 sps:$4 sm:$0xff]  }
 0x1c3   :  { %5270 = vmatpush2.bf16.msra.mxu0 %v7786_v60  ;;  %v7840_v60 = vld [vmem:[#allocation5 + $0x88] ss:$16 sps:$4 sm:$0xff]  }
 0x1c4   :  { %5313 = vmatpush2.bf16.msra.mxu1 %v7789_v61  ;;  %5271 = vmatprep.subr.bf16.mxu0 %v7794_v62  ;;  %v7843_v61 = vld [vmem:[#allocation5 + $0x288] ss:$16 sps:$4 sm:$0xff]   ;;  %v7848_v62 = vld [vmem:[#allocation5 + $0x6c] ss:$16 sps:$4 sm:$0xff]  }
 0x1c5   :  { %5314 = vmatprep.subr.bf16.mxu1 %v7797_v63  ;;  %v7851_v63 = vld [vmem:[#allocation5 + $0x26c] ss:$16 sps:$4 sm:$0xff]  }
 0x1c7   :  { %5272 = vmatpush2.bf16.msra.mxu0 %v7792_v4  ;;  %v7846_v4 = vld [vmem:[#allocation5 + $0x68] ss:$16 sps:$4 sm:$0xff]  }
 0x1c8   :  { %5315 = vmatpush2.bf16.msra.mxu1 %v7795_v5  ;;  %5273 = vmatprep.subr.bf16.mxu0 %v7800_v6  ;;  %v7857_v5 = vld [vmem:[#allocation5 + $0x24c] ss:$16 sps:$4 sm:$0xff]   ;;  %v7852_v6 = vld [vmem:[#allocation5 + $0x48] ss:$16 sps:$4 sm:$0xff]  }
 0x1c9   :  { %5316 = vmatprep.subr.bf16.mxu1 %v7803_v7  ;;  %v7855_v7 = vld [vmem:[#allocation5 + $0x248] ss:$16 sps:$4 sm:$0xff]  }
 0x1cb   :  { %5274 = vmatpush2.bf16.msra.mxu0 %v7798_v10  ;;  %v7860_v10 = vld [vmem:[#allocation5 + $0x2c] ss:$16 sps:$4 sm:$0xff]  }
 0x1cc   :  { %5317 = vmatpush2.bf16.msra.mxu1 %v7801_v11  ;;  %5275 = vmatprep.subr.bf16.mxu0 %v7806_v14  ;;  %v7863_v11 = vld [vmem:[#allocation5 + $0x22c] ss:$16 sps:$4 sm:$0xff]   ;;  %v7858_v14 = vld [vmem:[#allocation5 + $0x28] ss:$16 sps:$4 sm:$0xff]  }
 0x1cd   :  { %5318 = vmatprep.subr.bf16.mxu1 %v7809_v15  ;;  %v7861_v15 = vld [vmem:[#allocation5 + $0x228] ss:$16 sps:$4 sm:$0xff]  }
 0x1cf   :  { %5276 = vmatpush2.bf16.msra.mxu0 %v7804_v16  ;;  %v7866_v16 = vld [vmem:[#allocation5 + $0xc] ss:$16 sps:$4 sm:$0xff]  }
 0x1d0   :  { %5319 = vmatpush2.bf16.msra.mxu1 %v7807_v17  ;;  %5277 = vmatprep.subr.bf16.mxu0 %v7812_v18  ;;  %v7869_v17 = vld [vmem:[#allocation5 + $0x20c] ss:$16 sps:$4 sm:$0xff]   ;;  %v7864_v18 = vld [vmem:[#allocation5 + $0x8] ss:$16 sps:$4 sm:$0xff]  }
 0x1d1   :  { %5320 = vmatprep.subr.bf16.mxu1 %v7815_v19  ;;  %v7867_v19 = vld [vmem:[#allocation5 + $0x208] ss:$16 sps:$4 sm:$0xff]  }
 0x1d3   :  { %5278 = vmatpush2.bf16.msra.mxu0 %v7810_v20  ;;  %v7872_v20 = vld [vmem:[#allocation5 + $0x1ec] ss:$16 sps:$4 sm:$0xff]  }
 0x1d4   :  { %5321 = vmatpush2.bf16.msra.mxu1 %v7813_v21  ;;  %5279 = vmatprep.subr.bf16.mxu0 %v7818_v24  ;;  %v7875_v21 = vld [vmem:[#allocation5 + $0x3ec] ss:$16 sps:$4 sm:$0xff]   ;;  %v7870_v24 = vld [vmem:[#allocation5 + $0x1e8] ss:$16 sps:$4 sm:$0xff]  }
 0x1d5   :  { %5322 = vmatprep.subr.bf16.mxu1 %v7821_v25  ;;  %v7873_v25 = vld [vmem:[#allocation5 + $0x3e8] ss:$16 sps:$4 sm:$0xff]  }
 0x1d7   :  { %5280 = vmatpush2.bf16.msra.mxu0 %v7816_v26  ;;  %v7878_v26 = vld [vmem:[#allocation5 + $0x1cc] ss:$16 sps:$4 sm:$0xff]  }
 0x1d8   :  { %5323 = vmatpush2.bf16.msra.mxu1 %v7819_v27  ;;  %5335 = vmatprep.subr.bf16.mxu0 %v7824_v36  ;;  %v7881_v27 = vld [vmem:[#allocation5 + $0x3cc] ss:$16 sps:$4 sm:$0xff]   ;;  %v7882_v36 = vld [vmem:[#allocation5 + $0x1a8] ss:$16 sps:$4 sm:$0xff]  }
 0x1d9   :  { %5378 = vmatprep.subr.bf16.mxu1 %v7827_v37  ;;  %v7885_v37 = vld [vmem:[#allocation5 + $0x3a8] ss:$16 sps:$4 sm:$0xff]  }
 0x1da   :  { %5282 = vmatmul.mubr.bf16.vlgmr.msra.gmra.mxu0 %v8753_v41 }
 0x1db   :  { %5325 = vmatmul.mubr.bf16.vlgmr.msra.gmra.mxu1 %v8755_v42  ;;  %5336 = vmatpush1.bf16.msra.mxu0 %v7822_v38  ;;  %v7890_v38 = vld [vmem:[#allocation5 + $0x18c] ss:$16 sps:$4 sm:$0xff]  }
 0x1dc   :  { %5379 = vmatpush1.bf16.msra.mxu1 %v7825_v39  ;;  %5337 = vmatprep.subr.bf16.mxu0 %v7830_v43  ;;  %v7893_v39 = vld [vmem:[#allocation5 + $0x38c] ss:$16 sps:$4 sm:$0xff]   ;;  %v7888_v43 = vld [vmem:[#allocation5 + $0x188] ss:$16 sps:$4 sm:$0xff]  }
 0x1dd   :  { %5380 = vmatprep.subr.bf16.mxu1 %v7833_v44  ;;  %5367 = vmatprep.mubr.bf16.mxu0 %v8687_v53  ;;  %v7849_v53 = vld [vmem:[#allocation5 + $0x268] ss:$16 sps:$4 sm:$0xff]  }
 0x1de   :  { %5410 = vmatprep.mubr.bf16.mxu1 %v8689_v54  ;;  %v7854_v54 = vld [vmem:[#allocation5 + $0x4c] ss:$16 sps:$4 sm:$0xff]   ;;  %v7891_v44 = vld [vmem:[#allocation5 + $0x388] ss:$16 sps:$4 sm:$0xff]  }
 0x1df   :  { %5338 = vmatpush1.bf16.msra.mxu0 %v7828_v48  ;;  %v7896_v48 = vld [vmem:[#allocation5 + $0x16c] ss:$16 sps:$4 sm:$0xff]  }
 0x1e0   :  { %5381 = vmatpush1.bf16.msra.mxu1 %v7831_v49  ;;  %5339 = vmatprep.subr.bf16.mxu0 %v7836_v50  ;;  %v7899_v49 = vld [vmem:[#allocation5 + $0x36c] ss:$16 sps:$4 sm:$0xff]   ;;  %v7894_v50 = vld [vmem:[#allocation5 + $0x168] ss:$16 sps:$4 sm:$0xff]  }
 0x1e1   :  { %5382 = vmatprep.subr.bf16.mxu1 %v7839_v51  ;;  %v7897_v51 = vld [vmem:[#allocation5 + $0x368] ss:$16 sps:$4 sm:$0xff]  }
 0x1e3   :  { %5340 = vmatpush1.bf16.msra.mxu0 %v7834_v52  ;;  %v7902_v52 = vld [vmem:[#allocation5 + $0x14c] ss:$16 sps:$4 sm:$0xff]  }
 0x1e4   :  { %5383 = vmatpush1.bf16.msra.mxu1 %v7837_v55  ;;  %5341 = vmatprep.subr.bf16.mxu0 %v7842_v56  ;;  %v7905_v55 = vld [vmem:[#allocation5 + $0x34c] ss:$16 sps:$4 sm:$0xff]   ;;  %v7900_v56 = vld [vmem:[#allocation5 + $0x148] ss:$16 sps:$4 sm:$0xff]  }
 0x1e5   :  { %5384 = vmatprep.subr.bf16.mxu1 %v7845_v57  ;;  %v7903_v57 = vld [vmem:[#allocation5 + $0x348] ss:$16 sps:$4 sm:$0xff]  }
 0x1e7   :  { %5342 = vmatpush1.bf16.msra.mxu0 %v7840_v60  ;;  %v7908_v60 = vld [vmem:[#allocation5 + $0x12c] ss:$16 sps:$4 sm:$0xff]  }
 0x1e8   :  { %5385 = vmatpush1.bf16.msra.mxu1 %v7843_v61  ;;  %5343 = vmatprep.subr.bf16.mxu0 %v7848_v62  ;;  %v7911_v61 = vld [vmem:[#allocation5 + $0x32c] ss:$16 sps:$4 sm:$0xff]   ;;  %v7906_v62 = vld [vmem:[#allocation5 + $0x128] ss:$16 sps:$4 sm:$0xff]  }
 0x1e9   :  { %5386 = vmatprep.subr.bf16.mxu1 %v7851_v63  ;;  %v7909_v63 = vld [vmem:[#allocation5 + $0x328] ss:$16 sps:$4 sm:$0xff]  }
 0x1eb   :  { %5344 = vmatpush1.bf16.msra.mxu0 %v7846_v4  ;;  %v7914_v4 = vld [vmem:[#allocation5 + $0x10c] ss:$16 sps:$4 sm:$0xff]  }
 0x1ec   :  { %5387 = vmatpush1.bf16.msra.mxu1 %v7849_v53  ;;  %5345 = vmatprep.subr.bf16.mxu0 %v7854_v54  ;;  %v7917_v53 = vld [vmem:[#allocation5 + $0x30c] ss:$16 sps:$4 sm:$0xff]   ;;  %v7912_v54 = vld [vmem:[#allocation5 + $0x108] ss:$16 sps:$4 sm:$0xff]  }
 0x1ed   :  { %5388 = vmatprep.subr.bf16.mxu1 %v7857_v5  ;;  %v7915_v5 = vld [vmem:[#allocation5 + $0x308] ss:$16 sps:$4 sm:$0xff]  }
 0x1ef   :  { %5346 = vmatpush1.bf16.msra.mxu0 %v7852_v6  ;;  %v7920_v6 = vld [vmem:[#allocation5 + $0x4ec] ss:$16 sps:$4 sm:$0xff]  }
 0x1f0   :  { %5389 = vmatpush1.bf16.msra.mxu1 %v7855_v7  ;;  %5347 = vmatprep.subr.bf16.mxu0 %v7860_v10  ;;  %v7923_v7 = vld [vmem:[#allocation5 + $0x6ec] ss:$16 sps:$4 sm:$0xff]   ;;  %v7918_v10 = vld [vmem:[#allocation5 + $0x4e8] ss:$16 sps:$4 sm:$0xff]  }
 0x1f1   :  { %5390 = vmatprep.subr.bf16.mxu1 %v7863_v11  ;;  %v7921_v11 = vld [vmem:[#allocation5 + $0x6e8] ss:$16 sps:$4 sm:$0xff]  }
 0x1f3   :  { %5348 = vmatpush1.bf16.msra.mxu0 %v7858_v14  ;;  %v7926_v14 = vld [vmem:[#allocation5 + $0x4cc] ss:$16 sps:$4 sm:$0xff]  }
 0x1f4   :  { %5391 = vmatpush1.bf16.msra.mxu1 %v7861_v15  ;;  %5349 = vmatprep.subr.bf16.mxu0 %v7866_v16  ;;  %v7929_v15 = vld [vmem:[#allocation5 + $0x6cc] ss:$16 sps:$4 sm:$0xff]   ;;  %v7924_v16 = vld [vmem:[#allocation5 + $0x4c8] ss:$16 sps:$4 sm:$0xff]  }
 0x1f5   :  { %5392 = vmatprep.subr.bf16.mxu1 %v7869_v17  ;;  %v7927_v17 = vld [vmem:[#allocation5 + $0x6c8] ss:$16 sps:$4 sm:$0xff]  }
 0x1f7   :  { %5350 = vmatpush1.bf16.msra.mxu0 %v7864_v18  ;;  %v7932_v18 = vld [vmem:[#allocation5 + $0x4ac] ss:$16 sps:$4 sm:$0xff]  }
 0x1f8   :  { %5393 = vmatpush1.bf16.msra.mxu1 %v7867_v19  ;;  %5351 = vmatprep.subr.bf16.mxu0 %v7872_v20  ;;  %v7935_v19 = vld [vmem:[#allocation5 + $0x6ac] ss:$16 sps:$4 sm:$0xff]   ;;  %v7930_v20 = vld [vmem:[#allocation5 + $0x4a8] ss:$16 sps:$4 sm:$0xff]  }
 0x1f9   :  { %5394 = vmatprep.subr.bf16.mxu1 %v7875_v21  ;;  %v7933_v21 = vld [vmem:[#allocation5 + $0x6a8] ss:$16 sps:$4 sm:$0xff]  }
 0x1fb   :  { %5352 = vmatpush2.bf16.msra.mxu0 %v7870_v24  ;;  %v7938_v24 = vld [vmem:[#allocation5 + $0x48c] ss:$16 sps:$4 sm:$0xff]  }
 0x1fc   :  { %5395 = vmatpush2.bf16.msra.mxu1 %v7873_v25  ;;  %5353 = vmatprep.subr.bf16.mxu0 %v7878_v26  ;;  %v7936_v25 = vld [vmem:[#allocation5 + $0x488] ss:$16 sps:$4 sm:$0xff]   ;;  %v7944_v26 = vld [vmem:[#allocation5 + $0x46c] ss:$16 sps:$4 sm:$0xff]  }
 0x1fd   :  { %5396 = vmatprep.subr.bf16.mxu1 %v7881_v27  ;;  %v7947_v27 = vld [vmem:[#allocation5 + $0x66c] ss:$16 sps:$4 sm:$0xff]  }
 0x1ff   :  { %5354 = vmatpush2.bf16.msra.mxu0 %v7876_v32  ;;  %v7942_v32 = vld [vmem:[#allocation5 + $0x468] ss:$16 sps:$4 sm:$0xff]  }
 0x200   :  { %5397 = vmatpush2.bf16.msra.mxu1 %v7879_v33  ;;  %5355 = vmatprep.subr.bf16.mxu0 %v7884_v34  ;;  %v7953_v33 = vld [vmem:[#allocation5 + $0x64c] ss:$16 sps:$4 sm:$0xff]   ;;  %v7948_v34 = vld [vmem:[#allocation5 + $0x448] ss:$16 sps:$4 sm:$0xff]  }
 0x201   :  { %5398 = vmatprep.subr.bf16.mxu1 %v7887_v35  ;;  %v7951_v35 = vld [vmem:[#allocation5 + $0x648] ss:$16 sps:$4 sm:$0xff]  }
 0x203   :  { %5356 = vmatpush2.bf16.msra.mxu0 %v7882_v36  ;;  %v7956_v36 = vld [vmem:[#allocation5 + $0x42c] ss:$16 sps:$4 sm:$0xff]  }
 0x204   :  { %5399 = vmatpush2.bf16.msra.mxu1 %v7885_v37  ;;  %5357 = vmatprep.subr.bf16.mxu0 %v7890_v38  ;;  %v7959_v37 = vld [vmem:[#allocation5 + $0x62c] ss:$16 sps:$4 sm:$0xff]   ;;  %v7954_v38 = vld [vmem:[#allocation5 + $0x428] ss:$16 sps:$4 sm:$0xff]  }
 0x205   :  { %5400 = vmatprep.subr.bf16.mxu1 %v7893_v39  ;;  %v7957_v39 = vld [vmem:[#allocation5 + $0x628] ss:$16 sps:$4 sm:$0xff]  }
 0x207   :  { %5358 = vmatpush2.bf16.msra.mxu0 %v7888_v43  ;;  %v7962_v43 = vld [vmem:[#allocation5 + $0x40c] ss:$16 sps:$4 sm:$0xff]  }
 0x208   :  { %5401 = vmatpush2.bf16.msra.mxu1 %v7891_v44  ;;  %5359 = vmatprep.subr.bf16.mxu0 %v7896_v48  ;;  %v7965_v44 = vld [vmem:[#allocation5 + $0x60c] ss:$16 sps:$4 sm:$0xff]   ;;  %v7960_v48 = vld [vmem:[#allocation5 + $0x408] ss:$16 sps:$4 sm:$0xff]  }
 0x209   :  { %5402 = vmatprep.subr.bf16.mxu1 %v7899_v49  ;;  %v7963_v49 = vld [vmem:[#allocation5 + $0x608] ss:$16 sps:$4 sm:$0xff]  }
 0x20b   :  { %5360 = vmatpush2.bf16.msra.mxu0 %v7894_v50  ;;  %v7968_v50 = vld [vmem:[#allocation5 + $0x5ec] ss:$16 sps:$4 sm:$0xff]  }
 0x20c   :  { %5403 = vmatpush2.bf16.msra.mxu1 %v7897_v51  ;;  %5361 = vmatprep.subr.bf16.mxu0 %v7902_v52  ;;  %v7971_v51 = vld [vmem:[#allocation5 + $0x7ec] ss:$16 sps:$4 sm:$0xff]   ;;  %v7966_v52 = vld [vmem:[#allocation5 + $0x5e8] ss:$16 sps:$4 sm:$0xff]  }
 0x20d   :  { %5404 = vmatprep.subr.bf16.mxu1 %v7905_v55  ;;  %v7969_v55 = vld [vmem:[#allocation5 + $0x7e8] ss:$16 sps:$4 sm:$0xff]  }
 0x20f   :  { %5362 = vmatpush2.bf16.msra.mxu0 %v7900_v56  ;;  %v7974_v56 = vld [vmem:[#allocation5 + $0x5cc] ss:$16 sps:$4 sm:$0xff]  }
 0x210   :  { %5405 = vmatpush2.bf16.msra.mxu1 %v7903_v57  ;;  %5363 = vmatprep.subr.bf16.mxu0 %v7908_v60  ;;  %v7977_v57 = vld [vmem:[#allocation5 + $0x7cc] ss:$16 sps:$4 sm:$0xff]   ;;  %v7972_v60 = vld [vmem:[#allocation5 + $0x5c8] ss:$16 sps:$4 sm:$0xff]  }
 0x211   :  { %5406 = vmatprep.subr.bf16.mxu1 %v7911_v61  ;;  %v7975_v61 = vld [vmem:[#allocation5 + $0x7c8] ss:$16 sps:$4 sm:$0xff]  }
 0x213   :  { %5364 = vmatpush2.bf16.msra.mxu0 %v7906_v62  ;;  %v7980_v62 = vld [vmem:[#allocation5 + $0x5ac] ss:$16 sps:$4 sm:$0xff]  }
 0x214   :  { %5407 = vmatpush2.bf16.msra.mxu1 %v7909_v63  ;;  %5365 = vmatprep.subr.bf16.mxu0 %v7914_v4  ;;  %v7983_v63 = vld [vmem:[#allocation5 + $0x7ac] ss:$16 sps:$4 sm:$0xff]   ;;  %v7978_v4 = vld [vmem:[#allocation5 + $0x5a8] ss:$16 sps:$4 sm:$0xff]  }
 0x215   :  { %5408 = vmatprep.subr.bf16.mxu1 %v7917_v53  ;;  %v7981_v53 = vld [vmem:[#allocation5 + $0x7a8] ss:$16 sps:$4 sm:$0xff]  }
 0x217   :  { %5366 = vmatpush2.bf16.msra.mxu0 %v7912_v54  ;;  %v7986_v54 = vld [vmem:[#allocation5 + $0x58c] ss:$16 sps:$4 sm:$0xff]  }
 0x218   :  { %5409 = vmatpush2.bf16.msra.mxu1 %v7915_v5  ;;  %5421 = vmatprep.subr.bf16.mxu0 %v7920_v6  ;;  %v7989_v5 = vld [vmem:[#allocation5 + $0x78c] ss:$16 sps:$4 sm:$0xff]   ;;  %v7984_v6 = vld [vmem:[#allocation5 + $0x588] ss:$16 sps:$4 sm:$0xff]  }
 0x219   :  { %5464 = vmatprep.subr.bf16.mxu1 %v7923_v7  ;;  %v7987_v7 = vld [vmem:[#allocation5 + $0x788] ss:$16 sps:$4 sm:$0xff]  }
 0x21a   :  { %5368 = vmatmul.mubr.bf16.vlgmr.msra.gmra.mxu0 %v8693_v12  ;;  %v7941_v12 = vld [vmem:[#allocation5 + $0x68c] ss:$16 sps:$4 sm:$0xff]  }
 0x21b   :  { %5411 = vmatmul.mubr.bf16.vlgmr.msra.gmra.mxu1 %v8695_v13  ;;  %5422 = vmatpush1.bf16.msra.mxu0 %v7918_v10  ;;  %v7939_v13 = vld [vmem:[#allocation5 + $0x688] ss:$16 sps:$4 sm:$0xff]   ;;  %v7992_v10 = vld [vmem:[#allocation5 + $0x56c] ss:$16 sps:$4 sm:$0xff]  }
 0x21c   :  { %5465 = vmatpush1.bf16.msra.mxu1 %v7921_v11  ;;  %5423 = vmatprep.subr.bf16.mxu0 %v7926_v14  ;;  %v7995_v11 = vld [vmem:[#allocation5 + $0x76c] ss:$16 sps:$4 sm:$0xff]   ;;  %v7990_v14 = vld [vmem:[#allocation5 + $0x568] ss:$16 sps:$4 sm:$0xff]  }
 0x21d   :  { %5466 = vmatprep.subr.bf16.mxu1 %v7929_v15  ;;  %5453 = vmatprep.mubr.bf16.mxu0 %v8699_v45  ;;  %v7945_v45 = vld [vmem:[#allocation5 + $0x668] ss:$16 sps:$4 sm:$0xff]  }
 0x21e   :  { %5496 = vmatprep.mubr.bf16.mxu1 %v8701_v47  ;;  %v7950_v47 = vld [vmem:[#allocation5 + $0x44c] ss:$16 sps:$4 sm:$0xff]   ;;  %v7993_v15 = vld [vmem:[#allocation5 + $0x768] ss:$16 sps:$4 sm:$0xff]  }
 0x21f   :  { %5424 = vmatpush1.bf16.msra.mxu0 %v7924_v16  ;;  %v7998_v16 = vld [vmem:[#allocation5 + $0x54c] ss:$16 sps:$4 sm:$0xff]  }
 0x220   :  { %5467 = vmatpush1.bf16.msra.mxu1 %v7927_v17  ;;  %5425 = vmatprep.subr.bf16.mxu0 %v7932_v18  ;;  %v8001_v17 = vld [vmem:[#allocation5 + $0x74c] ss:$16 sps:$4 sm:$0xff]   ;;  %v7996_v18 = vld [vmem:[#allocation5 + $0x548] ss:$16 sps:$4 sm:$0xff]  }
 0x221   :  { %5468 = vmatprep.subr.bf16.mxu1 %v7935_v19  ;;  %v7999_v19 = vld [vmem:[#allocation5 + $0x748] ss:$16 sps:$4 sm:$0xff]  }
 0x223   :  { %5426 = vmatpush1.bf16.msra.mxu0 %v7930_v20  ;;  %v8004_v20 = vld [vmem:[#allocation5 + $0x52c] ss:$16 sps:$4 sm:$0xff]  }
 0x224   :  { %5469 = vmatpush1.bf16.msra.mxu1 %v7933_v21  ;;  %5427 = vmatprep.subr.bf16.mxu0 %v7938_v24  ;;  %v8007_v21 = vld [vmem:[#allocation5 + $0x72c] ss:$16 sps:$4 sm:$0xff]   ;;  %v8002_v24 = vld [vmem:[#allocation5 + $0x528] ss:$16 sps:$4 sm:$0xff]  }
 0x225   :  { %5470 = vmatprep.subr.bf16.mxu1 %v7941_v12  ;;  %v8005_v12 = vld [vmem:[#allocation5 + $0x728] ss:$16 sps:$4 sm:$0xff]  }
 0x227   :  { %5428 = vmatpush1.bf16.msra.mxu0 %v7936_v25  ;;  %v8010_v25 = vld [vmem:[#allocation5 + $0x50c] ss:$16 sps:$4 sm:$0xff]  }
 0x228   :  { %5471 = vmatpush1.bf16.msra.mxu1 %v7939_v13  ;;  %5429 = vmatprep.subr.bf16.mxu0 %v7944_v26  ;;  %v8013_v13 = vld [vmem:[#allocation5 + $0x70c] ss:$16 sps:$4 sm:$0xff]   ;;  %v8008_v26 = vld [vmem:[#allocation5 + $0x508] ss:$16 sps:$4 sm:$0xff]  }
 0x229   :  { %5472 = vmatprep.subr.bf16.mxu1 %v7947_v27  ;;  %v8011_v27 = vld [vmem:[#allocation5 + $0x708] ss:$16 sps:$4 sm:$0xff]  }
 0x22b   :  { %5430 = vmatpush1.bf16.msra.mxu0 %v7942_v32  ;;  %v8016_v32 = vld [vmem:[#allocation5 + $0x8ec] ss:$16 sps:$4 sm:$0xff]  }
 0x22c   :  { %5473 = vmatpush1.bf16.msra.mxu1 %v7945_v45  ;;  %5431 = vmatprep.subr.bf16.mxu0 %v7950_v47  ;;  %v8019_v45 = vld [vmem:[#allocation5 + $0xaec] ss:$16 sps:$4 sm:$0xff]   ;;  %v8014_v47 = vld [vmem:[#allocation5 + $0x8e8] ss:$16 sps:$4 sm:$0xff]  }
 0x22d   :  { %5474 = vmatprep.subr.bf16.mxu1 %v7953_v33  ;;  %v8017_v33 = vld [vmem:[#allocation5 + $0xae8] ss:$16 sps:$4 sm:$0xff]  }
 0x22f   :  { %5432 = vmatpush1.bf16.msra.mxu0 %v7948_v34  ;;  %v8022_v34 = vld [vmem:[#allocation5 + $0x8cc] ss:$16 sps:$4 sm:$0xff]  }
 0x230   :  { %5475 = vmatpush1.bf16.msra.mxu1 %v7951_v35  ;;  %5433 = vmatprep.subr.bf16.mxu0 %v7956_v36  ;;  %v8025_v35 = vld [vmem:[#allocation5 + $0xacc] ss:$16 sps:$4 sm:$0xff]   ;;  %v8020_v36 = vld [vmem:[#allocation5 + $0x8c8] ss:$16 sps:$4 sm:$0xff]  }
 0x231   :  { %5476 = vmatprep.subr.bf16.mxu1 %v7959_v37  ;;  %v8023_v37 = vld [vmem:[#allocation5 + $0xac8] ss:$16 sps:$4 sm:$0xff]  }
 0x233   :  { %5434 = vmatpush1.bf16.msra.mxu0 %v7954_v38  ;;  %v8028_v38 = vld [vmem:[#allocation5 + $0x8ac] ss:$16 sps:$4 sm:$0xff]  }
 0x234   :  { %5477 = vmatpush1.bf16.msra.mxu1 %v7957_v39  ;;  %5435 = vmatprep.subr.bf16.mxu0 %v7962_v43  ;;  %v8031_v39 = vld [vmem:[#allocation5 + $0xaac] ss:$16 sps:$4 sm:$0xff]   ;;  %v8026_v43 = vld [vmem:[#allocation5 + $0x8a8] ss:$16 sps:$4 sm:$0xff]  }
 0x235   :  { %5478 = vmatprep.subr.bf16.mxu1 %v7965_v44  ;;  %v8029_v44 = vld [vmem:[#allocation5 + $0xaa8] ss:$16 sps:$4 sm:$0xff]  }
 0x237   :  { %5436 = vmatpush1.bf16.msra.mxu0 %v7960_v48  ;;  %v8032_v48 = vld [vmem:[#allocation5 + $0x888] ss:$16 sps:$4 sm:$0xff]  }
 0x238   :  { %5479 = vmatpush1.bf16.msra.mxu1 %v7963_v49  ;;  %5437 = vmatprep.subr.bf16.mxu0 %v7968_v50  ;;  %v8035_v49 = vld [vmem:[#allocation5 + $0xa88] ss:$16 sps:$4 sm:$0xff]   ;;  %v8040_v50 = vld [vmem:[#allocation5 + $0x86c] ss:$16 sps:$4 sm:$0xff]  }
 0x239   :  { %5480 = vmatprep.subr.bf16.mxu1 %v7971_v51  ;;  %v8043_v51 = vld [vmem:[#allocation5 + $0xa6c] ss:$16 sps:$4 sm:$0xff]  }
 0x23b   :  { %5438 = vmatpush2.bf16.msra.mxu0 %v7966_v52  ;;  %v8046_v52 = vld [vmem:[#allocation5 + $0x84c] ss:$16 sps:$4 sm:$0xff]  }
 0x23c   :  { %5481 = vmatpush2.bf16.msra.mxu1 %v7969_v55  ;;  %5439 = vmatprep.subr.bf16.mxu0 %v7974_v56  ;;  %v8049_v55 = vld [vmem:[#allocation5 + $0xa4c] ss:$16 sps:$4 sm:$0xff]   ;;  %v8044_v56 = vld [vmem:[#allocation5 + $0x848] ss:$16 sps:$4 sm:$0xff]  }
 0x23d   :  { %5482 = vmatprep.subr.bf16.mxu1 %v7977_v57  ;;  %v8047_v57 = vld [vmem:[#allocation5 + $0xa48] ss:$16 sps:$4 sm:$0xff]  }
 0x23f   :  { %5440 = vmatpush2.bf16.msra.mxu0 %v7972_v60  ;;  %v8052_v60 = vld [vmem:[#allocation5 + $0x82c] ss:$16 sps:$4 sm:$0xff]  }
 0x240   :  { %5483 = vmatpush2.bf16.msra.mxu1 %v7975_v61  ;;  %5441 = vmatprep.subr.bf16.mxu0 %v7980_v62  ;;  %v8055_v61 = vld [vmem:[#allocation5 + $0xa2c] ss:$16 sps:$4 sm:$0xff]   ;;  %v8050_v62 = vld [vmem:[#allocation5 + $0x828] ss:$16 sps:$4 sm:$0xff]  }
 0x241   :  { %5484 = vmatprep.subr.bf16.mxu1 %v7983_v63  ;;  %v8053_v63 = vld [vmem:[#allocation5 + $0xa28] ss:$16 sps:$4 sm:$0xff]  }
 0x243   :  { %5442 = vmatpush2.bf16.msra.mxu0 %v7978_v4  ;;  %v8058_v4 = vld [vmem:[#allocation5 + $0x80c] ss:$16 sps:$4 sm:$0xff]  }
 0x244   :  { %5485 = vmatpush2.bf16.msra.mxu1 %v7981_v53  ;;  %5443 = vmatprep.subr.bf16.mxu0 %v7986_v54  ;;  %v8061_v53 = vld [vmem:[#allocation5 + $0xa0c] ss:$16 sps:$4 sm:$0xff]   ;;  %v8056_v54 = vld [vmem:[#allocation5 + $0x808] ss:$16 sps:$4 sm:$0xff]  }
 0x245   :  { %5486 = vmatprep.subr.bf16.mxu1 %v7989_v5  ;;  %v8059_v5 = vld [vmem:[#allocation5 + $0xa08] ss:$16 sps:$4 sm:$0xff]  }
 0x247   :  { %5444 = vmatpush2.bf16.msra.mxu0 %v7984_v6  ;;  %v8064_v6 = vld [vmem:[#allocation5 + $0x9ec] ss:$16 sps:$4 sm:$0xff]  }
 0x248   :  { %5487 = vmatpush2.bf16.msra.mxu1 %v7987_v7  ;;  %5445 = vmatprep.subr.bf16.mxu0 %v7992_v10  ;;  %v8067_v7 = vld [vmem:[#allocation5 + $0xbec] ss:$16 sps:$4 sm:$0xff]   ;;  %v8062_v10 = vld [vmem:[#allocation5 + $0x9e8] ss:$16 sps:$4 sm:$0xff]  }
 0x249   :  { %5488 = vmatprep.subr.bf16.mxu1 %v7995_v11  ;;  %v8065_v11 = vld [vmem:[#allocation5 + $0xbe8] ss:$16 sps:$4 sm:$0xff]  }
 0x24b   :  { %5446 = vmatpush2.bf16.msra.mxu0 %v7990_v14  ;;  %v8070_v14 = vld [vmem:[#allocation5 + $0x9cc] ss:$16 sps:$4 sm:$0xff]  }
 0x24c   :  { %5489 = vmatpush2.bf16.msra.mxu1 %v7993_v15  ;;  %5447 = vmatprep.subr.bf16.mxu0 %v7998_v16  ;;  %v8073_v15 = vld [vmem:[#allocation5 + $0xbcc] ss:$16 sps:$4 sm:$0xff]   ;;  %v8068_v16 = vld [vmem:[#allocation5 + $0x9c8] ss:$16 sps:$4 sm:$0xff]  }
 0x24d   :  { %5490 = vmatprep.subr.bf16.mxu1 %v8001_v17  ;;  %v8071_v17 = vld [vmem:[#allocation5 + $0xbc8] ss:$16 sps:$4 sm:$0xff]  }
 0x24f   :  { %5448 = vmatpush2.bf16.msra.mxu0 %v7996_v18  ;;  %v8076_v18 = vld [vmem:[#allocation5 + $0x9ac] ss:$16 sps:$4 sm:$0xff]  }
 0x250   :  { %5491 = vmatpush2.bf16.msra.mxu1 %v7999_v19  ;;  %5449 = vmatprep.subr.bf16.mxu0 %v8004_v20  ;;  %v8079_v19 = vld [vmem:[#allocation5 + $0xbac] ss:$16 sps:$4 sm:$0xff]   ;;  %v8074_v20 = vld [vmem:[#allocation5 + $0x9a8] ss:$16 sps:$4 sm:$0xff]  }
 0x251   :  { %5492 = vmatprep.subr.bf16.mxu1 %v8007_v21  ;;  %v8077_v21 = vld [vmem:[#allocation5 + $0xba8] ss:$16 sps:$4 sm:$0xff]  }
 0x253   :  { %5450 = vmatpush2.bf16.msra.mxu0 %v8002_v24  ;;  %v8082_v24 = vld [vmem:[#allocation5 + $0x98c] ss:$16 sps:$4 sm:$0xff]  }
 0x254   :  { %5493 = vmatpush2.bf16.msra.mxu1 %v8005_v12  ;;  %5451 = vmatprep.subr.bf16.mxu0 %v8010_v25  ;;  %v8085_v12 = vld [vmem:[#allocation5 + $0xb8c] ss:$16 sps:$4 sm:$0xff]   ;;  %v8080_v25 = vld [vmem:[#allocation5 + $0x988] ss:$16 sps:$4 sm:$0xff]  }
 0x255   :  { %5494 = vmatprep.subr.bf16.mxu1 %v8013_v13  ;;  %v8083_v13 = vld [vmem:[#allocation5 + $0xb88] ss:$16 sps:$4 sm:$0xff]  }
 0x257   :  { %5452 = vmatpush2.bf16.msra.mxu0 %v8008_v26  ;;  %v8088_v26 = vld [vmem:[#allocation5 + $0x96c] ss:$16 sps:$4 sm:$0xff]  }
 0x258   :  { %5495 = vmatpush2.bf16.msra.mxu1 %v8011_v27  ;;  %5507 = vmatprep.subr.bf16.mxu0 %v8016_v32  ;;  %v8091_v27 = vld [vmem:[#allocation5 + $0xb6c] ss:$16 sps:$4 sm:$0xff]   ;;  %v8086_v32 = vld [vmem:[#allocation5 + $0x968] ss:$16 sps:$4 sm:$0xff]  }
 0x259   :  { %5550 = vmatprep.subr.bf16.mxu1 %v8019_v45  ;;  %v8089_v45 = vld [vmem:[#allocation5 + $0xb68] ss:$16 sps:$4 sm:$0xff]  }
 0x25a   :  { %5454 = vmatmul.mubr.bf16.vlgmr.msra.gmra.mxu0 %v8705_v28  ;;  %v8034_v28 = vld [vmem:[#allocation5 + $0x88c] ss:$16 sps:$4 sm:$0xff]  }
 0x25b   :  { %5497 = vmatmul.mubr.bf16.vlgmr.msra.gmra.mxu1 %v8707_v29  ;;  %5508 = vmatpush1.bf16.msra.mxu0 %v8014_v47  ;;  %v8037_v29 = vld [vmem:[#allocation5 + $0xa8c] ss:$16 sps:$4 sm:$0xff]  }
 0x25c   :  { %5551 = vmatpush1.bf16.msra.mxu1 %v8017_v33  ;;  %5509 = vmatprep.subr.bf16.mxu0 %v8022_v34  ;;  %v8094_v47 = vld [vmem:[#allocation5 + $0x94c] ss:$16 sps:$4 sm:$0xff]   ;;  %v8092_v34 = vld [vmem:[#allocation5 + $0x948] ss:$16 sps:$4 sm:$0xff]  }
 0x25d   :  { %5552 = vmatprep.subr.bf16.mxu1 %v8025_v35  ;;  %5539 = vmatprep.mubr.bf16.mxu0 %v8711_v40  ;;  %v8038_v40 = vld [vmem:[#allocation5 + $0x868] ss:$16 sps:$4 sm:$0xff]   ;;  %v8097_v33 = vld [vmem:[#allocation5 + $0xb4c] ss:$16 sps:$4 sm:$0xff]  }
 0x25e   :  { %5582 = vmatprep.mubr.bf16.mxu1 %v8713_v46  ;;  %v8041_v46 = vld [vmem:[#allocation5 + $0xa68] ss:$16 sps:$4 sm:$0xff]  }
 0x25f   :  { %5510 = vmatpush1.bf16.msra.mxu0 %v8020_v36  ;;  %v8095_v35 = vld [vmem:[#allocation5 + $0xb48] ss:$16 sps:$4 sm:$0xff]   ;;  %v8100_v36 = vld [vmem:[#allocation5 + $0x92c] ss:$16 sps:$4 sm:$0xff]  }
 0x260   :  { %5553 = vmatpush1.bf16.msra.mxu1 %v8023_v37  ;;  %5511 = vmatprep.subr.bf16.mxu0 %v8028_v38  ;;  %v8103_v37 = vld [vmem:[#allocation5 + $0xb2c] ss:$16 sps:$4 sm:$0xff]   ;;  %v8098_v38 = vld [vmem:[#allocation5 + $0x928] ss:$16 sps:$4 sm:$0xff]  }
 0x261   :  { %5554 = vmatprep.subr.bf16.mxu1 %v8031_v39  ;;  %v8101_v39 = vld [vmem:[#allocation5 + $0xb28] ss:$16 sps:$4 sm:$0xff]  }
 0x263   :  { %5512 = vmatpush1.bf16.msra.mxu0 %v8026_v43  ;;  %v8106_v43 = vld [vmem:[#allocation5 + $0x90c] ss:$16 sps:$4 sm:$0xff]  }
 0x264   :  { %5555 = vmatpush1.bf16.msra.mxu1 %v8029_v44  ;;  %5513 = vmatprep.subr.bf16.mxu0 %v8034_v28  ;;  %v8109_v44 = vld [vmem:[#allocation5 + $0xb0c] ss:$16 sps:$4 sm:$0xff]   ;;  %v8104_v28 = vld [vmem:[#allocation5 + $0x908] ss:$16 sps:$4 sm:$0xff]  }
 0x265   :  { %5556 = vmatprep.subr.bf16.mxu1 %v8037_v29  ;;  %v8107_v29 = vld [vmem:[#allocation5 + $0xb08] ss:$16 sps:$4 sm:$0xff]  }
 0x267   :  { %5514 = vmatpush1.bf16.msra.mxu0 %v8032_v48  ;;  %v8112_v48 = vld [vmem:[#allocation5 + $0xcec] ss:$16 sps:$4 sm:$0xff]  }
 0x268   :  { %5557 = vmatpush1.bf16.msra.mxu1 %v8035_v49  ;;  %5515 = vmatprep.subr.bf16.mxu0 %v8040_v50  ;;  %v8115_v49 = vld [vmem:[#allocation5 + $0xeec] ss:$16 sps:$4 sm:$0xff]   ;;  %v8110_v50 = vld [vmem:[#allocation5 + $0xce8] ss:$16 sps:$4 sm:$0xff]  }
 0x269   :  { %5558 = vmatprep.subr.bf16.mxu1 %v8043_v51  ;;  %v8113_v51 = vld [vmem:[#allocation5 + $0xee8] ss:$16 sps:$4 sm:$0xff]  }
 0x26b   :  { %5516 = vmatpush1.bf16.msra.mxu0 %v8038_v40  ;;  %v8118_v40 = vld [vmem:[#allocation5 + $0xccc] ss:$16 sps:$4 sm:$0xff]  }
 0x26c   :  { %5559 = vmatpush1.bf16.msra.mxu1 %v8041_v46  ;;  %5517 = vmatprep.subr.bf16.mxu0 %v8046_v52  ;;  %v8121_v46 = vld [vmem:[#allocation5 + $0xecc] ss:$16 sps:$4 sm:$0xff]   ;;  %v8116_v52 = vld [vmem:[#allocation5 + $0xcc8] ss:$16 sps:$4 sm:$0xff]  }
 0x26d   :  { %5560 = vmatprep.subr.bf16.mxu1 %v8049_v55  ;;  %v8119_v55 = vld [vmem:[#allocation5 + $0xec8] ss:$16 sps:$4 sm:$0xff]  }
 0x26f   :  { %5518 = vmatpush1.bf16.msra.mxu0 %v8044_v56  ;;  %v8124_v56 = vld [vmem:[#allocation5 + $0xcac] ss:$16 sps:$4 sm:$0xff]  }
 0x270   :  { %5561 = vmatpush1.bf16.msra.mxu1 %v8047_v57  ;;  %5519 = vmatprep.subr.bf16.mxu0 %v8052_v60  ;;  %v8127_v57 = vld [vmem:[#allocation5 + $0xeac] ss:$16 sps:$4 sm:$0xff]   ;;  %v8122_v60 = vld [vmem:[#allocation5 + $0xca8] ss:$16 sps:$4 sm:$0xff]  }
 0x271   :  { %5562 = vmatprep.subr.bf16.mxu1 %v8055_v61  ;;  %v8125_v61 = vld [vmem:[#allocation5 + $0xea8] ss:$16 sps:$4 sm:$0xff]  }
 0x273   :  { %5520 = vmatpush1.bf16.msra.mxu0 %v8050_v62  ;;  %v8128_v62 = vld [vmem:[#allocation5 + $0xc88] ss:$16 sps:$4 sm:$0xff]  }
 0x274   :  { %5563 = vmatpush1.bf16.msra.mxu1 %v8053_v63  ;;  %5521 = vmatprep.subr.bf16.mxu0 %v8058_v4  ;;  %v8131_v63 = vld [vmem:[#allocation5 + $0xe88] ss:$16 sps:$4 sm:$0xff]   ;;  %v8136_v4 = vld [vmem:[#allocation5 + $0xc6c] ss:$16 sps:$4 sm:$0xff]  }
 0x275   :  { %5564 = vmatprep.subr.bf16.mxu1 %v8061_v53  ;;  %v8139_v53 = vld [vmem:[#allocation5 + $0xe6c] ss:$16 sps:$4 sm:$0xff]  }
 0x277   :  { %5522 = vmatpush1.bf16.msra.mxu0 %v8056_v54  ;;  %v8142_v54 = vld [vmem:[#allocation5 + $0xc4c] ss:$16 sps:$4 sm:$0xff]  }
 0x278   :  { %5565 = vmatpush1.bf16.msra.mxu1 %v8059_v5  ;;  %5523 = vmatprep.subr.bf16.mxu0 %v8064_v6  ;;  %v8145_v5 = vld [vmem:[#allocation5 + $0xe4c] ss:$16 sps:$4 sm:$0xff]   ;;  %v8140_v6 = vld [vmem:[#allocation5 + $0xc48] ss:$16 sps:$4 sm:$0xff]  }
 0x279   :  { %5566 = vmatprep.subr.bf16.mxu1 %v8067_v7  ;;  %v8143_v7 = vld [vmem:[#allocation5 + $0xe48] ss:$16 sps:$4 sm:$0xff]  }
 0x27b   :  { %5524 = vmatpush2.bf16.msra.mxu0 %v8062_v10  ;;  %v8148_v10 = vld [vmem:[#allocation5 + $0xc2c] ss:$16 sps:$4 sm:$0xff]  }
 0x27c   :  { %5567 = vmatpush2.bf16.msra.mxu1 %v8065_v11  ;;  %5525 = vmatprep.subr.bf16.mxu0 %v8070_v14  ;;  %v8151_v11 = vld [vmem:[#allocation5 + $0xe2c] ss:$16 sps:$4 sm:$0xff]   ;;  %v8146_v14 = vld [vmem:[#allocation5 + $0xc28] ss:$16 sps:$4 sm:$0xff]  }
 0x27d   :  { %5568 = vmatprep.subr.bf16.mxu1 %v8073_v15  ;;  %v8149_v15 = vld [vmem:[#allocation5 + $0xe28] ss:$16 sps:$4 sm:$0xff]  }
 0x27f   :  { %5526 = vmatpush2.bf16.msra.mxu0 %v8068_v16  ;;  %v8154_v16 = vld [vmem:[#allocation5 + $0xc0c] ss:$16 sps:$4 sm:$0xff]  }
 0x280   :  { %5569 = vmatpush2.bf16.msra.mxu1 %v8071_v17  ;;  %5527 = vmatprep.subr.bf16.mxu0 %v8076_v18  ;;  %v8157_v17 = vld [vmem:[#allocation5 + $0xe0c] ss:$16 sps:$4 sm:$0xff]   ;;  %v8152_v18 = vld [vmem:[#allocation5 + $0xc08] ss:$16 sps:$4 sm:$0xff]  }
 0x281   :  { %5570 = vmatprep.subr.bf16.mxu1 %v8079_v19  ;;  %v8155_v19 = vld [vmem:[#allocation5 + $0xe08] ss:$16 sps:$4 sm:$0xff]  }
 0x283   :  { %5528 = vmatpush2.bf16.msra.mxu0 %v8074_v20  ;;  %v8160_v20 = vld [vmem:[#allocation5 + $0xdec] ss:$16 sps:$4 sm:$0xff]  }
 0x284   :  { %5571 = vmatpush2.bf16.msra.mxu1 %v8077_v21  ;;  %5529 = vmatprep.subr.bf16.mxu0 %v8082_v24  ;;  %v8163_v21 = vld [vmem:[#allocation5 + $0xfec] ss:$16 sps:$4 sm:$0xff]   ;;  %v8158_v24 = vld [vmem:[#allocation5 + $0xde8] ss:$16 sps:$4 sm:$0xff]  }
 0x285   :  { %5572 = vmatprep.subr.bf16.mxu1 %v8085_v12  ;;  %v8161_v12 = vld [vmem:[#allocation5 + $0xfe8] ss:$16 sps:$4 sm:$0xff]  }
 0x287   :  { %5530 = vmatpush2.bf16.msra.mxu0 %v8080_v25  ;;  %v8166_v25 = vld [vmem:[#allocation5 + $0xdcc] ss:$16 sps:$4 sm:$0xff]  }
 0x288   :  { %5573 = vmatpush2.bf16.msra.mxu1 %v8083_v13  ;;  %5531 = vmatprep.subr.bf16.mxu0 %v8088_v26  ;;  %v8169_v13 = vld [vmem:[#allocation5 + $0xfcc] ss:$16 sps:$4 sm:$0xff]   ;;  %v8164_v26 = vld [vmem:[#allocation5 + $0xdc8] ss:$16 sps:$4 sm:$0xff]  }
 0x289   :  { %5574 = vmatprep.subr.bf16.mxu1 %v8091_v27  ;;  %v8167_v27 = vld [vmem:[#allocation5 + $0xfc8] ss:$16 sps:$4 sm:$0xff]  }
 0x28b   :  { %5532 = vmatpush2.bf16.msra.mxu0 %v8086_v32  ;;  %v8172_v32 = vld [vmem:[#allocation5 + $0xdac] ss:$16 sps:$4 sm:$0xff]  }
 0x28c   :  { %5575 = vmatpush2.bf16.msra.mxu1 %v8089_v45  ;;  %5533 = vmatprep.subr.bf16.mxu0 %v8094_v47  ;;  %v8175_v45 = vld [vmem:[#allocation5 + $0xfac] ss:$16 sps:$4 sm:$0xff]   ;;  %v8170_v47 = vld [vmem:[#allocation5 + $0xda8] ss:$16 sps:$4 sm:$0xff]  }
 0x28d   :  { %5576 = vmatprep.subr.bf16.mxu1 %v8097_v33  ;;  %v8173_v33 = vld [vmem:[#allocation5 + $0xfa8] ss:$16 sps:$4 sm:$0xff]  }
 0x28f   :  { %5534 = vmatpush2.bf16.msra.mxu0 %v8092_v34  ;;  %v8178_v34 = vld [vmem:[#allocation5 + $0xd8c] ss:$16 sps:$4 sm:$0xff]  }
 0x290   :  { %5577 = vmatpush2.bf16.msra.mxu1 %v8095_v35  ;;  %5535 = vmatprep.subr.bf16.mxu0 %v8100_v36  ;;  %v8181_v35 = vld [vmem:[#allocation5 + $0xf8c] ss:$16 sps:$4 sm:$0xff]   ;;  %v8176_v36 = vld [vmem:[#allocation5 + $0xd88] ss:$16 sps:$4 sm:$0xff]  }
 0x291   :  { %5578 = vmatprep.subr.bf16.mxu1 %v8103_v37  ;;  %v8179_v37 = vld [vmem:[#allocation5 + $0xf88] ss:$16 sps:$4 sm:$0xff]  }
 0x293   :  { %5536 = vmatpush2.bf16.msra.mxu0 %v8098_v38  ;;  %v8184_v38 = vld [vmem:[#allocation5 + $0xd6c] ss:$16 sps:$4 sm:$0xff]  }
 0x294   :  { %5579 = vmatpush2.bf16.msra.mxu1 %v8101_v39  ;;  %5537 = vmatprep.subr.bf16.mxu0 %v8106_v43  ;;  %v8187_v39 = vld [vmem:[#allocation5 + $0xf6c] ss:$16 sps:$4 sm:$0xff]   ;;  %v8182_v43 = vld [vmem:[#allocation5 + $0xd68] ss:$16 sps:$4 sm:$0xff]  }
 0x295   :  { %5580 = vmatprep.subr.bf16.mxu1 %v8109_v44  ;;  %v8185_v44 = vld [vmem:[#allocation5 + $0xf68] ss:$16 sps:$4 sm:$0xff]  }
 0x297   :  { %5538 = vmatpush2.bf16.msra.mxu0 %v8104_v28  ;;  %v8190_v28 = vld [vmem:[#allocation5 + $0xd4c] ss:$16 sps:$4 sm:$0xff]  }
 0x298   :  { %5581 = vmatpush2.bf16.msra.mxu1 %v8107_v29  ;;  %5593 = vmatprep.subr.bf16.mxu0 %v8112_v48  ;;  %v8193_v29 = vld [vmem:[#allocation5 + $0xf4c] ss:$16 sps:$4 sm:$0xff]   ;;  %v8188_v48 = vld [vmem:[#allocation5 + $0xd48] ss:$16 sps:$4 sm:$0xff]  }
 0x299   :  { %5636 = vmatprep.subr.bf16.mxu1 %v8115_v49  ;;  %v8191_v49 = vld [vmem:[#allocation5 + $0xf48] ss:$16 sps:$4 sm:$0xff]  }
 0x29a   :  { %5540 = vmatmul.mubr.bf16.vlgmr.msra.gmra.mxu0 %v8717_v58  ;;  %v8130_v58 = vld [vmem:[#allocation5 + $0xc8c] ss:$16 sps:$4 sm:$0xff]  }
 0x29b   :  { %5583 = vmatmul.mubr.bf16.vlgmr.msra.gmra.mxu1 %v8719_v59  ;;  %5594 = vmatpush1.bf16.msra.mxu0 %v8110_v50  ;;  %v8133_v59 = vld [vmem:[#allocation5 + $0xe8c] ss:$16 sps:$4 sm:$0xff]  }
 0x29c   :  { %5637 = vmatpush1.bf16.msra.mxu1 %v8113_v51  ;;  %5595 = vmatprep.subr.bf16.mxu0 %v8118_v40  ;;  %v8196_v50 = vld [vmem:[#allocation5 + $0xd2c] ss:$16 sps:$4 sm:$0xff]   ;;  %v8194_v40 = vld [vmem:[#allocation5 + $0xd28] ss:$16 sps:$4 sm:$0xff]  }
 0x29d   :  { %5638 = vmatprep.subr.bf16.mxu1 %v8121_v46  ;;  %5625 = vmatprep.mubr.bf16.mxu0 %v8721_v0  ;;  %v8134_v0 = vld [vmem:[#allocation5 + $0xc68] ss:$16 sps:$4 sm:$0xff]   ;;  %v8199_v51 = vld [vmem:[#allocation5 + $0xf2c] ss:$16 sps:$4 sm:$0xff]  }
 0x29e   :  { %5668 = vmatprep.mubr.bf16.mxu1 %v8723_v1  ;;  %v8137_v1 = vld [vmem:[#allocation5 + $0xe68] ss:$16 sps:$4 sm:$0xff]  }
 0x29f   :  { %5596 = vmatpush1.bf16.msra.mxu0 %v8116_v52  ;;  %v8197_v46 = vld [vmem:[#allocation5 + $0xf28] ss:$16 sps:$4 sm:$0xff]   ;;  %v8202_v52 = vld [vmem:[#allocation5 + $0xd0c] ss:$16 sps:$4 sm:$0xff]  }
 0x2a0   :  { %5639 = vmatpush1.bf16.msra.mxu1 %v8119_v55  ;;  %5597 = vmatprep.subr.bf16.mxu0 %v8124_v56  ;;  %v8205_v55 = vld [vmem:[#allocation5 + $0xf0c] ss:$16 sps:$4 sm:$0xff]   ;;  %v8200_v56 = vld [vmem:[#allocation5 + $0xd08] ss:$16 sps:$4 sm:$0xff]  }
 0x2a1   :  { %5640 = vmatprep.subr.bf16.mxu1 %v8127_v57  ;;  %v8203_v57 = vld [vmem:[#allocation5 + $0xf08] ss:$16 sps:$4 sm:$0xff]  }
 0x2a3   :  { %5598 = vmatpush1.bf16.msra.mxu0 %v8122_v60  ;;  %v8208_v60 = vld [vmem:[#allocation5 + $0x10ec] ss:$16 sps:$4 sm:$0xff]  }
 0x2a4   :  { %5641 = vmatpush1.bf16.msra.mxu1 %v8125_v61  ;;  %5599 = vmatprep.subr.bf16.mxu0 %v8130_v58  ;;  %v8211_v61 = vld [vmem:[#allocation5 + $0x12ec] ss:$16 sps:$4 sm:$0xff]   ;;  %v8206_v58 = vld [vmem:[#allocation5 + $0x10e8] ss:$16 sps:$4 sm:$0xff]  }
 0x2a5   :  { %5642 = vmatprep.subr.bf16.mxu1 %v8133_v59  ;;  %v8209_v59 = vld [vmem:[#allocation5 + $0x12e8] ss:$16 sps:$4 sm:$0xff]  }
 0x2a7   :  { %5600 = vmatpush1.bf16.msra.mxu0 %v8128_v62  ;;  %v8214_v62 = vld [vmem:[#allocation5 + $0x10cc] ss:$16 sps:$4 sm:$0xff]  }
 0x2a8   :  { %5643 = vmatpush1.bf16.msra.mxu1 %v8131_v63  ;;  %5601 = vmatprep.subr.bf16.mxu0 %v8136_v4  ;;  %v8217_v63 = vld [vmem:[#allocation5 + $0x12cc] ss:$16 sps:$4 sm:$0xff]   ;;  %v8212_v4 = vld [vmem:[#allocation5 + $0x10c8] ss:$16 sps:$4 sm:$0xff]  }
 0x2a9   :  { %5644 = vmatprep.subr.bf16.mxu1 %v8139_v53  ;;  %v8215_v53 = vld [vmem:[#allocation5 + $0x12c8] ss:$16 sps:$4 sm:$0xff]  }
 0x2ab   :  { %5602 = vmatpush1.bf16.msra.mxu0 %v8134_v0  ;;  %v8220_v0 = vld [vmem:[#allocation5 + $0x10ac] ss:$16 sps:$4 sm:$0xff]  }
 0x2ac   :  { %5645 = vmatpush1.bf16.msra.mxu1 %v8137_v1  ;;  %5603 = vmatprep.subr.bf16.mxu0 %v8142_v54  ;;  %v8223_v1 = vld [vmem:[#allocation5 + $0x12ac] ss:$16 sps:$4 sm:$0xff]   ;;  %v8218_v54 = vld [vmem:[#allocation5 + $0x10a8] ss:$16 sps:$4 sm:$0xff]  }
 0x2ad   :  { %5646 = vmatprep.subr.bf16.mxu1 %v8145_v5  ;;  %v8221_v5 = vld [vmem:[#allocation5 + $0x12a8] ss:$16 sps:$4 sm:$0xff]  }
 0x2af   :  { %5604 = vmatpush1.bf16.msra.mxu0 %v8140_v6  ;;  %v8224_v6 = vld [vmem:[#allocation5 + $0x1088] ss:$16 sps:$4 sm:$0xff]  }
 0x2b0   :  { %5647 = vmatpush1.bf16.msra.mxu1 %v8143_v7  ;;  %5605 = vmatprep.subr.bf16.mxu0 %v8148_v10  ;;  %v8227_v7 = vld [vmem:[#allocation5 + $0x1288] ss:$16 sps:$4 sm:$0xff]   ;;  %v8232_v10 = vld [vmem:[#allocation5 + $0x106c] ss:$16 sps:$4 sm:$0xff]  }
 0x2b1   :  { %5648 = vmatprep.subr.bf16.mxu1 %v8151_v11  ;;  %v8235_v11 = vld [vmem:[#allocation5 + $0x126c] ss:$16 sps:$4 sm:$0xff]  }
 0x2b3   :  { %5606 = vmatpush1.bf16.msra.mxu0 %v8146_v14  ;;  %v8238_v14 = vld [vmem:[#allocation5 + $0x104c] ss:$16 sps:$4 sm:$0xff]  }
 0x2b4   :  { %5649 = vmatpush1.bf16.msra.mxu1 %v8149_v15  ;;  %5607 = vmatprep.subr.bf16.mxu0 %v8154_v16  ;;  %v8241_v15 = vld [vmem:[#allocation5 + $0x124c] ss:$16 sps:$4 sm:$0xff]   ;;  %v8236_v16 = vld [vmem:[#allocation5 + $0x1048] ss:$16 sps:$4 sm:$0xff]  }
 0x2b5   :  { %5650 = vmatprep.subr.bf16.mxu1 %v8157_v17  ;;  %v8239_v17 = vld [vmem:[#allocation5 + $0x1248] ss:$16 sps:$4 sm:$0xff]  }
 0x2b7   :  { %5608 = vmatpush1.bf16.msra.mxu0 %v8152_v18  ;;  %v8244_v18 = vld [vmem:[#allocation5 + $0x102c] ss:$16 sps:$4 sm:$0xff]  }
 0x2b8   :  { %5651 = vmatpush1.bf16.msra.mxu1 %v8155_v19  ;;  %5609 = vmatprep.subr.bf16.mxu0 %v8160_v20  ;;  %v8247_v19 = vld [vmem:[#allocation5 + $0x122c] ss:$16 sps:$4 sm:$0xff]   ;;  %v8242_v20 = vld [vmem:[#allocation5 + $0x1028] ss:$16 sps:$4 sm:$0xff]  }
 0x2b9   :  { %5652 = vmatprep.subr.bf16.mxu1 %v8163_v21  ;;  %v8245_v21 = vld [vmem:[#allocation5 + $0x1228] ss:$16 sps:$4 sm:$0xff]  }
 0x2bb   :  { %5610 = vmatpush2.bf16.msra.mxu0 %v8158_v24  ;;  %v8250_v24 = vld [vmem:[#allocation5 + $0x100c] ss:$16 sps:$4 sm:$0xff]  }
 0x2bc   :  { %5653 = vmatpush2.bf16.msra.mxu1 %v8161_v12  ;;  %5611 = vmatprep.subr.bf16.mxu0 %v8166_v25  ;;  %v8253_v12 = vld [vmem:[#allocation5 + $0x120c] ss:$16 sps:$4 sm:$0xff]   ;;  %v8248_v25 = vld [vmem:[#allocation5 + $0x1008] ss:$16 sps:$4 sm:$0xff]  }
 0x2bd   :  { %5654 = vmatprep.subr.bf16.mxu1 %v8169_v13  ;;  %v8251_v13 = vld [vmem:[#allocation5 + $0x1208] ss:$16 sps:$4 sm:$0xff]  }
 0x2bf   :  { %5612 = vmatpush2.bf16.msra.mxu0 %v8164_v26  ;;  %v8256_v26 = vld [vmem:[#allocation5 + $0x11ec] ss:$16 sps:$4 sm:$0xff]  }
 0x2c0   :  { %5655 = vmatpush2.bf16.msra.mxu1 %v8167_v27  ;;  %5613 = vmatprep.subr.bf16.mxu0 %v8172_v32  ;;  %v8259_v27 = vld [vmem:[#allocation5 + $0x13ec] ss:$16 sps:$4 sm:$0xff]   ;;  %v8254_v32 = vld [vmem:[#allocation5 + $0x11e8] ss:$16 sps:$4 sm:$0xff]  }
 0x2c1   :  { %5656 = vmatprep.subr.bf16.mxu1 %v8175_v45  ;;  %v8257_v45 = vld [vmem:[#allocation5 + $0x13e8] ss:$16 sps:$4 sm:$0xff]  }
 0x2c3   :  { %5614 = vmatpush2.bf16.msra.mxu0 %v8170_v47  ;;  %v8777_v47 = vpop.f32.mrf.mxu0 }
 0x2c4   :  { %5657 = vmatpush2.bf16.msra.mxu1 %v8173_v33  ;;  %5615 = vmatprep.subr.bf16.mxu0 %v8178_v34  ;;  %v8262_v33 = vld [vmem:[#allocation5 + $0x11cc] ss:$16 sps:$4 sm:$0xff]  }
 0x2c5   :  { %5658 = vmatprep.subr.bf16.mxu1 %v8181_v35  ;;  %v8265_v34 = vld [vmem:[#allocation5 + $0x13cc] ss:$16 sps:$4 sm:$0xff]   ;;  %v8260_v35 = vld [vmem:[#allocation5 + $0x11c8] ss:$16 sps:$4 sm:$0xff]  }
 0x2c7   :  { %5616 = vmatpush2.bf16.msra.mxu0 %v8176_v36  ;;  %v8263_v36 = vld [vmem:[#allocation5 + $0x13c8] ss:$16 sps:$4 sm:$0xff]  }
 0x2c8   :  { %5659 = vmatpush2.bf16.msra.mxu1 %v8179_v37  ;;  %5617 = vmatprep.subr.bf16.mxu0 %v8184_v38  ;;  %v8779_v37 = vpop.f32.mrf.mxu0  ;;  %v8268_v38 = vld [vmem:[#allocation5 + $0x11ac] ss:$16 sps:$4 sm:$0xff]  }
 0x2c9   :  { %5660 = vmatprep.subr.bf16.mxu1 %v8187_v39  ;;  %v8271_v39 = vld [vmem:[#allocation5 + $0x13ac] ss:$16 sps:$4 sm:$0xff]  }
 0x2cb   :  { %5618 = vmatpush2.bf16.msra.mxu0 %v8182_v43  ;;  %v8781_v43 = vpop.f32.mrf.mxu1 }
 0x2cc   :  { %5661 = vmatpush2.bf16.msra.mxu1 %v8185_v44  ;;  %5619 = vmatprep.subr.bf16.mxu0 %v8190_v28  ;;  %v8266_v44 = vld [vmem:[#allocation5 + $0x11a8] ss:$16 sps:$4 sm:$0xff]  }
 0x2cd   :  { %5662 = vmatprep.subr.bf16.mxu1 %v8193_v29  ;;  %v8269_v28 = vld [vmem:[#allocation5 + $0x13a8] ss:$16 sps:$4 sm:$0xff]   ;;  %v8783_v29 = vpop.f32.mrf.mxu0 }
 0x2cf   :  { %5620 = vmatpush2.bf16.msra.mxu0 %v8188_v48  ;;  %v8274_v48 = vld [vmem:[#allocation5 + $0x118c] ss:$16 sps:$4 sm:$0xff]  }
 0x2d0   :  { %5663 = vmatpush2.bf16.msra.mxu1 %v8191_v49  ;;  %5621 = vmatprep.subr.bf16.mxu0 %v8196_v50  ;;  %v8277_v49 = vld [vmem:[#allocation5 + $0x138c] ss:$16 sps:$4 sm:$0xff]   ;;  %v8785_v50 = vpop.f32.mrf.mxu1 }
 0x2d1   :  { %5664 = vmatprep.subr.bf16.mxu1 %v8199_v51  ;;  %v8272_v51 = vld [vmem:[#allocation5 + $0x1188] ss:$16 sps:$4 sm:$0xff]  }
 0x2d3   :  { %5622 = vmatpush2.bf16.msra.mxu0 %v8194_v40  ;;  %v8275_v40 = vld [vmem:[#allocation5 + $0x1388] ss:$16 sps:$4 sm:$0xff]  }
 0x2d4   :  { %5665 = vmatpush2.bf16.msra.mxu1 %v8197_v46  ;;  %5623 = vmatprep.subr.bf16.mxu0 %v8202_v52  ;;  %v8787_v46 = vpop.f32.mrf.mxu0  ;;  %v8280_v52 = vld [vmem:[#allocation5 + $0x116c] ss:$16 sps:$4 sm:$0xff]  }
 0x2d5   :  { %5666 = vmatprep.subr.bf16.mxu1 %v8205_v55  ;;  %v8283_v55 = vld [vmem:[#allocation5 + $0x136c] ss:$16 sps:$4 sm:$0xff]  }
 0x2d7   :  { %5624 = vmatpush2.bf16.msra.mxu0 %v8200_v56  ;;  %v8789_v56 = vpop.f32.mrf.mxu1 }
 0x2d8   :  { %5667 = vmatpush2.bf16.msra.mxu1 %v8203_v57  ;;  %5679 = vmatprep.subr.bf16.mxu0 %v8208_v60  ;;  %v8791_v57 = vpop.f32.mrf.mxu0  ;;  %v8278_v60 = vld [vmem:[#allocation5 + $0x1168] ss:$16 sps:$4 sm:$0xff]  }
 0x2d9   :  { %5722 = vmatprep.subr.bf16.mxu1 %v8211_v61  ;;  %v8281_v61 = vld [vmem:[#allocation5 + $0x1368] ss:$16 sps:$4 sm:$0xff]  }
 0x2da   :  { %5626 = vmatmul.mubr.bf16.vlgmr.msra.gmra.mxu0 %v8729_v22  ;;  %v8226_v22 = vld [vmem:[#allocation5 + $0x108c] ss:$16 sps:$4 sm:$0xff]  }
 0x2db   :  { %5669 = vmatmul.mubr.bf16.vlgmr.msra.gmra.mxu1 %v8731_v23  ;;  %5680 = vmatpush1.bf16.msra.mxu0 %v8206_v58  ;;  %v8229_v23 = vld [vmem:[#allocation5 + $0x128c] ss:$16 sps:$4 sm:$0xff]  }
 0x2dc   :  { %5723 = vmatpush1.bf16.msra.mxu1 %v8209_v59  ;;  %5681 = vmatprep.subr.bf16.mxu0 %v8214_v62  ;;  %v8286_v58 = vld [vmem:[#allocation5 + $0x114c] ss:$16 sps:$4 sm:$0xff]   ;;  %v8793_v62 = vpop.f32.mrf.mxu1 }
 0x2dd   :  { %5724 = vmatprep.subr.bf16.mxu1 %v8217_v63  ;;  %5711 = vmatprep.mubr.bf16.mxu0 %v8733_v30  ;;  %v8230_v30 = vld [vmem:[#allocation5 + $0x1068] ss:$16 sps:$4 sm:$0xff]   ;;  %v8289_v59 = vld [vmem:[#allocation5 + $0x134c] ss:$16 sps:$4 sm:$0xff]   ;;  %v8795_v63 = vpop.f32.mrf.mxu0 }
 0x2de   :  { %5754 = vmatprep.mubr.bf16.mxu1 %v8735_v31  ;;  %v8233_v31 = vld [vmem:[#allocation5 + $0x1268] ss:$16 sps:$4 sm:$0xff]  }
 0x2df   :  { %5682 = vmatpush1.bf16.msra.mxu0 %v8212_v4  ;;  %v8284_v4 = vld [vmem:[#allocation5 + $0x1148] ss:$16 sps:$4 sm:$0xff]  }
 0x2e0   :  { %5725 = vmatpush1.bf16.msra.mxu1 %v8215_v53  ;;  %5683 = vmatprep.subr.bf16.mxu0 %v8220_v0  ;;  %v8287_v53 = vld [vmem:[#allocation5 + $0x1348] ss:$16 sps:$4 sm:$0xff]   ;;  %v8797_v0 = vpop.f32.mrf.mxu1 }
 0x2e1   :  { %5726 = vmatprep.subr.bf16.mxu1 %v8223_v1  ;;  %v8292_v1 = vld [vmem:[#allocation5 + $0x112c] ss:$16 sps:$4 sm:$0xff]  }
 0x2e3   :  { %5684 = vmatpush1.bf16.msra.mxu0 %v8218_v54  ;;  %v8295_v54 = vld [vmem:[#allocation5 + $0x132c] ss:$16 sps:$4 sm:$0xff]  }
 0x2e4   :  { %5727 = vmatpush1.bf16.msra.mxu1 %v8221_v5  ;;  %5685 = vmatprep.subr.bf16.mxu0 %v8226_v22  ;;  %v8799_v5 = vpop.f32.mrf.mxu0  ;;  %v8290_v22 = vld [vmem:[#allocation5 + $0x1128] ss:$16 sps:$4 sm:$0xff]  }
 0x2e5   :  { %5728 = vmatprep.subr.bf16.mxu1 %v8229_v23  ;;  %v8293_v23 = vld [vmem:[#allocation5 + $0x1328] ss:$16 sps:$4 sm:$0xff]  }
 0x2e7   :  { %5686 = vmatpush1.bf16.msra.mxu0 %v8224_v6  ;;  %v8801_v6 = vpop.f32.mrf.mxu1 }
 0x2e8   :  { %5729 = vmatpush1.bf16.msra.mxu1 %v8227_v7  ;;  %5687 = vmatprep.subr.bf16.mxu0 %v8232_v10  ;;  %v8298_v7 = vld [vmem:[#allocation5 + $0x110c] ss:$16 sps:$4 sm:$0xff]  }
 0x2e9   :  { %5730 = vmatprep.subr.bf16.mxu1 %v8235_v11  ;;  %v8301_v10 = vld [vmem:[#allocation5 + $0x130c] ss:$16 sps:$4 sm:$0xff]   ;;  %v8803_v11 = vpop.f32.mrf.mxu0 }
 0x2eb   :  { %5688 = vmatpush1.bf16.msra.mxu0 %v8230_v30  ;;  %v8296_v30 = vld [vmem:[#allocation5 + $0x1108] ss:$16 sps:$4 sm:$0xff]  }
 0x2ec   :  { %5731 = vmatpush1.bf16.msra.mxu1 %v8233_v31  ;;  %5689 = vmatprep.subr.bf16.mxu0 %v8238_v14  ;;  %v8299_v31 = vld [vmem:[#allocation5 + $0x1308] ss:$16 sps:$4 sm:$0xff]   ;;  %v8805_v14 = vpop.f32.mrf.mxu1 }
 0x2ed   :  { %5732 = vmatprep.subr.bf16.mxu1 %v8241_v15  ;;  %v8807_v15 = vpop.f32.mrf.mxu0 }
 0x2ef   :  { %5690 = vmatpush1.bf16.msra.mxu0 %v8236_v16  ;;  %v8304_v16 = vld [vmem:[#allocation5 + $0x14ec] ss:$16 sps:$4 sm:$0xff]  }
 0x2f0   :  { %5733 = vmatpush1.bf16.msra.mxu1 %v8239_v17  ;;  %5691 = vmatprep.subr.bf16.mxu0 %v8244_v18  ;;  %v8307_v17 = vld [vmem:[#allocation5 + $0x16ec] ss:$16 sps:$4 sm:$0xff]   ;;  %v8302_v18 = vld [vmem:[#allocation5 + $0x14e8] ss:$16 sps:$4 sm:$0xff]  }
 0x2f1   :  { %5734 = vmatprep.subr.bf16.mxu1 %v8247_v19  ;;  %v8305_v19 = vld [vmem:[#allocation5 + $0x16e8] ss:$16 sps:$4 sm:$0xff]  }
 0x2f3   :  { %5692 = vmatpush1.bf16.msra.mxu0 %v8242_v20  ;;  %v8809_v20 = vpop.f32.mrf.mxu1 }
 0x2f4   :  { %5735 = vmatpush1.bf16.msra.mxu1 %v8245_v21  ;;  %5693 = vmatprep.subr.bf16.mxu0 %v8250_v24  ;;  %v8811_v21 = vpop.f32.mrf.mxu0  ;;  %v8310_v24 = vld [vmem:[#allocation5 + $0x14cc] ss:$16 sps:$4 sm:$0xff]  }
 0x2f5   :  { %5736 = vmatprep.subr.bf16.mxu1 %v8253_v12  ;;  %v8313_v12 = vld [vmem:[#allocation5 + $0x16cc] ss:$16 sps:$4 sm:$0xff]  }
 0x2f7   :  { %5694 = vmatpush1.bf16.msra.mxu0 %v8248_v25  ;;  %v8813_v25 = vpop.f32.mrf.mxu1 }
 0x2f8   :  { %5737 = vmatpush1.bf16.msra.mxu1 %v8251_v13  ;;  %5695 = vmatprep.subr.bf16.mxu0 %v8256_v26  ;;  %v8308_v13 = vld [vmem:[#allocation5 + $0x14c8] ss:$16 sps:$4 sm:$0xff]  }
 0x2f9   :  { %5738 = vmatprep.subr.bf16.mxu1 %v8259_v27  ;;  %v8311_v26 = vld [vmem:[#allocation5 + $0x16c8] ss:$16 sps:$4 sm:$0xff]   ;;  %v8817_v27 = vpop.f32.mrf.mxu0 }
 0x2fb   :  { %5696 = vmatpush2.bf16.msra.mxu0 %v8254_v32  ;;  %v8316_v32 = vld [vmem:[#allocation5 + $0x14ac] ss:$16 sps:$4 sm:$0xff]  }
 0x2fc   :  { %5739 = vmatpush2.bf16.msra.mxu1 %v8257_v45  ;;  %5697 = vmatprep.subr.bf16.mxu0 %v8262_v33  ;;  %v8319_v45 = vld [vmem:[#allocation5 + $0x16ac] ss:$16 sps:$4 sm:$0xff]   ;;  %v8821_v33 = vpop.f32.mrf.mxu1 }
 0x2fd   :  { %5740 = vmatprep.subr.bf16.mxu1 %v8265_v34  ;;  %v8823_v34 = vpop.f32.mrf.mxu0 }
 0x2ff   :  { %5698 = vmatpush2.bf16.msra.mxu0 %v8260_v35  ;;  %v8322_v35 = vld [vmem:[#allocation5 + $0x148c] ss:$16 sps:$4 sm:$0xff]  }
 0x300   :  { %5741 = vmatpush2.bf16.msra.mxu1 %v8263_v36  ;;  %5699 = vmatprep.subr.bf16.mxu0 %v8268_v38  ;;  %v8325_v36 = vld [vmem:[#allocation5 + $0x168c] ss:$16 sps:$4 sm:$0xff]   ;;  %v959_v38 = vlaneseq }
 0x301   :  { %5742 = vmatprep.subr.bf16.mxu1 %v8271_v39  ;;  %v8825_v39 = vpop.f32.mrf.mxu1 }
 0x303   :  { %5700 = vmatpush2.bf16.msra.mxu0 %v8266_v44  ;;  %v8827_v44 = vpop.f32.mrf.mxu0 }
 0x304   :  { %5743 = vmatpush2.bf16.msra.mxu1 %v8269_v28  ;;  %5701 = vmatprep.subr.bf16.mxu0 %v8274_v48  ;;  %v8328_v28 = vld [vmem:[#allocation5 + $0x146c] ss:$16 sps:$4 sm:$0xff]  }
 0x305   :  { %5744 = vmatprep.subr.bf16.mxu1 %v8277_v49  ;;  %v8331_v48 = vld [vmem:[#allocation5 + $0x166c] ss:$16 sps:$4 sm:$0xff]   ;;  %v8829_v49 = vshrl.u32 %v959_v38, 7 }
 0x307   :  { %5702 = vmatpush2.bf16.msra.mxu0 %v8272_v51  ;;  %v8831_v51 = vpop.f32.mrf.mxu1 }
 0x308   :  { %5745 = vmatpush2.bf16.msra.mxu1 %v8275_v40  ;;  %5703 = vmatprep.subr.bf16.mxu0 %v8280_v52  ;;  %v8833_v40 = vpop.f32.mrf.mxu0  ;;  %v8326_v52 = vld [vmem:[#allocation5 + $0x1468] ss:$16 sps:$4 sm:$0xff]  }
 0x309   :  { %5746 = vmatprep.subr.bf16.mxu1 %v8283_v55  ;;  %v8329_v55 = vld [vmem:[#allocation5 + $0x1668] ss:$16 sps:$4 sm:$0xff]  }
 0x30b   :  { %5704 = vmatpush2.bf16.msra.mxu0 %v8278_v60  ;;  %v8835_v60 = vpop.f32.mrf.mxu1 }
 0x30c   :  { %5747 = vmatpush2.bf16.msra.mxu1 %v8281_v61  ;;  %5705 = vmatprep.subr.bf16.mxu0 %v8286_v58  ;;  %v8334_v61 = vld [vmem:[#allocation5 + $0x144c] ss:$16 sps:$4 sm:$0xff]  }
 0x30d   :  { %5748 = vmatprep.subr.bf16.mxu1 %v8289_v59  ;;  %v8337_v58 = vld [vmem:[#allocation5 + $0x164c] ss:$16 sps:$4 sm:$0xff]   ;;  %v965_v59 = vsub.s32 1, %v8829_v49 }
 0x30f   :  { %5706 = vmatpush2.bf16.msra.mxu0 %v8284_v4  ;;  %v8838_v4 = vld [vmem:[#allocation7] sm:$0xf] }
 0x310   :  { %5749 = vmatpush2.bf16.msra.mxu1 %v8287_v53  ;;  %5707 = vmatprep.subr.bf16.mxu0 %v8292_v1  ;;  %v8840_v53 = vpop.f32.mrf.mxu0  ;;  %v8332_v1 = vld [vmem:[#allocation5 + $0x1448] ss:$16 sps:$4 sm:$0xff]  }
 0x311   :  { %5750 = vmatprep.subr.bf16.mxu1 %v8295_v54  ;;  %v8335_v54 = vld [vmem:[#allocation5 + $0x1648] ss:$16 sps:$4 sm:$0xff]  }
 0x313   :  { %5708 = vmatpush2.bf16.msra.mxu0 %v8290_v22  ;;  %v8842_v22 = vpop.f32.mrf.mxu1 }
 0x314   :  { %5751 = vmatpush2.bf16.msra.mxu1 %v8293_v23  ;;  %5709 = vmatprep.subr.bf16.mxu0 %v8298_v7  ;;  %v8340_v23 = vld [vmem:[#allocation5 + $0x142c] ss:$16 sps:$4 sm:$0xff]  }
 0x315   :  { %5752 = vmatprep.subr.bf16.mxu1 %v8301_v10  ;;  %v8343_v7 = vld [vmem:[#allocation5 + $0x162c] ss:$16 sps:$4 sm:$0xff]   ;;  %v966_v10 = vrot.slane %v8838_v4, %v965_v59 }
 0x317   :  { %5710 = vmatpush2.bf16.msra.mxu0 %v8296_v30  ;;  %v8845_v30 = vpop.f32.mrf.mxu0 }
 0x318   :  { %5753 = vmatpush2.bf16.msra.mxu1 %v8299_v31  ;;  %5765 = vmatprep.subr.bf16.mxu0 %v8304_v16  ;;  %v4860_v31 = vadd.f32 %v8787_v46, %v966_v10  ;;  %v8338_v16 = vld [vmem:[#allocation5 + $0x1428] ss:$16 sps:$4 sm:$0xff]  }
 0x319   :  { %5808 = vmatprep.subr.bf16.mxu1 %v8307_v17  ;;  %v8341_v17 = vld [vmem:[#allocation5 + $0x1628] ss:$16 sps:$4 sm:$0xff]  }
 0x31a   :  { %5712 = vmatmul.mubr.bf16.vlgmr.msra.gmra.mxu0 %v8741_v2  ;;  %v8314_v2 = vld [vmem:[#allocation5 + $0x14a8] ss:$16 sps:$4 sm:$0xff]  }
 0x31b   :  { %5755 = vmatmul.mubr.bf16.vlgmr.msra.gmra.mxu1 %v8743_v3  ;;  %5766 = vmatpush1.bf16.msra.mxu0 %v8302_v18  ;;  %v8317_v3 = vld [vmem:[#allocation5 + $0x16a8] ss:$16 sps:$4 sm:$0xff]   ;;  %v8848_v18 = vpop.f32.mrf.mxu1 }
 0x31c   :  { %5809 = vmatpush1.bf16.msra.mxu1 %v8305_v19  ;;  %5767 = vmatprep.subr.bf16.mxu0 %v8310_v24  ;;  %v8850_v19 = vpop.f32.mrf.mxu0  ;;  %v8346_v24 = vld [vmem:[#allocation5 + $0x140c] ss:$16 sps:$4 sm:$0xff]   ;;  %v8347_v46 = vld [vmem:[#allocation5 + $0x1608] ss:$16 sps:$4 sm:$0xff]  }
 0x31d   :  { %5810 = vmatprep.subr.bf16.mxu1 %v8313_v12  ;;  %5797 = vmatprep.mubr.bf16.mxu0 %v8745_v8  ;;  %v8320_v8 = vld [vmem:[#allocation5 + $0x1488] ss:$16 sps:$4 sm:$0xff]   ;;  %v8349_v12 = vld [vmem:[#allocation5 + $0x160c] ss:$16 sps:$4 sm:$0xff]  }
 0x31e   :  { %5840 = vmatprep.mubr.bf16.mxu1 %v8747_v9  ;;  %v8323_v9 = vld [vmem:[#allocation5 + $0x1688] ss:$16 sps:$4 sm:$0xff]  }
 0x31f   :  { %5768 = vmatpush1.bf16.msra.mxu0 %v8308_v13  ;;  %v4856_v13 = vadd.f32 %v8779_v37, %v966_v10 }
 0x320   :  { %5811 = vmatpush1.bf16.msra.mxu1 %v8311_v26  ;;  %5769 = vmatprep.subr.bf16.mxu0 %v8316_v32  ;;  %v4903_v26 = vadd.f32 %v8793_v62, %v4860_v31  ;;  %v8344_v32 = vld [vmem:[#allocation5 + $0x1408] ss:$16 sps:$4 sm:$0xff]   ;;  %v8370_v31 = vld [vmem:[#allocation5 + $0x158c] ss:$16 sps:$4 sm:$0xff]  }
 0x321   :  { %5812 = vmatprep.subr.bf16.mxu1 %v8319_v45  ;;  %v5160_v45 = vpop.f32.mrf.mxu1  ;;  %v8350_v62 = vld [vmem:[#allocation5 + $0x15e8] ss:$16 sps:$4 sm:$0xff]  }
 0x322   :  { %v4946_v38 = vadd.f32 %v8803_v11, %v4903_v26  ;;  %v8368_v26 = vld [vmem:[#allocation5 + $0x1588] ss:$16 sps:$4 sm:$0xff]  }
 0x323   :  { %5770 = vmatpush1.bf16.msra.mxu0 %v8314_v2  ;;  %v8854_v2 = vpop.f32.mrf.mxu0 }
 0x324   :  { %5813 = vmatpush1.bf16.msra.mxu1 %v8317_v3  ;;  %5771 = vmatprep.subr.bf16.mxu0 %v8322_v35  ;;  %v8352_v3 = vld [vmem:[#allocation5 + $0x15ec] ss:$16 sps:$4 sm:$0xff]  }
 0x325   :  { %5814 = vmatprep.subr.bf16.mxu1 %v8325_v36  ;;  %v8355_v35 = vld [vmem:[#allocation5 + $0x17ec] ss:$16 sps:$4 sm:$0xff]   ;;  %v4899_v36 = vadd.f32 %v8785_v50, %v4856_v13 }
 0x327   :  { %5772 = vmatpush1.bf16.msra.mxu0 %v8320_v8  ;;  %v8858_v8 = vpop.f32.mrf.mxu1  ;;  %v4942_v37 = vadd.f32 %v8795_v63, %v4899_v36  ;;  %v8356_v63 = vld [vmem:[#allocation5 + $0x15c8] ss:$16 sps:$4 sm:$0xff]  }
 0x328   :  { %5815 = vmatpush1.bf16.msra.mxu1 %v8323_v9  ;;  %5773 = vmatprep.subr.bf16.mxu0 %v8328_v28  ;;  %v8353_v9 = vld [vmem:[#allocation5 + $0x17e8] ss:$16 sps:$4 sm:$0xff]   ;;  %v8861_v28 = vpop.f32.mrf.mxu0 }
 0x329   :  { %5816 = vmatprep.subr.bf16.mxu1 %v8331_v48  ;;  %v8358_v48 = vld [vmem:[#allocation5 + $0x15cc] ss:$16 sps:$4 sm:$0xff]   ;;  %v4985_v50 = vadd.f32 %v8801_v6, %v4942_v37  ;;  %v8362_v6 = vld [vmem:[#allocation5 + $0x15a8] ss:$16 sps:$4 sm:$0xff]   ;;  %v961_v37 = vsub.s32 0, %v8829_v49 }
 0x32a   :  { %v5203_v59 = vpop.f32.mrf.mxu0 }
 0x32b   :  { %5774 = vmatpush1.bf16.msra.mxu0 %v8326_v52  ;;  %v8361_v52 = vld [vmem:[#allocation5 + $0x17cc] ss:$16 sps:$4 sm:$0xff]  }
 0x32c   :  { %5817 = vmatpush1.bf16.msra.mxu1 %v8329_v55  ;;  %5775 = vmatprep.subr.bf16.mxu0 %v8334_v61  ;;  %v4989_v55 = vadd.f32 %v8809_v20, %v4946_v38  ;;  %v8864_v61 = vpop.f32.mrf.mxu1  ;;  %v8871_v20 = vpop.f32.mrf.mxu0  ;;  %v8374_v38 = vld [vmem:[#allocation5 + $0x1568] ss:$16 sps:$4 sm:$0xff]  }
 0x32d   :  { %5818 = vmatprep.subr.bf16.mxu1 %v8337_v58  ;;  %v8359_v58 = vld [vmem:[#allocation5 + $0x17c8] ss:$16 sps:$4 sm:$0xff]  }
 0x32e   :  { %v5032_v11 = vadd.f32 %v8823_v34, %v4989_v55  ;;  %v8365_v34 = vld [vmem:[#allocation5 + $0x17a8] ss:$16 sps:$4 sm:$0xff]  }
 0x32f   :  { %5776 = vmatpush1.bf16.msra.mxu0 %v8332_v1  ;;  %v8364_v1 = vld [vmem:[#allocation5 + $0x15ac] ss:$16 sps:$4 sm:$0xff]  }
 0x330   :  { %5819 = vmatpush1.bf16.msra.mxu1 %v8335_v54  ;;  %5777 = vmatprep.subr.bf16.mxu0 %v8340_v23  ;;  %v8367_v54 = vld [vmem:[#allocation5 + $0x17ac] ss:$16 sps:$4 sm:$0xff]   ;;  %v5028_v23 = vadd.f32 %v8811_v21, %v4985_v50  ;;  %v5075_v10 = vadd.f32 %v8831_v51, %v5032_v11  ;;  %v5285_v21 = vpop.f32.mrf.mxu0  ;;  %v8371_v51 = vld [vmem:[#allocation5 + $0x1788] ss:$16 sps:$4 sm:$0xff]   ;;  %v962_v11 = vrot.slane %v8838_v4, %v961_v37 }
 0x331   :  { %5820 = vmatprep.subr.bf16.mxu1 %v8343_v7  ;;  %v8869_v7 = vpop.f32.mrf.mxu1  ;;  %v8380_v50 = vld [vmem:[#allocation5 + $0x1548] ss:$16 sps:$4 sm:$0xff]   ;;  %v8403_v37 = vld [vmem:[#allocation8 + $0x28] sm:$0xff]  }
 0x332   :  { %v8879_v36 = vpop.f32.mrf.mxu0 }
 0x333   :  { %5778 = vmatpush1.bf16.msra.mxu0 %v8338_v16  ;;  %v8373_v16 = vld [vmem:[#allocation5 + $0x178c] ss:$16 sps:$4 sm:$0xff]  }
 0x334   :  { %5821 = vmatpush1.bf16.msra.mxu1 %v8341_v17  ;;  %5779 = vmatprep.subr.bf16.mxu0 %v8346_v24  ;;  %v5071_v17 = vadd.f32 %v8821_v33, %v5028_v23  ;;  %v5118_v24 = vadd.f32 %v8845_v30, %v5075_v10  ;;  %v5289_v55 = vpop.f32.mrf.mxu0  ;;  %v4858_v23 = vadd.f32 %v8783_v29, %v962_v11  ;;  %v8386_v10 = vld [vmem:[#allocation5 + $0x1528] ss:$16 sps:$4 sm:$0xff]  }
 0x335   :  { %5822 = vmatprep.subr.bf16.mxu1 %v8349_v12  ;;  %v5246_v12 = vpop.f32.mrf.mxu1  ;;  %v8395_v29 = vld [vmem:[#allocation5 + $0x1708] ss:$16 sps:$4 sm:$0xff]  }
 0x336   :  { %v5114_v13 = vadd.f32 %v8833_v40, %v5071_v17  ;;  %v8377_v40 = vld [vmem:[#allocation5 + $0x1768] ss:$16 sps:$4 sm:$0xff]   ;;  %v8397_v17 = vld [vmem:[#allocation5 + $0x170c] ss:$16 sps:$4 sm:$0xff]  }
 0x337   :  { %5780 = vmatpush1.bf16.msra.mxu0 %v8344_v32  ;;  %v8877_v32 = vpop.f32.mrf.mxu1 }
 0x338   :  { %5823 = vmatpush1.bf16.msra.mxu1 %v8347_v46  ;;  %5781 = vmatprep.subr.bf16.mxu0 %v8352_v3  ;;  %v8376_v46 = vld [vmem:[#allocation5 + $0x156c] ss:$16 sps:$4 sm:$0xff]   ;;  %v5157_v33 = vadd.f32 %v8842_v22, %v5114_v13  ;;  %v8383_v22 = vld [vmem:[#allocation5 + $0x1748] ss:$16 sps:$4 sm:$0xff]  }
 0x339   :  { %5824 = vmatprep.subr.bf16.mxu1 %v8355_v35  ;;  %v8379_v3 = vld [vmem:[#allocation5 + $0x176c] ss:$16 sps:$4 sm:$0xff]   ;;  %v5161_v35 = vadd.f32 %v5160_v45, %v5118_v24 }
 0x33b   :  { %5782 = vmatpush2.bf16.msra.mxu0 %v8350_v62  ;;  %v5204_v30 = vadd.f32 %v5203_v59, %v5161_v35  ;;  %v5328_v62 = vpop.f32.mrf.mxu1  ;;  %v8391_v59 = vld [vmem:[#allocation5 + $0x172c] ss:$16 sps:$4 sm:$0xff]  }
 0x33c   :  { %5825 = vmatpush2.bf16.msra.mxu1 %v8353_v9  ;;  %5783 = vmatprep.subr.bf16.mxu0 %v8358_v48  ;;  %v8382_v9 = vld [vmem:[#allocation5 + $0x154c] ss:$16 sps:$4 sm:$0xff]  }
 0x33d   :  { %5826 = vmatprep.subr.bf16.mxu1 %v8361_v52  ;;  %v8385_v48 = vld [vmem:[#allocation5 + $0x174c] ss:$16 sps:$4 sm:$0xff]   ;;  %v5200_v52 = vadd.f32 %v8854_v2, %v5157_v33  ;;  %v5247_v45 = vadd.f32 %v5246_v12, %v5204_v30  ;;  %v4901_v12 = vadd.f32 %v8789_v56, %v4858_v23  ;;  %v8400_v33 = vld [vmem:[#allocation8 + $0x70] sm:$0xff]  }
 0x33e   :  { %v8399_v35 = vld [vmem:[#allocation8 + $0x38] sm:$0xff]   ;;  %v8411_v23 = vld [vmem:[#allocation8 + $0x8] sm:$0xff]  }
 0x33f   :  { %5784 = vmatpush2.bf16.msra.mxu0 %v8356_v63  ;;  %v8885_v63 = vpop.f32.mrf.mxu1 }
 0x340   :  { %5827 = vmatpush2.bf16.msra.mxu1 %v8359_v58  ;;  %5785 = vmatprep.subr.bf16.mxu0 %v8364_v1  ;;  %v8388_v58 = vld [vmem:[#allocation5 + $0x152c] ss:$16 sps:$4 sm:$0xff]   ;;  %v5243_v1 = vadd.f32 %v8864_v61, %v5200_v52  ;;  %v8392_v61 = vld [vmem:[#allocation5 + $0x1508] ss:$16 sps:$4 sm:$0xff]  }
 0x341   :  { %5828 = vmatprep.subr.bf16.mxu1 %v8367_v54  ;;  %v5290_v54 = vadd.f32 %v5289_v55, %v5247_v45  ;;  %v8416_v52 = vld [vmem:[#allocation8 + $0xf0] sm:$0xff]   ;;  %v8406_v55 = vld [vmem:[#allocation8 + $0x58] sm:$0xff]  }
 0x342   :  { %v5286_v2 = vadd.f32 %v5285_v21, %v5243_v1  ;;  %v8407_v45 = vld [vmem:[#allocation8 + $0x18] sm:$0xff]   ;;  %v8410_v1 = vld [vmem:[#allocation8 + $0x48] sm:$0xff]  }
 0x343   :  { %5786 = vmatpush2.bf16.msra.mxu0 %v8362_v6  ;;  %v8389_v6 = vld [vmem:[#allocation5 + $0x1728] ss:$16 sps:$4 sm:$0xff]  }
 0x344   :  { %5829 = vmatpush2.bf16.msra.mxu1 %v8365_v34  ;;  %5787 = vmatprep.subr.bf16.mxu0 %v8370_v31  ;;  %v4854_v34 = vadd.f32 %v8777_v47, %v962_v11  ;;  %v5332_v31 = vpop.f32.mrf.mxu1  ;;  %v5329_v13 = vadd.f32 %v5328_v62, %v5286_v2  ;;  %v8398_v47 = vld [vmem:[#allocation8 + $0x78] sm:$0xff]   ;;  %v8412_v2 = vld [vmem:[#allocation8 + $0x40] sm:$0xff]  }
 0x345   :  { %5830 = vmatprep.subr.bf16.mxu1 %v8373_v16  ;;  %v8394_v16 = vld [vmem:[#allocation5 + $0x150c] ss:$16 sps:$4 sm:$0xff]   ;;  %v5333_v24 = vadd.f32 %v5332_v31, %v5290_v54 }
 0x346   :  { %v4897_v21 = vadd.f32 %v8781_v43, %v4854_v34  ;;  %v8423_v31 = vld [vmem:[#allocation8 + $0x98] sm:$0xff]  }
 0x347   :  { %5788 = vmatpush2.bf16.msra.mxu0 %v8368_v26  ;;  %v4944_v26 = vadd.f32 %v8799_v5, %v4901_v12  ;;  %v8429_v12 = vld [vmem:[#allocation8 + $0x80] sm:$0xff]  }
 0x348   :  { %5831 = vmatpush2.bf16.msra.mxu1 %v8371_v51  ;;  %5789 = vmatprep.subr.bf16.mxu0 %v8376_v46  ;;  %v5856_v51 = vmax.f32 %v5333_v24, 0.0  ;;  %v4940_v46 = vadd.f32 %v8791_v57, %v4897_v21  ;;  %v8401_v57 = vld [vmem:[#allocation8 + $0x30] sm:$0xff]   ;;  %v8427_v24 = vld [vmem:[#allocation8 + $0x88] sm:$0xff]  }
 0x349   :  { %5832 = vmatprep.subr.bf16.mxu1 %v8379_v3  ;;  %v5852_v3 = vmax.f32 %v5329_v13, 0.0  ;;  %v4987_v56 = vadd.f32 %v8805_v14, %v4944_v26  ;;  %v8430_v13 = vld [vmem:[#allocation11 + $0x38] sm:$0xff]   ;;  %v8432_v21 = vld [vmem:[#allocation11 + $0x28] sm:$0xff]   ;;  %v8433_v26 = vld [vmem:[#allocation11 + $0x20] sm:$0xff]  }
 0x34b   :  { %5790 = vmatpush2.bf16.msra.mxu0 %v8374_v38  ;;  %v5860_v30 = vpack.c.bf16 %v5856_v51, %v5852_v3  ;;  %v4983_v38 = vadd.f32 %v8797_v0, %v4940_v46  ;;  %v5030_v43 = vadd.f32 %v8817_v27, %v4987_v56  ;;  %v8404_v27 = vld [vmem:[#allocation8 + $0x60] sm:$0xff]   ;;  %v5412_v51 = vpop.f32.mrf.mxu1 }
 0x34c   :  { %5833 = vmatpush2.bf16.msra.mxu1 %v8377_v40  ;;  %5791 = vmatprep.subr.bf16.mxu0 %v8382_v9  ;;  %v8402_v40 = vld [vmem:[#allocation8 + $0x68] sm:$0xff]   ;;  %v8414_v9 = vld [vmem:[#allocation8 + $0xf8] sm:$0xff]  }
 0x34d   :  { %5834 = vmatprep.subr.bf16.mxu1 %v8385_v48  ;;  %v5026_v5 = vadd.f32 %v8807_v15, %v4983_v38  ;;  %v5073_v14 = vadd.f32 %v8825_v39, %v5030_v43  ;;  %v8415_v48 = vld [vmem:[#allocation8 + $0xb8] sm:$0xff]   ;;  %v5414_v3 = vpop.f32.mrf.mxu1 }
 0x34f   :  { %5792 = vmatpush2.bf16.msra.mxu0 %v8380_v50  ;;  %v5069_v62 = vadd.f32 %v8813_v25, %v5026_v5  ;;  %v5116_v0 = vadd.f32 %v8840_v53, %v5073_v14  ;;  %v8417_v53 = vld [vmem:[#allocation8 + $0xb0] sm:$0xff]   ;;  %v5416_v56 = vpop.f32.mrf.mxu1 }
 0x350   :  { %5835 = vmatpush2.bf16.msra.mxu1 %v8383_v22  ;;  %5793 = vmatprep.subr.bf16.mxu0 %v8388_v58  ;;  %v8408_v22 = vld [vmem:[#allocation8 + $0x50] sm:$0xff]  }
 0x351   :  { %5836 = vmatprep.subr.bf16.mxu1 %v8391_v59  ;;  %v5159_v15 = vadd.f32 %v8848_v18, %v5116_v0  ;;  %v8419_v18 = vld [vmem:[#allocation8 + $0xa8] sm:$0xff]   ;;  %v8409_v58 = vld [vmem:[#allocation8 + $0x10] sm:$0xff]  }
 0x353   :  { %5794 = vmatpush2.bf16.msra.mxu0 %v8386_v10  ;;  %v5202_v25 = vadd.f32 %v8861_v28, %v5159_v15 }
 0x354   :  { %5837 = vmatpush2.bf16.msra.mxu1 %v8389_v6  ;;  %5795 = vmatprep.subr.bf16.mxu0 %v8394_v16  ;;  %v8424_v16 = vld [vmem:[#allocation8 + $0xd0] sm:$0xff]  }
 0x355   :  { %5838 = vmatprep.subr.bf16.mxu1 %v8397_v17  ;;  %v5245_v11 = vadd.f32 %v8869_v7, %v5202_v25  ;;  %v8425_v17 = vld [vmem:[#allocation8 + $0x90] sm:$0xff]  }
 0x357   :  { %5796 = vmatpush2.bf16.msra.mxu0 %v8392_v61  ;;  %v5288_v59 = vadd.f32 %v8879_v36, %v5245_v11  ;;  %v8621_v61 = vmov 0.0  }
 0x358   :  { %5839 = vmatpush2.bf16.msra.mxu1 %v8395_v29  ;;  %7155 = vmatprep.subr.bf16.mxu0 %v8398_v47  ;;  %v8431_v29 = vld [vmem:[#allocation11 + $0x30] sm:$0xff]   ;;  %v5369_v47 = vpop.f32.mrf.mxu0 }
 0x359   :  { %7177 = vmatprep.subr.bf16.mxu1 %v8414_v9  ;;  %v5331_v7 = vadd.f32 %v8885_v63, %v5288_v59  ;;  %v8426_v63 = vld [vmem:[#allocation8 + $0xc8] sm:$0xff]   ;;  %v973_v9 = vsub.s32 3, %v8829_v49 }
 0x35a   :  { %5798 = vmatmul.mubr.bf16.vlgmr.msra.gmra.mxu0 %v8753_v41  ;;  %v5112_v41 = vadd.f32 %v8827_v44, %v5069_v62  ;;  %v8418_v44 = vld [vmem:[#allocation8 + $0xe8] sm:$0xff]   ;;  %v5371_v46 = vpop.f32.mrf.mxu0 }
 0x35b   :  { %5841 = vmatmul.mubr.bf16.vlgmr.msra.gmra.mxu1 %v8755_v42  ;;  %7156 = vmatpush3.bf16.msra.mxu0 %v8399_v35  ;;  %v8405_v42 = vld [vmem:[#allocation8 + $0x20] sm:$0xff]   ;;  %v5855_v6 = vmax.f32 %v5331_v7, 0.0 }
 0x35c   :  { %6158 = vmatprep.mubr.bf16.mxu0 %v5860_v30  ;;  %7157 = vmatprep.subr.bf16.mxu0 %v8400_v33  ;;  %v5155_v39 = vadd.f32 %v8835_v60, %v5112_v41  ;;  %v8420_v60 = vld [vmem:[#allocation8 + $0xe0] sm:$0xff]   ;;  %v5373_v35 = vpop.f32.mrf.mxu0  ;;  %v5418_v30 = vpop.f32.mrf.mxu1 }
 0x35d   :  { %7178 = vmatpush3.bf16.msra.mxu1 %v8415_v48  ;;  %v969_v48 = vsub.s32 2, %v8829_v49 }
 0x35e   :  { %7179 = vmatprep.subr.bf16.mxu1 %v8416_v52  ;;  %v5198_v50 = vadd.f32 %v8850_v19, %v5155_v39  ;;  %v8421_v19 = vld [vmem:[#allocation8 + $0xa0] sm:$0xff]   ;;  %v5375_v33 = vpop.f32.mrf.mxu0  ;;  %v5498_v43 = vpop.f32.mrf.mxu1 }
 0x35f   :  { %7158 = vmatpush3.bf16.msra.mxu0 %v8401_v57  ;;  %v970_v39 = vrot.slane %v8838_v4, %v969_v48 }
 0x360   :  { %7159 = vmatprep.subr.bf16.mxu0 %v8402_v40  ;;  %v5241_v28 = vadd.f32 %v8858_v8, %v5198_v50  ;;  %v8413_v8 = vld [vmem:[#allocation8] sm:$0xff]   ;;  %v5455_v38 = vpop.f32.mrf.mxu0  ;;  %v5500_v5 = vpop.f32.mrf.mxu1 }
 0x361   :  { %7180 = vmatpush3.bf16.msra.mxu1 %v8417_v53  ;;  %v5374_v11 = vadd.f32 %v5373_v35, %v970_v39 }
 0x362   :  { %7181 = vmatprep.subr.bf16.mxu1 %v8418_v44  ;;  %v5284_v54 = vadd.f32 %v8871_v20, %v5241_v28  ;;  %v8422_v20 = vld [vmem:[#allocation8 + $0xd8] sm:$0xff]   ;;  %v5457_v57 = vpop.f32.mrf.mxu0  ;;  %v5502_v14 = vpop.f32.mrf.mxu1 }
 0x363   :  { %7160 = vmatpush3.bf16.msra.mxu0 %v8403_v37 }
 0x364   :  { %7161 = vmatprep.subr.bf16.mxu0 %v8404_v27  ;;  %v5327_v10 = vadd.f32 %v8877_v32, %v5284_v54  ;;  %v8428_v32 = vld [vmem:[#allocation8 + $0xc0] sm:$0xff]   ;;  %v5459_v40 = vpop.f32.mrf.mxu0  ;;  %v5504_v62 = vpop.f32.mrf.mxu1 }
 0x365   :  { %7182 = vmatpush3.bf16.msra.mxu1 %v8419_v18 }
 0x366   :  { %7183 = vmatprep.subr.bf16.mxu1 %v8420_v60  ;;  %v5851_v36 = vmax.f32 %v5327_v10, 0.0  ;;  %v5461_v37 = vpop.f32.mrf.mxu0  ;;  %v5584_v27 = vpop.f32.mrf.mxu1 }
 0x367   :  { %7162 = vmatpush3.bf16.msra.mxu0 %v8405_v42 }
 0x368   :  { %7163 = vmatprep.subr.bf16.mxu0 %v8406_v55  ;;  %v5859_v34 = vpack.c.bf16 %v5855_v6, %v5851_v36  ;;  %v5541_v0 = vpop.f32.mrf.mxu0  ;;  %v5586_v42 = vpop.f32.mrf.mxu1  ;;  %v974_v55 = vrot.slane %v8838_v4, %v973_v9 }
 0x369   :  { %7184 = vmatpush3.bf16.msra.mxu1 %v8421_v19 }
 0x36a   :  { %7185 = vmatprep.subr.bf16.mxu1 %v8422_v20  ;;  %v5543_v41 = vpop.f32.mrf.mxu0  ;;  %v5588_v15 = vpop.f32.mrf.mxu1  ;;  %v5372_v50 = vadd.f32 %v5371_v46, %v974_v55  ;;  %v5376_v28 = vadd.f32 %v5375_v33, %v974_v55 }
 0x36b   :  { %7164 = vmatpush3.bf16.msra.mxu0 %v8407_v45 }
 0x36c   :  { %7165 = vmatprep.subr.bf16.mxu0 %v8408_v22  ;;  %v5545_v52 = vpop.f32.mrf.mxu0  ;;  %v5590_v53 = vpop.f32.mrf.mxu1  ;;  %v5370_v22 = vadd.f32 %v5369_v47, %v970_v39  ;;  %v5415_v60 = vadd.f32 %v5414_v3, %v5372_v50  ;;  %v5419_v7 = vadd.f32 %v5418_v30, %v5376_v28 }
 0x36d   :  { %7186 = vmatpush3.bf16.msra.mxu1 %v8423_v31 }
 0x36e   :  { %7187 = vmatprep.subr.bf16.mxu1 %v8424_v16  ;;  %v5547_v25 = vpop.f32.mrf.mxu0  ;;  %v5413_v59 = vadd.f32 %v5412_v51, %v5370_v22  ;;  %v5458_v49 = vadd.f32 %v5457_v57, %v5415_v60  ;;  %v5462_v10 = vadd.f32 %v5461_v37, %v5419_v7  ;;  %v8434_v7 = vld [vmem:[#allocation11 + $0x18] sm:$0xff]  }
 0x36f   :  { %7166 = vmatpush3.bf16.msra.mxu0 %v8409_v58 }
 0x370   :  { %7167 = vmatprep.subr.bf16.mxu0 %v8410_v1  ;;  %v5417_v1 = vadd.f32 %v5416_v56, %v5374_v11  ;;  %v5456_v54 = vadd.f32 %v5455_v38, %v5413_v59  ;;  %v5501_v4 = vadd.f32 %v5500_v5, %v5458_v49 }
 0x371   :  { %7188 = vmatpush3.bf16.msra.mxu1 %v8425_v17 }
 0x372   :  { %7189 = vmatprep.subr.bf16.mxu1 %v8426_v63  ;;  %v5544_v20 = vadd.f32 %v5543_v41, %v5501_v4  ;;  %v5505_v63 = vadd.f32 %v5504_v62, %v5462_v10  ;;  %v8436_v4 = vld [vmem:[#allocation11 + $0x8] sm:$0xff]   ;;  %v8437_v10 = vld [vmem:[#allocation11] sm:$0xff]  }
 0x373   :  { %7168 = vmatpush3.bf16.msra.mxu0 %v8411_v23 }
 0x374   :  { %7169 = vmatprep.subr.bf16.mxu0 %v8412_v2  ;;  %v5460_v2 = vadd.f32 %v5459_v40, %v5417_v1 }
 0x375   :  { %7190 = vmatpush3.bf16.msra.mxu1 %v8427_v24 }
 0x376   :  { %7191 = vmatprep.subr.bf16.mxu1 %v8428_v32  ;;  %v5587_v32 = vadd.f32 %v5586_v42, %v5544_v20 }
 0x377   :  { %7170 = vmatpush3.bf16.msra.mxu0 %v8413_v8  ;;  %v5499_v8 = vadd.f32 %v5498_v43, %v5456_v54 }
 0x378   :  { %7208 = vmatprep.subr.bf16.mxu0 %v8621_v61 }
 0x379   :  { %7192 = vmatpush3.bf16.msra.mxu1 %v8429_v12  ;;  %v5542_v31 = vadd.f32 %v5541_v0, %v5499_v8  ;;  %v5548_v12 = vadd.f32 %v5547_v25, %v5505_v63 }
 0x37a   :  { %6159 = vmatmul.mubr.bf16.vlgmr.msra.gmra.mxu0 %v5859_v34  ;;  %v5503_v34 = vadd.f32 %v5502_v14, %v5460_v2  ;;  %v8435_v2 = vld [vmem:[#allocation11 + $0x10] sm:$0xff]  }
 0x37b   :  { %7209 = vmatpush3.bf16.msra.mxu0 %v8430_v13  ;;  %v5585_v13 = vadd.f32 %v5584_v27, %v5542_v31  ;;  %v5591_v46 = vadd.f32 %v5590_v53, %v5548_v12  ;;  %7224 = vmatprep.mubr.msk.bf16.mxu0 %vm8622_vm0, %v8621_v61 }
 0x37c   :  { %7210 = vmatprep.subr.bf16.mxu0 %v8621_v61  ;;  %v5546_v24 = vadd.f32 %v5545_v52, %v5503_v34 }
 0x37f   :  { %7211 = vmatpush3.bf16.msra.mxu0 %v8431_v29 }
 0x380   :  { %7212 = vmatprep.subr.bf16.mxu0 %v8621_v61 }
 0x383   :  { %7213 = vmatpush3.bf16.msra.mxu0 %v8432_v21 }
 0x384   :  { %7214 = vmatprep.subr.bf16.mxu0 %v8621_v61 }
 0x387   :  { %7215 = vmatpush3.bf16.msra.mxu0 %v8433_v26  ;;  %v5589_v26 = vadd.f32 %v5588_v15, %v5546_v24 }
 0x388   :  { %7216 = vmatprep.subr.bf16.mxu0 %v8621_v61 }
 0x38b   :  { %7217 = vmatpush3.bf16.msra.mxu0 %v8434_v7 }
 0x38c   :  { %7218 = vmatprep.subr.bf16.mxu0 %v8621_v61 }
 0x38f   :  { %7219 = vmatpush3.bf16.msra.mxu0 %v8435_v2 }
 0x390   :  { %7220 = vmatprep.subr.bf16.mxu0 %v8621_v61 }
 0x393   :  { %7221 = vmatpush3.bf16.msra.mxu0 %v8436_v4 }
 0x394   :  { %7222 = vmatprep.subr.bf16.mxu0 %v8621_v61 }
 0x397   :  { %7223 = vmatpush3.bf16.msra.mxu0 %v8437_v10 }
 0x39a   :  { %v5627_v45 = vpop.f32.mrf.mxu0 }
 0x39b   :  { %v5670_v44 = vpop.f32.mrf.mxu1  ;;  %v5628_v51 = vadd.f32 %v5627_v45, %v5585_v13 }
 0x39c   :  { %v5629_v18 = vpop.f32.mrf.mxu0 }
 0x39d   :  { %v5672_v58 = vpop.f32.mrf.mxu1  ;;  %v5630_v47 = vadd.f32 %v5629_v18, %v5587_v32  ;;  %v5671_v38 = vadd.f32 %v5670_v44, %v5628_v51 }
 0x39e   :  { %v5631_v19 = vpop.f32.mrf.mxu0 }
 0x39f   :  { %v5674_v23 = vpop.f32.mrf.mxu1  ;;  %v5632_v3 = vadd.f32 %v5631_v19, %v5589_v26  ;;  %v5673_v33 = vadd.f32 %v5672_v58, %v5630_v47 }
 0x3a0   :  { %v5633_v6 = vpop.f32.mrf.mxu0 }
 0x3a1   :  { %v5676_v36 = vpop.f32.mrf.mxu1  ;;  %v5634_v30 = vadd.f32 %v5633_v6, %v5591_v46  ;;  %v5675_v43 = vadd.f32 %v5674_v23, %v5632_v3  ;;  %v7146_v3 = vld [vmem:[#allocation13] ss:$0 sm:$0xff] }
 0x3a3   :  { %v5677_v37 = vadd.f32 %v5676_v36, %v5634_v30 }
 0x3da   :  { %v5713_v16 = vpop.f32.mrf.mxu0 }
 0x3db   :  { %v5756_v17 = vpop.f32.mrf.mxu1  ;;  %v5714_v5 = vadd.f32 %v5713_v16, %v5671_v38  ;;  %v7113_v16 = vld [vmem:[#allocation10] ss:$0 sm:$0xff] }
 0x3dc   :  { %v5715_v29 = vpop.f32.mrf.mxu0 }
 0x3dd   :  { %v5758_v21 = vpop.f32.mrf.mxu1  ;;  %v5716_v57 = vadd.f32 %v5715_v29, %v5673_v33  ;;  %v5757_v9 = vadd.f32 %v5756_v17, %v5714_v5 }
 0x3de   :  { %v5717_v35 = vpop.f32.mrf.mxu0 }
 0x3df   :  { %v5760_v56 = vpop.f32.mrf.mxu1  ;;  %v5718_v62 = vadd.f32 %v5717_v35, %v5675_v43  ;;  %v5759_v41 = vadd.f32 %v5758_v21, %v5716_v57 }
 0x3e0   :  { %v5719_v40 = vpop.f32.mrf.mxu0 }
 0x3e1   :  { %v5762_v14 = vpop.f32.mrf.mxu1  ;;  %v5720_v42 = vadd.f32 %v5719_v40, %v5677_v37  ;;  %v5761_v15 = vadd.f32 %v5760_v56, %v5718_v62 }
 0x3e3   :  { %v5763_v45 = vadd.f32 %v5762_v14, %v5720_v42 }
 0x41a   :  { %v5799_v0 = vpop.f32.mrf.mxu0 }
 0x41b   :  { %v5842_v27 = vpop.f32.mrf.mxu1  ;;  %v5800_v39 = vadd.f32 %v5799_v0, %v5757_v9 }
 0x41c   :  { %v5801_v48 = vpop.f32.mrf.mxu0 }
 0x41d   :  { %v5844_v52 = vpop.f32.mrf.mxu1  ;;  %v5802_v55 = vadd.f32 %v5801_v48, %v5759_v41  ;;  %v5843_v58 = vadd.f32 %v5842_v27, %v5800_v39 }
 0x41e   :  { %v5803_v25 = vpop.f32.mrf.mxu0 }
 0x41f   :  { %v5846_v53 = vpop.f32.mrf.mxu1  ;;  %v5804_v44 = vadd.f32 %v5803_v25, %v5761_v15  ;;  %v5845_v22 = vadd.f32 %v5844_v52, %v5802_v55  ;;  %v5853_v54 = vmax.f32 %v5843_v58, 0.0 }
 0x420   :  { %v5805_v50 = vpop.f32.mrf.mxu0 }
 0x421   :  { %v5847_v11 = vadd.f32 %v5846_v53, %v5804_v44  ;;  %v5806_v18 = vadd.f32 %v5805_v50, %v5763_v45  ;;  %v5848_v60 = vpop.f32.mrf.mxu1  ;;  %v5854_v1 = vmax.f32 %v5845_v22, 0.0 }
 0x423   :  { %v5849_v28 = vadd.f32 %v5848_v60, %v5806_v18  ;;  %v5857_v59 = vmax.f32 %v5847_v11, 0.0 }
 0x425   :  { %v5858_v49 = vmax.f32 %v5849_v28, 0.0  ;;  %v5861_v23 = vpack.c.bf16 %v5857_v59, %v5853_v54 }
 0x427   :  { %v5862_v19 = vpack.c.bf16 %v5858_v49, %v5854_v1 }
 0x429   :  { %6199 = vmatprep.mubr.bf16.mxu1 %v5862_v19 }
 0x42a   :  { %6200 = vmatmul.mubr.bf16.vlgmr.msra.gmra.mxu1 %v5861_v23 }
 0x43a   :  { %v7171_v8 = vpop.f32.mrf.mxu0 }
 0x43c   :  { %v7172_v6 = vpop.f32.mrf.mxu0 }
 0x43d   :  { %v7173_v31 = vadd.f32 %v7172_v6, %v7171_v8 }
 0x43e   :  { %v7174_v36 = vpop.f32.mrf.mxu0 }
 0x43f   :  { %v6161_v12 = vadd.f32 %v7173_v31, %v7113_v16 }
 0x440   :  { %v7175_v34 = vpop.f32.mrf.mxu0 }
 0x441   :  { %v7176_v63 = vadd.f32 %v7175_v34, %v7174_v36 }
 0x443   :  { %v6164_v29 = vadd.f32 %v7176_v63, %v7113_v16 }
 0x4ea   :  { %v7193_v20 = vpop.f32.mrf.mxu1 }
 0x4ec   :  { %v7194_v17 = vpop.f32.mrf.mxu1 }
 0x4ed   :  { %v7195_v24 = vadd.f32 %v7194_v17, %v7193_v20 }
 0x4ee   :  { %v7196_v32 = vpop.f32.mrf.mxu1 }
 0x4ef   :  { %v6202_v21 = vadd.f32 %v7195_v24, %v6161_v12 }
 0x4f0   :  { %v7197_v13 = vpop.f32.mrf.mxu1 }
 0x4f1   :  { %v7198_v26 = vadd.f32 %v7197_v13, %v7196_v32  ;;  %v6208_v51 = vmax.f32 %v6202_v21, 0.0 }
 0x4f3   :  { %v6205_v47 = vadd.f32 %v7198_v26, %v6164_v29 }
 0x4f5   :  { %v6209_v46 = vmax.f32 %v6205_v47, 0.0 }
 0x4f7   :  { %v6210_v61 = vpack.c.bf16 %v6209_v46, %v6208_v51 }
 0x4f9   :  { %7225 = vmatmul.mubr.bf16.vlgmr.msra.gmra.mxu0 %v6210_v61 }
 0x5b9   :  { %v6316_v35 = vpop.f32.mrf.mxu0 }
 0x5ba   :  { %v6317_v56 = vadd.f32 %v7146_v3, %v6316_v35 }
 0x5bb   :  { %v7226_v33 = vpop.f32.mrf.mxu0 }
 0x5bc   :  { %6323 = vst [vmem:[#allocation14] sm:$0xff] %v6317_v56 }
 0x5bd   :  { %v6319_v30 = vpop.f32.mrf.mxu0 }
 0x5be   :  { %v6320_v38 = vadd.f32 %v7146_v3, %v6319_v30 }
 0x5bf   :  { %v7227_v43 = vpop.f32.mrf.mxu0 }
 0x5c0   :  { %6324 = vst [vmem:[#allocation14 + $0x8] sm:$0xff] %v6320_v38 }
 0x5c1   :  { %8589 = shalt.err (!%p8586_p11)
}
 0x5c2   :  { %s8624_s17 = smov 128   ;;  %s8625_s1 = smov 8  }
 0x5c3   :  { %6336 = dma.vmem_to_hbm [thread:$0]  %s6331_s6, 256, %s8937_s7, [#allocation4], %s8624_s17, %s8624_s17, %s8625_s1  }
 0x5c4   :  { %8606 = dma.done.wait [#allocation4], 256  }
 0x5c5   :  { %8607 = vsyncadd [#allocation4], 4294967040 }
 0x5c6   :  { %6340 = vsyncpa [#allocation3], 1 }
 0x5c7   :  { %6341 = vsyncpa [#allocation6], 1 }
 0x5c8   :  { %6342 = vsyncpa [#allocation9], 1 }
 0x5c9   :  { %6343 = vsyncpa [#allocation12], 1 }
 0x5ca   :  { %6344 = vsyncpa [#allocation4], 1 }

// kernel: tpu_custom_call.1
= control target key start
LH: loop header
LB: loop body
LE: loop exit
PB: predicated region body
PF: predicated region fallthrough
CT: control target
= control target key end

     0   :  { %12 = vsyncpa [#allocation3], 0  ;;  %s8930_s0 = inlined_call_operand.hbm [shape: f32[16,3072], index: 0, kind: input, shape index: {}]   ;;  %s8931_s1 = inlined_call_operand.hbm [shape: bf16[3072,512], index: 1, kind: input, shape index: {}]   ;;  %s8932_s2 = inlined_call_operand.hbm [shape: f32[1,512], index: 2, kind: input, shape index: {}]   ;;  %s8933_s3 = inlined_call_operand.hbm [shape: bf16[512,128], index: 3, kind: input, shape index: {}]   ;;  %s8934_s4 = inlined_call_operand.hbm [shape: f32[1,128], index: 4, kind: input, shape index: {}]   ;;  %s8935_s5 = inlined_call_operand.hbm [shape: bf16[128,128], index: 5, kind: input, shape index: {}]   ;;  %s8936_s6 = inlined_call_operand.hbm [shape: f32[1,128], index: 6, kind: input, shape index: {}]   ;;  %s8937_s7 = inlined_call_operand.hbm [shape: f32[16,128], index: 7, kind: output, shape index: {}]  }
   0x1   :  { %13 = vsyncpa [#allocation6], 0 }
   0x2   :  { %14 = vsyncpa [#allocation9], 0 }
   0x3   :  { %15 = vsyncpa [#allocation12], 0 }
   0x4   :  { %16 = vsyncpa [#allocation4], 0  ;;  %s8608_s24 = smov [#allocation5]  }
   0x5   :  { %s34_s25 = sshll.u32 %s8608_s24, 4  ;;  %s35_s25 = int_to_ptr.vmem [resolvable:$true] %s34_s25 }
   0x6   :  { %s8446_s26 = scalar_lea.vmem %s35_s25, 98304  ;;  %p8451_p1 = scmp.lt.s32.totalorder %s35_s25, %s35_s25 }
   0x7   :  { %p8447_p0 = scmp.ne.s32.totalorder %s35_s25, %s8446_s26  ;;  %p8452_p2 = scmp.lt.s32.totalorder %s8446_s26, %s8446_s26 }
   0x9   :  { %p8453_p3 = por %p8452_p2, %p8451_p1 }
   0xb   :  { %p8454_p4 = pnand %p8453_p3, %p8447_p0 }
   0xd   :  { %8457 = shalt.err (!%p8454_p4)
}
   0xe   :  { %s8609_s27 = smov 256   ;;  %s8610_s28 = smov 16  }
   0xf   :  { %40 = dma.hbm_to_vmem [thread:$0]  %s8931_s1, 98304, %s35_s25, [#allocation6], %s8609_s27, %s8609_s27, %s8610_s28  }
  0x10   :  { %s8611_s8 = smov [#allocation8]  }
  0x11   :  { %s56_s9 = sshll.u32 %s8611_s8, 4  ;;  %s57_s9 = int_to_ptr.vmem [resolvable:$true] %s56_s9 }
  0x12   :  { %s8466_s10 = scalar_lea.vmem %s57_s9, 4096  ;;  %p8471_p6 = scmp.lt.s32.totalorder %s57_s9, %s57_s9 }
  0x13   :  { %p8467_p5 = scmp.ne.s32.totalorder %s57_s9, %s8466_s10  ;;  %p8472_p7 = scmp.lt.s32.totalorder %s8466_s10, %s8466_s10 }
  0x15   :  { %p8473_p8 = por %p8472_p7, %p8471_p6 }
  0x17   :  { %p8474_p9 = pnand %p8473_p8, %p8467_p5 }
  0x19   :  { %8477 = shalt.err (!%p8474_p9)
}
  0x1a   :  { %s8612_s11 = smov 64   ;;  %s8613_s12 = smov 4  }
  0x1b   :  { %62 = dma.hbm_to_vmem [thread:$0]  %s8933_s3, 4096, %s57_s9, [#allocation9], %s8612_s11, %s8612_s11, %s8613_s12  }
  0x1c   :  { %s8614_s15 = smov [#allocation11]   ;;  %s8615_s17 = smov [#allocation2]  }
  0x1d   :  { %s78_s16 = sshll.u32 %s8614_s15, 4  ;;  %s22_s1 = sshll.u32 %s8615_s17, 4  ;;  %s79_s16 = int_to_ptr.vmem [resolvable:$true] %s78_s16  ;;  %s23_s1 = int_to_ptr.vmem [resolvable:$true] %s22_s1 }
  0x1e   :  { %s8486_s18 = scalar_lea.vmem %s79_s16, 1024  ;;  %p8491_p11 = scmp.lt.s32.totalorder %s79_s16, %s79_s16 }
  0x1f   :  { %p8487_p10 = scmp.ne.s32.totalorder %s79_s16, %s8486_s18  ;;  %p8492_p12 = scmp.lt.s32.totalorder %s8486_s18, %s8486_s18 }
  0x21   :  { %p8493_p13 = por %p8492_p12, %p8491_p11 }
  0x23   :  { %p8494_p0 = pnand %p8493_p13, %p8487_p10 }
  0x25   :  { %8497 = shalt.err (!%p8494_p0)
}
  0x26   :  { %84 = dma.hbm_to_vmem [thread:$0]  %s8935_s5, 1024, %s79_s16, [#allocation12], %s8612_s11, %s8612_s11, %s8613_s12  }
  0x27   :  { %s8506_s21 = scalar_lea.vmem %s23_s1, 6144  ;;  %p8511_p2 = scmp.lt.s32.totalorder %s23_s1, %s23_s1 }
  0x28   :  { %p8507_p1 = scmp.ne.s32.totalorder %s23_s1, %s8506_s21  ;;  %p8512_p3 = scmp.lt.s32.totalorder %s8506_s21, %s8506_s21 }
  0x2a   :  { %p8513_p4 = por %p8512_p3, %p8511_p2 }
  0x2c   :  { %p8514_p5 = pnand %p8513_p4, %p8507_p1 }
  0x2e   :  { %8517 = shalt.err (!%p8514_p5)
}
  0x2f   :  { %s8616_s3 = smov 3072   ;;  %s8617_s22 = smov 192  }
  0x30   :  { %28 = dma.hbm_to_vmem [thread:$0]  %s8930_s0, 6144, %s23_s1, [#allocation3], %s8616_s3, %s8616_s3, %s8617_s22  }
  0x31   :  { %s8618_s25 = smov [#allocation7]   ;;  %s8619_s27 = smov [#allocation10]  }
  0x32   :  { %s47_s26 = sshll.u32 %s8618_s25, 4  ;;  %s69_s28 = sshll.u32 %s8619_s27, 4  ;;  %s48_s26 = int_to_ptr.vmem [resolvable:$true] %s47_s26  ;;  %s70_s28 = int_to_ptr.vmem [resolvable:$true] %s69_s28 }
  0x33   :  { %s8526_s5 = scalar_lea.vmem %s48_s26, 64  ;;  %p8531_p7 = scmp.lt.s32.totalorder %s48_s26, %s48_s26 }
  0x34   :  { %p8527_p6 = scmp.ne.s32.totalorder %s48_s26, %s8526_s5  ;;  %p8532_p8 = scmp.lt.s32.totalorder %s8526_s5, %s8526_s5 }
  0x36   :  { %p8533_p9 = por %p8532_p8, %p8531_p7 }
  0x38   :  { %p8534_p10 = pnand %p8533_p9, %p8527_p6 }
  0x3a   :  { %8537 = shalt.err (!%p8534_p10)
}
  0x3b   :  { %50 = dma.hbm_to_vmem [thread:$0]  %s8932_s2, 64, %s48_s26, [#allocation6]  }
  0x3c   :  { %s8546_s8 = scalar_lea.vmem %s70_s28, 16  ;;  %s8550_s0 = scalar_lea.vmem %s70_s28, 32 }
  0x3d   :  { %p8547_p11 = scmp.ne.s32.totalorder %s70_s28, %s8546_s8  ;;  %p8551_p12 = scmp.lt.s32.totalorder %s70_s28, %s70_s28 }
  0x3e   :  { %p8552_p13 = scmp.lt.s32.totalorder %s8550_s0, %s8546_s8 }
  0x40   :  { %p8553_p0 = por %p8552_p13, %p8551_p12 }
  0x42   :  { %p8554_p1 = pnand %p8553_p0, %p8547_p11 }
  0x44   :  { %8557 = shalt.err (!%p8554_p1)
}
  0x45   :  { %72 = dma.hbm_to_vmem [thread:$0]  %s8934_s4, 16, %s70_s28, [#allocation9]  }
  0x46   :  { %s8620_s11 = smov [#allocation13]  }
  0x47   :  { %s91_s12 = sshll.u32 %s8620_s11, 4  ;;  %s92_s12 = int_to_ptr.vmem [resolvable:$true] %s91_s12 }
  0x48   :  { %s8566_s13 = scalar_lea.vmem %s92_s12, 16  ;;  %s8570_s14 = scalar_lea.vmem %s92_s12, 32 }
  0x49   :  { %p8567_p2 = scmp.ne.s32.totalorder %s92_s12, %s8566_s13  ;;  %p8571_p3 = scmp.lt.s32.totalorder %s92_s12, %s92_s12 }
  0x4a   :  { %p8572_p4 = scmp.lt.s32.totalorder %s8570_s14, %s8566_s13 }
  0x4c   :  { %p8573_p5 = por %p8572_p4, %p8571_p3 }
  0x4e   :  { %p8574_p6 = pnand %p8573_p5, %p8567_p2 }
  0x50   :  { %8577 = shalt.err (!%p8574_p6)
}
  0x51   :  { %94 = dma.hbm_to_vmem [thread:$0]  %s8936_s6, 16, %s92_s12, [#allocation12]  }
  0x52   :  { %8598 = dma.done.wait [#allocation3], 6144  }
  0x53   :  { %8599 = vsyncadd [#allocation3], 4294961152 }
  0x54   :  { %8600 = dma.done.wait [#allocation6], 98368  }
  0x55   :  { %8601 = vsyncadd [#allocation6], 4294868928 }
  0x56   :  { %8602 = dma.done.wait [#allocation9], 4112  }
  0x57   :  { %8603 = vsyncadd [#allocation9], 4294963184 }
  0x58   :  { %8604 = dma.done.wait [#allocation12], 1040  }
  0x59   :  { %8605 = vsyncadd [#allocation12], 4294966256  ;;  %v7246_v0 = vld [vmem:[#allocation5 + $0xe4] ss:$16 sps:$4 sm:$0xff]   ;;  %v7250_v2 = vld [vmem:[#allocation5 + $0xe0] ss:$16 sps:$4 sm:$0xff]  }
  0x5a   :  { %v7248_v1 = vld [vmem:[#allocation5 + $0x2e4] ss:$16 sps:$4 sm:$0xff]   ;;  %4819 = vmatprep.subr.bf16.mxu0 %v7246_v0  ;;  %v7251_v3 = vld [vmem:[#allocation5 + $0x2e0] ss:$16 sps:$4 sm:$0xff]   ;;  %v118_v46 = vld [vmem:[#allocation2 + $0x8] sm:$0xff]  ;;  %vm8622_vm0 = vmmov 0  }
  0x5b   :  { %4862 = vmatprep.subr.bf16.mxu1 %v7248_v1  ;;  %v7252_v4 = vld [vmem:[#allocation5 + $0xc4] ss:$16 sps:$4 sm:$0xff]   ;;  %4820 = vmatpush1.bf16.msra.mxu0 %v7250_v2  ;;  %v7256_v6 = vld [vmem:[#allocation5 + $0xc0] ss:$16 sps:$4 sm:$0xff]   ;;  %v142_v47 = vld [vmem:[#allocation2 + $0xc8] sm:$0xff]  ;;  %s8623_s4 = smov [#allocation14]  }
  0x5c   :  { %4863 = vmatpush1.bf16.msra.mxu1 %v7251_v3  ;;  %v7254_v5 = vld [vmem:[#allocation5 + $0x2c4] ss:$16 sps:$4 sm:$0xff]   ;;  %4821 = vmatprep.subr.bf16.mxu0 %v7252_v4  ;;  %v7257_v7 = vld [vmem:[#allocation5 + $0x2c0] ss:$16 sps:$4 sm:$0xff]   ;;  %v120_v48 = vld [vmem:[#allocation2 + $0x18] sm:$0xff]  ;;  %v8687_v53 = vpack.c.bf16 %v142_v47, %v118_v46  ;;  %s6330_s6 = sshll.u32 %s8623_s4, 4  ;;  %s6331_s6 = int_to_ptr.vmem [resolvable:$true] %s6330_s6 }
  0x5d   :  { %4864 = vmatprep.subr.bf16.mxu1 %v7254_v5  ;;  %v7258_v8 = vld [vmem:[#allocation5 + $0xa4] ss:$16 sps:$4 sm:$0xff]   ;;  %v7262_v10 = vld [vmem:[#allocation5 + $0xa0] ss:$16 sps:$4 sm:$0xff]   ;;  %v144_v49 = vld [vmem:[#allocation2 + $0xd8] sm:$0xff]  ;;  %s8578_s16 = scalar_lea.vmem %s6331_s6, 256  ;;  %p8583_p8 = scmp.lt.s32.totalorder %s6331_s6, %s6331_s6 }
  0x5e   :  { %v7260_v9 = vld [vmem:[#allocation5 + $0x2a4] ss:$16 sps:$4 sm:$0xff]   ;;  %v7263_v11 = vld [vmem:[#allocation5 + $0x2a0] ss:$16 sps:$4 sm:$0xff]   ;;  %v8689_v54 = vpack.c.bf16 %v144_v49, %v120_v48  ;;  %4851 = vmatprep.mubr.bf16.mxu0 %v8687_v53  ;;  %v148_v46 = vld [vmem:[#allocation2 + $0xf8] sm:$0xff]  ;;  %p8579_p7 = scmp.ne.s32.totalorder %s6331_s6, %s8578_s16  ;;  %p8584_p9 = scmp.lt.s32.totalorder %s8578_s16, %s8578_s16 }
  0x5f   :  { %4822 = vmatpush1.bf16.msra.mxu0 %v7256_v6  ;;  %v7264_v12 = vld [vmem:[#allocation5 + $0x84] ss:$16 sps:$4 sm:$0xff]   ;;  %v7268_v14 = vld [vmem:[#allocation5 + $0x80] ss:$16 sps:$4 sm:$0xff]  }
  0x60   :  { %4865 = vmatpush1.bf16.msra.mxu1 %v7257_v7  ;;  %4823 = vmatprep.subr.bf16.mxu0 %v7258_v8  ;;  %v7266_v13 = vld [vmem:[#allocation5 + $0x284] ss:$16 sps:$4 sm:$0xff]   ;;  %v7269_v15 = vld [vmem:[#allocation5 + $0x280] ss:$16 sps:$4 sm:$0xff]   ;;  %p8585_p10 = por %p8584_p9, %p8583_p8 }
  0x61   :  { %4866 = vmatprep.subr.bf16.mxu1 %v7260_v9  ;;  %v7270_v16 = vld [vmem:[#allocation5 + $0x64] ss:$16 sps:$4 sm:$0xff]   ;;  %v7274_v18 = vld [vmem:[#allocation5 + $0x60] ss:$16 sps:$4 sm:$0xff]   ;;  %4894 = vmatprep.mubr.bf16.mxu1 %v8689_v54 }
  0x62   :  { %v7272_v17 = vld [vmem:[#allocation5 + $0x264] ss:$16 sps:$4 sm:$0xff]   ;;  %v7275_v19 = vld [vmem:[#allocation5 + $0x260] ss:$16 sps:$4 sm:$0xff]   ;;  %p8586_p11 = pnand %p8585_p10, %p8579_p7 }
  0x63   :  { %4824 = vmatpush1.bf16.msra.mxu0 %v7262_v10  ;;  %v7276_v20 = vld [vmem:[#allocation5 + $0x44] ss:$16 sps:$4 sm:$0xff]   ;;  %v7280_v22 = vld [vmem:[#allocation5 + $0x40] ss:$16 sps:$4 sm:$0xff]  }
  0x64   :  { %4867 = vmatpush1.bf16.msra.mxu1 %v7263_v11  ;;  %4825 = vmatprep.subr.bf16.mxu0 %v7264_v12  ;;  %v7278_v21 = vld [vmem:[#allocation5 + $0x244] ss:$16 sps:$4 sm:$0xff]   ;;  %v7281_v23 = vld [vmem:[#allocation5 + $0x240] ss:$16 sps:$4 sm:$0xff]  }
  0x65   :  { %4868 = vmatprep.subr.bf16.mxu1 %v7266_v13  ;;  %v7282_v24 = vld [vmem:[#allocation5 + $0x24] ss:$16 sps:$4 sm:$0xff]   ;;  %v7286_v26 = vld [vmem:[#allocation5 + $0x20] ss:$16 sps:$4 sm:$0xff]  }
  0x66   :  { %v7284_v25 = vld [vmem:[#allocation5 + $0x224] ss:$16 sps:$4 sm:$0xff]   ;;  %v7287_v27 = vld [vmem:[#allocation5 + $0x220] ss:$16 sps:$4 sm:$0xff]  }
  0x67   :  { %4826 = vmatpush1.bf16.msra.mxu0 %v7268_v14  ;;  %v7288_v28 = vld [vmem:[#allocation5 + $0x4] ss:$16 sps:$4 sm:$0xff]   ;;  %v7292_v30 = vld [vmem:[#allocation5] ss:$16 sps:$4 sm:$0xff]  }
  0x68   :  { %4869 = vmatpush1.bf16.msra.mxu1 %v7269_v15  ;;  %4827 = vmatprep.subr.bf16.mxu0 %v7270_v16  ;;  %v7290_v29 = vld [vmem:[#allocation5 + $0x204] ss:$16 sps:$4 sm:$0xff]   ;;  %v7293_v31 = vld [vmem:[#allocation5 + $0x200] ss:$16 sps:$4 sm:$0xff]  }
  0x69   :  { %4870 = vmatprep.subr.bf16.mxu1 %v7272_v17  ;;  %v7294_v32 = vld [vmem:[#allocation5 + $0x1e4] ss:$16 sps:$4 sm:$0xff]   ;;  %v7298_v34 = vld [vmem:[#allocation5 + $0x1e0] ss:$16 sps:$4 sm:$0xff]  }
  0x6a   :  { %v7296_v33 = vld [vmem:[#allocation5 + $0x3e4] ss:$16 sps:$4 sm:$0xff]   ;;  %v7299_v35 = vld [vmem:[#allocation5 + $0x3e0] ss:$16 sps:$4 sm:$0xff]  }
  0x6b   :  { %4828 = vmatpush1.bf16.msra.mxu0 %v7274_v18  ;;  %v7300_v36 = vld [vmem:[#allocation5 + $0x1c4] ss:$16 sps:$4 sm:$0xff]   ;;  %v7304_v38 = vld [vmem:[#allocation5 + $0x1c0] ss:$16 sps:$4 sm:$0xff]  }
  0x6c   :  { %4871 = vmatpush1.bf16.msra.mxu1 %v7275_v19  ;;  %4829 = vmatprep.subr.bf16.mxu0 %v7276_v20  ;;  %v7302_v37 = vld [vmem:[#allocation5 + $0x3c4] ss:$16 sps:$4 sm:$0xff]   ;;  %v7305_v39 = vld [vmem:[#allocation5 + $0x3c0] ss:$16 sps:$4 sm:$0xff]  }
  0x6d   :  { %4872 = vmatprep.subr.bf16.mxu1 %v7278_v21  ;;  %v7306_v40 = vld [vmem:[#allocation5 + $0x1a4] ss:$16 sps:$4 sm:$0xff]   ;;  %v7310_v42 = vld [vmem:[#allocation5 + $0x1a0] ss:$16 sps:$4 sm:$0xff]  }
  0x6e   :  { %v7308_v41 = vld [vmem:[#allocation5 + $0x3a4] ss:$16 sps:$4 sm:$0xff]   ;;  %v7311_v43 = vld [vmem:[#allocation5 + $0x3a0] ss:$16 sps:$4 sm:$0xff]  }
  0x6f   :  { %4830 = vmatpush1.bf16.msra.mxu0 %v7280_v22  ;;  %v7312_v44 = vld [vmem:[#allocation5 + $0x184] ss:$16 sps:$4 sm:$0xff]   ;;  %v7316_v50 = vld [vmem:[#allocation5 + $0x180] ss:$16 sps:$4 sm:$0xff]  }
  0x70   :  { %4873 = vmatpush1.bf16.msra.mxu1 %v7281_v23  ;;  %4831 = vmatprep.subr.bf16.mxu0 %v7282_v24  ;;  %v7314_v45 = vld [vmem:[#allocation5 + $0x384] ss:$16 sps:$4 sm:$0xff]   ;;  %v7317_v51 = vld [vmem:[#allocation5 + $0x380] ss:$16 sps:$4 sm:$0xff]  }
  0x71   :  { %4874 = vmatprep.subr.bf16.mxu1 %v7284_v25  ;;  %v7318_v52 = vld [vmem:[#allocation5 + $0x164] ss:$16 sps:$4 sm:$0xff]   ;;  %v7322_v56 = vld [vmem:[#allocation5 + $0x160] ss:$16 sps:$4 sm:$0xff]  }
  0x72   :  { %v7320_v55 = vld [vmem:[#allocation5 + $0x364] ss:$16 sps:$4 sm:$0xff]   ;;  %v7323_v57 = vld [vmem:[#allocation5 + $0x360] ss:$16 sps:$4 sm:$0xff]  }
  0x73   :  { %4832 = vmatpush1.bf16.msra.mxu0 %v7286_v26  ;;  %v7324_v58 = vld [vmem:[#allocation5 + $0x144] ss:$16 sps:$4 sm:$0xff]   ;;  %v7328_v60 = vld [vmem:[#allocation5 + $0x140] ss:$16 sps:$4 sm:$0xff]  }
  0x74   :  { %4875 = vmatpush1.bf16.msra.mxu1 %v7287_v27  ;;  %4833 = vmatprep.subr.bf16.mxu0 %v7288_v28  ;;  %v7326_v59 = vld [vmem:[#allocation5 + $0x344] ss:$16 sps:$4 sm:$0xff]   ;;  %v7329_v61 = vld [vmem:[#allocation5 + $0x340] ss:$16 sps:$4 sm:$0xff]  }
  0x75   :  { %4876 = vmatprep.subr.bf16.mxu1 %v7290_v29  ;;  %v7330_v62 = vld [vmem:[#allocation5 + $0x124] ss:$16 sps:$4 sm:$0xff]   ;;  %v7334_v0 = vld [vmem:[#allocation5 + $0x120] ss:$16 sps:$4 sm:$0xff]  }
  0x76   :  { %v7332_v63 = vld [vmem:[#allocation5 + $0x324] ss:$16 sps:$4 sm:$0xff]   ;;  %v7335_v1 = vld [vmem:[#allocation5 + $0x320] ss:$16 sps:$4 sm:$0xff]  }
  0x77   :  { %4834 = vmatpush1.bf16.msra.mxu0 %v7292_v30  ;;  %v7336_v2 = vld [vmem:[#allocation5 + $0x104] ss:$16 sps:$4 sm:$0xff]   ;;  %v7340_v4 = vld [vmem:[#allocation5 + $0x100] ss:$16 sps:$4 sm:$0xff]  }
  0x78   :  { %4877 = vmatpush1.bf16.msra.mxu1 %v7293_v31  ;;  %4835 = vmatprep.subr.bf16.mxu0 %v7294_v32  ;;  %v7338_v3 = vld [vmem:[#allocation5 + $0x304] ss:$16 sps:$4 sm:$0xff]   ;;  %v7341_v5 = vld [vmem:[#allocation5 + $0x300] ss:$16 sps:$4 sm:$0xff]  }
  0x79   :  { %4878 = vmatprep.subr.bf16.mxu1 %v7296_v33  ;;  %v117_v6 = vld [vmem:[#allocation2] sm:$0xff]  ;;  %v119_v8 = vld [vmem:[#allocation2 + $0x10] sm:$0xff] }
  0x7a   :  { %v141_v7 = vld [vmem:[#allocation2 + $0xc0] sm:$0xff]  ;;  %v143_v9 = vld [vmem:[#allocation2 + $0xd0] sm:$0xff] }
  0x7b   :  { %4836 = vmatpush2.bf16.msra.mxu0 %v7298_v34  ;;  %v7344_v10 = vld [vmem:[#allocation5 + $0x4e4] ss:$16 sps:$4 sm:$0xff]   ;;  %v8693_v12 = vpack.c.bf16 %v141_v7, %v117_v6  ;;  %v8695_v13 = vpack.c.bf16 %v143_v9, %v119_v8  ;;  %v7342_v14 = vld [vmem:[#allocation5 + $0x4e0] ss:$16 sps:$4 sm:$0xff]  }
  0x7c   :  { %4879 = vmatpush2.bf16.msra.mxu1 %v7299_v35  ;;  %4837 = vmatprep.subr.bf16.mxu0 %v7300_v36  ;;  %v7347_v11 = vld [vmem:[#allocation5 + $0x6e4] ss:$16 sps:$4 sm:$0xff]   ;;  %v7345_v15 = vld [vmem:[#allocation5 + $0x6e0] ss:$16 sps:$4 sm:$0xff]  }
  0x7d   :  { %4880 = vmatprep.subr.bf16.mxu1 %v7302_v37  ;;  %v7350_v16 = vld [vmem:[#allocation5 + $0x4c4] ss:$16 sps:$4 sm:$0xff]   ;;  %v7348_v18 = vld [vmem:[#allocation5 + $0x4c0] ss:$16 sps:$4 sm:$0xff]  }
  0x7e   :  { %v7353_v17 = vld [vmem:[#allocation5 + $0x6c4] ss:$16 sps:$4 sm:$0xff]   ;;  %v7351_v19 = vld [vmem:[#allocation5 + $0x6c0] ss:$16 sps:$4 sm:$0xff]  }
  0x7f   :  { %4838 = vmatpush2.bf16.msra.mxu0 %v7304_v38  ;;  %v7356_v20 = vld [vmem:[#allocation5 + $0x4a4] ss:$16 sps:$4 sm:$0xff]   ;;  %v7354_v22 = vld [vmem:[#allocation5 + $0x4a0] ss:$16 sps:$4 sm:$0xff]  }
  0x80   :  { %4881 = vmatpush2.bf16.msra.mxu1 %v7305_v39  ;;  %4839 = vmatprep.subr.bf16.mxu0 %v7306_v40  ;;  %v7359_v21 = vld [vmem:[#allocation5 + $0x6a4] ss:$16 sps:$4 sm:$0xff]   ;;  %v7357_v23 = vld [vmem:[#allocation5 + $0x6a0] ss:$16 sps:$4 sm:$0xff]   ;;  %v122_v40 = vld [vmem:[#allocation2 + $0x28] sm:$0xff] }
  0x81   :  { %4882 = vmatprep.subr.bf16.mxu1 %v7308_v41  ;;  %v7362_v24 = vld [vmem:[#allocation5 + $0x484] ss:$16 sps:$4 sm:$0xff]   ;;  %v7360_v26 = vld [vmem:[#allocation5 + $0x480] ss:$16 sps:$4 sm:$0xff]   ;;  %v146_v41 = vld [vmem:[#allocation2 + $0xe8] sm:$0xff] }
  0x82   :  { %v7365_v25 = vld [vmem:[#allocation5 + $0x684] ss:$16 sps:$4 sm:$0xff]   ;;  %v7363_v27 = vld [vmem:[#allocation5 + $0x680] ss:$16 sps:$4 sm:$0xff]  }
  0x83   :  { %4840 = vmatpush2.bf16.msra.mxu0 %v7310_v42  ;;  %v7368_v28 = vld [vmem:[#allocation5 + $0x464] ss:$16 sps:$4 sm:$0xff]   ;;  %v7366_v30 = vld [vmem:[#allocation5 + $0x460] ss:$16 sps:$4 sm:$0xff]   ;;  %v124_v42 = vld [vmem:[#allocation2 + $0x38] sm:$0xff] }
  0x84   :  { %4883 = vmatpush2.bf16.msra.mxu1 %v7311_v43  ;;  %4841 = vmatprep.subr.bf16.mxu0 %v7312_v44  ;;  %v7371_v29 = vld [vmem:[#allocation5 + $0x664] ss:$16 sps:$4 sm:$0xff]   ;;  %v7369_v31 = vld [vmem:[#allocation5 + $0x660] ss:$16 sps:$4 sm:$0xff]   ;;  %v8701_v47 = vpack.c.bf16 %v148_v46, %v124_v42  ;;  %v152_v42 = vld [vmem:[#allocation2 + $0x118] sm:$0xff] }
  0x85   :  { %4884 = vmatprep.subr.bf16.mxu1 %v7314_v45  ;;  %v7374_v32 = vld [vmem:[#allocation5 + $0x444] ss:$16 sps:$4 sm:$0xff]   ;;  %v7372_v34 = vld [vmem:[#allocation5 + $0x440] ss:$16 sps:$4 sm:$0xff]   ;;  %v8699_v45 = vpack.c.bf16 %v146_v41, %v122_v40  ;;  %v128_v41 = vld [vmem:[#allocation2 + $0x58] sm:$0xff] }
  0x86   :  { %v7377_v33 = vld [vmem:[#allocation5 + $0x644] ss:$16 sps:$4 sm:$0xff]   ;;  %v7375_v35 = vld [vmem:[#allocation5 + $0x640] ss:$16 sps:$4 sm:$0xff]   ;;  %v8713_v46 = vpack.c.bf16 %v152_v42, %v128_v41 }
  0x87   :  { %4842 = vmatpush2.bf16.msra.mxu0 %v7316_v50  ;;  %v7380_v36 = vld [vmem:[#allocation5 + $0x424] ss:$16 sps:$4 sm:$0xff]   ;;  %v7378_v38 = vld [vmem:[#allocation5 + $0x420] ss:$16 sps:$4 sm:$0xff]  }
  0x88   :  { %4885 = vmatpush2.bf16.msra.mxu1 %v7317_v51  ;;  %4843 = vmatprep.subr.bf16.mxu0 %v7318_v52  ;;  %v7383_v37 = vld [vmem:[#allocation5 + $0x624] ss:$16 sps:$4 sm:$0xff]   ;;  %v7381_v39 = vld [vmem:[#allocation5 + $0x620] ss:$16 sps:$4 sm:$0xff]  }
  0x89   :  { %4886 = vmatprep.subr.bf16.mxu1 %v7320_v55  ;;  %v7386_v43 = vld [vmem:[#allocation5 + $0x404] ss:$16 sps:$4 sm:$0xff]   ;;  %v7384_v48 = vld [vmem:[#allocation5 + $0x400] ss:$16 sps:$4 sm:$0xff]  }
  0x8a   :  { %v7389_v44 = vld [vmem:[#allocation5 + $0x604] ss:$16 sps:$4 sm:$0xff]   ;;  %v7387_v49 = vld [vmem:[#allocation5 + $0x600] ss:$16 sps:$4 sm:$0xff]  }
  0x8b   :  { %4844 = vmatpush2.bf16.msra.mxu0 %v7322_v56  ;;  %v7392_v50 = vld [vmem:[#allocation5 + $0x5e4] ss:$16 sps:$4 sm:$0xff]   ;;  %v7390_v52 = vld [vmem:[#allocation5 + $0x5e0] ss:$16 sps:$4 sm:$0xff]  }
  0x8c   :  { %4887 = vmatpush2.bf16.msra.mxu1 %v7323_v57  ;;  %4845 = vmatprep.subr.bf16.mxu0 %v7324_v58  ;;  %v7395_v51 = vld [vmem:[#allocation5 + $0x7e4] ss:$16 sps:$4 sm:$0xff]   ;;  %v7393_v55 = vld [vmem:[#allocation5 + $0x7e0] ss:$16 sps:$4 sm:$0xff]  }
  0x8d   :  { %4888 = vmatprep.subr.bf16.mxu1 %v7326_v59  ;;  %v7398_v56 = vld [vmem:[#allocation5 + $0x5c4] ss:$16 sps:$4 sm:$0xff]   ;;  %v7396_v58 = vld [vmem:[#allocation5 + $0x5c0] ss:$16 sps:$4 sm:$0xff]  }
  0x8e   :  { %v7401_v57 = vld [vmem:[#allocation5 + $0x7c4] ss:$16 sps:$4 sm:$0xff]   ;;  %v7399_v59 = vld [vmem:[#allocation5 + $0x7c0] ss:$16 sps:$4 sm:$0xff]  }
  0x8f   :  { %4846 = vmatpush2.bf16.msra.mxu0 %v7328_v60  ;;  %v7404_v60 = vld [vmem:[#allocation5 + $0x5a4] ss:$16 sps:$4 sm:$0xff]   ;;  %v7414_v6 = vld [vmem:[#allocation5 + $0x560] ss:$16 sps:$4 sm:$0xff]  }
  0x90   :  { %4889 = vmatpush2.bf16.msra.mxu1 %v7329_v61  ;;  %4847 = vmatprep.subr.bf16.mxu0 %v7330_v62  ;;  %v7407_v61 = vld [vmem:[#allocation5 + $0x7a4] ss:$16 sps:$4 sm:$0xff]   ;;  %v7402_v62 = vld [vmem:[#allocation5 + $0x5a0] ss:$16 sps:$4 sm:$0xff]  }
  0x91   :  { %4890 = vmatprep.subr.bf16.mxu1 %v7332_v63  ;;  %v7405_v63 = vld [vmem:[#allocation5 + $0x7a0] ss:$16 sps:$4 sm:$0xff]   ;;  %v7422_v8 = vld [vmem:[#allocation5 + $0x544] ss:$16 sps:$4 sm:$0xff]  }
  0x92   :  { %v7417_v7 = vld [vmem:[#allocation5 + $0x760] ss:$16 sps:$4 sm:$0xff]   ;;  %v7425_v9 = vld [vmem:[#allocation5 + $0x744] ss:$16 sps:$4 sm:$0xff]  }
  0x93   :  { %4848 = vmatpush2.bf16.msra.mxu0 %v7334_v0  ;;  %v7410_v0 = vld [vmem:[#allocation5 + $0x584] ss:$16 sps:$4 sm:$0xff]   ;;  %v7528_v41 = vld [vmem:[#allocation5 + $0x900] ss:$16 sps:$4 sm:$0xff]  }
  0x94   :  { %4891 = vmatpush2.bf16.msra.mxu1 %v7335_v1  ;;  %4849 = vmatprep.subr.bf16.mxu0 %v7336_v2  ;;  %v7413_v1 = vld [vmem:[#allocation5 + $0x784] ss:$16 sps:$4 sm:$0xff]   ;;  %v7408_v2 = vld [vmem:[#allocation5 + $0x580] ss:$16 sps:$4 sm:$0xff]  }
  0x95   :  { %4892 = vmatprep.subr.bf16.mxu1 %v7338_v3  ;;  %v7411_v3 = vld [vmem:[#allocation5 + $0x780] ss:$16 sps:$4 sm:$0xff]  }
  0x96   :  { %v7531_v42 = vld [vmem:[#allocation5 + $0xb00] ss:$16 sps:$4 sm:$0xff]  }
  0x97   :  { %4850 = vmatpush2.bf16.msra.mxu0 %v7340_v4  ;;  %v7416_v4 = vld [vmem:[#allocation5 + $0x564] ss:$16 sps:$4 sm:$0xff]  }
  0x98   :  { %4893 = vmatpush2.bf16.msra.mxu1 %v7341_v5  ;;  %4905 = vmatprep.subr.bf16.mxu0 %v7344_v10  ;;  %v7419_v5 = vld [vmem:[#allocation5 + $0x764] ss:$16 sps:$4 sm:$0xff]   ;;  %v7420_v10 = vld [vmem:[#allocation5 + $0x540] ss:$16 sps:$4 sm:$0xff]  }
  0x99   :  { %4948 = vmatprep.subr.bf16.mxu1 %v7347_v11  ;;  %v7423_v11 = vld [vmem:[#allocation5 + $0x740] ss:$16 sps:$4 sm:$0xff]  }
  0x9a   :  { %4852 = vmatmul.mubr.bf16.vlgmr.msra.gmra.mxu0 %v8693_v12 }
  0x9b   :  { %4895 = vmatmul.mubr.bf16.vlgmr.msra.gmra.mxu1 %v8695_v13  ;;  %4906 = vmatpush1.bf16.msra.mxu0 %v7342_v14  ;;  %v7428_v14 = vld [vmem:[#allocation5 + $0x524] ss:$16 sps:$4 sm:$0xff]  }
  0x9c   :  { %4949 = vmatpush1.bf16.msra.mxu1 %v7345_v15  ;;  %4907 = vmatprep.subr.bf16.mxu0 %v7350_v16  ;;  %v7431_v15 = vld [vmem:[#allocation5 + $0x724] ss:$16 sps:$4 sm:$0xff]   ;;  %v7426_v16 = vld [vmem:[#allocation5 + $0x520] ss:$16 sps:$4 sm:$0xff]  }
  0x9d   :  { %4950 = vmatprep.subr.bf16.mxu1 %v7353_v17  ;;  %4937 = vmatprep.mubr.bf16.mxu0 %v8699_v45  ;;  %v7429_v17 = vld [vmem:[#allocation5 + $0x720] ss:$16 sps:$4 sm:$0xff]  }
  0x9e   :  { %4980 = vmatprep.mubr.bf16.mxu1 %v8701_v47 }
  0x9f   :  { %4908 = vmatpush1.bf16.msra.mxu0 %v7348_v18  ;;  %v7434_v18 = vld [vmem:[#allocation5 + $0x504] ss:$16 sps:$4 sm:$0xff]  }
  0xa0   :  { %4951 = vmatpush1.bf16.msra.mxu1 %v7351_v19  ;;  %4909 = vmatprep.subr.bf16.mxu0 %v7356_v20  ;;  %v7437_v19 = vld [vmem:[#allocation5 + $0x704] ss:$16 sps:$4 sm:$0xff]   ;;  %v7432_v20 = vld [vmem:[#allocation5 + $0x500] ss:$16 sps:$4 sm:$0xff]  }
  0xa1   :  { %4952 = vmatprep.subr.bf16.mxu1 %v7359_v21  ;;  %v7435_v21 = vld [vmem:[#allocation5 + $0x700] ss:$16 sps:$4 sm:$0xff]  }
  0xa3   :  { %4910 = vmatpush1.bf16.msra.mxu0 %v7354_v22  ;;  %v121_v22 = vld [vmem:[#allocation2 + $0x20] sm:$0xff] }
  0xa4   :  { %4953 = vmatpush1.bf16.msra.mxu1 %v7357_v23  ;;  %4911 = vmatprep.subr.bf16.mxu0 %v7362_v24  ;;  %v145_v23 = vld [vmem:[#allocation2 + $0xe0] sm:$0xff]  ;;  %v123_v24 = vld [vmem:[#allocation2 + $0x30] sm:$0xff] }
  0xa5   :  { %4954 = vmatprep.subr.bf16.mxu1 %v7365_v25  ;;  %v147_v25 = vld [vmem:[#allocation2 + $0xf0] sm:$0xff] }
  0xa7   :  { %4912 = vmatpush1.bf16.msra.mxu0 %v7360_v26  ;;  %v7440_v26 = vld [vmem:[#allocation5 + $0x8e4] ss:$16 sps:$4 sm:$0xff]  }
  0xa8   :  { %4955 = vmatpush1.bf16.msra.mxu1 %v7363_v27  ;;  %4913 = vmatprep.subr.bf16.mxu0 %v7368_v28  ;;  %v7443_v27 = vld [vmem:[#allocation5 + $0xae4] ss:$16 sps:$4 sm:$0xff]   ;;  %v8705_v28 = vpack.c.bf16 %v145_v23, %v121_v22  ;;  %v7504_v22 = vld [vmem:[#allocation5 + $0x980] ss:$16 sps:$4 sm:$0xff]  }
  0xa9   :  { %4956 = vmatprep.subr.bf16.mxu1 %v7371_v29  ;;  %v8707_v29 = vpack.c.bf16 %v147_v25, %v123_v24  ;;  %v7507_v23 = vld [vmem:[#allocation5 + $0xb80] ss:$16 sps:$4 sm:$0xff]   ;;  %v7512_v24 = vld [vmem:[#allocation5 + $0x964] ss:$16 sps:$4 sm:$0xff]  }
  0xaa   :  { %v7515_v25 = vld [vmem:[#allocation5 + $0xb64] ss:$16 sps:$4 sm:$0xff]  }
  0xab   :  { %4914 = vmatpush1.bf16.msra.mxu0 %v7366_v30  ;;  %v7438_v30 = vld [vmem:[#allocation5 + $0x8e0] ss:$16 sps:$4 sm:$0xff]  }
  0xac   :  { %4957 = vmatpush1.bf16.msra.mxu1 %v7369_v31  ;;  %4915 = vmatprep.subr.bf16.mxu0 %v7374_v32  ;;  %v7441_v31 = vld [vmem:[#allocation5 + $0xae0] ss:$16 sps:$4 sm:$0xff]   ;;  %v7446_v32 = vld [vmem:[#allocation5 + $0x8c4] ss:$16 sps:$4 sm:$0xff]  }
  0xad   :  { %4958 = vmatprep.subr.bf16.mxu1 %v7377_v33  ;;  %v7449_v33 = vld [vmem:[#allocation5 + $0xac4] ss:$16 sps:$4 sm:$0xff]  }
  0xaf   :  { %4916 = vmatpush1.bf16.msra.mxu0 %v7372_v34  ;;  %v7444_v34 = vld [vmem:[#allocation5 + $0x8c0] ss:$16 sps:$4 sm:$0xff]  }
  0xb0   :  { %4959 = vmatpush1.bf16.msra.mxu1 %v7375_v35  ;;  %4917 = vmatprep.subr.bf16.mxu0 %v7380_v36  ;;  %v7447_v35 = vld [vmem:[#allocation5 + $0xac0] ss:$16 sps:$4 sm:$0xff]   ;;  %v7452_v36 = vld [vmem:[#allocation5 + $0x8a4] ss:$16 sps:$4 sm:$0xff]  }
  0xb1   :  { %4960 = vmatprep.subr.bf16.mxu1 %v7383_v37  ;;  %v7455_v37 = vld [vmem:[#allocation5 + $0xaa4] ss:$16 sps:$4 sm:$0xff]  }
  0xb3   :  { %4918 = vmatpush1.bf16.msra.mxu0 %v7378_v38  ;;  %v126_v38 = vld [vmem:[#allocation2 + $0x48] sm:$0xff] }
  0xb4   :  { %4961 = vmatpush1.bf16.msra.mxu1 %v7381_v39  ;;  %4919 = vmatprep.subr.bf16.mxu0 %v7386_v43  ;;  %v150_v39 = vld [vmem:[#allocation2 + $0x108] sm:$0xff]  ;;  %v7450_v43 = vld [vmem:[#allocation5 + $0x8a0] ss:$16 sps:$4 sm:$0xff]  }
  0xb5   :  { %4962 = vmatprep.subr.bf16.mxu1 %v7389_v44  ;;  %v8711_v40 = vpack.c.bf16 %v150_v39, %v126_v38  ;;  %v7453_v44 = vld [vmem:[#allocation5 + $0xaa0] ss:$16 sps:$4 sm:$0xff]   ;;  %v7530_v38 = vld [vmem:[#allocation5 + $0x904] ss:$16 sps:$4 sm:$0xff]  }
  0xb6   :  { %v7533_v39 = vld [vmem:[#allocation5 + $0xb04] ss:$16 sps:$4 sm:$0xff]  }
  0xb7   :  { %4920 = vmatpush1.bf16.msra.mxu0 %v7384_v48  ;;  %v7458_v48 = vld [vmem:[#allocation5 + $0x884] ss:$16 sps:$4 sm:$0xff]  }
  0xb8   :  { %4963 = vmatpush1.bf16.msra.mxu1 %v7387_v49  ;;  %4921 = vmatprep.subr.bf16.mxu0 %v7392_v50  ;;  %v7461_v49 = vld [vmem:[#allocation5 + $0xa84] ss:$16 sps:$4 sm:$0xff]   ;;  %v7456_v50 = vld [vmem:[#allocation5 + $0x880] ss:$16 sps:$4 sm:$0xff]  }
  0xb9   :  { %4964 = vmatprep.subr.bf16.mxu1 %v7395_v51  ;;  %v7459_v51 = vld [vmem:[#allocation5 + $0xa80] ss:$16 sps:$4 sm:$0xff]  }
  0xbb   :  { %4922 = vmatpush2.bf16.msra.mxu0 %v7390_v52  ;;  %v7464_v52 = vld [vmem:[#allocation5 + $0x864] ss:$16 sps:$4 sm:$0xff]  }
  0xbc   :  { %4965 = vmatpush2.bf16.msra.mxu1 %v7393_v55  ;;  %4923 = vmatprep.subr.bf16.mxu0 %v7398_v56  ;;  %v7467_v55 = vld [vmem:[#allocation5 + $0xa64] ss:$16 sps:$4 sm:$0xff]   ;;  %v7462_v56 = vld [vmem:[#allocation5 + $0x860] ss:$16 sps:$4 sm:$0xff]  }
  0xbd   :  { %4966 = vmatprep.subr.bf16.mxu1 %v7401_v57  ;;  %v7465_v57 = vld [vmem:[#allocation5 + $0xa60] ss:$16 sps:$4 sm:$0xff]  }
  0xbf   :  { %4924 = vmatpush2.bf16.msra.mxu0 %v7396_v58  ;;  %v7470_v58 = vld [vmem:[#allocation5 + $0x844] ss:$16 sps:$4 sm:$0xff]  }
  0xc0   :  { %4967 = vmatpush2.bf16.msra.mxu1 %v7399_v59  ;;  %4925 = vmatprep.subr.bf16.mxu0 %v7404_v60  ;;  %v7473_v59 = vld [vmem:[#allocation5 + $0xa44] ss:$16 sps:$4 sm:$0xff]   ;;  %v7468_v60 = vld [vmem:[#allocation5 + $0x840] ss:$16 sps:$4 sm:$0xff]  }
  0xc1   :  { %4968 = vmatprep.subr.bf16.mxu1 %v7407_v61  ;;  %v7471_v61 = vld [vmem:[#allocation5 + $0xa40] ss:$16 sps:$4 sm:$0xff]  }
  0xc3   :  { %4926 = vmatpush2.bf16.msra.mxu0 %v7402_v62  ;;  %v7476_v62 = vld [vmem:[#allocation5 + $0x824] ss:$16 sps:$4 sm:$0xff]  }
  0xc4   :  { %4969 = vmatpush2.bf16.msra.mxu1 %v7405_v63  ;;  %4927 = vmatprep.subr.bf16.mxu0 %v7410_v0  ;;  %v7479_v63 = vld [vmem:[#allocation5 + $0xa24] ss:$16 sps:$4 sm:$0xff]   ;;  %v7474_v0 = vld [vmem:[#allocation5 + $0x820] ss:$16 sps:$4 sm:$0xff]  }
  0xc5   :  { %4970 = vmatprep.subr.bf16.mxu1 %v7413_v1  ;;  %v7477_v1 = vld [vmem:[#allocation5 + $0xa20] ss:$16 sps:$4 sm:$0xff]  }
  0xc7   :  { %4928 = vmatpush2.bf16.msra.mxu0 %v7408_v2  ;;  %v7482_v2 = vld [vmem:[#allocation5 + $0x804] ss:$16 sps:$4 sm:$0xff]  }
  0xc8   :  { %4971 = vmatpush2.bf16.msra.mxu1 %v7411_v3  ;;  %4929 = vmatprep.subr.bf16.mxu0 %v7416_v4  ;;  %v7485_v3 = vld [vmem:[#allocation5 + $0xa04] ss:$16 sps:$4 sm:$0xff]   ;;  %v7480_v4 = vld [vmem:[#allocation5 + $0x800] ss:$16 sps:$4 sm:$0xff]  }
  0xc9   :  { %4972 = vmatprep.subr.bf16.mxu1 %v7419_v5  ;;  %v7483_v5 = vld [vmem:[#allocation5 + $0xa00] ss:$16 sps:$4 sm:$0xff]  }
  0xcb   :  { %4930 = vmatpush2.bf16.msra.mxu0 %v7414_v6  ;;  %v7488_v6 = vld [vmem:[#allocation5 + $0x9e4] ss:$16 sps:$4 sm:$0xff]  }
  0xcc   :  { %4973 = vmatpush2.bf16.msra.mxu1 %v7417_v7  ;;  %4931 = vmatprep.subr.bf16.mxu0 %v7422_v8  ;;  %v7491_v7 = vld [vmem:[#allocation5 + $0xbe4] ss:$16 sps:$4 sm:$0xff]   ;;  %v7486_v8 = vld [vmem:[#allocation5 + $0x9e0] ss:$16 sps:$4 sm:$0xff]  }
  0xcd   :  { %4974 = vmatprep.subr.bf16.mxu1 %v7425_v9  ;;  %v7489_v9 = vld [vmem:[#allocation5 + $0xbe0] ss:$16 sps:$4 sm:$0xff]  }
  0xcf   :  { %4932 = vmatpush2.bf16.msra.mxu0 %v7420_v10  ;;  %v7494_v10 = vld [vmem:[#allocation5 + $0x9c4] ss:$16 sps:$4 sm:$0xff]  }
  0xd0   :  { %4975 = vmatpush2.bf16.msra.mxu1 %v7423_v11  ;;  %4933 = vmatprep.subr.bf16.mxu0 %v7428_v14  ;;  %v7497_v11 = vld [vmem:[#allocation5 + $0xbc4] ss:$16 sps:$4 sm:$0xff]   ;;  %v7492_v14 = vld [vmem:[#allocation5 + $0x9c0] ss:$16 sps:$4 sm:$0xff]  }
  0xd1   :  { %4976 = vmatprep.subr.bf16.mxu1 %v7431_v15  ;;  %v7495_v15 = vld [vmem:[#allocation5 + $0xbc0] ss:$16 sps:$4 sm:$0xff]  }
  0xd3   :  { %4934 = vmatpush2.bf16.msra.mxu0 %v7426_v16  ;;  %v7500_v16 = vld [vmem:[#allocation5 + $0x9a4] ss:$16 sps:$4 sm:$0xff]  }
  0xd4   :  { %4977 = vmatpush2.bf16.msra.mxu1 %v7429_v17  ;;  %4935 = vmatprep.subr.bf16.mxu0 %v7434_v18  ;;  %v7503_v17 = vld [vmem:[#allocation5 + $0xba4] ss:$16 sps:$4 sm:$0xff]   ;;  %v7498_v18 = vld [vmem:[#allocation5 + $0x9a0] ss:$16 sps:$4 sm:$0xff]  }
  0xd5   :  { %4978 = vmatprep.subr.bf16.mxu1 %v7437_v19  ;;  %v7501_v19 = vld [vmem:[#allocation5 + $0xba0] ss:$16 sps:$4 sm:$0xff]  }
  0xd7   :  { %4936 = vmatpush2.bf16.msra.mxu0 %v7432_v20  ;;  %v7506_v20 = vld [vmem:[#allocation5 + $0x984] ss:$16 sps:$4 sm:$0xff]  }
  0xd8   :  { %4979 = vmatpush2.bf16.msra.mxu1 %v7435_v21  ;;  %4991 = vmatprep.subr.bf16.mxu0 %v7440_v26  ;;  %v7509_v21 = vld [vmem:[#allocation5 + $0xb84] ss:$16 sps:$4 sm:$0xff]   ;;  %v7510_v26 = vld [vmem:[#allocation5 + $0x960] ss:$16 sps:$4 sm:$0xff]  }
  0xd9   :  { %5034 = vmatprep.subr.bf16.mxu1 %v7443_v27  ;;  %v7513_v27 = vld [vmem:[#allocation5 + $0xb60] ss:$16 sps:$4 sm:$0xff]  }
  0xda   :  { %4938 = vmatmul.mubr.bf16.vlgmr.msra.gmra.mxu0 %v8705_v28 }
  0xdb   :  { %4981 = vmatmul.mubr.bf16.vlgmr.msra.gmra.mxu1 %v8707_v29  ;;  %4992 = vmatpush1.bf16.msra.mxu0 %v7438_v30  ;;  %v7518_v30 = vld [vmem:[#allocation5 + $0x944] ss:$16 sps:$4 sm:$0xff]  }
  0xdc   :  { %5035 = vmatpush1.bf16.msra.mxu1 %v7441_v31  ;;  %4993 = vmatprep.subr.bf16.mxu0 %v7446_v32  ;;  %v7521_v31 = vld [vmem:[#allocation5 + $0xb44] ss:$16 sps:$4 sm:$0xff]   ;;  %v7516_v32 = vld [vmem:[#allocation5 + $0x940] ss:$16 sps:$4 sm:$0xff]  }
  0xdd   :  { %5036 = vmatprep.subr.bf16.mxu1 %v7449_v33  ;;  %5023 = vmatprep.mubr.bf16.mxu0 %v8711_v40  ;;  %v7519_v33 = vld [vmem:[#allocation5 + $0xb40] ss:$16 sps:$4 sm:$0xff]  }
  0xde   :  { %5066 = vmatprep.mubr.bf16.mxu1 %v8713_v46 }
  0xdf   :  { %4994 = vmatpush1.bf16.msra.mxu0 %v7444_v34  ;;  %v7524_v34 = vld [vmem:[#allocation5 + $0x924] ss:$16 sps:$4 sm:$0xff]  }
  0xe0   :  { %5037 = vmatpush1.bf16.msra.mxu1 %v7447_v35  ;;  %4995 = vmatprep.subr.bf16.mxu0 %v7452_v36  ;;  %v7527_v35 = vld [vmem:[#allocation5 + $0xb24] ss:$16 sps:$4 sm:$0xff]   ;;  %v7522_v36 = vld [vmem:[#allocation5 + $0x920] ss:$16 sps:$4 sm:$0xff]  }
  0xe1   :  { %5038 = vmatprep.subr.bf16.mxu1 %v7455_v37  ;;  %v7525_v37 = vld [vmem:[#allocation5 + $0xb20] ss:$16 sps:$4 sm:$0xff]  }
  0xe3   :  { %4996 = vmatpush1.bf16.msra.mxu0 %v7450_v43  ;;  %v125_v43 = vld [vmem:[#allocation2 + $0x40] sm:$0xff] }
  0xe4   :  { %5039 = vmatpush1.bf16.msra.mxu1 %v7453_v44  ;;  %4997 = vmatprep.subr.bf16.mxu0 %v7458_v48  ;;  %v149_v44 = vld [vmem:[#allocation2 + $0x100] sm:$0xff]  ;;  %v127_v48 = vld [vmem:[#allocation2 + $0x50] sm:$0xff] }
  0xe5   :  { %5040 = vmatprep.subr.bf16.mxu1 %v7461_v49  ;;  %v151_v49 = vld [vmem:[#allocation2 + $0x110] sm:$0xff] }
  0xe7   :  { %4998 = vmatpush1.bf16.msra.mxu0 %v7456_v50  ;;  %v7536_v50 = vld [vmem:[#allocation5 + $0xce4] ss:$16 sps:$4 sm:$0xff]  }
  0xe8   :  { %5041 = vmatpush1.bf16.msra.mxu1 %v7459_v51  ;;  %4999 = vmatprep.subr.bf16.mxu0 %v7464_v52  ;;  %v7539_v51 = vld [vmem:[#allocation5 + $0xee4] ss:$16 sps:$4 sm:$0xff]   ;;  %v130_v52 = vld [vmem:[#allocation2 + $0x68] sm:$0xff] }
  0xe9   :  { %5042 = vmatprep.subr.bf16.mxu1 %v7467_v55  ;;  %v7534_v55 = vld [vmem:[#allocation5 + $0xce0] ss:$16 sps:$4 sm:$0xff]  }
  0xeb   :  { %5000 = vmatpush1.bf16.msra.mxu0 %v7462_v56  ;;  %v154_v56 = vld [vmem:[#allocation2 + $0x128] sm:$0xff] }
  0xec   :  { %5043 = vmatpush1.bf16.msra.mxu1 %v7465_v57  ;;  %5001 = vmatprep.subr.bf16.mxu0 %v7470_v58  ;;  %v132_v57 = vld [vmem:[#allocation2 + $0x78] sm:$0xff]  ;;  %v8717_v58 = vpack.c.bf16 %v149_v44, %v125_v43  ;;  %v7594_v43 = vld [vmem:[#allocation5 + $0xda0] ss:$16 sps:$4 sm:$0xff]  }
  0xed   :  { %5044 = vmatprep.subr.bf16.mxu1 %v7473_v59  ;;  %v8719_v59 = vpack.c.bf16 %v151_v49, %v127_v48  ;;  %v7597_v44 = vld [vmem:[#allocation5 + $0xfa0] ss:$16 sps:$4 sm:$0xff]   ;;  %v7602_v48 = vld [vmem:[#allocation5 + $0xd84] ss:$16 sps:$4 sm:$0xff]  }
  0xee   :  { %v7605_v49 = vld [vmem:[#allocation5 + $0xf84] ss:$16 sps:$4 sm:$0xff]  }
  0xef   :  { %5002 = vmatpush1.bf16.msra.mxu0 %v7468_v60  ;;  %v156_v60 = vld [vmem:[#allocation2 + $0x138] sm:$0xff] }
  0xf0   :  { %5045 = vmatpush1.bf16.msra.mxu1 %v7471_v61  ;;  %5003 = vmatprep.subr.bf16.mxu0 %v7476_v62  ;;  %v7537_v61 = vld [vmem:[#allocation5 + $0xee0] ss:$16 sps:$4 sm:$0xff]   ;;  %v7542_v62 = vld [vmem:[#allocation5 + $0xcc4] ss:$16 sps:$4 sm:$0xff]  }
  0xf1   :  { %5046 = vmatprep.subr.bf16.mxu1 %v7479_v63  ;;  %v7545_v63 = vld [vmem:[#allocation5 + $0xec4] ss:$16 sps:$4 sm:$0xff]  }
  0xf3   :  { %5004 = vmatpush1.bf16.msra.mxu0 %v7474_v0  ;;  %v8721_v0 = vpack.c.bf16 %v154_v56, %v130_v52  ;;  %v7608_v52 = vld [vmem:[#allocation5 + $0xd64] ss:$16 sps:$4 sm:$0xff]   ;;  %v7606_v56 = vld [vmem:[#allocation5 + $0xd60] ss:$16 sps:$4 sm:$0xff]  }
  0xf4   :  { %5047 = vmatpush1.bf16.msra.mxu1 %v7477_v1  ;;  %5005 = vmatprep.subr.bf16.mxu0 %v7482_v2  ;;  %v8723_v1 = vpack.c.bf16 %v156_v60, %v132_v57  ;;  %v7540_v2 = vld [vmem:[#allocation5 + $0xcc0] ss:$16 sps:$4 sm:$0xff]   ;;  %v7614_v60 = vld [vmem:[#allocation5 + $0xd44] ss:$16 sps:$4 sm:$0xff]  }
  0xf5   :  { %5048 = vmatprep.subr.bf16.mxu1 %v7485_v3  ;;  %v7543_v3 = vld [vmem:[#allocation5 + $0xec0] ss:$16 sps:$4 sm:$0xff]  }
  0xf6   :  { %v7609_v57 = vld [vmem:[#allocation5 + $0xf60] ss:$16 sps:$4 sm:$0xff]  }
  0xf7   :  { %5006 = vmatpush1.bf16.msra.mxu0 %v7480_v4  ;;  %v7548_v4 = vld [vmem:[#allocation5 + $0xca4] ss:$16 sps:$4 sm:$0xff]  }
  0xf8   :  { %5049 = vmatpush1.bf16.msra.mxu1 %v7483_v5  ;;  %5007 = vmatprep.subr.bf16.mxu0 %v7488_v6  ;;  %v7551_v5 = vld [vmem:[#allocation5 + $0xea4] ss:$16 sps:$4 sm:$0xff]   ;;  %v7546_v6 = vld [vmem:[#allocation5 + $0xca0] ss:$16 sps:$4 sm:$0xff]  }
  0xf9   :  { %5050 = vmatprep.subr.bf16.mxu1 %v7491_v7  ;;  %v7549_v7 = vld [vmem:[#allocation5 + $0xea0] ss:$16 sps:$4 sm:$0xff]  }
  0xfb   :  { %5008 = vmatpush2.bf16.msra.mxu0 %v7486_v8  ;;  %v7554_v8 = vld [vmem:[#allocation5 + $0xc84] ss:$16 sps:$4 sm:$0xff]  }
  0xfc   :  { %5051 = vmatpush2.bf16.msra.mxu1 %v7489_v9  ;;  %5009 = vmatprep.subr.bf16.mxu0 %v7494_v10  ;;  %v7557_v9 = vld [vmem:[#allocation5 + $0xe84] ss:$16 sps:$4 sm:$0xff]   ;;  %v7552_v10 = vld [vmem:[#allocation5 + $0xc80] ss:$16 sps:$4 sm:$0xff]  }
  0xfd   :  { %5052 = vmatprep.subr.bf16.mxu1 %v7497_v11  ;;  %v7555_v11 = vld [vmem:[#allocation5 + $0xe80] ss:$16 sps:$4 sm:$0xff]  }
  0xff   :  { %5010 = vmatpush2.bf16.msra.mxu0 %v7492_v14  ;;  %v7560_v14 = vld [vmem:[#allocation5 + $0xc64] ss:$16 sps:$4 sm:$0xff]  }
 0x100   :  { %5053 = vmatpush2.bf16.msra.mxu1 %v7495_v15  ;;  %5011 = vmatprep.subr.bf16.mxu0 %v7500_v16  ;;  %v7563_v15 = vld [vmem:[#allocation5 + $0xe64] ss:$16 sps:$4 sm:$0xff]   ;;  %v7558_v16 = vld [vmem:[#allocation5 + $0xc60] ss:$16 sps:$4 sm:$0xff]  }
 0x101   :  { %5054 = vmatprep.subr.bf16.mxu1 %v7503_v17  ;;  %v7561_v17 = vld [vmem:[#allocation5 + $0xe60] ss:$16 sps:$4 sm:$0xff]  }
 0x103   :  { %5012 = vmatpush2.bf16.msra.mxu0 %v7498_v18  ;;  %v7566_v18 = vld [vmem:[#allocation5 + $0xc44] ss:$16 sps:$4 sm:$0xff]  }
 0x104   :  { %5055 = vmatpush2.bf16.msra.mxu1 %v7501_v19  ;;  %5013 = vmatprep.subr.bf16.mxu0 %v7506_v20  ;;  %v7569_v19 = vld [vmem:[#allocation5 + $0xe44] ss:$16 sps:$4 sm:$0xff]   ;;  %v7564_v20 = vld [vmem:[#allocation5 + $0xc40] ss:$16 sps:$4 sm:$0xff]  }
 0x105   :  { %5056 = vmatprep.subr.bf16.mxu1 %v7509_v21  ;;  %v7567_v21 = vld [vmem:[#allocation5 + $0xe40] ss:$16 sps:$4 sm:$0xff]  }
 0x107   :  { %5014 = vmatpush2.bf16.msra.mxu0 %v7504_v22  ;;  %v7572_v22 = vld [vmem:[#allocation5 + $0xc24] ss:$16 sps:$4 sm:$0xff]  }
 0x108   :  { %5057 = vmatpush2.bf16.msra.mxu1 %v7507_v23  ;;  %5015 = vmatprep.subr.bf16.mxu0 %v7512_v24  ;;  %v7575_v23 = vld [vmem:[#allocation5 + $0xe24] ss:$16 sps:$4 sm:$0xff]   ;;  %v7570_v24 = vld [vmem:[#allocation5 + $0xc20] ss:$16 sps:$4 sm:$0xff]  }
 0x109   :  { %5058 = vmatprep.subr.bf16.mxu1 %v7515_v25  ;;  %v7573_v25 = vld [vmem:[#allocation5 + $0xe20] ss:$16 sps:$4 sm:$0xff]  }
 0x10b   :  { %5016 = vmatpush2.bf16.msra.mxu0 %v7510_v26  ;;  %v7578_v26 = vld [vmem:[#allocation5 + $0xc04] ss:$16 sps:$4 sm:$0xff]  }
 0x10c   :  { %5059 = vmatpush2.bf16.msra.mxu1 %v7513_v27  ;;  %5017 = vmatprep.subr.bf16.mxu0 %v7518_v30  ;;  %v7581_v27 = vld [vmem:[#allocation5 + $0xe04] ss:$16 sps:$4 sm:$0xff]   ;;  %v7576_v30 = vld [vmem:[#allocation5 + $0xc00] ss:$16 sps:$4 sm:$0xff]  }
 0x10d   :  { %5060 = vmatprep.subr.bf16.mxu1 %v7521_v31  ;;  %v7579_v31 = vld [vmem:[#allocation5 + $0xe00] ss:$16 sps:$4 sm:$0xff]  }
 0x10f   :  { %5018 = vmatpush2.bf16.msra.mxu0 %v7516_v32  ;;  %v7584_v32 = vld [vmem:[#allocation5 + $0xde4] ss:$16 sps:$4 sm:$0xff]  }
 0x110   :  { %5061 = vmatpush2.bf16.msra.mxu1 %v7519_v33  ;;  %5019 = vmatprep.subr.bf16.mxu0 %v7524_v34  ;;  %v7587_v33 = vld [vmem:[#allocation5 + $0xfe4] ss:$16 sps:$4 sm:$0xff]   ;;  %v7582_v34 = vld [vmem:[#allocation5 + $0xde0] ss:$16 sps:$4 sm:$0xff]  }
 0x111   :  { %5062 = vmatprep.subr.bf16.mxu1 %v7527_v35  ;;  %v7585_v35 = vld [vmem:[#allocation5 + $0xfe0] ss:$16 sps:$4 sm:$0xff]  }
 0x113   :  { %5020 = vmatpush2.bf16.msra.mxu0 %v7522_v36  ;;  %v7590_v36 = vld [vmem:[#allocation5 + $0xdc4] ss:$16 sps:$4 sm:$0xff]  }
 0x114   :  { %5063 = vmatpush2.bf16.msra.mxu1 %v7525_v37  ;;  %5021 = vmatprep.subr.bf16.mxu0 %v7530_v38  ;;  %v7593_v37 = vld [vmem:[#allocation5 + $0xfc4] ss:$16 sps:$4 sm:$0xff]   ;;  %v7588_v38 = vld [vmem:[#allocation5 + $0xdc0] ss:$16 sps:$4 sm:$0xff]  }
 0x115   :  { %5064 = vmatprep.subr.bf16.mxu1 %v7533_v39  ;;  %v7591_v39 = vld [vmem:[#allocation5 + $0xfc0] ss:$16 sps:$4 sm:$0xff]  }
 0x117   :  { %5022 = vmatpush2.bf16.msra.mxu0 %v7528_v41  ;;  %v7596_v41 = vld [vmem:[#allocation5 + $0xda4] ss:$16 sps:$4 sm:$0xff]  }
 0x118   :  { %5065 = vmatpush2.bf16.msra.mxu1 %v7531_v42  ;;  %5077 = vmatprep.subr.bf16.mxu0 %v7536_v50  ;;  %v7599_v42 = vld [vmem:[#allocation5 + $0xfa4] ss:$16 sps:$4 sm:$0xff]   ;;  %v7600_v50 = vld [vmem:[#allocation5 + $0xd80] ss:$16 sps:$4 sm:$0xff]  }
 0x119   :  { %5120 = vmatprep.subr.bf16.mxu1 %v7539_v51  ;;  %v7603_v51 = vld [vmem:[#allocation5 + $0xf80] ss:$16 sps:$4 sm:$0xff]  }
 0x11a   :  { %5024 = vmatmul.mubr.bf16.vlgmr.msra.gmra.mxu0 %v8717_v58 }
 0x11b   :  { %5067 = vmatmul.mubr.bf16.vlgmr.msra.gmra.mxu1 %v8719_v59  ;;  %5078 = vmatpush1.bf16.msra.mxu0 %v7534_v55  ;;  %v7611_v55 = vld [vmem:[#allocation5 + $0xf64] ss:$16 sps:$4 sm:$0xff]  }
 0x11c   :  { %5121 = vmatpush1.bf16.msra.mxu1 %v7537_v61  ;;  %5079 = vmatprep.subr.bf16.mxu0 %v7542_v62  ;;  %v7617_v61 = vld [vmem:[#allocation5 + $0xf44] ss:$16 sps:$4 sm:$0xff]   ;;  %v7612_v62 = vld [vmem:[#allocation5 + $0xd40] ss:$16 sps:$4 sm:$0xff]  }
 0x11d   :  { %5122 = vmatprep.subr.bf16.mxu1 %v7545_v63  ;;  %5109 = vmatprep.mubr.bf16.mxu0 %v8721_v0  ;;  %v7615_v63 = vld [vmem:[#allocation5 + $0xf40] ss:$16 sps:$4 sm:$0xff]  }
 0x11e   :  { %5152 = vmatprep.mubr.bf16.mxu1 %v8723_v1 }
 0x11f   :  { %5080 = vmatpush1.bf16.msra.mxu0 %v7540_v2  ;;  %v7620_v2 = vld [vmem:[#allocation5 + $0xd24] ss:$16 sps:$4 sm:$0xff]  }
 0x120   :  { %5123 = vmatpush1.bf16.msra.mxu1 %v7543_v3  ;;  %5081 = vmatprep.subr.bf16.mxu0 %v7548_v4  ;;  %v7623_v3 = vld [vmem:[#allocation5 + $0xf24] ss:$16 sps:$4 sm:$0xff]   ;;  %v7618_v4 = vld [vmem:[#allocation5 + $0xd20] ss:$16 sps:$4 sm:$0xff]  }
 0x121   :  { %5124 = vmatprep.subr.bf16.mxu1 %v7551_v5  ;;  %v7621_v5 = vld [vmem:[#allocation5 + $0xf20] ss:$16 sps:$4 sm:$0xff]  }
 0x123   :  { %5082 = vmatpush1.bf16.msra.mxu0 %v7546_v6  ;;  %v7626_v6 = vld [vmem:[#allocation5 + $0xd04] ss:$16 sps:$4 sm:$0xff]  }
 0x124   :  { %5125 = vmatpush1.bf16.msra.mxu1 %v7549_v7  ;;  %5083 = vmatprep.subr.bf16.mxu0 %v7554_v8  ;;  %v7629_v7 = vld [vmem:[#allocation5 + $0xf04] ss:$16 sps:$4 sm:$0xff]   ;;  %v7624_v8 = vld [vmem:[#allocation5 + $0xd00] ss:$16 sps:$4 sm:$0xff]  }
 0x125   :  { %5126 = vmatprep.subr.bf16.mxu1 %v7557_v9  ;;  %v7627_v9 = vld [vmem:[#allocation5 + $0xf00] ss:$16 sps:$4 sm:$0xff]  }
 0x127   :  { %5084 = vmatpush1.bf16.msra.mxu0 %v7552_v10  ;;  %v129_v10 = vld [vmem:[#allocation2 + $0x60] sm:$0xff] }
 0x128   :  { %5127 = vmatpush1.bf16.msra.mxu1 %v7555_v11  ;;  %5085 = vmatprep.subr.bf16.mxu0 %v7560_v14  ;;  %v153_v11 = vld [vmem:[#allocation2 + $0x120] sm:$0xff]  ;;  %v131_v14 = vld [vmem:[#allocation2 + $0x70] sm:$0xff] }
 0x129   :  { %5128 = vmatprep.subr.bf16.mxu1 %v7563_v15  ;;  %v155_v15 = vld [vmem:[#allocation2 + $0x130] sm:$0xff] }
 0x12b   :  { %5086 = vmatpush1.bf16.msra.mxu0 %v7558_v16  ;;  %v7632_v16 = vld [vmem:[#allocation5 + $0x10e4] ss:$16 sps:$4 sm:$0xff]  }
 0x12c   :  { %5129 = vmatpush1.bf16.msra.mxu1 %v7561_v17  ;;  %5087 = vmatprep.subr.bf16.mxu0 %v7566_v18  ;;  %v7635_v17 = vld [vmem:[#allocation5 + $0x12e4] ss:$16 sps:$4 sm:$0xff]   ;;  %v134_v18 = vld [vmem:[#allocation2 + $0x88] sm:$0xff] }
 0x12d   :  { %5130 = vmatprep.subr.bf16.mxu1 %v7569_v19  ;;  %v7630_v19 = vld [vmem:[#allocation5 + $0x10e0] ss:$16 sps:$4 sm:$0xff]  }
 0x12f   :  { %5088 = vmatpush1.bf16.msra.mxu0 %v7564_v20  ;;  %v158_v20 = vld [vmem:[#allocation2 + $0x148] sm:$0xff] }
 0x130   :  { %5131 = vmatpush1.bf16.msra.mxu1 %v7567_v21  ;;  %5089 = vmatprep.subr.bf16.mxu0 %v7572_v22  ;;  %v136_v21 = vld [vmem:[#allocation2 + $0x98] sm:$0xff]  ;;  %v8729_v22 = vpack.c.bf16 %v153_v11, %v129_v10  ;;  %v7684_v10 = vld [vmem:[#allocation5 + $0x11c0] ss:$16 sps:$4 sm:$0xff]  }
 0x131   :  { %5132 = vmatprep.subr.bf16.mxu1 %v7575_v23  ;;  %v8731_v23 = vpack.c.bf16 %v155_v15, %v131_v14  ;;  %v7687_v11 = vld [vmem:[#allocation5 + $0x13c0] ss:$16 sps:$4 sm:$0xff]   ;;  %v7692_v14 = vld [vmem:[#allocation5 + $0x11a4] ss:$16 sps:$4 sm:$0xff]  }
 0x132   :  { %v7695_v15 = vld [vmem:[#allocation5 + $0x13a4] ss:$16 sps:$4 sm:$0xff]  }
 0x133   :  { %5090 = vmatpush1.bf16.msra.mxu0 %v7570_v24  ;;  %v160_v24 = vld [vmem:[#allocation2 + $0x158] sm:$0xff] }
 0x134   :  { %5133 = vmatpush1.bf16.msra.mxu1 %v7573_v25  ;;  %5091 = vmatprep.subr.bf16.mxu0 %v7578_v26  ;;  %v7633_v25 = vld [vmem:[#allocation5 + $0x12e0] ss:$16 sps:$4 sm:$0xff]   ;;  %v7638_v26 = vld [vmem:[#allocation5 + $0x10c4] ss:$16 sps:$4 sm:$0xff]  }
 0x135   :  { %5134 = vmatprep.subr.bf16.mxu1 %v7581_v27  ;;  %v7641_v27 = vld [vmem:[#allocation5 + $0x12c4] ss:$16 sps:$4 sm:$0xff]  }
 0x137   :  { %5092 = vmatpush1.bf16.msra.mxu0 %v7576_v30  ;;  %v8733_v30 = vpack.c.bf16 %v158_v20, %v134_v18  ;;  %v7698_v18 = vld [vmem:[#allocation5 + $0x1184] ss:$16 sps:$4 sm:$0xff]   ;;  %v7696_v20 = vld [vmem:[#allocation5 + $0x1180] ss:$16 sps:$4 sm:$0xff]  }
 0x138   :  { %5135 = vmatpush1.bf16.msra.mxu1 %v7579_v31  ;;  %5093 = vmatprep.subr.bf16.mxu0 %v7584_v32  ;;  %v8735_v31 = vpack.c.bf16 %v160_v24, %v136_v21  ;;  %v7636_v32 = vld [vmem:[#allocation5 + $0x10c0] ss:$16 sps:$4 sm:$0xff]   ;;  %v7704_v24 = vld [vmem:[#allocation5 + $0x1164] ss:$16 sps:$4 sm:$0xff]  }
 0x139   :  { %5136 = vmatprep.subr.bf16.mxu1 %v7587_v33  ;;  %v7639_v33 = vld [vmem:[#allocation5 + $0x12c0] ss:$16 sps:$4 sm:$0xff]  }
 0x13a   :  { %v7699_v21 = vld [vmem:[#allocation5 + $0x1380] ss:$16 sps:$4 sm:$0xff]  }
 0x13b   :  { %5094 = vmatpush2.bf16.msra.mxu0 %v7582_v34  ;;  %v7644_v34 = vld [vmem:[#allocation5 + $0x10a4] ss:$16 sps:$4 sm:$0xff]  }
 0x13c   :  { %5137 = vmatpush2.bf16.msra.mxu1 %v7585_v35  ;;  %5095 = vmatprep.subr.bf16.mxu0 %v7590_v36  ;;  %v7647_v35 = vld [vmem:[#allocation5 + $0x12a4] ss:$16 sps:$4 sm:$0xff]   ;;  %v7642_v36 = vld [vmem:[#allocation5 + $0x10a0] ss:$16 sps:$4 sm:$0xff]  }
 0x13d   :  { %5138 = vmatprep.subr.bf16.mxu1 %v7593_v37  ;;  %v7645_v37 = vld [vmem:[#allocation5 + $0x12a0] ss:$16 sps:$4 sm:$0xff]  }
 0x13f   :  { %5096 = vmatpush2.bf16.msra.mxu0 %v7588_v38  ;;  %v7650_v38 = vld [vmem:[#allocation5 + $0x1084] ss:$16 sps:$4 sm:$0xff]  }
 0x140   :  { %5139 = vmatpush2.bf16.msra.mxu1 %v7591_v39  ;;  %5097 = vmatprep.subr.bf16.mxu0 %v7596_v41  ;;  %v7653_v39 = vld [vmem:[#allocation5 + $0x1284] ss:$16 sps:$4 sm:$0xff]   ;;  %v7648_v41 = vld [vmem:[#allocation5 + $0x1080] ss:$16 sps:$4 sm:$0xff]  }
 0x141   :  { %5140 = vmatprep.subr.bf16.mxu1 %v7599_v42  ;;  %v7651_v42 = vld [vmem:[#allocation5 + $0x1280] ss:$16 sps:$4 sm:$0xff]  }
 0x143   :  { %5098 = vmatpush2.bf16.msra.mxu0 %v7594_v43  ;;  %v7656_v43 = vld [vmem:[#allocation5 + $0x1064] ss:$16 sps:$4 sm:$0xff]  }
 0x144   :  { %5141 = vmatpush2.bf16.msra.mxu1 %v7597_v44  ;;  %5099 = vmatprep.subr.bf16.mxu0 %v7602_v48  ;;  %v7659_v44 = vld [vmem:[#allocation5 + $0x1264] ss:$16 sps:$4 sm:$0xff]   ;;  %v7654_v48 = vld [vmem:[#allocation5 + $0x1060] ss:$16 sps:$4 sm:$0xff]  }
 0x145   :  { %5142 = vmatprep.subr.bf16.mxu1 %v7605_v49  ;;  %v7657_v49 = vld [vmem:[#allocation5 + $0x1260] ss:$16 sps:$4 sm:$0xff]  }
 0x147   :  { %5100 = vmatpush2.bf16.msra.mxu0 %v7600_v50  ;;  %v7662_v50 = vld [vmem:[#allocation5 + $0x1044] ss:$16 sps:$4 sm:$0xff]  }
 0x148   :  { %5143 = vmatpush2.bf16.msra.mxu1 %v7603_v51  ;;  %5101 = vmatprep.subr.bf16.mxu0 %v7608_v52  ;;  %v7665_v51 = vld [vmem:[#allocation5 + $0x1244] ss:$16 sps:$4 sm:$0xff]   ;;  %v7660_v52 = vld [vmem:[#allocation5 + $0x1040] ss:$16 sps:$4 sm:$0xff]  }
 0x149   :  { %5144 = vmatprep.subr.bf16.mxu1 %v7611_v55  ;;  %v7663_v55 = vld [vmem:[#allocation5 + $0x1240] ss:$16 sps:$4 sm:$0xff]  }
 0x14b   :  { %5102 = vmatpush2.bf16.msra.mxu0 %v7606_v56  ;;  %v7668_v56 = vld [vmem:[#allocation5 + $0x1024] ss:$16 sps:$4 sm:$0xff]  }
 0x14c   :  { %5145 = vmatpush2.bf16.msra.mxu1 %v7609_v57  ;;  %5103 = vmatprep.subr.bf16.mxu0 %v7614_v60  ;;  %v7671_v57 = vld [vmem:[#allocation5 + $0x1224] ss:$16 sps:$4 sm:$0xff]   ;;  %v7666_v60 = vld [vmem:[#allocation5 + $0x1020] ss:$16 sps:$4 sm:$0xff]  }
 0x14d   :  { %5146 = vmatprep.subr.bf16.mxu1 %v7617_v61  ;;  %v7669_v61 = vld [vmem:[#allocation5 + $0x1220] ss:$16 sps:$4 sm:$0xff]  }
 0x14f   :  { %5104 = vmatpush2.bf16.msra.mxu0 %v7612_v62  ;;  %v7674_v62 = vld [vmem:[#allocation5 + $0x1004] ss:$16 sps:$4 sm:$0xff]  }
 0x150   :  { %5147 = vmatpush2.bf16.msra.mxu1 %v7615_v63  ;;  %5105 = vmatprep.subr.bf16.mxu0 %v7620_v2  ;;  %v7677_v63 = vld [vmem:[#allocation5 + $0x1204] ss:$16 sps:$4 sm:$0xff]   ;;  %v7672_v2 = vld [vmem:[#allocation5 + $0x1000] ss:$16 sps:$4 sm:$0xff]  }
 0x151   :  { %5148 = vmatprep.subr.bf16.mxu1 %v7623_v3  ;;  %v7675_v3 = vld [vmem:[#allocation5 + $0x1200] ss:$16 sps:$4 sm:$0xff]  }
 0x153   :  { %5106 = vmatpush2.bf16.msra.mxu0 %v7618_v4  ;;  %v7680_v4 = vld [vmem:[#allocation5 + $0x11e4] ss:$16 sps:$4 sm:$0xff]  }
 0x154   :  { %5149 = vmatpush2.bf16.msra.mxu1 %v7621_v5  ;;  %5107 = vmatprep.subr.bf16.mxu0 %v7626_v6  ;;  %v7683_v5 = vld [vmem:[#allocation5 + $0x13e4] ss:$16 sps:$4 sm:$0xff]   ;;  %v7678_v6 = vld [vmem:[#allocation5 + $0x11e0] ss:$16 sps:$4 sm:$0xff]  }
 0x155   :  { %5150 = vmatprep.subr.bf16.mxu1 %v7629_v7  ;;  %v7681_v7 = vld [vmem:[#allocation5 + $0x13e0] ss:$16 sps:$4 sm:$0xff]  }
 0x157   :  { %5108 = vmatpush2.bf16.msra.mxu0 %v7624_v8  ;;  %v7686_v8 = vld [vmem:[#allocation5 + $0x11c4] ss:$16 sps:$4 sm:$0xff]  }
 0x158   :  { %5151 = vmatpush2.bf16.msra.mxu1 %v7627_v9  ;;  %5163 = vmatprep.subr.bf16.mxu0 %v7632_v16  ;;  %v7689_v9 = vld [vmem:[#allocation5 + $0x13c4] ss:$16 sps:$4 sm:$0xff]   ;;  %v7690_v16 = vld [vmem:[#allocation5 + $0x11a0] ss:$16 sps:$4 sm:$0xff]  }
 0x159   :  { %5206 = vmatprep.subr.bf16.mxu1 %v7635_v17  ;;  %v7693_v17 = vld [vmem:[#allocation5 + $0x13a0] ss:$16 sps:$4 sm:$0xff]  }
 0x15a   :  { %5110 = vmatmul.mubr.bf16.vlgmr.msra.gmra.mxu0 %v8729_v22 }
 0x15b   :  { %5153 = vmatmul.mubr.bf16.vlgmr.msra.gmra.mxu1 %v8731_v23  ;;  %5164 = vmatpush1.bf16.msra.mxu0 %v7630_v19  ;;  %v7701_v19 = vld [vmem:[#allocation5 + $0x1384] ss:$16 sps:$4 sm:$0xff]  }
 0x15c   :  { %5207 = vmatpush1.bf16.msra.mxu1 %v7633_v25  ;;  %5165 = vmatprep.subr.bf16.mxu0 %v7638_v26  ;;  %v7707_v25 = vld [vmem:[#allocation5 + $0x1364] ss:$16 sps:$4 sm:$0xff]   ;;  %v7702_v26 = vld [vmem:[#allocation5 + $0x1160] ss:$16 sps:$4 sm:$0xff]  }
 0x15d   :  { %5208 = vmatprep.subr.bf16.mxu1 %v7641_v27  ;;  %5195 = vmatprep.mubr.bf16.mxu0 %v8733_v30  ;;  %v7705_v27 = vld [vmem:[#allocation5 + $0x1360] ss:$16 sps:$4 sm:$0xff]  }
 0x15e   :  { %5238 = vmatprep.mubr.bf16.mxu1 %v8735_v31 }
 0x15f   :  { %5166 = vmatpush1.bf16.msra.mxu0 %v7636_v32  ;;  %v7710_v32 = vld [vmem:[#allocation5 + $0x1144] ss:$16 sps:$4 sm:$0xff]  }
 0x160   :  { %5209 = vmatpush1.bf16.msra.mxu1 %v7639_v33  ;;  %5167 = vmatprep.subr.bf16.mxu0 %v7644_v34  ;;  %v7713_v33 = vld [vmem:[#allocation5 + $0x1344] ss:$16 sps:$4 sm:$0xff]   ;;  %v7708_v34 = vld [vmem:[#allocation5 + $0x1140] ss:$16 sps:$4 sm:$0xff]  }
 0x161   :  { %5210 = vmatprep.subr.bf16.mxu1 %v7647_v35  ;;  %v7711_v35 = vld [vmem:[#allocation5 + $0x1340] ss:$16 sps:$4 sm:$0xff]  }
 0x163   :  { %5168 = vmatpush1.bf16.msra.mxu0 %v7642_v36  ;;  %v7716_v36 = vld [vmem:[#allocation5 + $0x1124] ss:$16 sps:$4 sm:$0xff]  }
 0x164   :  { %5211 = vmatpush1.bf16.msra.mxu1 %v7645_v37  ;;  %5169 = vmatprep.subr.bf16.mxu0 %v7650_v38  ;;  %v7719_v37 = vld [vmem:[#allocation5 + $0x1324] ss:$16 sps:$4 sm:$0xff]   ;;  %v7714_v38 = vld [vmem:[#allocation5 + $0x1120] ss:$16 sps:$4 sm:$0xff]  }
 0x165   :  { %5212 = vmatprep.subr.bf16.mxu1 %v7653_v39  ;;  %v7717_v39 = vld [vmem:[#allocation5 + $0x1320] ss:$16 sps:$4 sm:$0xff]  }
 0x167   :  { %5170 = vmatpush1.bf16.msra.mxu0 %v7648_v41  ;;  %v7722_v41 = vld [vmem:[#allocation5 + $0x1104] ss:$16 sps:$4 sm:$0xff]  }
 0x168   :  { %5213 = vmatpush1.bf16.msra.mxu1 %v7651_v42  ;;  %5171 = vmatprep.subr.bf16.mxu0 %v7656_v43  ;;  %v7725_v42 = vld [vmem:[#allocation5 + $0x1304] ss:$16 sps:$4 sm:$0xff]   ;;  %v7720_v43 = vld [vmem:[#allocation5 + $0x1100] ss:$16 sps:$4 sm:$0xff]  }
 0x169   :  { %5214 = vmatprep.subr.bf16.mxu1 %v7659_v44  ;;  %v7723_v44 = vld [vmem:[#allocation5 + $0x1300] ss:$16 sps:$4 sm:$0xff]  }
 0x16b   :  { %5172 = vmatpush1.bf16.msra.mxu0 %v7654_v48  ;;  %v133_v48 = vld [vmem:[#allocation2 + $0x80] sm:$0xff] }
 0x16c   :  { %5215 = vmatpush1.bf16.msra.mxu1 %v7657_v49  ;;  %5173 = vmatprep.subr.bf16.mxu0 %v7662_v50  ;;  %v157_v49 = vld [vmem:[#allocation2 + $0x140] sm:$0xff]  ;;  %v135_v50 = vld [vmem:[#allocation2 + $0x90] sm:$0xff] }
 0x16d   :  { %5216 = vmatprep.subr.bf16.mxu1 %v7665_v51  ;;  %v159_v51 = vld [vmem:[#allocation2 + $0x150] sm:$0xff] }
 0x16f   :  { %5174 = vmatpush1.bf16.msra.mxu0 %v7660_v52  ;;  %v7728_v52 = vld [vmem:[#allocation5 + $0x14e4] ss:$16 sps:$4 sm:$0xff]  }
 0x170   :  { %5217 = vmatpush1.bf16.msra.mxu1 %v7663_v55  ;;  %5175 = vmatprep.subr.bf16.mxu0 %v7668_v56  ;;  %v7731_v55 = vld [vmem:[#allocation5 + $0x16e4] ss:$16 sps:$4 sm:$0xff]   ;;  %v138_v56 = vld [vmem:[#allocation2 + $0xa8] sm:$0xff] }
 0x171   :  { %5218 = vmatprep.subr.bf16.mxu1 %v7671_v57  ;;  %v162_v57 = vld [vmem:[#allocation2 + $0x168] sm:$0xff] }
 0x173   :  { %5176 = vmatpush1.bf16.msra.mxu0 %v7666_v60  ;;  %v140_v60 = vld [vmem:[#allocation2 + $0xb8] sm:$0xff] }
 0x174   :  { %5219 = vmatpush1.bf16.msra.mxu1 %v7669_v61  ;;  %5177 = vmatprep.subr.bf16.mxu0 %v7674_v62  ;;  %v164_v61 = vld [vmem:[#allocation2 + $0x178] sm:$0xff]  ;;  %v7726_v62 = vld [vmem:[#allocation5 + $0x14e0] ss:$16 sps:$4 sm:$0xff]  }
 0x175   :  { %5220 = vmatprep.subr.bf16.mxu1 %v7677_v63  ;;  %v7729_v63 = vld [vmem:[#allocation5 + $0x16e0] ss:$16 sps:$4 sm:$0xff]  }
 0x177   :  { %5178 = vmatpush1.bf16.msra.mxu0 %v7672_v2  ;;  %v8741_v2 = vpack.c.bf16 %v157_v49, %v133_v48  ;;  %v7774_v48 = vld [vmem:[#allocation5 + $0x15e0] ss:$16 sps:$4 sm:$0xff]  }
 0x178   :  { %5221 = vmatpush1.bf16.msra.mxu1 %v7675_v3  ;;  %5179 = vmatprep.subr.bf16.mxu0 %v7680_v4  ;;  %v8743_v3 = vpack.c.bf16 %v159_v51, %v135_v50  ;;  %v7734_v4 = vld [vmem:[#allocation5 + $0x14c4] ss:$16 sps:$4 sm:$0xff]   ;;  %v7777_v49 = vld [vmem:[#allocation5 + $0x17e0] ss:$16 sps:$4 sm:$0xff]  }
 0x179   :  { %5222 = vmatprep.subr.bf16.mxu1 %v7683_v5  ;;  %v7737_v5 = vld [vmem:[#allocation5 + $0x16c4] ss:$16 sps:$4 sm:$0xff]  }
 0x17a   :  { %v7782_v50 = vld [vmem:[#allocation5 + $0x15c4] ss:$16 sps:$4 sm:$0xff]  }
 0x17b   :  { %5180 = vmatpush2.bf16.msra.mxu0 %v7678_v6  ;;  %v7732_v6 = vld [vmem:[#allocation5 + $0x14c0] ss:$16 sps:$4 sm:$0xff]   ;;  %v7785_v51 = vld [vmem:[#allocation5 + $0x17c4] ss:$16 sps:$4 sm:$0xff]  }
 0x17c   :  { %5223 = vmatpush2.bf16.msra.mxu1 %v7681_v7  ;;  %5181 = vmatprep.subr.bf16.mxu0 %v7686_v8  ;;  %v7735_v7 = vld [vmem:[#allocation5 + $0x16c0] ss:$16 sps:$4 sm:$0xff]   ;;  %v8745_v8 = vpack.c.bf16 %v162_v57, %v138_v56  ;;  %v7788_v56 = vld [vmem:[#allocation5 + $0x15a4] ss:$16 sps:$4 sm:$0xff]  }
 0x17d   :  { %5224 = vmatprep.subr.bf16.mxu1 %v7689_v9  ;;  %v8747_v9 = vpack.c.bf16 %v164_v61, %v140_v60  ;;  %v7791_v57 = vld [vmem:[#allocation5 + $0x17a4] ss:$16 sps:$4 sm:$0xff]   ;;  %v7786_v60 = vld [vmem:[#allocation5 + $0x15a0] ss:$16 sps:$4 sm:$0xff]  }
 0x17e   :  { %v7789_v61 = vld [vmem:[#allocation5 + $0x17a0] ss:$16 sps:$4 sm:$0xff]  }
 0x17f   :  { %5182 = vmatpush2.bf16.msra.mxu0 %v7684_v10  ;;  %v7740_v10 = vld [vmem:[#allocation5 + $0x14a4] ss:$16 sps:$4 sm:$0xff]  }
 0x180   :  { %5225 = vmatpush2.bf16.msra.mxu1 %v7687_v11  ;;  %5183 = vmatprep.subr.bf16.mxu0 %v7692_v14  ;;  %v7743_v11 = vld [vmem:[#allocation5 + $0x16a4] ss:$16 sps:$4 sm:$0xff]   ;;  %v7738_v14 = vld [vmem:[#allocation5 + $0x14a0] ss:$16 sps:$4 sm:$0xff]  }
 0x181   :  { %5226 = vmatprep.subr.bf16.mxu1 %v7695_v15  ;;  %v7741_v15 = vld [vmem:[#allocation5 + $0x16a0] ss:$16 sps:$4 sm:$0xff]  }
 0x183   :  { %5184 = vmatpush2.bf16.msra.mxu0 %v7690_v16  ;;  %v7746_v16 = vld [vmem:[#allocation5 + $0x1484] ss:$16 sps:$4 sm:$0xff]  }
 0x184   :  { %5227 = vmatpush2.bf16.msra.mxu1 %v7693_v17  ;;  %5185 = vmatprep.subr.bf16.mxu0 %v7698_v18  ;;  %v7749_v17 = vld [vmem:[#allocation5 + $0x1684] ss:$16 sps:$4 sm:$0xff]   ;;  %v7744_v18 = vld [vmem:[#allocation5 + $0x1480] ss:$16 sps:$4 sm:$0xff]  }
 0x185   :  { %5228 = vmatprep.subr.bf16.mxu1 %v7701_v19  ;;  %v7747_v19 = vld [vmem:[#allocation5 + $0x1680] ss:$16 sps:$4 sm:$0xff]  }
 0x187   :  { %5186 = vmatpush2.bf16.msra.mxu0 %v7696_v20  ;;  %v7752_v20 = vld [vmem:[#allocation5 + $0x1464] ss:$16 sps:$4 sm:$0xff]  }
 0x188   :  { %5229 = vmatpush2.bf16.msra.mxu1 %v7699_v21  ;;  %5187 = vmatprep.subr.bf16.mxu0 %v7704_v24  ;;  %v7755_v21 = vld [vmem:[#allocation5 + $0x1664] ss:$16 sps:$4 sm:$0xff]   ;;  %v7750_v24 = vld [vmem:[#allocation5 + $0x1460] ss:$16 sps:$4 sm:$0xff]  }
 0x189   :  { %5230 = vmatprep.subr.bf16.mxu1 %v7707_v25  ;;  %v7753_v25 = vld [vmem:[#allocation5 + $0x1660] ss:$16 sps:$4 sm:$0xff]  }
 0x18b   :  { %5188 = vmatpush2.bf16.msra.mxu0 %v7702_v26  ;;  %v7758_v26 = vld [vmem:[#allocation5 + $0x1444] ss:$16 sps:$4 sm:$0xff]  }
 0x18c   :  { %5231 = vmatpush2.bf16.msra.mxu1 %v7705_v27  ;;  %5189 = vmatprep.subr.bf16.mxu0 %v7710_v32  ;;  %v7761_v27 = vld [vmem:[#allocation5 + $0x1644] ss:$16 sps:$4 sm:$0xff]   ;;  %v7756_v32 = vld [vmem:[#allocation5 + $0x1440] ss:$16 sps:$4 sm:$0xff]  }
 0x18d   :  { %5232 = vmatprep.subr.bf16.mxu1 %v7713_v33  ;;  %v7759_v33 = vld [vmem:[#allocation5 + $0x1640] ss:$16 sps:$4 sm:$0xff]  }
 0x18f   :  { %5190 = vmatpush2.bf16.msra.mxu0 %v7708_v34  ;;  %v7764_v34 = vld [vmem:[#allocation5 + $0x1424] ss:$16 sps:$4 sm:$0xff]  }
 0x190   :  { %5233 = vmatpush2.bf16.msra.mxu1 %v7711_v35  ;;  %5191 = vmatprep.subr.bf16.mxu0 %v7716_v36  ;;  %v7767_v35 = vld [vmem:[#allocation5 + $0x1624] ss:$16 sps:$4 sm:$0xff]   ;;  %v7762_v36 = vld [vmem:[#allocation5 + $0x1420] ss:$16 sps:$4 sm:$0xff]  }
 0x191   :  { %5234 = vmatprep.subr.bf16.mxu1 %v7719_v37  ;;  %v7765_v37 = vld [vmem:[#allocation5 + $0x1620] ss:$16 sps:$4 sm:$0xff]  }
 0x193   :  { %5192 = vmatpush2.bf16.msra.mxu0 %v7714_v38  ;;  %v7770_v38 = vld [vmem:[#allocation5 + $0x1404] ss:$16 sps:$4 sm:$0xff]  }
 0x194   :  { %5235 = vmatpush2.bf16.msra.mxu1 %v7717_v39  ;;  %5193 = vmatprep.subr.bf16.mxu0 %v7722_v41  ;;  %v7773_v39 = vld [vmem:[#allocation5 + $0x1604] ss:$16 sps:$4 sm:$0xff]   ;;  %v7768_v41 = vld [vmem:[#allocation5 + $0x1400] ss:$16 sps:$4 sm:$0xff]  }
 0x195   :  { %5236 = vmatprep.subr.bf16.mxu1 %v7725_v42  ;;  %v7771_v42 = vld [vmem:[#allocation5 + $0x1600] ss:$16 sps:$4 sm:$0xff]  }
 0x197   :  { %5194 = vmatpush2.bf16.msra.mxu0 %v7720_v43  ;;  %v7776_v43 = vld [vmem:[#allocation5 + $0x15e4] ss:$16 sps:$4 sm:$0xff]  }
 0x198   :  { %5237 = vmatpush2.bf16.msra.mxu1 %v7723_v44  ;;  %5249 = vmatprep.subr.bf16.mxu0 %v7728_v52  ;;  %v7779_v44 = vld [vmem:[#allocation5 + $0x17e4] ss:$16 sps:$4 sm:$0xff]   ;;  %v7780_v52 = vld [vmem:[#allocation5 + $0x15c0] ss:$16 sps:$4 sm:$0xff]  }
 0x199   :  { %5292 = vmatprep.subr.bf16.mxu1 %v7731_v55  ;;  %v7783_v55 = vld [vmem:[#allocation5 + $0x17c0] ss:$16 sps:$4 sm:$0xff]  }
 0x19a   :  { %5196 = vmatmul.mubr.bf16.vlgmr.msra.gmra.mxu0 %v8741_v2 }
 0x19b   :  { %5239 = vmatmul.mubr.bf16.vlgmr.msra.gmra.mxu1 %v8743_v3  ;;  %5250 = vmatpush1.bf16.msra.mxu0 %v7726_v62  ;;  %v7794_v62 = vld [vmem:[#allocation5 + $0x1584] ss:$16 sps:$4 sm:$0xff]  }
 0x19c   :  { %5293 = vmatpush1.bf16.msra.mxu1 %v7729_v63  ;;  %5251 = vmatprep.subr.bf16.mxu0 %v7734_v4  ;;  %v7797_v63 = vld [vmem:[#allocation5 + $0x1784] ss:$16 sps:$4 sm:$0xff]   ;;  %v7792_v4 = vld [vmem:[#allocation5 + $0x1580] ss:$16 sps:$4 sm:$0xff]  }
 0x19d   :  { %5294 = vmatprep.subr.bf16.mxu1 %v7737_v5  ;;  %5281 = vmatprep.mubr.bf16.mxu0 %v8745_v8  ;;  %v7795_v5 = vld [vmem:[#allocation5 + $0x1780] ss:$16 sps:$4 sm:$0xff]  }
 0x19e   :  { %5324 = vmatprep.mubr.bf16.mxu1 %v8747_v9 }
 0x19f   :  { %5252 = vmatpush1.bf16.msra.mxu0 %v7732_v6  ;;  %v7800_v6 = vld [vmem:[#allocation5 + $0x1564] ss:$16 sps:$4 sm:$0xff]  }
 0x1a0   :  { %5295 = vmatpush1.bf16.msra.mxu1 %v7735_v7  ;;  %5253 = vmatprep.subr.bf16.mxu0 %v7740_v10  ;;  %v7803_v7 = vld [vmem:[#allocation5 + $0x1764] ss:$16 sps:$4 sm:$0xff]   ;;  %v7798_v10 = vld [vmem:[#allocation5 + $0x1560] ss:$16 sps:$4 sm:$0xff]  }
 0x1a1   :  { %5296 = vmatprep.subr.bf16.mxu1 %v7743_v11  ;;  %v7801_v11 = vld [vmem:[#allocation5 + $0x1760] ss:$16 sps:$4 sm:$0xff]  }
 0x1a3   :  { %5254 = vmatpush1.bf16.msra.mxu0 %v7738_v14  ;;  %v7806_v14 = vld [vmem:[#allocation5 + $0x1544] ss:$16 sps:$4 sm:$0xff]  }
 0x1a4   :  { %5297 = vmatpush1.bf16.msra.mxu1 %v7741_v15  ;;  %5255 = vmatprep.subr.bf16.mxu0 %v7746_v16  ;;  %v7809_v15 = vld [vmem:[#allocation5 + $0x1744] ss:$16 sps:$4 sm:$0xff]   ;;  %v7804_v16 = vld [vmem:[#allocation5 + $0x1540] ss:$16 sps:$4 sm:$0xff]  }
 0x1a5   :  { %5298 = vmatprep.subr.bf16.mxu1 %v7749_v17  ;;  %v7807_v17 = vld [vmem:[#allocation5 + $0x1740] ss:$16 sps:$4 sm:$0xff]  }
 0x1a7   :  { %5256 = vmatpush1.bf16.msra.mxu0 %v7744_v18  ;;  %v7812_v18 = vld [vmem:[#allocation5 + $0x1524] ss:$16 sps:$4 sm:$0xff]  }
 0x1a8   :  { %5299 = vmatpush1.bf16.msra.mxu1 %v7747_v19  ;;  %5257 = vmatprep.subr.bf16.mxu0 %v7752_v20  ;;  %v7815_v19 = vld [vmem:[#allocation5 + $0x1724] ss:$16 sps:$4 sm:$0xff]   ;;  %v7810_v20 = vld [vmem:[#allocation5 + $0x1520] ss:$16 sps:$4 sm:$0xff]  }
 0x1a9   :  { %5300 = vmatprep.subr.bf16.mxu1 %v7755_v21  ;;  %v7813_v21 = vld [vmem:[#allocation5 + $0x1720] ss:$16 sps:$4 sm:$0xff]  }
 0x1ab   :  { %5258 = vmatpush1.bf16.msra.mxu0 %v7750_v24  ;;  %v7818_v24 = vld [vmem:[#allocation5 + $0x1504] ss:$16 sps:$4 sm:$0xff]  }
 0x1ac   :  { %5301 = vmatpush1.bf16.msra.mxu1 %v7753_v25  ;;  %5259 = vmatprep.subr.bf16.mxu0 %v7758_v26  ;;  %v7821_v25 = vld [vmem:[#allocation5 + $0x1704] ss:$16 sps:$4 sm:$0xff]   ;;  %v7816_v26 = vld [vmem:[#allocation5 + $0x1500] ss:$16 sps:$4 sm:$0xff]  }
 0x1ad   :  { %5302 = vmatprep.subr.bf16.mxu1 %v7761_v27  ;;  %v7819_v27 = vld [vmem:[#allocation5 + $0x1700] ss:$16 sps:$4 sm:$0xff]  }
 0x1af   :  { %5260 = vmatpush1.bf16.msra.mxu0 %v7756_v32  ;;  %v137_v32 = vld [vmem:[#allocation2 + $0xa0] sm:$0xff] }
 0x1b0   :  { %5303 = vmatpush1.bf16.msra.mxu1 %v7759_v33  ;;  %5261 = vmatprep.subr.bf16.mxu0 %v7764_v34  ;;  %v161_v33 = vld [vmem:[#allocation2 + $0x160] sm:$0xff]  ;;  %v139_v34 = vld [vmem:[#allocation2 + $0xb0] sm:$0xff] }
 0x1b1   :  { %5304 = vmatprep.subr.bf16.mxu1 %v7767_v35  ;;  %v163_v35 = vld [vmem:[#allocation2 + $0x170] sm:$0xff] }
 0x1b3   :  { %5262 = vmatpush1.bf16.msra.mxu0 %v7762_v36  ;;  %v7824_v36 = vld [vmem:[#allocation5 + $0xec] ss:$16 sps:$4 sm:$0xff]  }
 0x1b4   :  { %5305 = vmatpush1.bf16.msra.mxu1 %v7765_v37  ;;  %5263 = vmatprep.subr.bf16.mxu0 %v7770_v38  ;;  %v7827_v37 = vld [vmem:[#allocation5 + $0x2ec] ss:$16 sps:$4 sm:$0xff]   ;;  %v7822_v38 = vld [vmem:[#allocation5 + $0xe8] ss:$16 sps:$4 sm:$0xff]  }
 0x1b5   :  { %5306 = vmatprep.subr.bf16.mxu1 %v7773_v39  ;;  %v7825_v39 = vld [vmem:[#allocation5 + $0x2e8] ss:$16 sps:$4 sm:$0xff]  }
 0x1b7   :  { %5264 = vmatpush1.bf16.msra.mxu0 %v7768_v41  ;;  %v8753_v41 = vpack.c.bf16 %v161_v33, %v137_v32  ;;  %v7876_v32 = vld [vmem:[#allocation5 + $0x1c8] ss:$16 sps:$4 sm:$0xff]  }
 0x1b8   :  { %5307 = vmatpush1.bf16.msra.mxu1 %v7771_v42  ;;  %5265 = vmatprep.subr.bf16.mxu0 %v7776_v43  ;;  %v8755_v42 = vpack.c.bf16 %v163_v35, %v139_v34  ;;  %v7830_v43 = vld [vmem:[#allocation5 + $0xcc] ss:$16 sps:$4 sm:$0xff]   ;;  %v7879_v33 = vld [vmem:[#allocation5 + $0x3c8] ss:$16 sps:$4 sm:$0xff]  }
 0x1b9   :  { %5308 = vmatprep.subr.bf16.mxu1 %v7779_v44  ;;  %v7833_v44 = vld [vmem:[#allocation5 + $0x2cc] ss:$16 sps:$4 sm:$0xff]  }
 0x1ba   :  { %v7884_v34 = vld [vmem:[#allocation5 + $0x1ac] ss:$16 sps:$4 sm:$0xff]  }
 0x1bb   :  { %5266 = vmatpush2.bf16.msra.mxu0 %v7774_v48  ;;  %v7828_v48 = vld [vmem:[#allocation5 + $0xc8] ss:$16 sps:$4 sm:$0xff]   ;;  %v7887_v35 = vld [vmem:[#allocation5 + $0x3ac] ss:$16 sps:$4 sm:$0xff]  }
 0x1bc   :  { %5309 = vmatpush2.bf16.msra.mxu1 %v7777_v49  ;;  %5267 = vmatprep.subr.bf16.mxu0 %v7782_v50  ;;  %v7831_v49 = vld [vmem:[#allocation5 + $0x2c8] ss:$16 sps:$4 sm:$0xff]   ;;  %v7836_v50 = vld [vmem:[#allocation5 + $0xac] ss:$16 sps:$4 sm:$0xff]  }
 0x1bd   :  { %5310 = vmatprep.subr.bf16.mxu1 %v7785_v51  ;;  %v7839_v51 = vld [vmem:[#allocation5 + $0x2ac] ss:$16 sps:$4 sm:$0xff]  }
 0x1bf   :  { %5268 = vmatpush2.bf16.msra.mxu0 %v7780_v52  ;;  %v7834_v52 = vld [vmem:[#allocation5 + $0xa8] ss:$16 sps:$4 sm:$0xff]  }
 0x1c0   :  { %5311 = vmatpush2.bf16.msra.mxu1 %v7783_v55  ;;  %5269 = vmatprep.subr.bf16.mxu0 %v7788_v56  ;;  %v7837_v55 = vld [vmem:[#allocation5 + $0x2a8] ss:$16 sps:$4 sm:$0xff]   ;;  %v7842_v56 = vld [vmem:[#allocation5 + $0x8c] ss:$16 sps:$4 sm:$0xff]  }
 0x1c1   :  { %5312 = vmatprep.subr.bf16.mxu1 %v7791_v57  ;;  %v7845_v57 = vld [vmem:[#allocation5 + $0x28c] ss:$16 sps:$4 sm:$0xff]  }
 0x1c3   :  { %5270 = vmatpush2.bf16.msra.mxu0 %v7786_v60  ;;  %v7840_v60 = vld [vmem:[#allocation5 + $0x88] ss:$16 sps:$4 sm:$0xff]  }
 0x1c4   :  { %5313 = vmatpush2.bf16.msra.mxu1 %v7789_v61  ;;  %5271 = vmatprep.subr.bf16.mxu0 %v7794_v62  ;;  %v7843_v61 = vld [vmem:[#allocation5 + $0x288] ss:$16 sps:$4 sm:$0xff]   ;;  %v7848_v62 = vld [vmem:[#allocation5 + $0x6c] ss:$16 sps:$4 sm:$0xff]  }
 0x1c5   :  { %5314 = vmatprep.subr.bf16.mxu1 %v7797_v63  ;;  %v7851_v63 = vld [vmem:[#allocation5 + $0x26c] ss:$16 sps:$4 sm:$0xff]  }
 0x1c7   :  { %5272 = vmatpush2.bf16.msra.mxu0 %v7792_v4  ;;  %v7846_v4 = vld [vmem:[#allocation5 + $0x68] ss:$16 sps:$4 sm:$0xff]  }
 0x1c8   :  { %5315 = vmatpush2.bf16.msra.mxu1 %v7795_v5  ;;  %5273 = vmatprep.subr.bf16.mxu0 %v7800_v6  ;;  %v7857_v5 = vld [vmem:[#allocation5 + $0x24c] ss:$16 sps:$4 sm:$0xff]   ;;  %v7852_v6 = vld [vmem:[#allocation5 + $0x48] ss:$16 sps:$4 sm:$0xff]  }
 0x1c9   :  { %5316 = vmatprep.subr.bf16.mxu1 %v7803_v7  ;;  %v7855_v7 = vld [vmem:[#allocation5 + $0x248] ss:$16 sps:$4 sm:$0xff]  }
 0x1cb   :  { %5274 = vmatpush2.bf16.msra.mxu0 %v7798_v10  ;;  %v7860_v10 = vld [vmem:[#allocation5 + $0x2c] ss:$16 sps:$4 sm:$0xff]  }
 0x1cc   :  { %5317 = vmatpush2.bf16.msra.mxu1 %v7801_v11  ;;  %5275 = vmatprep.subr.bf16.mxu0 %v7806_v14  ;;  %v7863_v11 = vld [vmem:[#allocation5 + $0x22c] ss:$16 sps:$4 sm:$0xff]   ;;  %v7858_v14 = vld [vmem:[#allocation5 + $0x28] ss:$16 sps:$4 sm:$0xff]  }
 0x1cd   :  { %5318 = vmatprep.subr.bf16.mxu1 %v7809_v15  ;;  %v7861_v15 = vld [vmem:[#allocation5 + $0x228] ss:$16 sps:$4 sm:$0xff]  }
 0x1cf   :  { %5276 = vmatpush2.bf16.msra.mxu0 %v7804_v16  ;;  %v7866_v16 = vld [vmem:[#allocation5 + $0xc] ss:$16 sps:$4 sm:$0xff]  }
 0x1d0   :  { %5319 = vmatpush2.bf16.msra.mxu1 %v7807_v17  ;;  %5277 = vmatprep.subr.bf16.mxu0 %v7812_v18  ;;  %v7869_v17 = vld [vmem:[#allocation5 + $0x20c] ss:$16 sps:$4 sm:$0xff]   ;;  %v7864_v18 = vld [vmem:[#allocation5 + $0x8] ss:$16 sps:$4 sm:$0xff]  }
 0x1d1   :  { %5320 = vmatprep.subr.bf16.mxu1 %v7815_v19  ;;  %v7867_v19 = vld [vmem:[#allocation5 + $0x208] ss:$16 sps:$4 sm:$0xff]  }
 0x1d3   :  { %5278 = vmatpush2.bf16.msra.mxu0 %v7810_v20  ;;  %v7872_v20 = vld [vmem:[#allocation5 + $0x1ec] ss:$16 sps:$4 sm:$0xff]  }
 0x1d4   :  { %5321 = vmatpush2.bf16.msra.mxu1 %v7813_v21  ;;  %5279 = vmatprep.subr.bf16.mxu0 %v7818_v24  ;;  %v7875_v21 = vld [vmem:[#allocation5 + $0x3ec] ss:$16 sps:$4 sm:$0xff]   ;;  %v7870_v24 = vld [vmem:[#allocation5 + $0x1e8] ss:$16 sps:$4 sm:$0xff]  }
 0x1d5   :  { %5322 = vmatprep.subr.bf16.mxu1 %v7821_v25  ;;  %v7873_v25 = vld [vmem:[#allocation5 + $0x3e8] ss:$16 sps:$4 sm:$0xff]  }
 0x1d7   :  { %5280 = vmatpush2.bf16.msra.mxu0 %v7816_v26  ;;  %v7878_v26 = vld [vmem:[#allocation5 + $0x1cc] ss:$16 sps:$4 sm:$0xff]  }
 0x1d8   :  { %5323 = vmatpush2.bf16.msra.mxu1 %v7819_v27  ;;  %5335 = vmatprep.subr.bf16.mxu0 %v7824_v36  ;;  %v7881_v27 = vld [vmem:[#allocation5 + $0x3cc] ss:$16 sps:$4 sm:$0xff]   ;;  %v7882_v36 = vld [vmem:[#allocation5 + $0x1a8] ss:$16 sps:$4 sm:$0xff]  }
 0x1d9   :  { %5378 = vmatprep.subr.bf16.mxu1 %v7827_v37  ;;  %v7885_v37 = vld [vmem:[#allocation5 + $0x3a8] ss:$16 sps:$4 sm:$0xff]  }
 0x1da   :  { %5282 = vmatmul.mubr.bf16.vlgmr.msra.gmra.mxu0 %v8753_v41 }
 0x1db   :  { %5325 = vmatmul.mubr.bf16.vlgmr.msra.gmra.mxu1 %v8755_v42  ;;  %5336 = vmatpush1.bf16.msra.mxu0 %v7822_v38  ;;  %v7890_v38 = vld [vmem:[#allocation5 + $0x18c] ss:$16 sps:$4 sm:$0xff]  }
 0x1dc   :  { %5379 = vmatpush1.bf16.msra.mxu1 %v7825_v39  ;;  %5337 = vmatprep.subr.bf16.mxu0 %v7830_v43  ;;  %v7893_v39 = vld [vmem:[#allocation5 + $0x38c] ss:$16 sps:$4 sm:$0xff]   ;;  %v7888_v43 = vld [vmem:[#allocation5 + $0x188] ss:$16 sps:$4 sm:$0xff]  }
 0x1dd   :  { %5380 = vmatprep.subr.bf16.mxu1 %v7833_v44  ;;  %5367 = vmatprep.mubr.bf16.mxu0 %v8687_v53  ;;  %v7849_v53 = vld [vmem:[#allocation5 + $0x268] ss:$16 sps:$4 sm:$0xff]  }
 0x1de   :  { %5410 = vmatprep.mubr.bf16.mxu1 %v8689_v54  ;;  %v7854_v54 = vld [vmem:[#allocation5 + $0x4c] ss:$16 sps:$4 sm:$0xff]   ;;  %v7891_v44 = vld [vmem:[#allocation5 + $0x388] ss:$16 sps:$4 sm:$0xff]  }
 0x1df   :  { %5338 = vmatpush1.bf16.msra.mxu0 %v7828_v48  ;;  %v7896_v48 = vld [vmem:[#allocation5 + $0x16c] ss:$16 sps:$4 sm:$0xff]  }
 0x1e0   :  { %5381 = vmatpush1.bf16.msra.mxu1 %v7831_v49  ;;  %5339 = vmatprep.subr.bf16.mxu0 %v7836_v50  ;;  %v7899_v49 = vld [vmem:[#allocation5 + $0x36c] ss:$16 sps:$4 sm:$0xff]   ;;  %v7894_v50 = vld [vmem:[#allocation5 + $0x168] ss:$16 sps:$4 sm:$0xff]  }
 0x1e1   :  { %5382 = vmatprep.subr.bf16.mxu1 %v7839_v51  ;;  %v7897_v51 = vld [vmem:[#allocation5 + $0x368] ss:$16 sps:$4 sm:$0xff]  }
 0x1e3   :  { %5340 = vmatpush1.bf16.msra.mxu0 %v7834_v52  ;;  %v7902_v52 = vld [vmem:[#allocation5 + $0x14c] ss:$16 sps:$4 sm:$0xff]  }
 0x1e4   :  { %5383 = vmatpush1.bf16.msra.mxu1 %v7837_v55  ;;  %5341 = vmatprep.subr.bf16.mxu0 %v7842_v56  ;;  %v7905_v55 = vld [vmem:[#allocation5 + $0x34c] ss:$16 sps:$4 sm:$0xff]   ;;  %v7900_v56 = vld [vmem:[#allocation5 + $0x148] ss:$16 sps:$4 sm:$0xff]  }
 0x1e5   :  { %5384 = vmatprep.subr.bf16.mxu1 %v7845_v57  ;;  %v7903_v57 = vld [vmem:[#allocation5 + $0x348] ss:$16 sps:$4 sm:$0xff]  }
 0x1e7   :  { %5342 = vmatpush1.bf16.msra.mxu0 %v7840_v60  ;;  %v7908_v60 = vld [vmem:[#allocation5 + $0x12c] ss:$16 sps:$4 sm:$0xff]  }
 0x1e8   :  { %5385 = vmatpush1.bf16.msra.mxu1 %v7843_v61  ;;  %5343 = vmatprep.subr.bf16.mxu0 %v7848_v62  ;;  %v7911_v61 = vld [vmem:[#allocation5 + $0x32c] ss:$16 sps:$4 sm:$0xff]   ;;  %v7906_v62 = vld [vmem:[#allocation5 + $0x128] ss:$16 sps:$4 sm:$0xff]  }
 0x1e9   :  { %5386 = vmatprep.subr.bf16.mxu1 %v7851_v63  ;;  %v7909_v63 = vld [vmem:[#allocation5 + $0x328] ss:$16 sps:$4 sm:$0xff]  }
 0x1eb   :  { %5344 = vmatpush1.bf16.msra.mxu0 %v7846_v4  ;;  %v7914_v4 = vld [vmem:[#allocation5 + $0x10c] ss:$16 sps:$4 sm:$0xff]  }
 0x1ec   :  { %5387 = vmatpush1.bf16.msra.mxu1 %v7849_v53  ;;  %5345 = vmatprep.subr.bf16.mxu0 %v7854_v54  ;;  %v7917_v53 = vld [vmem:[#allocation5 + $0x30c] ss:$16 sps:$4 sm:$0xff]   ;;  %v7912_v54 = vld [vmem:[#allocation5 + $0x108] ss:$16 sps:$4 sm:$0xff]  }
 0x1ed   :  { %5388 = vmatprep.subr.bf16.mxu1 %v7857_v5  ;;  %v7915_v5 = vld [vmem:[#allocation5 + $0x308] ss:$16 sps:$4 sm:$0xff]  }
 0x1ef   :  { %5346 = vmatpush1.bf16.msra.mxu0 %v7852_v6  ;;  %v7920_v6 = vld [vmem:[#allocation5 + $0x4ec] ss:$16 sps:$4 sm:$0xff]  }
 0x1f0   :  { %5389 = vmatpush1.bf16.msra.mxu1 %v7855_v7  ;;  %5347 = vmatprep.subr.bf16.mxu0 %v7860_v10  ;;  %v7923_v7 = vld [vmem:[#allocation5 + $0x6ec] ss:$16 sps:$4 sm:$0xff]   ;;  %v7918_v10 = vld [vmem:[#allocation5 + $0x4e8] ss:$16 sps:$4 sm:$0xff]  }
 0x1f1   :  { %5390 = vmatprep.subr.bf16.mxu1 %v7863_v11  ;;  %v7921_v11 = vld [vmem:[#allocation5 + $0x6e8] ss:$16 sps:$4 sm:$0xff]  }
 0x1f3   :  { %5348 = vmatpush1.bf16.msra.mxu0 %v7858_v14  ;;  %v7926_v14 = vld [vmem:[#allocation5 + $0x4cc] ss:$16 sps:$4 sm:$0xff]  }
 0x1f4   :  { %5391 = vmatpush1.bf16.msra.mxu1 %v7861_v15  ;;  %5349 = vmatprep.subr.bf16.mxu0 %v7866_v16  ;;  %v7929_v15 = vld [vmem:[#allocation5 + $0x6cc] ss:$16 sps:$4 sm:$0xff]   ;;  %v7924_v16 = vld [vmem:[#allocation5 + $0x4c8] ss:$16 sps:$4 sm:$0xff]  }
 0x1f5   :  { %5392 = vmatprep.subr.bf16.mxu1 %v7869_v17  ;;  %v7927_v17 = vld [vmem:[#allocation5 + $0x6c8] ss:$16 sps:$4 sm:$0xff]  }
 0x1f7   :  { %5350 = vmatpush1.bf16.msra.mxu0 %v7864_v18  ;;  %v7932_v18 = vld [vmem:[#allocation5 + $0x4ac] ss:$16 sps:$4 sm:$0xff]  }
 0x1f8   :  { %5393 = vmatpush1.bf16.msra.mxu1 %v7867_v19  ;;  %5351 = vmatprep.subr.bf16.mxu0 %v7872_v20  ;;  %v7935_v19 = vld [vmem:[#allocation5 + $0x6ac] ss:$16 sps:$4 sm:$0xff]   ;;  %v7930_v20 = vld [vmem:[#allocation5 + $0x4a8] ss:$16 sps:$4 sm:$0xff]  }
 0x1f9   :  { %5394 = vmatprep.subr.bf16.mxu1 %v7875_v21  ;;  %v7933_v21 = vld [vmem:[#allocation5 + $0x6a8] ss:$16 sps:$4 sm:$0xff]  }
 0x1fb   :  { %5352 = vmatpush2.bf16.msra.mxu0 %v7870_v24  ;;  %v7938_v24 = vld [vmem:[#allocation5 + $0x48c] ss:$16 sps:$4 sm:$0xff]  }
 0x1fc   :  { %5395 = vmatpush2.bf16.msra.mxu1 %v7873_v25  ;;  %5353 = vmatprep.subr.bf16.mxu0 %v7878_v26  ;;  %v7936_v25 = vld [vmem:[#allocation5 + $0x488] ss:$16 sps:$4 sm:$0xff]   ;;  %v7944_v26 = vld [vmem:[#allocation5 + $0x46c] ss:$16 sps:$4 sm:$0xff]  }
 0x1fd   :  { %5396 = vmatprep.subr.bf16.mxu1 %v7881_v27  ;;  %v7947_v27 = vld [vmem:[#allocation5 + $0x66c] ss:$16 sps:$4 sm:$0xff]  }
 0x1ff   :  { %5354 = vmatpush2.bf16.msra.mxu0 %v7876_v32  ;;  %v7942_v32 = vld [vmem:[#allocation5 + $0x468] ss:$16 sps:$4 sm:$0xff]  }
 0x200   :  { %5397 = vmatpush2.bf16.msra.mxu1 %v7879_v33  ;;  %5355 = vmatprep.subr.bf16.mxu0 %v7884_v34  ;;  %v7953_v33 = vld [vmem:[#allocation5 + $0x64c] ss:$16 sps:$4 sm:$0xff]   ;;  %v7948_v34 = vld [vmem:[#allocation5 + $0x448] ss:$16 sps:$4 sm:$0xff]  }
 0x201   :  { %5398 = vmatprep.subr.bf16.mxu1 %v7887_v35  ;;  %v7951_v35 = vld [vmem:[#allocation5 + $0x648] ss:$16 sps:$4 sm:$0xff]  }
 0x203   :  { %5356 = vmatpush2.bf16.msra.mxu0 %v7882_v36  ;;  %v7956_v36 = vld [vmem:[#allocation5 + $0x42c] ss:$16 sps:$4 sm:$0xff]  }
 0x204   :  { %5399 = vmatpush2.bf16.msra.mxu1 %v7885_v37  ;;  %5357 = vmatprep.subr.bf16.mxu0 %v7890_v38  ;;  %v7959_v37 = vld [vmem:[#allocation5 + $0x62c] ss:$16 sps:$4 sm:$0xff]   ;;  %v7954_v38 = vld [vmem:[#allocation5 + $0x428] ss:$16 sps:$4 sm:$0xff]  }
 0x205   :  { %5400 = vmatprep.subr.bf16.mxu1 %v7893_v39  ;;  %v7957_v39 = vld [vmem:[#allocation5 + $0x628] ss:$16 sps:$4 sm:$0xff]  }
 0x207   :  { %5358 = vmatpush2.bf16.msra.mxu0 %v7888_v43  ;;  %v7962_v43 = vld [vmem:[#allocation5 + $0x40c] ss:$16 sps:$4 sm:$0xff]  }
 0x208   :  { %5401 = vmatpush2.bf16.msra.mxu1 %v7891_v44  ;;  %5359 = vmatprep.subr.bf16.mxu0 %v7896_v48  ;;  %v7965_v44 = vld [vmem:[#allocation5 + $0x60c] ss:$16 sps:$4 sm:$0xff]   ;;  %v7960_v48 = vld [vmem:[#allocation5 + $0x408] ss:$16 sps:$4 sm:$0xff]  }
 0x209   :  { %5402 = vmatprep.subr.bf16.mxu1 %v7899_v49  ;;  %v7963_v49 = vld [vmem:[#allocation5 + $0x608] ss:$16 sps:$4 sm:$0xff]  }
 0x20b   :  { %5360 = vmatpush2.bf16.msra.mxu0 %v7894_v50  ;;  %v7968_v50 = vld [vmem:[#allocation5 + $0x5ec] ss:$16 sps:$4 sm:$0xff]  }
 0x20c   :  { %5403 = vmatpush2.bf16.msra.mxu1 %v7897_v51  ;;  %5361 = vmatprep.subr.bf16.mxu0 %v7902_v52  ;;  %v7971_v51 = vld [vmem:[#allocation5 + $0x7ec] ss:$16 sps:$4 sm:$0xff]   ;;  %v7966_v52 = vld [vmem:[#allocation5 + $0x5e8] ss:$16 sps:$4 sm:$0xff]  }
 0x20d   :  { %5404 = vmatprep.subr.bf16.mxu1 %v7905_v55  ;;  %v7969_v55 = vld [vmem:[#allocation5 + $0x7e8] ss:$16 sps:$4 sm:$0xff]  }
 0x20f   :  { %5362 = vmatpush2.bf16.msra.mxu0 %v7900_v56  ;;  %v7974_v56 = vld [vmem:[#allocation5 + $0x5cc] ss:$16 sps:$4 sm:$0xff]  }
 0x210   :  { %5405 = vmatpush2.bf16.msra.mxu1 %v7903_v57  ;;  %5363 = vmatprep.subr.bf16.mxu0 %v7908_v60  ;;  %v7977_v57 = vld [vmem:[#allocation5 + $0x7cc] ss:$16 sps:$4 sm:$0xff]   ;;  %v7972_v60 = vld [vmem:[#allocation5 + $0x5c8] ss:$16 sps:$4 sm:$0xff]  }
 0x211   :  { %5406 = vmatprep.subr.bf16.mxu1 %v7911_v61  ;;  %v7975_v61 = vld [vmem:[#allocation5 + $0x7c8] ss:$16 sps:$4 sm:$0xff]  }
 0x213   :  { %5364 = vmatpush2.bf16.msra.mxu0 %v7906_v62  ;;  %v7980_v62 = vld [vmem:[#allocation5 + $0x5ac] ss:$16 sps:$4 sm:$0xff]  }
 0x214   :  { %5407 = vmatpush2.bf16.msra.mxu1 %v7909_v63  ;;  %5365 = vmatprep.subr.bf16.mxu0 %v7914_v4  ;;  %v7983_v63 = vld [vmem:[#allocation5 + $0x7ac] ss:$16 sps:$4 sm:$0xff]   ;;  %v7978_v4 = vld [vmem:[#allocation5 + $0x5a8] ss:$16 sps:$4 sm:$0xff]  }
 0x215   :  { %5408 = vmatprep.subr.bf16.mxu1 %v7917_v53  ;;  %v7981_v53 = vld [vmem:[#allocation5 + $0x7a8] ss:$16 sps:$4 sm:$0xff]  }
 0x217   :  { %5366 = vmatpush2.bf16.msra.mxu0 %v7912_v54  ;;  %v7986_v54 = vld [vmem:[#allocation5 + $0x58c] ss:$16 sps:$4 sm:$0xff]  }
 0x218   :  { %5409 = vmatpush2.bf16.msra.mxu1 %v7915_v5  ;;  %5421 = vmatprep.subr.bf16.mxu0 %v7920_v6  ;;  %v7989_v5 = vld [vmem:[#allocation5 + $0x78c] ss:$16 sps:$4 sm:$0xff]   ;;  %v7984_v6 = vld [vmem:[#allocation5 + $0x588] ss:$16 sps:$4 sm:$0xff]  }
 0x219   :  { %5464 = vmatprep.subr.bf16.mxu1 %v7923_v7  ;;  %v7987_v7 = vld [vmem:[#allocation5 + $0x788] ss:$16 sps:$4 sm:$0xff]  }
 0x21a   :  { %5368 = vmatmul.mubr.bf16.vlgmr.msra.gmra.mxu0 %v8693_v12  ;;  %v7941_v12 = vld [vmem:[#allocation5 + $0x68c] ss:$16 sps:$4 sm:$0xff]  }
 0x21b   :  { %5411 = vmatmul.mubr.bf16.vlgmr.msra.gmra.mxu1 %v8695_v13  ;;  %5422 = vmatpush1.bf16.msra.mxu0 %v7918_v10  ;;  %v7939_v13 = vld [vmem:[#allocation5 + $0x688] ss:$16 sps:$4 sm:$0xff]   ;;  %v7992_v10 = vld [vmem:[#allocation5 + $0x56c] ss:$16 sps:$4 sm:$0xff]  }
 0x21c   :  { %5465 = vmatpush1.bf16.msra.mxu1 %v7921_v11  ;;  %5423 = vmatprep.subr.bf16.mxu0 %v7926_v14  ;;  %v7995_v11 = vld [vmem:[#allocation5 + $0x76c] ss:$16 sps:$4 sm:$0xff]   ;;  %v7990_v14 = vld [vmem:[#allocation5 + $0x568] ss:$16 sps:$4 sm:$0xff]  }
 0x21d   :  { %5466 = vmatprep.subr.bf16.mxu1 %v7929_v15  ;;  %5453 = vmatprep.mubr.bf16.mxu0 %v8699_v45  ;;  %v7945_v45 = vld [vmem:[#allocation5 + $0x668] ss:$16 sps:$4 sm:$0xff]  }
 0x21e   :  { %5496 = vmatprep.mubr.bf16.mxu1 %v8701_v47  ;;  %v7950_v47 = vld [vmem:[#allocation5 + $0x44c] ss:$16 sps:$4 sm:$0xff]   ;;  %v7993_v15 = vld [vmem:[#allocation5 + $0x768] ss:$16 sps:$4 sm:$0xff]  }
 0x21f   :  { %5424 = vmatpush1.bf16.msra.mxu0 %v7924_v16  ;;  %v7998_v16 = vld [vmem:[#allocation5 + $0x54c] ss:$16 sps:$4 sm:$0xff]  }
 0x220   :  { %5467 = vmatpush1.bf16.msra.mxu1 %v7927_v17  ;;  %5425 = vmatprep.subr.bf16.mxu0 %v7932_v18  ;;  %v8001_v17 = vld [vmem:[#allocation5 + $0x74c] ss:$16 sps:$4 sm:$0xff]   ;;  %v7996_v18 = vld [vmem:[#allocation5 + $0x548] ss:$16 sps:$4 sm:$0xff]  }
 0x221   :  { %5468 = vmatprep.subr.bf16.mxu1 %v7935_v19  ;;  %v7999_v19 = vld [vmem:[#allocation5 + $0x748] ss:$16 sps:$4 sm:$0xff]  }
 0x223   :  { %5426 = vmatpush1.bf16.msra.mxu0 %v7930_v20  ;;  %v8004_v20 = vld [vmem:[#allocation5 + $0x52c] ss:$16 sps:$4 sm:$0xff]  }
 0x224   :  { %5469 = vmatpush1.bf16.msra.mxu1 %v7933_v21  ;;  %5427 = vmatprep.subr.bf16.mxu0 %v7938_v24  ;;  %v8007_v21 = vld [vmem:[#allocation5 + $0x72c] ss:$16 sps:$4 sm:$0xff]   ;;  %v8002_v24 = vld [vmem:[#allocation5 + $0x528] ss:$16 sps:$4 sm:$0xff]  }
 0x225   :  { %5470 = vmatprep.subr.bf16.mxu1 %v7941_v12  ;;  %v8005_v12 = vld [vmem:[#allocation5 + $0x728] ss:$16 sps:$4 sm:$0xff]  }
 0x227   :  { %5428 = vmatpush1.bf16.msra.mxu0 %v7936_v25  ;;  %v8010_v25 = vld [vmem:[#allocation5 + $0x50c] ss:$16 sps:$4 sm:$0xff]  }
 0x228   :  { %5471 = vmatpush1.bf16.msra.mxu1 %v7939_v13  ;;  %5429 = vmatprep.subr.bf16.mxu0 %v7944_v26  ;;  %v8013_v13 = vld [vmem:[#allocation5 + $0x70c] ss:$16 sps:$4 sm:$0xff]   ;;  %v8008_v26 = vld [vmem:[#allocation5 + $0x508] ss:$16 sps:$4 sm:$0xff]  }
 0x229   :  { %5472 = vmatprep.subr.bf16.mxu1 %v7947_v27  ;;  %v8011_v27 = vld [vmem:[#allocation5 + $0x708] ss:$16 sps:$4 sm:$0xff]  }
 0x22b   :  { %5430 = vmatpush1.bf16.msra.mxu0 %v7942_v32  ;;  %v8016_v32 = vld [vmem:[#allocation5 + $0x8ec] ss:$16 sps:$4 sm:$0xff]  }
 0x22c   :  { %5473 = vmatpush1.bf16.msra.mxu1 %v7945_v45  ;;  %5431 = vmatprep.subr.bf16.mxu0 %v7950_v47  ;;  %v8019_v45 = vld [vmem:[#allocation5 + $0xaec] ss:$16 sps:$4 sm:$0xff]   ;;  %v8014_v47 = vld [vmem:[#allocation5 + $0x8e8] ss:$16 sps:$4 sm:$0xff]  }
 0x22d   :  { %5474 = vmatprep.subr.bf16.mxu1 %v7953_v33  ;;  %v8017_v33 = vld [vmem:[#allocation5 + $0xae8] ss:$16 sps:$4 sm:$0xff]  }
 0x22f   :  { %5432 = vmatpush1.bf16.msra.mxu0 %v7948_v34  ;;  %v8022_v34 = vld [vmem:[#allocation5 + $0x8cc] ss:$16 sps:$4 sm:$0xff]  }
 0x230   :  { %5475 = vmatpush1.bf16.msra.mxu1 %v7951_v35  ;;  %5433 = vmatprep.subr.bf16.mxu0 %v7956_v36  ;;  %v8025_v35 = vld [vmem:[#allocation5 + $0xacc] ss:$16 sps:$4 sm:$0xff]   ;;  %v8020_v36 = vld [vmem:[#allocation5 + $0x8c8] ss:$16 sps:$4 sm:$0xff]  }
 0x231   :  { %5476 = vmatprep.subr.bf16.mxu1 %v7959_v37  ;;  %v8023_v37 = vld [vmem:[#allocation5 + $0xac8] ss:$16 sps:$4 sm:$0xff]  }
 0x233   :  { %5434 = vmatpush1.bf16.msra.mxu0 %v7954_v38  ;;  %v8028_v38 = vld [vmem:[#allocation5 + $0x8ac] ss:$16 sps:$4 sm:$0xff]  }
 0x234   :  { %5477 = vmatpush1.bf16.msra.mxu1 %v7957_v39  ;;  %5435 = vmatprep.subr.bf16.mxu0 %v7962_v43  ;;  %v8031_v39 = vld [vmem:[#allocation5 + $0xaac] ss:$16 sps:$4 sm:$0xff]   ;;  %v8026_v43 = vld [vmem:[#allocation5 + $0x8a8] ss:$16 sps:$4 sm:$0xff]  }
 0x235   :  { %5478 = vmatprep.subr.bf16.mxu1 %v7965_v44  ;;  %v8029_v44 = vld [vmem:[#allocation5 + $0xaa8] ss:$16 sps:$4 sm:$0xff]  }
 0x237   :  { %5436 = vmatpush1.bf16.msra.mxu0 %v7960_v48  ;;  %v8032_v48 = vld [vmem:[#allocation5 + $0x888] ss:$16 sps:$4 sm:$0xff]  }
 0x238   :  { %5479 = vmatpush1.bf16.msra.mxu1 %v7963_v49  ;;  %5437 = vmatprep.subr.bf16.mxu0 %v7968_v50  ;;  %v8035_v49 = vld [vmem:[#allocation5 + $0xa88] ss:$16 sps:$4 sm:$0xff]   ;;  %v8040_v50 = vld [vmem:[#allocation5 + $0x86c] ss:$16 sps:$4 sm:$0xff]  }
 0x239   :  { %5480 = vmatprep.subr.bf16.mxu1 %v7971_v51  ;;  %v8043_v51 = vld [vmem:[#allocation5 + $0xa6c] ss:$16 sps:$4 sm:$0xff]  }
 0x23b   :  { %5438 = vmatpush2.bf16.msra.mxu0 %v7966_v52  ;;  %v8046_v52 = vld [vmem:[#allocation5 + $0x84c] ss:$16 sps:$4 sm:$0xff]  }
 0x23c   :  { %5481 = vmatpush2.bf16.msra.mxu1 %v7969_v55  ;;  %5439 = vmatprep.subr.bf16.mxu0 %v7974_v56  ;;  %v8049_v55 = vld [vmem:[#allocation5 + $0xa4c] ss:$16 sps:$4 sm:$0xff]   ;;  %v8044_v56 = vld [vmem:[#allocation5 + $0x848] ss:$16 sps:$4 sm:$0xff]  }
 0x23d   :  { %5482 = vmatprep.subr.bf16.mxu1 %v7977_v57  ;;  %v8047_v57 = vld [vmem:[#allocation5 + $0xa48] ss:$16 sps:$4 sm:$0xff]  }
 0x23f   :  { %5440 = vmatpush2.bf16.msra.mxu0 %v7972_v60  ;;  %v8052_v60 = vld [vmem:[#allocation5 + $0x82c] ss:$16 sps:$4 sm:$0xff]  }
 0x240   :  { %5483 = vmatpush2.bf16.msra.mxu1 %v7975_v61  ;;  %5441 = vmatprep.subr.bf16.mxu0 %v7980_v62  ;;  %v8055_v61 = vld [vmem:[#allocation5 + $0xa2c] ss:$16 sps:$4 sm:$0xff]   ;;  %v8050_v62 = vld [vmem:[#allocation5 + $0x828] ss:$16 sps:$4 sm:$0xff]  }
 0x241   :  { %5484 = vmatprep.subr.bf16.mxu1 %v7983_v63  ;;  %v8053_v63 = vld [vmem:[#allocation5 + $0xa28] ss:$16 sps:$4 sm:$0xff]  }
 0x243   :  { %5442 = vmatpush2.bf16.msra.mxu0 %v7978_v4  ;;  %v8058_v4 = vld [vmem:[#allocation5 + $0x80c] ss:$16 sps:$4 sm:$0xff]  }
 0x244   :  { %5485 = vmatpush2.bf16.msra.mxu1 %v7981_v53  ;;  %5443 = vmatprep.subr.bf16.mxu0 %v7986_v54  ;;  %v8061_v53 = vld [vmem:[#allocation5 + $0xa0c] ss:$16 sps:$4 sm:$0xff]   ;;  %v8056_v54 = vld [vmem:[#allocation5 + $0x808] ss:$16 sps:$4 sm:$0xff]  }
 0x245   :  { %5486 = vmatprep.subr.bf16.mxu1 %v7989_v5  ;;  %v8059_v5 = vld [vmem:[#allocation5 + $0xa08] ss:$16 sps:$4 sm:$0xff]  }
 0x247   :  { %5444 = vmatpush2.bf16.msra.mxu0 %v7984_v6  ;;  %v8064_v6 = vld [vmem:[#allocation5 + $0x9ec] ss:$16 sps:$4 sm:$0xff]  }
 0x248   :  { %5487 = vmatpush2.bf16.msra.mxu1 %v7987_v7  ;;  %5445 = vmatprep.subr.bf16.mxu0 %v7992_v10  ;;  %v8067_v7 = vld [vmem:[#allocation5 + $0xbec] ss:$16 sps:$4 sm:$0xff]   ;;  %v8062_v10 = vld [vmem:[#allocation5 + $0x9e8] ss:$16 sps:$4 sm:$0xff]  }
 0x249   :  { %5488 = vmatprep.subr.bf16.mxu1 %v7995_v11  ;;  %v8065_v11 = vld [vmem:[#allocation5 + $0xbe8] ss:$16 sps:$4 sm:$0xff]  }
 0x24b   :  { %5446 = vmatpush2.bf16.msra.mxu0 %v7990_v14  ;;  %v8070_v14 = vld [vmem:[#allocation5 + $0x9cc] ss:$16 sps:$4 sm:$0xff]  }
 0x24c   :  { %5489 = vmatpush2.bf16.msra.mxu1 %v7993_v15  ;;  %5447 = vmatprep.subr.bf16.mxu0 %v7998_v16  ;;  %v8073_v15 = vld [vmem:[#allocation5 + $0xbcc] ss:$16 sps:$4 sm:$0xff]   ;;  %v8068_v16 = vld [vmem:[#allocation5 + $0x9c8] ss:$16 sps:$4 sm:$0xff]  }
 0x24d   :  { %5490 = vmatprep.subr.bf16.mxu1 %v8001_v17  ;;  %v8071_v17 = vld [vmem:[#allocation5 + $0xbc8] ss:$16 sps:$4 sm:$0xff]  }
 0x24f   :  { %5448 = vmatpush2.bf16.msra.mxu0 %v7996_v18  ;;  %v8076_v18 = vld [vmem:[#allocation5 + $0x9ac] ss:$16 sps:$4 sm:$0xff]  }
 0x250   :  { %5491 = vmatpush2.bf16.msra.mxu1 %v7999_v19  ;;  %5449 = vmatprep.subr.bf16.mxu0 %v8004_v20  ;;  %v8079_v19 = vld [vmem:[#allocation5 + $0xbac] ss:$16 sps:$4 sm:$0xff]   ;;  %v8074_v20 = vld [vmem:[#allocation5 + $0x9a8] ss:$16 sps:$4 sm:$0xff]  }
 0x251   :  { %5492 = vmatprep.subr.bf16.mxu1 %v8007_v21  ;;  %v8077_v21 = vld [vmem:[#allocation5 + $0xba8] ss:$16 sps:$4 sm:$0xff]  }
 0x253   :  { %5450 = vmatpush2.bf16.msra.mxu0 %v8002_v24  ;;  %v8082_v24 = vld [vmem:[#allocation5 + $0x98c] ss:$16 sps:$4 sm:$0xff]  }
 0x254   :  { %5493 = vmatpush2.bf16.msra.mxu1 %v8005_v12  ;;  %5451 = vmatprep.subr.bf16.mxu0 %v8010_v25  ;;  %v8085_v12 = vld [vmem:[#allocation5 + $0xb8c] ss:$16 sps:$4 sm:$0xff]   ;;  %v8080_v25 = vld [vmem:[#allocation5 + $0x988] ss:$16 sps:$4 sm:$0xff]  }
 0x255   :  { %5494 = vmatprep.subr.bf16.mxu1 %v8013_v13  ;;  %v8083_v13 = vld [vmem:[#allocation5 + $0xb88] ss:$16 sps:$4 sm:$0xff]  }
 0x257   :  { %5452 = vmatpush2.bf16.msra.mxu0 %v8008_v26  ;;  %v8088_v26 = vld [vmem:[#allocation5 + $0x96c] ss:$16 sps:$4 sm:$0xff]  }
 0x258   :  { %5495 = vmatpush2.bf16.msra.mxu1 %v8011_v27  ;;  %5507 = vmatprep.subr.bf16.mxu0 %v8016_v32  ;;  %v8091_v27 = vld [vmem:[#allocation5 + $0xb6c] ss:$16 sps:$4 sm:$0xff]   ;;  %v8086_v32 = vld [vmem:[#allocation5 + $0x968] ss:$16 sps:$4 sm:$0xff]  }
 0x259   :  { %5550 = vmatprep.subr.bf16.mxu1 %v8019_v45  ;;  %v8089_v45 = vld [vmem:[#allocation5 + $0xb68] ss:$16 sps:$4 sm:$0xff]  }
 0x25a   :  { %5454 = vmatmul.mubr.bf16.vlgmr.msra.gmra.mxu0 %v8705_v28  ;;  %v8034_v28 = vld [vmem:[#allocation5 + $0x88c] ss:$16 sps:$4 sm:$0xff]  }
 0x25b   :  { %5497 = vmatmul.mubr.bf16.vlgmr.msra.gmra.mxu1 %v8707_v29  ;;  %5508 = vmatpush1.bf16.msra.mxu0 %v8014_v47  ;;  %v8037_v29 = vld [vmem:[#allocation5 + $0xa8c] ss:$16 sps:$4 sm:$0xff]  }
 0x25c   :  { %5551 = vmatpush1.bf16.msra.mxu1 %v8017_v33  ;;  %5509 = vmatprep.subr.bf16.mxu0 %v8022_v34  ;;  %v8094_v47 = vld [vmem:[#allocation5 + $0x94c] ss:$16 sps:$4 sm:$0xff]   ;;  %v8092_v34 = vld [vmem:[#allocation5 + $0x948] ss:$16 sps:$4 sm:$0xff]  }
 0x25d   :  { %5552 = vmatprep.subr.bf16.mxu1 %v8025_v35  ;;  %5539 = vmatprep.mubr.bf16.mxu0 %v8711_v40  ;;  %v8038_v40 = vld [vmem:[#allocation5 + $0x868] ss:$16 sps:$4 sm:$0xff]   ;;  %v8097_v33 = vld [vmem:[#allocation5 + $0xb4c] ss:$16 sps:$4 sm:$0xff]  }
 0x25e   :  { %5582 = vmatprep.mubr.bf16.mxu1 %v8713_v46  ;;  %v8041_v46 = vld [vmem:[#allocation5 + $0xa68] ss:$16 sps:$4 sm:$0xff]  }
 0x25f   :  { %5510 = vmatpush1.bf16.msra.mxu0 %v8020_v36  ;;  %v8095_v35 = vld [vmem:[#allocation5 + $0xb48] ss:$16 sps:$4 sm:$0xff]   ;;  %v8100_v36 = vld [vmem:[#allocation5 + $0x92c] ss:$16 sps:$4 sm:$0xff]  }
 0x260   :  { %5553 = vmatpush1.bf16.msra.mxu1 %v8023_v37  ;;  %5511 = vmatprep.subr.bf16.mxu0 %v8028_v38  ;;  %v8103_v37 = vld [vmem:[#allocation5 + $0xb2c] ss:$16 sps:$4 sm:$0xff]   ;;  %v8098_v38 = vld [vmem:[#allocation5 + $0x928] ss:$16 sps:$4 sm:$0xff]  }
 0x261   :  { %5554 = vmatprep.subr.bf16.mxu1 %v8031_v39  ;;  %v8101_v39 = vld [vmem:[#allocation5 + $0xb28] ss:$16 sps:$4 sm:$0xff]  }
 0x263   :  { %5512 = vmatpush1.bf16.msra.mxu0 %v8026_v43  ;;  %v8106_v43 = vld [vmem:[#allocation5 + $0x90c] ss:$16 sps:$4 sm:$0xff]  }
 0x264   :  { %5555 = vmatpush1.bf16.msra.mxu1 %v8029_v44  ;;  %5513 = vmatprep.subr.bf16.mxu0 %v8034_v28  ;;  %v8109_v44 = vld [vmem:[#allocation5 + $0xb0c] ss:$16 sps:$4 sm:$0xff]   ;;  %v8104_v28 = vld [vmem:[#allocation5 + $0x908] ss:$16 sps:$4 sm:$0xff]  }
 0x265   :  { %5556 = vmatprep.subr.bf16.mxu1 %v8037_v29  ;;  %v8107_v29 = vld [vmem:[#allocation5 + $0xb08] ss:$16 sps:$4 sm:$0xff]  }
 0x267   :  { %5514 = vmatpush1.bf16.msra.mxu0 %v8032_v48  ;;  %v8112_v48 = vld [vmem:[#allocation5 + $0xcec] ss:$16 sps:$4 sm:$0xff]  }
 0x268   :  { %5557 = vmatpush1.bf16.msra.mxu1 %v8035_v49  ;;  %5515 = vmatprep.subr.bf16.mxu0 %v8040_v50  ;;  %v8115_v49 = vld [vmem:[#allocation5 + $0xeec] ss:$16 sps:$4 sm:$0xff]   ;;  %v8110_v50 = vld [vmem:[#allocation5 + $0xce8] ss:$16 sps:$4 sm:$0xff]  }
 0x269   :  { %5558 = vmatprep.subr.bf16.mxu1 %v8043_v51  ;;  %v8113_v51 = vld [vmem:[#allocation5 + $0xee8] ss:$16 sps:$4 sm:$0xff]  }
 0x26b   :  { %5516 = vmatpush1.bf16.msra.mxu0 %v8038_v40  ;;  %v8118_v40 = vld [vmem:[#allocation5 + $0xccc] ss:$16 sps:$4 sm:$0xff]  }
 0x26c   :  { %5559 = vmatpush1.bf16.msra.mxu1 %v8041_v46  ;;  %5517 = vmatprep.subr.bf16.mxu0 %v8046_v52  ;;  %v8121_v46 = vld [vmem:[#allocation5 + $0xecc] ss:$16 sps:$4 sm:$0xff]   ;;  %v8116_v52 = vld [vmem:[#allocation5 + $0xcc8] ss:$16 sps:$4 sm:$0xff]  }
 0x26d   :  { %5560 = vmatprep.subr.bf16.mxu1 %v8049_v55  ;;  %v8119_v55 = vld [vmem:[#allocation5 + $0xec8] ss:$16 sps:$4 sm:$0xff]  }
 0x26f   :  { %5518 = vmatpush1.bf16.msra.mxu0 %v8044_v56  ;;  %v8124_v56 = vld [vmem:[#allocation5 + $0xcac] ss:$16 sps:$4 sm:$0xff]  }
 0x270   :  { %5561 = vmatpush1.bf16.msra.mxu1 %v8047_v57  ;;  %5519 = vmatprep.subr.bf16.mxu0 %v8052_v60  ;;  %v8127_v57 = vld [vmem:[#allocation5 + $0xeac] ss:$16 sps:$4 sm:$0xff]   ;;  %v8122_v60 = vld [vmem:[#allocation5 + $0xca8] ss:$16 sps:$4 sm:$0xff]  }
 0x271   :  { %5562 = vmatprep.subr.bf16.mxu1 %v8055_v61  ;;  %v8125_v61 = vld [vmem:[#allocation5 + $0xea8] ss:$16 sps:$4 sm:$0xff]  }
 0x273   :  { %5520 = vmatpush1.bf16.msra.mxu0 %v8050_v62  ;;  %v8128_v62 = vld [vmem:[#allocation5 + $0xc88] ss:$16 sps:$4 sm:$0xff]  }
 0x274   :  { %5563 = vmatpush1.bf16.msra.mxu1 %v8053_v63  ;;  %5521 = vmatprep.subr.bf16.mxu0 %v8058_v4  ;;  %v8131_v63 = vld [vmem:[#allocation5 + $0xe88] ss:$16 sps:$4 sm:$0xff]   ;;  %v8136_v4 = vld [vmem:[#allocation5 + $0xc6c] ss:$16 sps:$4 sm:$0xff]  }
 0x275   :  { %5564 = vmatprep.subr.bf16.mxu1 %v8061_v53  ;;  %v8139_v53 = vld [vmem:[#allocation5 + $0xe6c] ss:$16 sps:$4 sm:$0xff]  }
 0x277   :  { %5522 = vmatpush1.bf16.msra.mxu0 %v8056_v54  ;;  %v8142_v54 = vld [vmem:[#allocation5 + $0xc4c] ss:$16 sps:$4 sm:$0xff]  }
 0x278   :  { %5565 = vmatpush1.bf16.msra.mxu1 %v8059_v5  ;;  %5523 = vmatprep.subr.bf16.mxu0 %v8064_v6  ;;  %v8145_v5 = vld [vmem:[#allocation5 + $0xe4c] ss:$16 sps:$4 sm:$0xff]   ;;  %v8140_v6 = vld [vmem:[#allocation5 + $0xc48] ss:$16 sps:$4 sm:$0xff]  }
 0x279   :  { %5566 = vmatprep.subr.bf16.mxu1 %v8067_v7  ;;  %v8143_v7 = vld [vmem:[#allocation5 + $0xe48] ss:$16 sps:$4 sm:$0xff]  }
 0x27b   :  { %5524 = vmatpush2.bf16.msra.mxu0 %v8062_v10  ;;  %v8148_v10 = vld [vmem:[#allocation5 + $0xc2c] ss:$16 sps:$4 sm:$0xff]  }
 0x27c   :  { %5567 = vmatpush2.bf16.msra.mxu1 %v8065_v11  ;;  %5525 = vmatprep.subr.bf16.mxu0 %v8070_v14  ;;  %v8151_v11 = vld [vmem:[#allocation5 + $0xe2c] ss:$16 sps:$4 sm:$0xff]   ;;  %v8146_v14 = vld [vmem:[#allocation5 + $0xc28] ss:$16 sps:$4 sm:$0xff]  }
 0x27d   :  { %5568 = vmatprep.subr.bf16.mxu1 %v8073_v15  ;;  %v8149_v15 = vld [vmem:[#allocation5 + $0xe28] ss:$16 sps:$4 sm:$0xff]  }
 0x27f   :  { %5526 = vmatpush2.bf16.msra.mxu0 %v8068_v16  ;;  %v8154_v16 = vld [vmem:[#allocation5 + $0xc0c] ss:$16 sps:$4 sm:$0xff]  }
 0x280   :  { %5569 = vmatpush2.bf16.msra.mxu1 %v8071_v17  ;;  %5527 = vmatprep.subr.bf16.mxu0 %v8076_v18  ;;  %v8157_v17 = vld [vmem:[#allocation5 + $0xe0c] ss:$16 sps:$4 sm:$0xff]   ;;  %v8152_v18 = vld [vmem:[#allocation5 + $0xc08] ss:$16 sps:$4 sm:$0xff]  }
 0x281   :  { %5570 = vmatprep.subr.bf16.mxu1 %v8079_v19  ;;  %v8155_v19 = vld [vmem:[#allocation5 + $0xe08] ss:$16 sps:$4 sm:$0xff]  }
 0x283   :  { %5528 = vmatpush2.bf16.msra.mxu0 %v8074_v20  ;;  %v8160_v20 = vld [vmem:[#allocation5 + $0xdec] ss:$16 sps:$4 sm:$0xff]  }
 0x284   :  { %5571 = vmatpush2.bf16.msra.mxu1 %v8077_v21  ;;  %5529 = vmatprep.subr.bf16.mxu0 %v8082_v24  ;;  %v8163_v21 = vld [vmem:[#allocation5 + $0xfec] ss:$16 sps:$4 sm:$0xff]   ;;  %v8158_v24 = vld [vmem:[#allocation5 + $0xde8] ss:$16 sps:$4 sm:$0xff]  }
 0x285   :  { %5572 = vmatprep.subr.bf16.mxu1 %v8085_v12  ;;  %v8161_v12 = vld [vmem:[#allocation5 + $0xfe8] ss:$16 sps:$4 sm:$0xff]  }
 0x287   :  { %5530 = vmatpush2.bf16.msra.mxu0 %v8080_v25  ;;  %v8166_v25 = vld [vmem:[#allocation5 + $0xdcc] ss:$16 sps:$4 sm:$0xff]  }
 0x288   :  { %5573 = vmatpush2.bf16.msra.mxu1 %v8083_v13  ;;  %5531 = vmatprep.subr.bf16.mxu0 %v8088_v26  ;;  %v8169_v13 = vld [vmem:[#allocation5 + $0xfcc] ss:$16 sps:$4 sm:$0xff]   ;;  %v8164_v26 = vld [vmem:[#allocation5 + $0xdc8] ss:$16 sps:$4 sm:$0xff]  }
 0x289   :  { %5574 = vmatprep.subr.bf16.mxu1 %v8091_v27  ;;  %v8167_v27 = vld [vmem:[#allocation5 + $0xfc8] ss:$16 sps:$4 sm:$0xff]  }
 0x28b   :  { %5532 = vmatpush2.bf16.msra.mxu0 %v8086_v32  ;;  %v8172_v32 = vld [vmem:[#allocation5 + $0xdac] ss:$16 sps:$4 sm:$0xff]  }
 0x28c   :  { %5575 = vmatpush2.bf16.msra.mxu1 %v8089_v45  ;;  %5533 = vmatprep.subr.bf16.mxu0 %v8094_v47  ;;  %v8175_v45 = vld [vmem:[#allocation5 + $0xfac] ss:$16 sps:$4 sm:$0xff]   ;;  %v8170_v47 = vld [vmem:[#allocation5 + $0xda8] ss:$16 sps:$4 sm:$0xff]  }
 0x28d   :  { %5576 = vmatprep.subr.bf16.mxu1 %v8097_v33  ;;  %v8173_v33 = vld [vmem:[#allocation5 + $0xfa8] ss:$16 sps:$4 sm:$0xff]  }
 0x28f   :  { %5534 = vmatpush2.bf16.msra.mxu0 %v8092_v34  ;;  %v8178_v34 = vld [vmem:[#allocation5 + $0xd8c] ss:$16 sps:$4 sm:$0xff]  }
 0x290   :  { %5577 = vmatpush2.bf16.msra.mxu1 %v8095_v35  ;;  %5535 = vmatprep.subr.bf16.mxu0 %v8100_v36  ;;  %v8181_v35 = vld [vmem:[#allocation5 + $0xf8c] ss:$16 sps:$4 sm:$0xff]   ;;  %v8176_v36 = vld [vmem:[#allocation5 + $0xd88] ss:$16 sps:$4 sm:$0xff]  }
 0x291   :  { %5578 = vmatprep.subr.bf16.mxu1 %v8103_v37  ;;  %v8179_v37 = vld [vmem:[#allocation5 + $0xf88] ss:$16 sps:$4 sm:$0xff]  }
 0x293   :  { %5536 = vmatpush2.bf16.msra.mxu0 %v8098_v38  ;;  %v8184_v38 = vld [vmem:[#allocation5 + $0xd6c] ss:$16 sps:$4 sm:$0xff]  }
 0x294   :  { %5579 = vmatpush2.bf16.msra.mxu1 %v8101_v39  ;;  %5537 = vmatprep.subr.bf16.mxu0 %v8106_v43  ;;  %v8187_v39 = vld [vmem:[#allocation5 + $0xf6c] ss:$16 sps:$4 sm:$0xff]   ;;  %v8182_v43 = vld [vmem:[#allocation5 + $0xd68] ss:$16 sps:$4 sm:$0xff]  }
 0x295   :  { %5580 = vmatprep.subr.bf16.mxu1 %v8109_v44  ;;  %v8185_v44 = vld [vmem:[#allocation5 + $0xf68] ss:$16 sps:$4 sm:$0xff]  }
 0x297   :  { %5538 = vmatpush2.bf16.msra.mxu0 %v8104_v28  ;;  %v8190_v28 = vld [vmem:[#allocation5 + $0xd4c] ss:$16 sps:$4 sm:$0xff]  }
 0x298   :  { %5581 = vmatpush2.bf16.msra.mxu1 %v8107_v29  ;;  %5593 = vmatprep.subr.bf16.mxu0 %v8112_v48  ;;  %v8193_v29 = vld [vmem:[#allocation5 + $0xf4c] ss:$16 sps:$4 sm:$0xff]   ;;  %v8188_v48 = vld [vmem:[#allocation5 + $0xd48] ss:$16 sps:$4 sm:$0xff]  }
 0x299   :  { %5636 = vmatprep.subr.bf16.mxu1 %v8115_v49  ;;  %v8191_v49 = vld [vmem:[#allocation5 + $0xf48] ss:$16 sps:$4 sm:$0xff]  }
 0x29a   :  { %5540 = vmatmul.mubr.bf16.vlgmr.msra.gmra.mxu0 %v8717_v58  ;;  %v8130_v58 = vld [vmem:[#allocation5 + $0xc8c] ss:$16 sps:$4 sm:$0xff]  }
 0x29b   :  { %5583 = vmatmul.mubr.bf16.vlgmr.msra.gmra.mxu1 %v8719_v59  ;;  %5594 = vmatpush1.bf16.msra.mxu0 %v8110_v50  ;;  %v8133_v59 = vld [vmem:[#allocation5 + $0xe8c] ss:$16 sps:$4 sm:$0xff]  }
 0x29c   :  { %5637 = vmatpush1.bf16.msra.mxu1 %v8113_v51  ;;  %5595 = vmatprep.subr.bf16.mxu0 %v8118_v40  ;;  %v8196_v50 = vld [vmem:[#allocation5 + $0xd2c] ss:$16 sps:$4 sm:$0xff]   ;;  %v8194_v40 = vld [vmem:[#allocation5 + $0xd28] ss:$16 sps:$4 sm:$0xff]  }
 0x29d   :  { %5638 = vmatprep.subr.bf16.mxu1 %v8121_v46  ;;  %5625 = vmatprep.mubr.bf16.mxu0 %v8721_v0  ;;  %v8134_v0 = vld [vmem:[#allocation5 + $0xc68] ss:$16 sps:$4 sm:$0xff]   ;;  %v8199_v51 = vld [vmem:[#allocation5 + $0xf2c] ss:$16 sps:$4 sm:$0xff]  }
 0x29e   :  { %5668 = vmatprep.mubr.bf16.mxu1 %v8723_v1  ;;  %v8137_v1 = vld [vmem:[#allocation5 + $0xe68] ss:$16 sps:$4 sm:$0xff]  }
 0x29f   :  { %5596 = vmatpush1.bf16.msra.mxu0 %v8116_v52  ;;  %v8197_v46 = vld [vmem:[#allocation5 + $0xf28] ss:$16 sps:$4 sm:$0xff]   ;;  %v8202_v52 = vld [vmem:[#allocation5 + $0xd0c] ss:$16 sps:$4 sm:$0xff]  }
 0x2a0   :  { %5639 = vmatpush1.bf16.msra.mxu1 %v8119_v55  ;;  %5597 = vmatprep.subr.bf16.mxu0 %v8124_v56  ;;  %v8205_v55 = vld [vmem:[#allocation5 + $0xf0c] ss:$16 sps:$4 sm:$0xff]   ;;  %v8200_v56 = vld [vmem:[#allocation5 + $0xd08] ss:$16 sps:$4 sm:$0xff]  }
 0x2a1   :  { %5640 = vmatprep.subr.bf16.mxu1 %v8127_v57  ;;  %v8203_v57 = vld [vmem:[#allocation5 + $0xf08] ss:$16 sps:$4 sm:$0xff]  }
 0x2a3   :  { %5598 = vmatpush1.bf16.msra.mxu0 %v8122_v60  ;;  %v8208_v60 = vld [vmem:[#allocation5 + $0x10ec] ss:$16 sps:$4 sm:$0xff]  }
 0x2a4   :  { %5641 = vmatpush1.bf16.msra.mxu1 %v8125_v61  ;;  %5599 = vmatprep.subr.bf16.mxu0 %v8130_v58  ;;  %v8211_v61 = vld [vmem:[#allocation5 + $0x12ec] ss:$16 sps:$4 sm:$0xff]   ;;  %v8206_v58 = vld [vmem:[#allocation5 + $0x10e8] ss:$16 sps:$4 sm:$0xff]  }
 0x2a5   :  { %5642 = vmatprep.subr.bf16.mxu1 %v8133_v59  ;;  %v8209_v59 = vld [vmem:[#allocation5 + $0x12e8] ss:$16 sps:$4 sm:$0xff]  }
 0x2a7   :  { %5600 = vmatpush1.bf16.msra.mxu0 %v8128_v62  ;;  %v8214_v62 = vld [vmem:[#allocation5 + $0x10cc] ss:$16 sps:$4 sm:$0xff]  }
 0x2a8   :  { %5643 = vmatpush1.bf16.msra.mxu1 %v8131_v63  ;;  %5601 = vmatprep.subr.bf16.mxu0 %v8136_v4  ;;  %v8217_v63 = vld [vmem:[#allocation5 + $0x12cc] ss:$16 sps:$4 sm:$0xff]   ;;  %v8212_v4 = vld [vmem:[#allocation5 + $0x10c8] ss:$16 sps:$4 sm:$0xff]  }
 0x2a9   :  { %5644 = vmatprep.subr.bf16.mxu1 %v8139_v53  ;;  %v8215_v53 = vld [vmem:[#allocation5 + $0x12c8] ss:$16 sps:$4 sm:$0xff]  }
 0x2ab   :  { %5602 = vmatpush1.bf16.msra.mxu0 %v8134_v0  ;;  %v8220_v0 = vld [vmem:[#allocation5 + $0x10ac] ss:$16 sps:$4 sm:$0xff]  }
 0x2ac   :  { %5645 = vmatpush1.bf16.msra.mxu1 %v8137_v1  ;;  %5603 = vmatprep.subr.bf16.mxu0 %v8142_v54  ;;  %v8223_v1 = vld [vmem:[#allocation5 + $0x12ac] ss:$16 sps:$4 sm:$0xff]   ;;  %v8218_v54 = vld [vmem:[#allocation5 + $0x10a8] ss:$16 sps:$4 sm:$0xff]  }
 0x2ad   :  { %5646 = vmatprep.subr.bf16.mxu1 %v8145_v5  ;;  %v8221_v5 = vld [vmem:[#allocation5 + $0x12a8] ss:$16 sps:$4 sm:$0xff]  }
 0x2af   :  { %5604 = vmatpush1.bf16.msra.mxu0 %v8140_v6  ;;  %v8224_v6 = vld [vmem:[#allocation5 + $0x1088] ss:$16 sps:$4 sm:$0xff]  }
 0x2b0   :  { %5647 = vmatpush1.bf16.msra.mxu1 %v8143_v7  ;;  %5605 = vmatprep.subr.bf16.mxu0 %v8148_v10  ;;  %v8227_v7 = vld [vmem:[#allocation5 + $0x1288] ss:$16 sps:$4 sm:$0xff]   ;;  %v8232_v10 = vld [vmem:[#allocation5 + $0x106c] ss:$16 sps:$4 sm:$0xff]  }
 0x2b1   :  { %5648 = vmatprep.subr.bf16.mxu1 %v8151_v11  ;;  %v8235_v11 = vld [vmem:[#allocation5 + $0x126c] ss:$16 sps:$4 sm:$0xff]  }
 0x2b3   :  { %5606 = vmatpush1.bf16.msra.mxu0 %v8146_v14  ;;  %v8238_v14 = vld [vmem:[#allocation5 + $0x104c] ss:$16 sps:$4 sm:$0xff]  }
 0x2b4   :  { %5649 = vmatpush1.bf16.msra.mxu1 %v8149_v15  ;;  %5607 = vmatprep.subr.bf16.mxu0 %v8154_v16  ;;  %v8241_v15 = vld [vmem:[#allocation5 + $0x124c] ss:$16 sps:$4 sm:$0xff]   ;;  %v8236_v16 = vld [vmem:[#allocation5 + $0x1048] ss:$16 sps:$4 sm:$0xff]  }
 0x2b5   :  { %5650 = vmatprep.subr.bf16.mxu1 %v8157_v17  ;;  %v8239_v17 = vld [vmem:[#allocation5 + $0x1248] ss:$16 sps:$4 sm:$0xff]  }
 0x2b7   :  { %5608 = vmatpush1.bf16.msra.mxu0 %v8152_v18  ;;  %v8244_v18 = vld [vmem:[#allocation5 + $0x102c] ss:$16 sps:$4 sm:$0xff]  }
 0x2b8   :  { %5651 = vmatpush1.bf16.msra.mxu1 %v8155_v19  ;;  %5609 = vmatprep.subr.bf16.mxu0 %v8160_v20  ;;  %v8247_v19 = vld [vmem:[#allocation5 + $0x122c] ss:$16 sps:$4 sm:$0xff]   ;;  %v8242_v20 = vld [vmem:[#allocation5 + $0x1028] ss:$16 sps:$4 sm:$0xff]  }
 0x2b9   :  { %5652 = vmatprep.subr.bf16.mxu1 %v8163_v21  ;;  %v8245_v21 = vld [vmem:[#allocation5 + $0x1228] ss:$16 sps:$4 sm:$0xff]  }
 0x2bb   :  { %5610 = vmatpush2.bf16.msra.mxu0 %v8158_v24  ;;  %v8250_v24 = vld [vmem:[#allocation5 + $0x100c] ss:$16 sps:$4 sm:$0xff]  }
 0x2bc   :  { %5653 = vmatpush2.bf16.msra.mxu1 %v8161_v12  ;;  %5611 = vmatprep.subr.bf16.mxu0 %v8166_v25  ;;  %v8253_v12 = vld [vmem:[#allocation5 + $0x120c] ss:$16 sps:$4 sm:$0xff]   ;;  %v8248_v25 = vld [vmem:[#allocation5 + $0x1008] ss:$16 sps:$4 sm:$0xff]  }
 0x2bd   :  { %5654 = vmatprep.subr.bf16.mxu1 %v8169_v13  ;;  %v8251_v13 = vld [vmem:[#allocation5 + $0x1208] ss:$16 sps:$4 sm:$0xff]  }
 0x2bf   :  { %5612 = vmatpush2.bf16.msra.mxu0 %v8164_v26  ;;  %v8256_v26 = vld [vmem:[#allocation5 + $0x11ec] ss:$16 sps:$4 sm:$0xff]  }
 0x2c0   :  { %5655 = vmatpush2.bf16.msra.mxu1 %v8167_v27  ;;  %5613 = vmatprep.subr.bf16.mxu0 %v8172_v32  ;;  %v8259_v27 = vld [vmem:[#allocation5 + $0x13ec] ss:$16 sps:$4 sm:$0xff]   ;;  %v8254_v32 = vld [vmem:[#allocation5 + $0x11e8] ss:$16 sps:$4 sm:$0xff]  }
 0x2c1   :  { %5656 = vmatprep.subr.bf16.mxu1 %v8175_v45  ;;  %v8257_v45 = vld [vmem:[#allocation5 + $0x13e8] ss:$16 sps:$4 sm:$0xff]  }
 0x2c3   :  { %5614 = vmatpush2.bf16.msra.mxu0 %v8170_v47  ;;  %v8777_v47 = vpop.f32.mrf.mxu0 }
 0x2c4   :  { %5657 = vmatpush2.bf16.msra.mxu1 %v8173_v33  ;;  %5615 = vmatprep.subr.bf16.mxu0 %v8178_v34  ;;  %v8262_v33 = vld [vmem:[#allocation5 + $0x11cc] ss:$16 sps:$4 sm:$0xff]  }
 0x2c5   :  { %5658 = vmatprep.subr.bf16.mxu1 %v8181_v35  ;;  %v8265_v34 = vld [vmem:[#allocation5 + $0x13cc] ss:$16 sps:$4 sm:$0xff]   ;;  %v8260_v35 = vld [vmem:[#allocation5 + $0x11c8] ss:$16 sps:$4 sm:$0xff]  }
 0x2c7   :  { %5616 = vmatpush2.bf16.msra.mxu0 %v8176_v36  ;;  %v8263_v36 = vld [vmem:[#allocation5 + $0x13c8] ss:$16 sps:$4 sm:$0xff]  }
 0x2c8   :  { %5659 = vmatpush2.bf16.msra.mxu1 %v8179_v37  ;;  %5617 = vmatprep.subr.bf16.mxu0 %v8184_v38  ;;  %v8779_v37 = vpop.f32.mrf.mxu0  ;;  %v8268_v38 = vld [vmem:[#allocation5 + $0x11ac] ss:$16 sps:$4 sm:$0xff]  }
 0x2c9   :  { %5660 = vmatprep.subr.bf16.mxu1 %v8187_v39  ;;  %v8271_v39 = vld [vmem:[#allocation5 + $0x13ac] ss:$16 sps:$4 sm:$0xff]  }
 0x2cb   :  { %5618 = vmatpush2.bf16.msra.mxu0 %v8182_v43  ;;  %v8781_v43 = vpop.f32.mrf.mxu1 }
 0x2cc   :  { %5661 = vmatpush2.bf16.msra.mxu1 %v8185_v44  ;;  %5619 = vmatprep.subr.bf16.mxu0 %v8190_v28  ;;  %v8266_v44 = vld [vmem:[#allocation5 + $0x11a8] ss:$16 sps:$4 sm:$0xff]  }
 0x2cd   :  { %5662 = vmatprep.subr.bf16.mxu1 %v8193_v29  ;;  %v8269_v28 = vld [vmem:[#allocation5 + $0x13a8] ss:$16 sps:$4 sm:$0xff]   ;;  %v8783_v29 = vpop.f32.mrf.mxu0 }
 0x2cf   :  { %5620 = vmatpush2.bf16.msra.mxu0 %v8188_v48  ;;  %v8274_v48 = vld [vmem:[#allocation5 + $0x118c] ss:$16 sps:$4 sm:$0xff]  }
 0x2d0   :  { %5663 = vmatpush2.bf16.msra.mxu1 %v8191_v49  ;;  %5621 = vmatprep.subr.bf16.mxu0 %v8196_v50  ;;  %v8277_v49 = vld [vmem:[#allocation5 + $0x138c] ss:$16 sps:$4 sm:$0xff]   ;;  %v8785_v50 = vpop.f32.mrf.mxu1 }
 0x2d1   :  { %5664 = vmatprep.subr.bf16.mxu1 %v8199_v51  ;;  %v8272_v51 = vld [vmem:[#allocation5 + $0x1188] ss:$16 sps:$4 sm:$0xff]  }
 0x2d3   :  { %5622 = vmatpush2.bf16.msra.mxu0 %v8194_v40  ;;  %v8275_v40 = vld [vmem:[#allocation5 + $0x1388] ss:$16 sps:$4 sm:$0xff]  }
 0x2d4   :  { %5665 = vmatpush2.bf16.msra.mxu1 %v8197_v46  ;;  %5623 = vmatprep.subr.bf16.mxu0 %v8202_v52  ;;  %v8787_v46 = vpop.f32.mrf.mxu0  ;;  %v8280_v52 = vld [vmem:[#allocation5 + $0x116c] ss:$16 sps:$4 sm:$0xff]  }
 0x2d5   :  { %5666 = vmatprep.subr.bf16.mxu1 %v8205_v55  ;;  %v8283_v55 = vld [vmem:[#allocation5 + $0x136c] ss:$16 sps:$4 sm:$0xff]  }
 0x2d7   :  { %5624 = vmatpush2.bf16.msra.mxu0 %v8200_v56  ;;  %v8789_v56 = vpop.f32.mrf.mxu1 }
 0x2d8   :  { %5667 = vmatpush2.bf16.msra.mxu1 %v8203_v57  ;;  %5679 = vmatprep.subr.bf16.mxu0 %v8208_v60  ;;  %v8791_v57 = vpop.f32.mrf.mxu0  ;;  %v8278_v60 = vld [vmem:[#allocation5 + $0x1168] ss:$16 sps:$4 sm:$0xff]  }
 0x2d9   :  { %5722 = vmatprep.subr.bf16.mxu1 %v8211_v61  ;;  %v8281_v61 = vld [vmem:[#allocation5 + $0x1368] ss:$16 sps:$4 sm:$0xff]  }
 0x2da   :  { %5626 = vmatmul.mubr.bf16.vlgmr.msra.gmra.mxu0 %v8729_v22  ;;  %v8226_v22 = vld [vmem:[#allocation5 + $0x108c] ss:$16 sps:$4 sm:$0xff]  }
 0x2db   :  { %5669 = vmatmul.mubr.bf16.vlgmr.msra.gmra.mxu1 %v8731_v23  ;;  %5680 = vmatpush1.bf16.msra.mxu0 %v8206_v58  ;;  %v8229_v23 = vld [vmem:[#allocation5 + $0x128c] ss:$16 sps:$4 sm:$0xff]  }
 0x2dc   :  { %5723 = vmatpush1.bf16.msra.mxu1 %v8209_v59  ;;  %5681 = vmatprep.subr.bf16.mxu0 %v8214_v62  ;;  %v8286_v58 = vld [vmem:[#allocation5 + $0x114c] ss:$16 sps:$4 sm:$0xff]   ;;  %v8793_v62 = vpop.f32.mrf.mxu1 }
 0x2dd   :  { %5724 = vmatprep.subr.bf16.mxu1 %v8217_v63  ;;  %5711 = vmatprep.mubr.bf16.mxu0 %v8733_v30  ;;  %v8230_v30 = vld [vmem:[#allocation5 + $0x1068] ss:$16 sps:$4 sm:$0xff]   ;;  %v8289_v59 = vld [vmem:[#allocation5 + $0x134c] ss:$16 sps:$4 sm:$0xff]   ;;  %v8795_v63 = vpop.f32.mrf.mxu0 }
 0x2de   :  { %5754 = vmatprep.mubr.bf16.mxu1 %v8735_v31  ;;  %v8233_v31 = vld [vmem:[#allocation5 + $0x1268] ss:$16 sps:$4 sm:$0xff]  }
 0x2df   :  { %5682 = vmatpush1.bf16.msra.mxu0 %v8212_v4  ;;  %v8284_v4 = vld [vmem:[#allocation5 + $0x1148] ss:$16 sps:$4 sm:$0xff]  }
 0x2e0   :  { %5725 = vmatpush1.bf16.msra.mxu1 %v8215_v53  ;;  %5683 = vmatprep.subr.bf16.mxu0 %v8220_v0  ;;  %v8287_v53 = vld [vmem:[#allocation5 + $0x1348] ss:$16 sps:$4 sm:$0xff]   ;;  %v8797_v0 = vpop.f32.mrf.mxu1 }
 0x2e1   :  { %5726 = vmatprep.subr.bf16.mxu1 %v8223_v1  ;;  %v8292_v1 = vld [vmem:[#allocation5 + $0x112c] ss:$16 sps:$4 sm:$0xff]  }
 0x2e3   :  { %5684 = vmatpush1.bf16.msra.mxu0 %v8218_v54  ;;  %v8295_v54 = vld [vmem:[#allocation5 + $0x132c] ss:$16 sps:$4 sm:$0xff]  }
 0x2e4   :  { %5727 = vmatpush1.bf16.msra.mxu1 %v8221_v5  ;;  %5685 = vmatprep.subr.bf16.mxu0 %v8226_v22  ;;  %v8799_v5 = vpop.f32.mrf.mxu0  ;;  %v8290_v22 = vld [vmem:[#allocation5 + $0x1128] ss:$16 sps:$4 sm:$0xff]  }
 0x2e5   :  { %5728 = vmatprep.subr.bf16.mxu1 %v8229_v23  ;;  %v8293_v23 = vld [vmem:[#allocation5 + $0x1328] ss:$16 sps:$4 sm:$0xff]  }
 0x2e7   :  { %5686 = vmatpush1.bf16.msra.mxu0 %v8224_v6  ;;  %v8801_v6 = vpop.f32.mrf.mxu1 }
 0x2e8   :  { %5729 = vmatpush1.bf16.msra.mxu1 %v8227_v7  ;;  %5687 = vmatprep.subr.bf16.mxu0 %v8232_v10  ;;  %v8298_v7 = vld [vmem:[#allocation5 + $0x110c] ss:$16 sps:$4 sm:$0xff]  }
 0x2e9   :  { %5730 = vmatprep.subr.bf16.mxu1 %v8235_v11  ;;  %v8301_v10 = vld [vmem:[#allocation5 + $0x130c] ss:$16 sps:$4 sm:$0xff]   ;;  %v8803_v11 = vpop.f32.mrf.mxu0 }
 0x2eb   :  { %5688 = vmatpush1.bf16.msra.mxu0 %v8230_v30  ;;  %v8296_v30 = vld [vmem:[#allocation5 + $0x1108] ss:$16 sps:$4 sm:$0xff]  }
 0x2ec   :  { %5731 = vmatpush1.bf16.msra.mxu1 %v8233_v31  ;;  %5689 = vmatprep.subr.bf16.mxu0 %v8238_v14  ;;  %v8299_v31 = vld [vmem:[#allocation5 + $0x1308] ss:$16 sps:$4 sm:$0xff]   ;;  %v8805_v14 = vpop.f32.mrf.mxu1 }
 0x2ed   :  { %5732 = vmatprep.subr.bf16.mxu1 %v8241_v15  ;;  %v8807_v15 = vpop.f32.mrf.mxu0 }
 0x2ef   :  { %5690 = vmatpush1.bf16.msra.mxu0 %v8236_v16  ;;  %v8304_v16 = vld [vmem:[#allocation5 + $0x14ec] ss:$16 sps:$4 sm:$0xff]  }
 0x2f0   :  { %5733 = vmatpush1.bf16.msra.mxu1 %v8239_v17  ;;  %5691 = vmatprep.subr.bf16.mxu0 %v8244_v18  ;;  %v8307_v17 = vld [vmem:[#allocation5 + $0x16ec] ss:$16 sps:$4 sm:$0xff]   ;;  %v8302_v18 = vld [vmem:[#allocation5 + $0x14e8] ss:$16 sps:$4 sm:$0xff]  }
 0x2f1   :  { %5734 = vmatprep.subr.bf16.mxu1 %v8247_v19  ;;  %v8305_v19 = vld [vmem:[#allocation5 + $0x16e8] ss:$16 sps:$4 sm:$0xff]  }
 0x2f3   :  { %5692 = vmatpush1.bf16.msra.mxu0 %v8242_v20  ;;  %v8809_v20 = vpop.f32.mrf.mxu1 }
 0x2f4   :  { %5735 = vmatpush1.bf16.msra.mxu1 %v8245_v21  ;;  %5693 = vmatprep.subr.bf16.mxu0 %v8250_v24  ;;  %v8811_v21 = vpop.f32.mrf.mxu0  ;;  %v8310_v24 = vld [vmem:[#allocation5 + $0x14cc] ss:$16 sps:$4 sm:$0xff]  }
 0x2f5   :  { %5736 = vmatprep.subr.bf16.mxu1 %v8253_v12  ;;  %v8313_v12 = vld [vmem:[#allocation5 + $0x16cc] ss:$16 sps:$4 sm:$0xff]  }
 0x2f7   :  { %5694 = vmatpush1.bf16.msra.mxu0 %v8248_v25  ;;  %v8813_v25 = vpop.f32.mrf.mxu1 }
 0x2f8   :  { %5737 = vmatpush1.bf16.msra.mxu1 %v8251_v13  ;;  %5695 = vmatprep.subr.bf16.mxu0 %v8256_v26  ;;  %v8308_v13 = vld [vmem:[#allocation5 + $0x14c8] ss:$16 sps:$4 sm:$0xff]  }
 0x2f9   :  { %5738 = vmatprep.subr.bf16.mxu1 %v8259_v27  ;;  %v8311_v26 = vld [vmem:[#allocation5 + $0x16c8] ss:$16 sps:$4 sm:$0xff]   ;;  %v8817_v27 = vpop.f32.mrf.mxu0 }
 0x2fb   :  { %5696 = vmatpush2.bf16.msra.mxu0 %v8254_v32  ;;  %v8316_v32 = vld [vmem:[#allocation5 + $0x14ac] ss:$16 sps:$4 sm:$0xff]  }
 0x2fc   :  { %5739 = vmatpush2.bf16.msra.mxu1 %v8257_v45  ;;  %5697 = vmatprep.subr.bf16.mxu0 %v8262_v33  ;;  %v8319_v45 = vld [vmem:[#allocation5 + $0x16ac] ss:$16 sps:$4 sm:$0xff]   ;;  %v8821_v33 = vpop.f32.mrf.mxu1 }
 0x2fd   :  { %5740 = vmatprep.subr.bf16.mxu1 %v8265_v34  ;;  %v8823_v34 = vpop.f32.mrf.mxu0 }
 0x2ff   :  { %5698 = vmatpush2.bf16.msra.mxu0 %v8260_v35  ;;  %v8322_v35 = vld [vmem:[#allocation5 + $0x148c] ss:$16 sps:$4 sm:$0xff]  }
 0x300   :  { %5741 = vmatpush2.bf16.msra.mxu1 %v8263_v36  ;;  %5699 = vmatprep.subr.bf16.mxu0 %v8268_v38  ;;  %v8325_v36 = vld [vmem:[#allocation5 + $0x168c] ss:$16 sps:$4 sm:$0xff]   ;;  %v959_v38 = vlaneseq }
 0x301   :  { %5742 = vmatprep.subr.bf16.mxu1 %v8271_v39  ;;  %v8825_v39 = vpop.f32.mrf.mxu1 }
 0x303   :  { %5700 = vmatpush2.bf16.msra.mxu0 %v8266_v44  ;;  %v8827_v44 = vpop.f32.mrf.mxu0 }
 0x304   :  { %5743 = vmatpush2.bf16.msra.mxu1 %v8269_v28  ;;  %5701 = vmatprep.subr.bf16.mxu0 %v8274_v48  ;;  %v8328_v28 = vld [vmem:[#allocation5 + $0x146c] ss:$16 sps:$4 sm:$0xff]  }
 0x305   :  { %5744 = vmatprep.subr.bf16.mxu1 %v8277_v49  ;;  %v8331_v48 = vld [vmem:[#allocation5 + $0x166c] ss:$16 sps:$4 sm:$0xff]   ;;  %v8829_v49 = vshrl.u32 %v959_v38, 7 }
 0x307   :  { %5702 = vmatpush2.bf16.msra.mxu0 %v8272_v51  ;;  %v8831_v51 = vpop.f32.mrf.mxu1 }
 0x308   :  { %5745 = vmatpush2.bf16.msra.mxu1 %v8275_v40  ;;  %5703 = vmatprep.subr.bf16.mxu0 %v8280_v52  ;;  %v8833_v40 = vpop.f32.mrf.mxu0  ;;  %v8326_v52 = vld [vmem:[#allocation5 + $0x1468] ss:$16 sps:$4 sm:$0xff]  }
 0x309   :  { %5746 = vmatprep.subr.bf16.mxu1 %v8283_v55  ;;  %v8329_v55 = vld [vmem:[#allocation5 + $0x1668] ss:$16 sps:$4 sm:$0xff]  }
 0x30b   :  { %5704 = vmatpush2.bf16.msra.mxu0 %v8278_v60  ;;  %v8835_v60 = vpop.f32.mrf.mxu1 }
 0x30c   :  { %5747 = vmatpush2.bf16.msra.mxu1 %v8281_v61  ;;  %5705 = vmatprep.subr.bf16.mxu0 %v8286_v58  ;;  %v8334_v61 = vld [vmem:[#allocation5 + $0x144c] ss:$16 sps:$4 sm:$0xff]  }
 0x30d   :  { %5748 = vmatprep.subr.bf16.mxu1 %v8289_v59  ;;  %v8337_v58 = vld [vmem:[#allocation5 + $0x164c] ss:$16 sps:$4 sm:$0xff]   ;;  %v965_v59 = vsub.s32 1, %v8829_v49 }
 0x30f   :  { %5706 = vmatpush2.bf16.msra.mxu0 %v8284_v4  ;;  %v8838_v4 = vld [vmem:[#allocation7] sm:$0xf] }
 0x310   :  { %5749 = vmatpush2.bf16.msra.mxu1 %v8287_v53  ;;  %5707 = vmatprep.subr.bf16.mxu0 %v8292_v1  ;;  %v8840_v53 = vpop.f32.mrf.mxu0  ;;  %v8332_v1 = vld [vmem:[#allocation5 + $0x1448] ss:$16 sps:$4 sm:$0xff]  }
 0x311   :  { %5750 = vmatprep.subr.bf16.mxu1 %v8295_v54  ;;  %v8335_v54 = vld [vmem:[#allocation5 + $0x1648] ss:$16 sps:$4 sm:$0xff]  }
 0x313   :  { %5708 = vmatpush2.bf16.msra.mxu0 %v8290_v22  ;;  %v8842_v22 = vpop.f32.mrf.mxu1 }
 0x314   :  { %5751 = vmatpush2.bf16.msra.mxu1 %v8293_v23  ;;  %5709 = vmatprep.subr.bf16.mxu0 %v8298_v7  ;;  %v8340_v23 = vld [vmem:[#allocation5 + $0x142c] ss:$16 sps:$4 sm:$0xff]  }
 0x315   :  { %5752 = vmatprep.subr.bf16.mxu1 %v8301_v10  ;;  %v8343_v7 = vld [vmem:[#allocation5 + $0x162c] ss:$16 sps:$4 sm:$0xff]   ;;  %v966_v10 = vrot.slane %v8838_v4, %v965_v59 }
 0x317   :  { %5710 = vmatpush2.bf16.msra.mxu0 %v8296_v30  ;;  %v8845_v30 = vpop.f32.mrf.mxu0 }
 0x318   :  { %5753 = vmatpush2.bf16.msra.mxu1 %v8299_v31  ;;  %5765 = vmatprep.subr.bf16.mxu0 %v8304_v16  ;;  %v4860_v31 = vadd.f32 %v8787_v46, %v966_v10  ;;  %v8338_v16 = vld [vmem:[#allocation5 + $0x1428] ss:$16 sps:$4 sm:$0xff]  }
 0x319   :  { %5808 = vmatprep.subr.bf16.mxu1 %v8307_v17  ;;  %v8341_v17 = vld [vmem:[#allocation5 + $0x1628] ss:$16 sps:$4 sm:$0xff]  }
 0x31a   :  { %5712 = vmatmul.mubr.bf16.vlgmr.msra.gmra.mxu0 %v8741_v2  ;;  %v8314_v2 = vld [vmem:[#allocation5 + $0x14a8] ss:$16 sps:$4 sm:$0xff]  }
 0x31b   :  { %5755 = vmatmul.mubr.bf16.vlgmr.msra.gmra.mxu1 %v8743_v3  ;;  %5766 = vmatpush1.bf16.msra.mxu0 %v8302_v18  ;;  %v8317_v3 = vld [vmem:[#allocation5 + $0x16a8] ss:$16 sps:$4 sm:$0xff]   ;;  %v8848_v18 = vpop.f32.mrf.mxu1 }
 0x31c   :  { %5809 = vmatpush1.bf16.msra.mxu1 %v8305_v19  ;;  %5767 = vmatprep.subr.bf16.mxu0 %v8310_v24  ;;  %v8850_v19 = vpop.f32.mrf.mxu0  ;;  %v8346_v24 = vld [vmem:[#allocation5 + $0x140c] ss:$16 sps:$4 sm:$0xff]   ;;  %v8347_v46 = vld [vmem:[#allocation5 + $0x1608] ss:$16 sps:$4 sm:$0xff]  }
 0x31d   :  { %5810 = vmatprep.subr.bf16.mxu1 %v8313_v12  ;;  %5797 = vmatprep.mubr.bf16.mxu0 %v8745_v8  ;;  %v8320_v8 = vld [vmem:[#allocation5 + $0x1488] ss:$16 sps:$4 sm:$0xff]   ;;  %v8349_v12 = vld [vmem:[#allocation5 + $0x160c] ss:$16 sps:$4 sm:$0xff]  }
 0x31e   :  { %5840 = vmatprep.mubr.bf16.mxu1 %v8747_v9  ;;  %v8323_v9 = vld [vmem:[#allocation5 + $0x1688] ss:$16 sps:$4 sm:$0xff]  }
 0x31f   :  { %5768 = vmatpush1.bf16.msra.mxu0 %v8308_v13  ;;  %v4856_v13 = vadd.f32 %v8779_v37, %v966_v10 }
 0x320   :  { %5811 = vmatpush1.bf16.msra.mxu1 %v8311_v26  ;;  %5769 = vmatprep.subr.bf16.mxu0 %v8316_v32  ;;  %v4903_v26 = vadd.f32 %v8793_v62, %v4860_v31  ;;  %v8344_v32 = vld [vmem:[#allocation5 + $0x1408] ss:$16 sps:$4 sm:$0xff]   ;;  %v8370_v31 = vld [vmem:[#allocation5 + $0x158c] ss:$16 sps:$4 sm:$0xff]  }
 0x321   :  { %5812 = vmatprep.subr.bf16.mxu1 %v8319_v45  ;;  %v5160_v45 = vpop.f32.mrf.mxu1  ;;  %v8350_v62 = vld [vmem:[#allocation5 + $0x15e8] ss:$16 sps:$4 sm:$0xff]  }
 0x322   :  { %v4946_v38 = vadd.f32 %v8803_v11, %v4903_v26  ;;  %v8368_v26 = vld [vmem:[#allocation5 + $0x1588] ss:$16 sps:$4 sm:$0xff]  }
 0x323   :  { %5770 = vmatpush1.bf16.msra.mxu0 %v8314_v2  ;;  %v8854_v2 = vpop.f32.mrf.mxu0 }
 0x324   :  { %5813 = vmatpush1.bf16.msra.mxu1 %v8317_v3  ;;  %5771 = vmatprep.subr.bf16.mxu0 %v8322_v35  ;;  %v8352_v3 = vld [vmem:[#allocation5 + $0x15ec] ss:$16 sps:$4 sm:$0xff]  }
 0x325   :  { %5814 = vmatprep.subr.bf16.mxu1 %v8325_v36  ;;  %v8355_v35 = vld [vmem:[#allocation5 + $0x17ec] ss:$16 sps:$4 sm:$0xff]   ;;  %v4899_v36 = vadd.f32 %v8785_v50, %v4856_v13 }
 0x327   :  { %5772 = vmatpush1.bf16.msra.mxu0 %v8320_v8  ;;  %v8858_v8 = vpop.f32.mrf.mxu1  ;;  %v4942_v37 = vadd.f32 %v8795_v63, %v4899_v36  ;;  %v8356_v63 = vld [vmem:[#allocation5 + $0x15c8] ss:$16 sps:$4 sm:$0xff]  }
 0x328   :  { %5815 = vmatpush1.bf16.msra.mxu1 %v8323_v9  ;;  %5773 = vmatprep.subr.bf16.mxu0 %v8328_v28  ;;  %v8353_v9 = vld [vmem:[#allocation5 + $0x17e8] ss:$16 sps:$4 sm:$0xff]   ;;  %v8861_v28 = vpop.f32.mrf.mxu0 }
 0x329   :  { %5816 = vmatprep.subr.bf16.mxu1 %v8331_v48  ;;  %v8358_v48 = vld [vmem:[#allocation5 + $0x15cc] ss:$16 sps:$4 sm:$0xff]   ;;  %v4985_v50 = vadd.f32 %v8801_v6, %v4942_v37  ;;  %v8362_v6 = vld [vmem:[#allocation5 + $0x15a8] ss:$16 sps:$4 sm:$0xff]   ;;  %v961_v37 = vsub.s32 0, %v8829_v49 }
 0x32a   :  { %v5203_v59 = vpop.f32.mrf.mxu0 }
 0x32b   :  { %5774 = vmatpush1.bf16.msra.mxu0 %v8326_v52  ;;  %v8361_v52 = vld [vmem:[#allocation5 + $0x17cc] ss:$16 sps:$4 sm:$0xff]  }
 0x32c   :  { %5817 = vmatpush1.bf16.msra.mxu1 %v8329_v55  ;;  %5775 = vmatprep.subr.bf16.mxu0 %v8334_v61  ;;  %v4989_v55 = vadd.f32 %v8809_v20, %v4946_v38  ;;  %v8864_v61 = vpop.f32.mrf.mxu1  ;;  %v8871_v20 = vpop.f32.mrf.mxu0  ;;  %v8374_v38 = vld [vmem:[#allocation5 + $0x1568] ss:$16 sps:$4 sm:$0xff]  }
 0x32d   :  { %5818 = vmatprep.subr.bf16.mxu1 %v8337_v58  ;;  %v8359_v58 = vld [vmem:[#allocation5 + $0x17c8] ss:$16 sps:$4 sm:$0xff]  }
 0x32e   :  { %v5032_v11 = vadd.f32 %v8823_v34, %v4989_v55  ;;  %v8365_v34 = vld [vmem:[#allocation5 + $0x17a8] ss:$16 sps:$4 sm:$0xff]  }
 0x32f   :  { %5776 = vmatpush1.bf16.msra.mxu0 %v8332_v1  ;;  %v8364_v1 = vld [vmem:[#allocation5 + $0x15ac] ss:$16 sps:$4 sm:$0xff]  }
 0x330   :  { %5819 = vmatpush1.bf16.msra.mxu1 %v8335_v54  ;;  %5777 = vmatprep.subr.bf16.mxu0 %v8340_v23  ;;  %v8367_v54 = vld [vmem:[#allocation5 + $0x17ac] ss:$16 sps:$4 sm:$0xff]   ;;  %v5028_v23 = vadd.f32 %v8811_v21, %v4985_v50  ;;  %v5075_v10 = vadd.f32 %v8831_v51, %v5032_v11  ;;  %v5285_v21 = vpop.f32.mrf.mxu0  ;;  %v8371_v51 = vld [vmem:[#allocation5 + $0x1788] ss:$16 sps:$4 sm:$0xff]   ;;  %v962_v11 = vrot.slane %v8838_v4, %v961_v37 }
 0x331   :  { %5820 = vmatprep.subr.bf16.mxu1 %v8343_v7  ;;  %v8869_v7 = vpop.f32.mrf.mxu1  ;;  %v8380_v50 = vld [vmem:[#allocation5 + $0x1548] ss:$16 sps:$4 sm:$0xff]   ;;  %v8403_v37 = vld [vmem:[#allocation8 + $0x28] sm:$0xff]  }
 0x332   :  { %v8879_v36 = vpop.f32.mrf.mxu0 }
 0x333   :  { %5778 = vmatpush1.bf16.msra.mxu0 %v8338_v16  ;;  %v8373_v16 = vld [vmem:[#allocation5 + $0x178c] ss:$16 sps:$4 sm:$0xff]  }
 0x334   :  { %5821 = vmatpush1.bf16.msra.mxu1 %v8341_v17  ;;  %5779 = vmatprep.subr.bf16.mxu0 %v8346_v24  ;;  %v5071_v17 = vadd.f32 %v8821_v33, %v5028_v23  ;;  %v5118_v24 = vadd.f32 %v8845_v30, %v5075_v10  ;;  %v5289_v55 = vpop.f32.mrf.mxu0  ;;  %v4858_v23 = vadd.f32 %v8783_v29, %v962_v11  ;;  %v8386_v10 = vld [vmem:[#allocation5 + $0x1528] ss:$16 sps:$4 sm:$0xff]  }
 0x335   :  { %5822 = vmatprep.subr.bf16.mxu1 %v8349_v12  ;;  %v5246_v12 = vpop.f32.mrf.mxu1  ;;  %v8395_v29 = vld [vmem:[#allocation5 + $0x1708] ss:$16 sps:$4 sm:$0xff]  }
 0x336   :  { %v5114_v13 = vadd.f32 %v8833_v40, %v5071_v17  ;;  %v8377_v40 = vld [vmem:[#allocation5 + $0x1768] ss:$16 sps:$4 sm:$0xff]   ;;  %v8397_v17 = vld [vmem:[#allocation5 + $0x170c] ss:$16 sps:$4 sm:$0xff]  }
 0x337   :  { %5780 = vmatpush1.bf16.msra.mxu0 %v8344_v32  ;;  %v8877_v32 = vpop.f32.mrf.mxu1 }
 0x338   :  { %5823 = vmatpush1.bf16.msra.mxu1 %v8347_v46  ;;  %5781 = vmatprep.subr.bf16.mxu0 %v8352_v3  ;;  %v8376_v46 = vld [vmem:[#allocation5 + $0x156c] ss:$16 sps:$4 sm:$0xff]   ;;  %v5157_v33 = vadd.f32 %v8842_v22, %v5114_v13  ;;  %v8383_v22 = vld [vmem:[#allocation5 + $0x1748] ss:$16 sps:$4 sm:$0xff]  }
 0x339   :  { %5824 = vmatprep.subr.bf16.mxu1 %v8355_v35  ;;  %v8379_v3 = vld [vmem:[#allocation5 + $0x176c] ss:$16 sps:$4 sm:$0xff]   ;;  %v5161_v35 = vadd.f32 %v5160_v45, %v5118_v24 }
 0x33b   :  { %5782 = vmatpush2.bf16.msra.mxu0 %v8350_v62  ;;  %v5204_v30 = vadd.f32 %v5203_v59, %v5161_v35  ;;  %v5328_v62 = vpop.f32.mrf.mxu1  ;;  %v8391_v59 = vld [vmem:[#allocation5 + $0x172c] ss:$16 sps:$4 sm:$0xff]  }
 0x33c   :  { %5825 = vmatpush2.bf16.msra.mxu1 %v8353_v9  ;;  %5783 = vmatprep.subr.bf16.mxu0 %v8358_v48  ;;  %v8382_v9 = vld [vmem:[#allocation5 + $0x154c] ss:$16 sps:$4 sm:$0xff]  }
 0x33d   :  { %5826 = vmatprep.subr.bf16.mxu1 %v8361_v52  ;;  %v8385_v48 = vld [vmem:[#allocation5 + $0x174c] ss:$16 sps:$4 sm:$0xff]   ;;  %v5200_v52 = vadd.f32 %v8854_v2, %v5157_v33  ;;  %v5247_v45 = vadd.f32 %v5246_v12, %v5204_v30  ;;  %v4901_v12 = vadd.f32 %v8789_v56, %v4858_v23  ;;  %v8400_v33 = vld [vmem:[#allocation8 + $0x70] sm:$0xff]  }
 0x33e   :  { %v8399_v35 = vld [vmem:[#allocation8 + $0x38] sm:$0xff]   ;;  %v8411_v23 = vld [vmem:[#allocation8 + $0x8] sm:$0xff]  }
 0x33f   :  { %5784 = vmatpush2.bf16.msra.mxu0 %v8356_v63  ;;  %v8885_v63 = vpop.f32.mrf.mxu1 }
 0x340   :  { %5827 = vmatpush2.bf16.msra.mxu1 %v8359_v58  ;;  %5785 = vmatprep.subr.bf16.mxu0 %v8364_v1  ;;  %v8388_v58 = vld [vmem:[#allocation5 + $0x152c] ss:$16 sps:$4 sm:$0xff]   ;;  %v5243_v1 = vadd.f32 %v8864_v61, %v5200_v52  ;;  %v8392_v61 = vld [vmem:[#allocation5 + $0x1508] ss:$16 sps:$4 sm:$0xff]  }
 0x341   :  { %5828 = vmatprep.subr.bf16.mxu1 %v8367_v54  ;;  %v5290_v54 = vadd.f32 %v5289_v55, %v5247_v45  ;;  %v8416_v52 = vld [vmem:[#allocation8 + $0xf0] sm:$0xff]   ;;  %v8406_v55 = vld [vmem:[#allocation8 + $0x58] sm:$0xff]  }
 0x342   :  { %v5286_v2 = vadd.f32 %v5285_v21, %v5243_v1  ;;  %v8407_v45 = vld [vmem:[#allocation8 + $0x18] sm:$0xff]   ;;  %v8410_v1 = vld [vmem:[#allocation8 + $0x48] sm:$0xff]  }
 0x343   :  { %5786 = vmatpush2.bf16.msra.mxu0 %v8362_v6  ;;  %v8389_v6 = vld [vmem:[#allocation5 + $0x1728] ss:$16 sps:$4 sm:$0xff]  }
 0x344   :  { %5829 = vmatpush2.bf16.msra.mxu1 %v8365_v34  ;;  %5787 = vmatprep.subr.bf16.mxu0 %v8370_v31  ;;  %v4854_v34 = vadd.f32 %v8777_v47, %v962_v11  ;;  %v5332_v31 = vpop.f32.mrf.mxu1  ;;  %v5329_v13 = vadd.f32 %v5328_v62, %v5286_v2  ;;  %v8398_v47 = vld [vmem:[#allocation8 + $0x78] sm:$0xff]   ;;  %v8412_v2 = vld [vmem:[#allocation8 + $0x40] sm:$0xff]  }
 0x345   :  { %5830 = vmatprep.subr.bf16.mxu1 %v8373_v16  ;;  %v8394_v16 = vld [vmem:[#allocation5 + $0x150c] ss:$16 sps:$4 sm:$0xff]   ;;  %v5333_v24 = vadd.f32 %v5332_v31, %v5290_v54 }
 0x346   :  { %v4897_v21 = vadd.f32 %v8781_v43, %v4854_v34  ;;  %v8423_v31 = vld [vmem:[#allocation8 + $0x98] sm:$0xff]  }
 0x347   :  { %5788 = vmatpush2.bf16.msra.mxu0 %v8368_v26  ;;  %v4944_v26 = vadd.f32 %v8799_v5, %v4901_v12  ;;  %v8429_v12 = vld [vmem:[#allocation8 + $0x80] sm:$0xff]  }
 0x348   :  { %5831 = vmatpush2.bf16.msra.mxu1 %v8371_v51  ;;  %5789 = vmatprep.subr.bf16.mxu0 %v8376_v46  ;;  %v5856_v51 = vmax.f32 %v5333_v24, 0.0  ;;  %v4940_v46 = vadd.f32 %v8791_v57, %v4897_v21  ;;  %v8401_v57 = vld [vmem:[#allocation8 + $0x30] sm:$0xff]   ;;  %v8427_v24 = vld [vmem:[#allocation8 + $0x88] sm:$0xff]  }
 0x349   :  { %5832 = vmatprep.subr.bf16.mxu1 %v8379_v3  ;;  %v5852_v3 = vmax.f32 %v5329_v13, 0.0  ;;  %v4987_v56 = vadd.f32 %v8805_v14, %v4944_v26  ;;  %v8430_v13 = vld [vmem:[#allocation11 + $0x38] sm:$0xff]   ;;  %v8432_v21 = vld [vmem:[#allocation11 + $0x28] sm:$0xff]   ;;  %v8433_v26 = vld [vmem:[#allocation11 + $0x20] sm:$0xff]  }
 0x34b   :  { %5790 = vmatpush2.bf16.msra.mxu0 %v8374_v38  ;;  %v5860_v30 = vpack.c.bf16 %v5856_v51, %v5852_v3  ;;  %v4983_v38 = vadd.f32 %v8797_v0, %v4940_v46  ;;  %v5030_v43 = vadd.f32 %v8817_v27, %v4987_v56  ;;  %v8404_v27 = vld [vmem:[#allocation8 + $0x60] sm:$0xff]   ;;  %v5412_v51 = vpop.f32.mrf.mxu1 }
 0x34c   :  { %5833 = vmatpush2.bf16.msra.mxu1 %v8377_v40  ;;  %5791 = vmatprep.subr.bf16.mxu0 %v8382_v9  ;;  %v8402_v40 = vld [vmem:[#allocation8 + $0x68] sm:$0xff]   ;;  %v8414_v9 = vld [vmem:[#allocation8 + $0xf8] sm:$0xff]  }
 0x34d   :  { %5834 = vmatprep.subr.bf16.mxu1 %v8385_v48  ;;  %v5026_v5 = vadd.f32 %v8807_v15, %v4983_v38  ;;  %v5073_v14 = vadd.f32 %v8825_v39, %v5030_v43  ;;  %v8415_v48 = vld [vmem:[#allocation8 + $0xb8] sm:$0xff]   ;;  %v5414_v3 = vpop.f32.mrf.mxu1 }
 0x34f   :  { %5792 = vmatpush2.bf16.msra.mxu0 %v8380_v50  ;;  %v5069_v62 = vadd.f32 %v8813_v25, %v5026_v5  ;;  %v5116_v0 = vadd.f32 %v8840_v53, %v5073_v14  ;;  %v8417_v53 = vld [vmem:[#allocation8 + $0xb0] sm:$0xff]   ;;  %v5416_v56 = vpop.f32.mrf.mxu1 }
 0x350   :  { %5835 = vmatpush2.bf16.msra.mxu1 %v8383_v22  ;;  %5793 = vmatprep.subr.bf16.mxu0 %v8388_v58  ;;  %v8408_v22 = vld [vmem:[#allocation8 + $0x50] sm:$0xff]  }
 0x351   :  { %5836 = vmatprep.subr.bf16.mxu1 %v8391_v59  ;;  %v5159_v15 = vadd.f32 %v8848_v18, %v5116_v0  ;;  %v8419_v18 = vld [vmem:[#allocation8 + $0xa8] sm:$0xff]   ;;  %v8409_v58 = vld [vmem:[#allocation8 + $0x10] sm:$0xff]  }
 0x353   :  { %5794 = vmatpush2.bf16.msra.mxu0 %v8386_v10  ;;  %v5202_v25 = vadd.f32 %v8861_v28, %v5159_v15 }
 0x354   :  { %5837 = vmatpush2.bf16.msra.mxu1 %v8389_v6  ;;  %5795 = vmatprep.subr.bf16.mxu0 %v8394_v16  ;;  %v8424_v16 = vld [vmem:[#allocation8 + $0xd0] sm:$0xff]  }
 0x355   :  { %5838 = vmatprep.subr.bf16.mxu1 %v8397_v17  ;;  %v5245_v11 = vadd.f32 %v8869_v7, %v5202_v25  ;;  %v8425_v17 = vld [vmem:[#allocation8 + $0x90] sm:$0xff]  }
 0x357   :  { %5796 = vmatpush2.bf16.msra.mxu0 %v8392_v61  ;;  %v5288_v59 = vadd.f32 %v8879_v36, %v5245_v11  ;;  %v8621_v61 = vmov 0.0  }
 0x358   :  { %5839 = vmatpush2.bf16.msra.mxu1 %v8395_v29  ;;  %7155 = vmatprep.subr.bf16.mxu0 %v8398_v47  ;;  %v8431_v29 = vld [vmem:[#allocation11 + $0x30] sm:$0xff]   ;;  %v5369_v47 = vpop.f32.mrf.mxu0 }
 0x359   :  { %7177 = vmatprep.subr.bf16.mxu1 %v8414_v9  ;;  %v5331_v7 = vadd.f32 %v8885_v63, %v5288_v59  ;;  %v8426_v63 = vld [vmem:[#allocation8 + $0xc8] sm:$0xff]   ;;  %v973_v9 = vsub.s32 3, %v8829_v49 }
 0x35a   :  { %5798 = vmatmul.mubr.bf16.vlgmr.msra.gmra.mxu0 %v8753_v41  ;;  %v5112_v41 = vadd.f32 %v8827_v44, %v5069_v62  ;;  %v8418_v44 = vld [vmem:[#allocation8 + $0xe8] sm:$0xff]   ;;  %v5371_v46 = vpop.f32.mrf.mxu0 }
 0x35b   :  { %5841 = vmatmul.mubr.bf16.vlgmr.msra.gmra.mxu1 %v8755_v42  ;;  %7156 = vmatpush3.bf16.msra.mxu0 %v8399_v35  ;;  %v8405_v42 = vld [vmem:[#allocation8 + $0x20] sm:$0xff]   ;;  %v5855_v6 = vmax.f32 %v5331_v7, 0.0 }
 0x35c   :  { %6158 = vmatprep.mubr.bf16.mxu0 %v5860_v30  ;;  %7157 = vmatprep.subr.bf16.mxu0 %v8400_v33  ;;  %v5155_v39 = vadd.f32 %v8835_v60, %v5112_v41  ;;  %v8420_v60 = vld [vmem:[#allocation8 + $0xe0] sm:$0xff]   ;;  %v5373_v35 = vpop.f32.mrf.mxu0  ;;  %v5418_v30 = vpop.f32.mrf.mxu1 }
 0x35d   :  { %7178 = vmatpush3.bf16.msra.mxu1 %v8415_v48  ;;  %v969_v48 = vsub.s32 2, %v8829_v49 }
 0x35e   :  { %7179 = vmatprep.subr.bf16.mxu1 %v8416_v52  ;;  %v5198_v50 = vadd.f32 %v8850_v19, %v5155_v39  ;;  %v8421_v19 = vld [vmem:[#allocation8 + $0xa0] sm:$0xff]   ;;  %v5375_v33 = vpop.f32.mrf.mxu0  ;;  %v5498_v43 = vpop.f32.mrf.mxu1 }
 0x35f   :  { %7158 = vmatpush3.bf16.msra.mxu0 %v8401_v57  ;;  %v970_v39 = vrot.slane %v8838_v4, %v969_v48 }
 0x360   :  { %7159 = vmatprep.subr.bf16.mxu0 %v8402_v40  ;;  %v5241_v28 = vadd.f32 %v8858_v8, %v5198_v50  ;;  %v8413_v8 = vld [vmem:[#allocation8] sm:$0xff]   ;;  %v5455_v38 = vpop.f32.mrf.mxu0  ;;  %v5500_v5 = vpop.f32.mrf.mxu1 }
 0x361   :  { %7180 = vmatpush3.bf16.msra.mxu1 %v8417_v53  ;;  %v5374_v11 = vadd.f32 %v5373_v35, %v970_v39 }
 0x362   :  { %7181 = vmatprep.subr.bf16.mxu1 %v8418_v44  ;;  %v5284_v54 = vadd.f32 %v8871_v20, %v5241_v28  ;;  %v8422_v20 = vld [vmem:[#allocation8 + $0xd8] sm:$0xff]   ;;  %v5457_v57 = vpop.f32.mrf.mxu0  ;;  %v5502_v14 = vpop.f32.mrf.mxu1 }
 0x363   :  { %7160 = vmatpush3.bf16.msra.mxu0 %v8403_v37 }
 0x364   :  { %7161 = vmatprep.subr.bf16.mxu0 %v8404_v27  ;;  %v5327_v10 = vadd.f32 %v8877_v32, %v5284_v54  ;;  %v8428_v32 = vld [vmem:[#allocation8 + $0xc0] sm:$0xff]   ;;  %v5459_v40 = vpop.f32.mrf.mxu0  ;;  %v5504_v62 = vpop.f32.mrf.mxu1 }
 0x365   :  { %7182 = vmatpush3.bf16.msra.mxu1 %v8419_v18 }
 0x366   :  { %7183 = vmatprep.subr.bf16.mxu1 %v8420_v60  ;;  %v5851_v36 = vmax.f32 %v5327_v10, 0.0  ;;  %v5461_v37 = vpop.f32.mrf.mxu0  ;;  %v5584_v27 = vpop.f32.mrf.mxu1 }
 0x367   :  { %7162 = vmatpush3.bf16.msra.mxu0 %v8405_v42 }
 0x368   :  { %7163 = vmatprep.subr.bf16.mxu0 %v8406_v55  ;;  %v5859_v34 = vpack.c.bf16 %v5855_v6, %v5851_v36  ;;  %v5541_v0 = vpop.f32.mrf.mxu0  ;;  %v5586_v42 = vpop.f32.mrf.mxu1  ;;  %v974_v55 = vrot.slane %v8838_v4, %v973_v9 }
 0x369   :  { %7184 = vmatpush3.bf16.msra.mxu1 %v8421_v19 }
 0x36a   :  { %7185 = vmatprep.subr.bf16.mxu1 %v8422_v20  ;;  %v5543_v41 = vpop.f32.mrf.mxu0  ;;  %v5588_v15 = vpop.f32.mrf.mxu1  ;;  %v5372_v50 = vadd.f32 %v5371_v46, %v974_v55  ;;  %v5376_v28 = vadd.f32 %v5375_v33, %v974_v55 }
 0x36b   :  { %7164 = vmatpush3.bf16.msra.mxu0 %v8407_v45 }
 0x36c   :  { %7165 = vmatprep.subr.bf16.mxu0 %v8408_v22  ;;  %v5545_v52 = vpop.f32.mrf.mxu0  ;;  %v5590_v53 = vpop.f32.mrf.mxu1  ;;  %v5370_v22 = vadd.f32 %v5369_v47, %v970_v39  ;;  %v5415_v60 = vadd.f32 %v5414_v3, %v5372_v50  ;;  %v5419_v7 = vadd.f32 %v5418_v30, %v5376_v28 }
 0x36d   :  { %7186 = vmatpush3.bf16.msra.mxu1 %v8423_v31 }
 0x36e   :  { %7187 = vmatprep.subr.bf16.mxu1 %v8424_v16  ;;  %v5547_v25 = vpop.f32.mrf.mxu0  ;;  %v5413_v59 = vadd.f32 %v5412_v51, %v5370_v22  ;;  %v5458_v49 = vadd.f32 %v5457_v57, %v5415_v60  ;;  %v5462_v10 = vadd.f32 %v5461_v37, %v5419_v7  ;;  %v8434_v7 = vld [vmem:[#allocation11 + $0x18] sm:$0xff]  }
 0x36f   :  { %7166 = vmatpush3.bf16.msra.mxu0 %v8409_v58 }
 0x370   :  { %7167 = vmatprep.subr.bf16.mxu0 %v8410_v1  ;;  %v5417_v1 = vadd.f32 %v5416_v56, %v5374_v11  ;;  %v5456_v54 = vadd.f32 %v5455_v38, %v5413_v59  ;;  %v5501_v4 = vadd.f32 %v5500_v5, %v5458_v49 }
 0x371   :  { %7188 = vmatpush3.bf16.msra.mxu1 %v8425_v17 }
 0x372   :  { %7189 = vmatprep.subr.bf16.mxu1 %v8426_v63  ;;  %v5544_v20 = vadd.f32 %v5543_v41, %v5501_v4  ;;  %v5505_v63 = vadd.f32 %v5504_v62, %v5462_v10  ;;  %v8436_v4 = vld [vmem:[#allocation11 + $0x8] sm:$0xff]   ;;  %v8437_v10 = vld [vmem:[#allocation11] sm:$0xff]  }
 0x373   :  { %7168 = vmatpush3.bf16.msra.mxu0 %v8411_v23 }
 0x374   :  { %7169 = vmatprep.subr.bf16.mxu0 %v8412_v2  ;;  %v5460_v2 = vadd.f32 %v5459_v40, %v5417_v1 }
 0x375   :  { %7190 = vmatpush3.bf16.msra.mxu1 %v8427_v24 }
 0x376   :  { %7191 = vmatprep.subr.bf16.mxu1 %v8428_v32  ;;  %v5587_v32 = vadd.f32 %v5586_v42, %v5544_v20 }
 0x377   :  { %7170 = vmatpush3.bf16.msra.mxu0 %v8413_v8  ;;  %v5499_v8 = vadd.f32 %v5498_v43, %v5456_v54 }
 0x378   :  { %7208 = vmatprep.subr.bf16.mxu0 %v8621_v61 }
 0x379   :  { %7192 = vmatpush3.bf16.msra.mxu1 %v8429_v12  ;;  %v5542_v31 = vadd.f32 %v5541_v0, %v5499_v8  ;;  %v5548_v12 = vadd.f32 %v5547_v25, %v5505_v63 }
 0x37a   :  { %6159 = vmatmul.mubr.bf16.vlgmr.msra.gmra.mxu0 %v5859_v34  ;;  %v5503_v34 = vadd.f32 %v5502_v14, %v5460_v2  ;;  %v8435_v2 = vld [vmem:[#allocation11 + $0x10] sm:$0xff]  }
 0x37b   :  { %7209 = vmatpush3.bf16.msra.mxu0 %v8430_v13  ;;  %v5585_v13 = vadd.f32 %v5584_v27, %v5542_v31  ;;  %v5591_v46 = vadd.f32 %v5590_v53, %v5548_v12  ;;  %7224 = vmatprep.mubr.msk.bf16.mxu0 %vm8622_vm0, %v8621_v61 }
 0x37c   :  { %7210 = vmatprep.subr.bf16.mxu0 %v8621_v61  ;;  %v5546_v24 = vadd.f32 %v5545_v52, %v5503_v34 }
 0x37f   :  { %7211 = vmatpush3.bf16.msra.mxu0 %v8431_v29 }
 0x380   :  { %7212 = vmatprep.subr.bf16.mxu0 %v8621_v61 }
 0x383   :  { %7213 = vmatpush3.bf16.msra.mxu0 %v8432_v21 }
 0x384   :  { %7214 = vmatprep.subr.bf16.mxu0 %v8621_v61 }
 0x387   :  { %7215 = vmatpush3.bf16.msra.mxu0 %v8433_v26  ;;  %v5589_v26 = vadd.f32 %v5588_v15, %v5546_v24 }
 0x388   :  { %7216 = vmatprep.subr.bf16.mxu0 %v8621_v61 }
 0x38b   :  { %7217 = vmatpush3.bf16.msra.mxu0 %v8434_v7 }
 0x38c   :  { %7218 = vmatprep.subr.bf16.mxu0 %v8621_v61 }
 0x38f   :  { %7219 = vmatpush3.bf16.msra.mxu0 %v8435_v2 }
 0x390   :  { %7220 = vmatprep.subr.bf16.mxu0 %v8621_v61 }
 0x393   :  { %7221 = vmatpush3.bf16.msra.mxu0 %v8436_v4 }
 0x394   :  { %7222 = vmatprep.subr.bf16.mxu0 %v8621_v61 }
 0x397   :  { %7223 = vmatpush3.bf16.msra.mxu0 %v8437_v10 }
 0x39a   :  { %v5627_v45 = vpop.f32.mrf.mxu0 }
 0x39b   :  { %v5670_v44 = vpop.f32.mrf.mxu1  ;;  %v5628_v51 = vadd.f32 %v5627_v45, %v5585_v13 }
 0x39c   :  { %v5629_v18 = vpop.f32.mrf.mxu0 }
 0x39d   :  { %v5672_v58 = vpop.f32.mrf.mxu1  ;;  %v5630_v47 = vadd.f32 %v5629_v18, %v5587_v32  ;;  %v5671_v38 = vadd.f32 %v5670_v44, %v5628_v51 }
 0x39e   :  { %v5631_v19 = vpop.f32.mrf.mxu0 }
 0x39f   :  { %v5674_v23 = vpop.f32.mrf.mxu1  ;;  %v5632_v3 = vadd.f32 %v5631_v19, %v5589_v26  ;;  %v5673_v33 = vadd.f32 %v5672_v58, %v5630_v47 }
 0x3a0   :  { %v5633_v6 = vpop.f32.mrf.mxu0 }
 0x3a1   :  { %v5676_v36 = vpop.f32.mrf.mxu1  ;;  %v5634_v30 = vadd.f32 %v5633_v6, %v5591_v46  ;;  %v5675_v43 = vadd.f32 %v5674_v23, %v5632_v3  ;;  %v7146_v3 = vld [vmem:[#allocation13] ss:$0 sm:$0xff] }
 0x3a3   :  { %v5677_v37 = vadd.f32 %v5676_v36, %v5634_v30 }
 0x3da   :  { %v5713_v16 = vpop.f32.mrf.mxu0 }
 0x3db   :  { %v5756_v17 = vpop.f32.mrf.mxu1  ;;  %v5714_v5 = vadd.f32 %v5713_v16, %v5671_v38  ;;  %v7113_v16 = vld [vmem:[#allocation10] ss:$0 sm:$0xff] }
 0x3dc   :  { %v5715_v29 = vpop.f32.mrf.mxu0 }
 0x3dd   :  { %v5758_v21 = vpop.f32.mrf.mxu1  ;;  %v5716_v57 = vadd.f32 %v5715_v29, %v5673_v33  ;;  %v5757_v9 = vadd.f32 %v5756_v17, %v5714_v5 }
 0x3de   :  { %v5717_v35 = vpop.f32.mrf.mxu0 }
 0x3df   :  { %v5760_v56 = vpop.f32.mrf.mxu1  ;;  %v5718_v62 = vadd.f32 %v5717_v35, %v5675_v43  ;;  %v5759_v41 = vadd.f32 %v5758_v21, %v5716_v57 }
 0x3e0   :  { %v5719_v40 = vpop.f32.mrf.mxu0 }
 0x3e1   :  { %v5762_v14 = vpop.f32.mrf.mxu1  ;;  %v5720_v42 = vadd.f32 %v5719_v40, %v5677_v37  ;;  %v5761_v15 = vadd.f32 %v5760_v56, %v5718_v62 }
 0x3e3   :  { %v5763_v45 = vadd.f32 %v5762_v14, %v5720_v42 }
 0x41a   :  { %v5799_v0 = vpop.f32.mrf.mxu0 }
 0x41b   :  { %v5842_v27 = vpop.f32.mrf.mxu1  ;;  %v5800_v39 = vadd.f32 %v5799_v0, %v5757_v9 }
 0x41c   :  { %v5801_v48 = vpop.f32.mrf.mxu0 }
 0x41d   :  { %v5844_v52 = vpop.f32.mrf.mxu1  ;;  %v5802_v55 = vadd.f32 %v5801_v48, %v5759_v41  ;;  %v5843_v58 = vadd.f32 %v5842_v27, %v5800_v39 }
 0x41e   :  { %v5803_v25 = vpop.f32.mrf.mxu0 }
 0x41f   :  { %v5846_v53 = vpop.f32.mrf.mxu1  ;;  %v5804_v44 = vadd.f32 %v5803_v25, %v5761_v15  ;;  %v5845_v22 = vadd.f32 %v5844_v52, %v5802_v55  ;;  %v5853_v54 = vmax.f32 %v5843_v58, 0.0 }
 0x420   :  { %v5805_v50 = vpop.f32.mrf.mxu0 }
 0x421   :  { %v5847_v11 = vadd.f32 %v5846_v53, %v5804_v44  ;;  %v5806_v18 = vadd.f32 %v5805_v50, %v5763_v45  ;;  %v5848_v60 = vpop.f32.mrf.mxu1  ;;  %v5854_v1 = vmax.f32 %v5845_v22, 0.0 }
 0x423   :  { %v5849_v28 = vadd.f32 %v5848_v60, %v5806_v18  ;;  %v5857_v59 = vmax.f32 %v5847_v11, 0.0 }
 0x425   :  { %v5858_v49 = vmax.f32 %v5849_v28, 0.0  ;;  %v5861_v23 = vpack.c.bf16 %v5857_v59, %v5853_v54 }
 0x427   :  { %v5862_v19 = vpack.c.bf16 %v5858_v49, %v5854_v1 }
 0x429   :  { %6199 = vmatprep.mubr.bf16.mxu1 %v5862_v19 }
 0x42a   :  { %6200 = vmatmul.mubr.bf16.vlgmr.msra.gmra.mxu1 %v5861_v23 }
 0x43a   :  { %v7171_v8 = vpop.f32.mrf.mxu0 }
 0x43c   :  { %v7172_v6 = vpop.f32.mrf.mxu0 }
 0x43d   :  { %v7173_v31 = vadd.f32 %v7172_v6, %v7171_v8 }
 0x43e   :  { %v7174_v36 = vpop.f32.mrf.mxu0 }
 0x43f   :  { %v6161_v12 = vadd.f32 %v7173_v31, %v7113_v16 }
 0x440   :  { %v7175_v34 = vpop.f32.mrf.mxu0 }
 0x441   :  { %v7176_v63 = vadd.f32 %v7175_v34, %v7174_v36 }
 0x443   :  { %v6164_v29 = vadd.f32 %v7176_v63, %v7113_v16 }
 0x4ea   :  { %v7193_v20 = vpop.f32.mrf.mxu1 }
 0x4ec   :  { %v7194_v17 = vpop.f32.mrf.mxu1 }
 0x4ed   :  { %v7195_v24 = vadd.f32 %v7194_v17, %v7193_v20 }
 0x4ee   :  { %v7196_v32 = vpop.f32.mrf.mxu1 }
 0x4ef   :  { %v6202_v21 = vadd.f32 %v7195_v24, %v6161_v12 }
 0x4f0   :  { %v7197_v13 = vpop.f32.mrf.mxu1 }
 0x4f1   :  { %v7198_v26 = vadd.f32 %v7197_v13, %v7196_v32  ;;  %v6208_v51 = vmax.f32 %v6202_v21, 0.0 }
 0x4f3   :  { %v6205_v47 = vadd.f32 %v7198_v26, %v6164_v29 }
 0x4f5   :  { %v6209_v46 = vmax.f32 %v6205_v47, 0.0 }
 0x4f7   :  { %v6210_v61 = vpack.c.bf16 %v6209_v46, %v6208_v51 }
 0x4f9   :  { %7225 = vmatmul.mubr.bf16.vlgmr.msra.gmra.mxu0 %v6210_v61 }
 0x5b9   :  { %v6316_v35 = vpop.f32.mrf.mxu0 }
 0x5ba   :  { %v6317_v56 = vadd.f32 %v7146_v3, %v6316_v35 }
 0x5bb   :  { %v7226_v33 = vpop.f32.mrf.mxu0 }
 0x5bc   :  { %6323 = vst [vmem:[#allocation14] sm:$0xff] %v6317_v56 }
 0x5bd   :  { %v6319_v30 = vpop.f32.mrf.mxu0 }
 0x5be   :  { %v6320_v38 = vadd.f32 %v7146_v3, %v6319_v30 }
 0x5bf   :  { %v7227_v43 = vpop.f32.mrf.mxu0 }
 0x5c0   :  { %6324 = vst [vmem:[#allocation14 + $0x8] sm:$0xff] %v6320_v38 }
 0x5c1   :  { %8589 = shalt.err (!%p8586_p11)
}
 0x5c2   :  { %s8624_s17 = smov 128   ;;  %s8625_s1 = smov 8  }
 0x5c3   :  { %6336 = dma.vmem_to_hbm [thread:$0]  %s6331_s6, 256, %s8937_s7, [#allocation4], %s8624_s17, %s8624_s17, %s8625_s1  }
 0x5c4   :  { %8606 = dma.done.wait [#allocation4], 256  }
 0x5c5   :  { %8607 = vsyncadd [#allocation4], 4294967040 }
 0x5c6   :  { %6340 = vsyncpa [#allocation3], 1 }
 0x5c7   :  { %6341 = vsyncpa [#allocation6], 1 }
 0x5c8   :  { %6342 = vsyncpa [#allocation9], 1 }
 0x5c9   :  { %6343 = vsyncpa [#allocation12], 1 }
 0x5ca   :  { %6344 = vsyncpa [#allocation4], 1 }

</bundles_post_ra>
